<compile_context>
chip_gen: v6e
topology: v6e:2x2x1
jax: 0.10.0
libtpu: 0.0.40
codegen_flags: <defaults>
</compile_context>

<pallas_src>
import jax
import jax.numpy as jnp
from jax import lax
from jax.experimental import pallas as pl
from jax.experimental.pallas import tpu as pltpu

F_DIM = 128          # feature dim of the synthetic "inception" feature extractor
NEWTON_ITERS = 20    # matches sqrtm_newton in the reference module


def _spec(shape):
    """Whole-array BlockSpec for a grid of size 1."""
    nd = len(shape)
    return pl.BlockSpec(shape, lambda i, _nd=nd: (0,) * _nd)


def _activation_statistics(act):
    """mu (1,F), sigma (F,F): unbiased covariance of act (B,F) — matches
    calculate_activation_statistics in the reference."""
    n = act.shape[0]
    mu = jnp.mean(act, axis=0, keepdims=True)             # (1, F)
    centered = act - mu                                    # expand_as broadcast
    sigma = lax.dot_general(
        centered, centered,
        dimension_numbers=(((0,), (0,)), ((), ())),        # centered^T @ centered
        preferred_element_type=jnp.float32,
    ) * jnp.float32(1.0 / (n - 1))
    return mu, sigma


def _fid_kernel(x_ref, w_ref, out_ref):
    # ---- feature extraction: one stacked matmul for real + fake ----
    x = x_ref[...]                                          # (2B, D)
    w = w_ref[...]                                          # (D, F)
    act = jnp.dot(x, w, preferred_element_type=jnp.float32)  # (2B, F)
    b = act.shape[0] // 2
    mu_r, sig_r = _activation_statistics(act[:b])
    mu_f, sig_f = _activation_statistics(act[b:])

    # ---- Frechet distance ----
    m = jnp.sum(jnp.square(mu_r - mu_f))

    d = jnp.dot(sig_r, sig_f, preferred_element_type=jnp.float32)  # (F, F)
    norm_a = jnp.sqrt(jnp.sum(d * d))                       # Frobenius norm (normA)

    dim = d.shape[0]
    rows = lax.broadcasted_iota(jnp.int32, (dim, dim), 0)
    cols = lax.broadcasted_iota(jnp.int32, (dim, dim), 1)
    diag = rows == cols
    eye = jnp.where(diag, 1.0, 0.0).astype(jnp.float32)
    eye_1p5 = 1.5 * eye                                     # hoisted loop invariant

    # trace(sigma1 + sigma2): loop-independent, computed once up front.
    trace_s12 = jnp.sum(jnp.where(diag, sig_r + sig_f, 0.0))

    # Scalar reciprocal once, then scale the matrix (instead of a full-matrix divide).
    y0 = d * (1.0 / norm_a)
    z0 = eye

    def body(_, carry):
        y, z = carry
        zy = jnp.dot(z, y, preferred_element_type=jnp.float32)
        t = eye_1p5 - 0.5 * zy                              # == 0.5*(3I - Z@Y)
        # Y@T and T@Z are independent given T; keep them adjacent so the fully
        # unrolled trace lets the scheduler overlap their MXU pushes/drains.
        y_new = jnp.dot(y, t, preferred_element_type=jnp.float32)
        z_new = jnp.dot(t, z, preferred_element_type=jnp.float32)
        return y_new, z_new

    y, _ = lax.fori_loop(0, NEWTON_ITERS, body, (y0, z0), unroll=True)

    # s = Y * sqrt(normA) never materialized — only its trace is needed.
    trace_y = jnp.sum(jnp.where(diag, y, 0.0))
    dist = m + trace_s12 - 2.0 * jnp.sqrt(norm_a) * trace_y
    out_ref[...] = jnp.reshape(dist, (1, 1))


def frechet_inception_distance(real_data, fake_data, w):
    """forward(real, fake) of FrechetInceptionDistance with a linear `model`."""
    b = real_data.shape[0]
    real_flat = real_data.reshape(b, -1).astype(jnp.float32)
    fake_flat = fake_data.reshape(b, -1).astype(jnp.float32)
    x = jnp.concatenate([real_flat, fake_flat], axis=0)     # (2B, D)
    d = x.shape[1]
    f = w.shape[1]

    out = pl.pallas_call(
        _fid_kernel,
        grid=(1,),
        in_specs=[_spec((2 * b, d)), _spec((d, f))],
        out_specs=_spec((1, 1)),
        out_shape=jax.ShapeDtypeStruct((1, 1), jnp.float32),
        compiler_params=pltpu.CompilerParams(
            dimension_semantics=("arbitrary",)),
    )(x, w)
    return out[0, 0]


if __name__ == "__main__":
    key = jax.random.PRNGKey(0)
    k1, k2, k3 = jax.random.split(key, 3)

    B, C, H, W = 2, 4, 16, 16
    real = jax.random.normal(k1, (B, C, H, W), dtype=jnp.float32)
    fake = jax.random.normal(k2, (B, C, H, W), dtype=jnp.float32)

    # Deterministic synthetic "model" weights: linear feature extractor mapping
    # the flattened NCHW image (C*H*W = 1024) -> F_DIM inception-style features.
    w = jax.random.normal(k3, (C * H * W, F_DIM), dtype=jnp.float32) * 0.02

    fid = jax.jit(frechet_inception_distance)
    dist = jax.block_until_ready(fid(real, fake, w))
    print("KERNEL_OK")
</pallas_src>

<mosaic_0001>
module attributes {stable_mosaic.version = 11 : i64} {
  func.func @_fid_kernel(%arg0: i32, %arg1: memref<4x1024xf32, #tpu.memory_space<vmem>>, %arg2: memref<1024x128xf32, #tpu.memory_space<vmem>>, %arg3: memref<1x1xf32, #tpu.memory_space<vmem>>) attributes {dimension_semantics = [#tpu.dimension_semantics<arbitrary>], iteration_bounds = array<i64: 1>, scalar_prefetch = 0 : i64, scratch_operands = 0 : i64, tpu.core_type = #tpu.core_type<tc>, window_params = [{pipeline_mode = #tpu.pipeline_mode<synchronous>, transform_indices = @transform_0, window_bounds = array<i64: 4, 1024>}, {pipeline_mode = #tpu.pipeline_mode<synchronous>, transform_indices = @transform_1, window_bounds = array<i64: 1024, 128>}, {pipeline_mode = #tpu.pipeline_mode<synchronous>, transform_indices = @transform_2, window_bounds = array<i64: 1, 1>}]} {
    %c0 = arith.constant 0 : index
    %c0_0 = arith.constant 0 : index
    %0 = vector.load %arg1[%c0, %c0_0] : memref<4x1024xf32, #tpu.memory_space<vmem>>, vector<4x1024xf32>
    %c0_1 = arith.constant 0 : index
    %c0_2 = arith.constant 0 : index
    %1 = vector.load %arg2[%c0_1, %c0_2] : memref<1024x128xf32, #tpu.memory_space<vmem>>, vector<1024x128xf32>
    %cst = arith.constant dense<0.000000e+00> : vector<4x128xf32>
    %2 = tpu.matmul %0, %1, %cst {dimension_numbers = #tpu.dot_dimension_numbers<[1], [0], [0], [1], [0, 0, 1, 1], [], []>} : vector<4x1024xf32>, vector<1024x128xf32>, vector<4x128xf32> -> vector<4x128xf32>
    %3 = vector.extract_strided_slice %2 {offsets = [0, 0], sizes = [2, 128], strides = [1, 1]} : vector<4x128xf32> to vector<2x128xf32>
    %cst_3 = arith.constant dense<0.000000e+00> : vector<128xf32>
    %4 = vector.multi_reduction <add>, %3, %cst_3 [0] : vector<2x128xf32> to vector<128xf32>
    %5 = vector.shape_cast %4 : vector<128xf32> to vector<1x128xf32>
    %cst_4 = arith.constant 2.000000e+00 : f32
    %6 = vector.broadcast %cst_4 : f32 to vector<1x128xf32>
    %7 = arith.divf %5, %6 : vector<1x128xf32>
    %8 = vector.broadcast %7 : vector<1x128xf32> to vector<2x128xf32>
    %9 = arith.subf %3, %8 : vector<2x128xf32>
    %cst_5 = arith.constant dense<0.000000e+00> : vector<128x128xf32>
    %10 = tpu.matmul %9, %9, %cst_5 {dimension_numbers = #tpu.dot_dimension_numbers<[0], [0], [1], [1], [0, 1, 1, 1], [], []>} : vector<2x128xf32>, vector<2x128xf32>, vector<128x128xf32> -> vector<128x128xf32>
    %cst_6 = arith.constant 1.000000e+00 : f32
    %11 = vector.broadcast %cst_6 : f32 to vector<128x128xf32>
    %12 = arith.mulf %10, %11 : vector<128x128xf32>
    %13 = vector.extract_strided_slice %2 {offsets = [2, 0], sizes = [2, 128], strides = [1, 1]} : vector<4x128xf32> to vector<2x128xf32>
    %cst_7 = arith.constant dense<0.000000e+00> : vector<128xf32>
    %14 = vector.multi_reduction <add>, %13, %cst_7 [0] : vector<2x128xf32> to vector<128xf32>
    %15 = vector.shape_cast %14 : vector<128xf32> to vector<1x128xf32>
    %cst_8 = arith.constant 2.000000e+00 : f32
    %16 = vector.broadcast %cst_8 : f32 to vector<1x128xf32>
    %17 = arith.divf %15, %16 : vector<1x128xf32>
    %18 = vector.broadcast %17 : vector<1x128xf32> to vector<2x128xf32>
    %19 = arith.subf %13, %18 : vector<2x128xf32>
    %cst_9 = arith.constant dense<0.000000e+00> : vector<128x128xf32>
    %20 = tpu.matmul %19, %19, %cst_9 {dimension_numbers = #tpu.dot_dimension_numbers<[0], [0], [1], [1], [0, 1, 1, 1], [], []>} : vector<2x128xf32>, vector<2x128xf32>, vector<128x128xf32> -> vector<128x128xf32>
    %cst_10 = arith.constant 1.000000e+00 : f32
    %21 = vector.broadcast %cst_10 : f32 to vector<128x128xf32>
    %22 = arith.mulf %20, %21 : vector<128x128xf32>
    %23 = arith.subf %7, %17 : vector<1x128xf32>
    %24 = arith.mulf %23, %23 : vector<1x128xf32>
    %25 = vector.shape_cast %24 : vector<1x128xf32> to vector<1x1x128xf32>
    %cst_11 = arith.constant dense<0.000000e+00> : vector<1xf32>
    %26 = vector.multi_reduction <add>, %25, %cst_11 [1, 2] : vector<1x1x128xf32> to vector<1xf32>
    %27 = vector.shape_cast %26 : vector<1xf32> to vector<1x1x1xf32>
    %28 = vector.extract %27[0, 0, 0] : f32 from vector<1x1x1xf32>
    %cst_12 = arith.constant dense<0.000000e+00> : vector<128x128xf32>
    %29 = tpu.matmul %12, %22, %cst_12 {dimension_numbers = #tpu.dot_dimension_numbers<[1], [0], [0], [1], [0, 0, 1, 1], [], []>} : vector<128x128xf32>, vector<128x128xf32>, vector<128x128xf32> -> vector<128x128xf32>
    %30 = arith.mulf %29, %29 : vector<128x128xf32>
    %31 = vector.shape_cast %30 : vector<128x128xf32> to vector<1x128x128xf32>
    %cst_13 = arith.constant dense<0.000000e+00> : vector<1xf32>
    %32 = vector.multi_reduction <add>, %31, %cst_13 [1, 2] : vector<1x128x128xf32> to vector<1xf32>
    %33 = vector.shape_cast %32 : vector<1xf32> to vector<1x1x1xf32>
    %34 = vector.extract %33[0, 0, 0] : f32 from vector<1x1x1xf32>
    %35 = math.sqrt %34 : f32
    %36 = tpu.iota {dimensions = array<i32: 0>} : vector<128x128xi32>
    %37 = tpu.iota {dimensions = array<i32: 1>} : vector<128x128xi32>
    %38 = arith.cmpi eq, %36, %37 : vector<128x128xi32>
    %cst_14 = arith.constant 1.000000e+00 : f32
    %cst_15 = arith.constant 0.000000e+00 : f32
    %39 = vector.broadcast %cst_14 : f32 to vector<128x128xf32>
    %40 = vector.broadcast %cst_15 : f32 to vector<128x128xf32>
    %41 = arith.select %38, %39, %40 : vector<128x128xi1>, vector<128x128xf32>
    %cst_16 = arith.constant 1.500000e+00 : f32
    %42 = vector.broadcast %cst_16 : f32 to vector<128x128xf32>
    %43 = arith.mulf %42, %41 : vector<128x128xf32>
    %44 = arith.addf %12, %22 : vector<128x128xf32>
    %cst_17 = arith.constant 0.000000e+00 : f32
    %45 = vector.broadcast %cst_17 : f32 to vector<128x128xf32>
    %46 = arith.select %38, %44, %45 : vector<128x128xi1>, vector<128x128xf32>
    %47 = vector.shape_cast %46 : vector<128x128xf32> to vector<1x128x128xf32>
    %cst_18 = arith.constant dense<0.000000e+00> : vector<1xf32>
    %48 = vector.multi_reduction <add>, %47, %cst_18 [1, 2] : vector<1x128x128xf32> to vector<1xf32>
    %49 = vector.shape_cast %48 : vector<1xf32> to vector<1x1x1xf32>
    %50 = vector.extract %49[0, 0, 0] : f32 from vector<1x1x1xf32>
    %cst_19 = arith.constant 1.000000e+00 : f32
    %51 = arith.divf %cst_19, %35 : f32
    %52 = vector.broadcast %51 : f32 to vector<128x128xf32>
    %53 = arith.mulf %29, %52 : vector<128x128xf32>
    %c0_i32 = arith.constant 0 : i32
    %cst_20 = arith.constant dense<0.000000e+00> : vector<128x128xf32>
    %54 = tpu.matmul %41, %53, %cst_20 {dimension_numbers = #tpu.dot_dimension_numbers<[1], [0], [0], [1], [0, 0, 1, 1], [], []>} : vector<128x128xf32>, vector<128x128xf32>, vector<128x128xf32> -> vector<128x128xf32>
    %cst_21 = arith.constant 5.000000e-01 : f32
    %55 = vector.broadcast %cst_21 : f32 to vector<128x128xf32>
    %56 = arith.mulf %55, %54 : vector<128x128xf32>
    %57 = arith.subf %43, %56 : vector<128x128xf32>
    %cst_22 = arith.constant dense<0.000000e+00> : vector<128x128xf32>
    %58 = tpu.matmul %53, %57, %cst_22 {dimension_numbers = #tpu.dot_dimension_numbers<[1], [0], [0], [1], [0, 0, 1, 1], [], []>} : vector<128x128xf32>, vector<128x128xf32>, vector<128x128xf32> -> vector<128x128xf32>
    %cst_23 = arith.constant dense<0.000000e+00> : vector<128x128xf32>
    %59 = tpu.matmul %57, %41, %cst_23 {dimension_numbers = #tpu.dot_dimension_numbers<[1], [0], [0], [1], [0, 0, 1, 1], [], []>} : vector<128x128xf32>, vector<128x128xf32>, vector<128x128xf32> -> vector<128x128xf32>
    %c1_i32 = arith.constant 1 : i32
    %cst_24 = arith.constant dense<0.000000e+00> : vector<128x128xf32>
    %60 = tpu.matmul %59, %58, %cst_24 {dimension_numbers = #tpu.dot_dimension_numbers<[1], [0], [0], [1], [0, 0, 1, 1], [], []>} : vector<128x128xf32>, vector<128x128xf32>, vector<128x128xf32> -> vector<128x128xf32>
    %cst_25 = arith.constant 5.000000e-01 : f32
    %61 = vector.broadcast %cst_25 : f32 to vector<128x128xf32>
    %62 = arith.mulf %61, %60 : vector<128x128xf32>
    %63 = arith.subf %43, %62 : vector<128x128xf32>
    %cst_26 = arith.constant dense<0.000000e+00> : vector<128x128xf32>
    %64 = tpu.matmul %58, %63, %cst_26 {dimension_numbers = #tpu.dot_dimension_numbers<[1], [0], [0], [1], [0, 0, 1, 1], [], []>} : vector<128x128xf32>, vector<128x128xf32>, vector<128x128xf32> -> vector<128x128xf32>
    %cst_27 = arith.constant dense<0.000000e+00> : vector<128x128xf32>
    %65 = tpu.matmul %63, %59, %cst_27 {dimension_numbers = #tpu.dot_dimension_numbers<[1], [0], [0], [1], [0, 0, 1, 1], [], []>} : vector<128x128xf32>, vector<128x128xf32>, vector<128x128xf32> -> vector<128x128xf32>
    %c2_i32 = arith.constant 2 : i32
    %cst_28 = arith.constant dense<0.000000e+00> : vector<128x128xf32>
    %66 = tpu.matmul %65, %64, %cst_28 {dimension_numbers = #tpu.dot_dimension_numbers<[1], [0], [0], [1], [0, 0, 1, 1], [], []>} : vector<128x128xf32>, vector<128x128xf32>, vector<128x128xf32> -> vector<128x128xf32>
    %cst_29 = arith.constant 5.000000e-01 : f32
    %67 = vector.broadcast %cst_29 : f32 to vector<128x128xf32>
    %68 = arith.mulf %67, %66 : vector<128x128xf32>
    %69 = arith.subf %43, %68 : vector<128x128xf32>
    %cst_30 = arith.constant dense<0.000000e+00> : vector<128x128xf32>
    %70 = tpu.matmul %64, %69, %cst_30 {dimension_numbers = #tpu.dot_dimension_numbers<[1], [0], [0], [1], [0, 0, 1, 1], [], []>} : vector<128x128xf32>, vector<128x128xf32>, vector<128x128xf32> -> vector<128x128xf32>
    %cst_31 = arith.constant dense<0.000000e+00> : vector<128x128xf32>
    %71 = tpu.matmul %69, %65, %cst_31 {dimension_numbers = #tpu.dot_dimension_numbers<[1], [0], [0], [1], [0, 0, 1, 1], [], []>} : vector<128x128xf32>, vector<128x128xf32>, vector<128x128xf32> -> vector<128x128xf32>
    %c3_i32 = arith.constant 3 : i32
    %cst_32 = arith.constant dense<0.000000e+00> : vector<128x128xf32>
    %72 = tpu.matmul %71, %70, %cst_32 {dimension_numbers = #tpu.dot_dimension_numbers<[1], [0], [0], [1], [0, 0, 1, 1], [], []>} : vector<128x128xf32>, vector<128x128xf32>, vector<128x128xf32> -> vector<128x128xf32>
    %cst_33 = arith.constant 5.000000e-01 : f32
    %73 = vector.broadcast %cst_33 : f32 to vector<128x128xf32>
    %74 = arith.mulf %73, %72 : vector<128x128xf32>
    %75 = arith.subf %43, %74 : vector<128x128xf32>
    %cst_34 = arith.constant dense<0.000000e+00> : vector<128x128xf32>
    %76 = tpu.matmul %70, %75, %cst_34 {dimension_numbers = #tpu.dot_dimension_numbers<[1], [0], [0], [1], [0, 0, 1, 1], [], []>} : vector<128x128xf32>, vector<128x128xf32>, vector<128x128xf32> -> vector<128x128xf32>
    %cst_35 = arith.constant dense<0.000000e+00> : vector<128x128xf32>
    %77 = tpu.matmul %75, %71, %cst_35 {dimension_numbers = #tpu.dot_dimension_numbers<[1], [0], [0], [1], [0, 0, 1, 1], [], []>} : vector<128x128xf32>, vector<128x128xf32>, vector<128x128xf32> -> vector<128x128xf32>
    %c4_i32 = arith.constant 4 : i32
    %cst_36 = arith.constant dense<0.000000e+00> : vector<128x128xf32>
    %78 = tpu.matmul %77, %76, %cst_36 {dimension_numbers = #tpu.dot_dimension_numbers<[1], [0], [0], [1], [0, 0, 1, 1], [], []>} : vector<128x128xf32>, vector<128x128xf32>, vector<128x128xf32> -> vector<128x128xf32>
    %cst_37 = arith.constant 5.000000e-01 : f32
    %79 = vector.broadcast %cst_37 : f32 to vector<128x128xf32>
    %80 = arith.mulf %79, %78 : vector<128x128xf32>
    %81 = arith.subf %43, %80 : vector<128x128xf32>
    %cst_38 = arith.constant dense<0.000000e+00> : vector<128x128xf32>
    %82 = tpu.matmul %76, %81, %cst_38 {dimension_numbers = #tpu.dot_dimension_numbers<[1], [0], [0], [1], [0, 0, 1, 1], [], []>} : vector<128x128xf32>, vector<128x128xf32>, vector<128x128xf32> -> vector<128x128xf32>
    %cst_39 = arith.constant dense<0.000000e+00> : vector<128x128xf32>
    %83 = tpu.matmul %81, %77, %cst_39 {dimension_numbers = #tpu.dot_dimension_numbers<[1], [0], [0], [1], [0, 0, 1, 1], [], []>} : vector<128x128xf32>, vector<128x128xf32>, vector<128x128xf32> -> vector<128x128xf32>
    %c5_i32 = arith.constant 5 : i32
    %cst_40 = arith.constant dense<0.000000e+00> : vector<128x128xf32>
    %84 = tpu.matmul %83, %82, %cst_40 {dimension_numbers = #tpu.dot_dimension_numbers<[1], [0], [0], [1], [0, 0, 1, 1], [], []>} : vector<128x128xf32>, vector<128x128xf32>, vector<128x128xf32> -> vector<128x128xf32>
    %cst_41 = arith.constant 5.000000e-01 : f32
    %85 = vector.broadcast %cst_41 : f32 to vector<128x128xf32>
    %86 = arith.mulf %85, %84 : vector<128x128xf32>
    %87 = arith.subf %43, %86 : vector<128x128xf32>
    %cst_42 = arith.constant dense<0.000000e+00> : vector<128x128xf32>
    %88 = tpu.matmul %82, %87, %cst_42 {dimension_numbers = #tpu.dot_dimension_numbers<[1], [0], [0], [1], [0, 0, 1, 1], [], []>} : vector<128x128xf32>, vector<128x128xf32>, vector<128x128xf32> -> vector<128x128xf32>
    %cst_43 = arith.constant dense<0.000000e+00> : vector<128x128xf32>
    %89 = tpu.matmul %87, %83, %cst_43 {dimension_numbers = #tpu.dot_dimension_numbers<[1], [0], [0], [1], [0, 0, 1, 1], [], []>} : vector<128x128xf32>, vector<128x128xf32>, vector<128x128xf32> -> vector<128x128xf32>
    %c6_i32 = arith.constant 6 : i32
    %cst_44 = arith.constant dense<0.000000e+00> : vector<128x128xf32>
    %90 = tpu.matmul %89, %88, %cst_44 {dimension_numbers = #tpu.dot_dimension_numbers<[1], [0], [0], [1], [0, 0, 1, 1], [], []>} : vector<128x128xf32>, vector<128x128xf32>, vector<128x128xf32> -> vector<128x128xf32>
    %cst_45 = arith.constant 5.000000e-01 : f32
    %91 = vector.broadcast %cst_45 : f32 to vector<128x128xf32>
    %92 = arith.mulf %91, %90 : vector<128x128xf32>
    %93 = arith.subf %43, %92 : vector<128x128xf32>
    %cst_46 = arith.constant dense<0.000000e+00> : vector<128x128xf32>
    %94 = tpu.matmul %88, %93, %cst_46 {dimension_numbers = #tpu.dot_dimension_numbers<[1], [0], [0], [1], [0, 0, 1, 1], [], []>} : vector<128x128xf32>, vector<128x128xf32>, vector<128x128xf32> -> vector<128x128xf32>
    %cst_47 = arith.constant dense<0.000000e+00> : vector<128x128xf32>
    %95 = tpu.matmul %93, %89, %cst_47 {dimension_numbers = #tpu.dot_dimension_numbers<[1], [0], [0], [1], [0, 0, 1, 1], [], []>} : vector<128x128xf32>, vector<128x128xf32>, vector<128x128xf32> -> vector<128x128xf32>
    %c7_i32 = arith.constant 7 : i32
    %cst_48 = arith.constant dense<0.000000e+00> : vector<128x128xf32>
    %96 = tpu.matmul %95, %94, %cst_48 {dimension_numbers = #tpu.dot_dimension_numbers<[1], [0], [0], [1], [0, 0, 1, 1], [], []>} : vector<128x128xf32>, vector<128x128xf32>, vector<128x128xf32> -> vector<128x128xf32>
    %cst_49 = arith.constant 5.000000e-01 : f32
    %97 = vector.broadcast %cst_49 : f32 to vector<128x128xf32>
    %98 = arith.mulf %97, %96 : vector<128x128xf32>
    %99 = arith.subf %43, %98 : vector<128x128xf32>
    %cst_50 = arith.constant dense<0.000000e+00> : vector<128x128xf32>
    %100 = tpu.matmul %94, %99, %cst_50 {dimension_numbers = #tpu.dot_dimension_numbers<[1], [0], [0], [1], [0, 0, 1, 1], [], []>} : vector<128x128xf32>, vector<128x128xf32>, vector<128x128xf32> -> vector<128x128xf32>
    %cst_51 = arith.constant dense<0.000000e+00> : vector<128x128xf32>
    %101 = tpu.matmul %99, %95, %cst_51 {dimension_numbers = #tpu.dot_dimension_numbers<[1], [0], [0], [1], [0, 0, 1, 1], [], []>} : vector<128x128xf32>, vector<128x128xf32>, vector<128x128xf32> -> vector<128x128xf32>
    %c8_i32 = arith.constant 8 : i32
    %cst_52 = arith.constant dense<0.000000e+00> : vector<128x128xf32>
    %102 = tpu.matmul %101, %100, %cst_52 {dimension_numbers = #tpu.dot_dimension_numbers<[1], [0], [0], [1], [0, 0, 1, 1], [], []>} : vector<128x128xf32>, vector<128x128xf32>, vector<128x128xf32> -> vector<128x128xf32>
    %cst_53 = arith.constant 5.000000e-01 : f32
    %103 = vector.broadcast %cst_53 : f32 to vector<128x128xf32>
    %104 = arith.mulf %103, %102 : vector<128x128xf32>
    %105 = arith.subf %43, %104 : vector<128x128xf32>
    %cst_54 = arith.constant dense<0.000000e+00> : vector<128x128xf32>
    %106 = tpu.matmul %100, %105, %cst_54 {dimension_numbers = #tpu.dot_dimension_numbers<[1], [0], [0], [1], [0, 0, 1, 1], [], []>} : vector<128x128xf32>, vector<128x128xf32>, vector<128x128xf32> -> vector<128x128xf32>
    %cst_55 = arith.constant dense<0.000000e+00> : vector<128x128xf32>
    %107 = tpu.matmul %105, %101, %cst_55 {dimension_numbers = #tpu.dot_dimension_numbers<[1], [0], [0], [1], [0, 0, 1, 1], [], []>} : vector<128x128xf32>, vector<128x128xf32>, vector<128x128xf32> -> vector<128x128xf32>
    %c9_i32 = arith.constant 9 : i32
    %cst_56 = arith.constant dense<0.000000e+00> : vector<128x128xf32>
    %108 = tpu.matmul %107, %106, %cst_56 {dimension_numbers = #tpu.dot_dimension_numbers<[1], [0], [0], [1], [0, 0, 1, 1], [], []>} : vector<128x128xf32>, vector<128x128xf32>, vector<128x128xf32> -> vector<128x128xf32>
    %cst_57 = arith.constant 5.000000e-01 : f32
    %109 = vector.broadcast %cst_57 : f32 to vector<128x128xf32>
    %110 = arith.mulf %109, %108 : vector<128x128xf32>
    %111 = arith.subf %43, %110 : vector<128x128xf32>
    %cst_58 = arith.constant dense<0.000000e+00> : vector<128x128xf32>
    %112 = tpu.matmul %106, %111, %cst_58 {dimension_numbers = #tpu.dot_dimension_numbers<[1], [0], [0], [1], [0, 0, 1, 1], [], []>} : vector<128x128xf32>, vector<128x128xf32>, vector<128x128xf32> -> vector<128x128xf32>
    %cst_59 = arith.constant dense<0.000000e+00> : vector<128x128xf32>
    %113 = tpu.matmul %111, %107, %cst_59 {dimension_numbers = #tpu.dot_dimension_numbers<[1], [0], [0], [1], [0, 0, 1, 1], [], []>} : vector<128x128xf32>, vector<128x128xf32>, vector<128x128xf32> -> vector<128x128xf32>
    %c10_i32 = arith.constant 10 : i32
    %cst_60 = arith.constant dense<0.000000e+00> : vector<128x128xf32>
    %114 = tpu.matmul %113, %112, %cst_60 {dimension_numbers = #tpu.dot_dimension_numbers<[1], [0], [0], [1], [0, 0, 1, 1], [], []>} : vector<128x128xf32>, vector<128x128xf32>, vector<128x128xf32> -> vector<128x128xf32>
    %cst_61 = arith.constant 5.000000e-01 : f32
    %115 = vector.broadcast %cst_61 : f32 to vector<128x128xf32>
    %116 = arith.mulf %115, %114 : vector<128x128xf32>
    %117 = arith.subf %43, %116 : vector<128x128xf32>
    %cst_62 = arith.constant dense<0.000000e+00> : vector<128x128xf32>
    %118 = tpu.matmul %112, %117, %cst_62 {dimension_numbers = #tpu.dot_dimension_numbers<[1], [0], [0], [1], [0, 0, 1, 1], [], []>} : vector<128x128xf32>, vector<128x128xf32>, vector<128x128xf32> -> vector<128x128xf32>
    %cst_63 = arith.constant dense<0.000000e+00> : vector<128x128xf32>
    %119 = tpu.matmul %117, %113, %cst_63 {dimension_numbers = #tpu.dot_dimension_numbers<[1], [0], [0], [1], [0, 0, 1, 1], [], []>} : vector<128x128xf32>, vector<128x128xf32>, vector<128x128xf32> -> vector<128x128xf32>
    %c11_i32 = arith.constant 11 : i32
    %cst_64 = arith.constant dense<0.000000e+00> : vector<128x128xf32>
    %120 = tpu.matmul %119, %118, %cst_64 {dimension_numbers = #tpu.dot_dimension_numbers<[1], [0], [0], [1], [0, 0, 1, 1], [], []>} : vector<128x128xf32>, vector<128x128xf32>, vector<128x128xf32> -> vector<128x128xf32>
    %cst_65 = arith.constant 5.000000e-01 : f32
    %121 = vector.broadcast %cst_65 : f32 to vector<128x128xf32>
    %122 = arith.mulf %121, %120 : vector<128x128xf32>
    %123 = arith.subf %43, %122 : vector<128x128xf32>
    %cst_66 = arith.constant dense<0.000000e+00> : vector<128x128xf32>
    %124 = tpu.matmul %118, %123, %cst_66 {dimension_numbers = #tpu.dot_dimension_numbers<[1], [0], [0], [1], [0, 0, 1, 1], [], []>} : vector<128x128xf32>, vector<128x128xf32>, vector<128x128xf32> -> vector<128x128xf32>
    %cst_67 = arith.constant dense<0.000000e+00> : vector<128x128xf32>
    %125 = tpu.matmul %123, %119, %cst_67 {dimension_numbers = #tpu.dot_dimension_numbers<[1], [0], [0], [1], [0, 0, 1, 1], [], []>} : vector<128x128xf32>, vector<128x128xf32>, vector<128x128xf32> -> vector<128x128xf32>
    %c12_i32 = arith.constant 12 : i32
    %cst_68 = arith.constant dense<0.000000e+00> : vector<128x128xf32>
    %126 = tpu.matmul %125, %124, %cst_68 {dimension_numbers = #tpu.dot_dimension_numbers<[1], [0], [0], [1], [0, 0, 1, 1], [], []>} : vector<128x128xf32>, vector<128x128xf32>, vector<128x128xf32> -> vector<128x128xf32>
    %cst_69 = arith.constant 5.000000e-01 : f32
    %127 = vector.broadcast %cst_69 : f32 to vector<128x128xf32>
    %128 = arith.mulf %127, %126 : vector<128x128xf32>
    %129 = arith.subf %43, %128 : vector<128x128xf32>
    %cst_70 = arith.constant dense<0.000000e+00> : vector<128x128xf32>
    %130 = tpu.matmul %124, %129, %cst_70 {dimension_numbers = #tpu.dot_dimension_numbers<[1], [0], [0], [1], [0, 0, 1, 1], [], []>} : vector<128x128xf32>, vector<128x128xf32>, vector<128x128xf32> -> vector<128x128xf32>
    %cst_71 = arith.constant dense<0.000000e+00> : vector<128x128xf32>
    %131 = tpu.matmul %129, %125, %cst_71 {dimension_numbers = #tpu.dot_dimension_numbers<[1], [0], [0], [1], [0, 0, 1, 1], [], []>} : vector<128x128xf32>, vector<128x128xf32>, vector<128x128xf32> -> vector<128x128xf32>
    %c13_i32 = arith.constant 13 : i32
    %cst_72 = arith.constant dense<0.000000e+00> : vector<128x128xf32>
    %132 = tpu.matmul %131, %130, %cst_72 {dimension_numbers = #tpu.dot_dimension_numbers<[1], [0], [0], [1], [0, 0, 1, 1], [], []>} : vector<128x128xf32>, vector<128x128xf32>, vector<128x128xf32> -> vector<128x128xf32>
    %cst_73 = arith.constant 5.000000e-01 : f32
    %133 = vector.broadcast %cst_73 : f32 to vector<128x128xf32>
    %134 = arith.mulf %133, %132 : vector<128x128xf32>
    %135 = arith.subf %43, %134 : vector<128x128xf32>
    %cst_74 = arith.constant dense<0.000000e+00> : vector<128x128xf32>
    %136 = tpu.matmul %130, %135, %cst_74 {dimension_numbers = #tpu.dot_dimension_numbers<[1], [0], [0], [1], [0, 0, 1, 1], [], []>} : vector<128x128xf32>, vector<128x128xf32>, vector<128x128xf32> -> vector<128x128xf32>
    %cst_75 = arith.constant dense<0.000000e+00> : vector<128x128xf32>
    %137 = tpu.matmul %135, %131, %cst_75 {dimension_numbers = #tpu.dot_dimension_numbers<[1], [0], [0], [1], [0, 0, 1, 1], [], []>} : vector<128x128xf32>, vector<128x128xf32>, vector<128x128xf32> -> vector<128x128xf32>
    %c14_i32 = arith.constant 14 : i32
    %cst_76 = arith.constant dense<0.000000e+00> : vector<128x128xf32>
    %138 = tpu.matmul %137, %136, %cst_76 {dimension_numbers = #tpu.dot_dimension_numbers<[1], [0], [0], [1], [0, 0, 1, 1], [], []>} : vector<128x128xf32>, vector<128x128xf32>, vector<128x128xf32> -> vector<128x128xf32>
    %cst_77 = arith.constant 5.000000e-01 : f32
    %139 = vector.broadcast %cst_77 : f32 to vector<128x128xf32>
    %140 = arith.mulf %139, %138 : vector<128x128xf32>
    %141 = arith.subf %43, %140 : vector<128x128xf32>
    %cst_78 = arith.constant dense<0.000000e+00> : vector<128x128xf32>
    %142 = tpu.matmul %136, %141, %cst_78 {dimension_numbers = #tpu.dot_dimension_numbers<[1], [0], [0], [1], [0, 0, 1, 1], [], []>} : vector<128x128xf32>, vector<128x128xf32>, vector<128x128xf32> -> vector<128x128xf32>
    %cst_79 = arith.constant dense<0.000000e+00> : vector<128x128xf32>
    %143 = tpu.matmul %141, %137, %cst_79 {dimension_numbers = #tpu.dot_dimension_numbers<[1], [0], [0], [1], [0, 0, 1, 1], [], []>} : vector<128x128xf32>, vector<128x128xf32>, vector<128x128xf32> -> vector<128x128xf32>
    %c15_i32 = arith.constant 15 : i32
    %cst_80 = arith.constant dense<0.000000e+00> : vector<128x128xf32>
    %144 = tpu.matmul %143, %142, %cst_80 {dimension_numbers = #tpu.dot_dimension_numbers<[1], [0], [0], [1], [0, 0, 1, 1], [], []>} : vector<128x128xf32>, vector<128x128xf32>, vector<128x128xf32> -> vector<128x128xf32>
    %cst_81 = arith.constant 5.000000e-01 : f32
    %145 = vector.broadcast %cst_81 : f32 to vector<128x128xf32>
    %146 = arith.mulf %145, %144 : vector<128x128xf32>
    %147 = arith.subf %43, %146 : vector<128x128xf32>
    %cst_82 = arith.constant dense<0.000000e+00> : vector<128x128xf32>
    %148 = tpu.matmul %142, %147, %cst_82 {dimension_numbers = #tpu.dot_dimension_numbers<[1], [0], [0], [1], [0, 0, 1, 1], [], []>} : vector<128x128xf32>, vector<128x128xf32>, vector<128x128xf32> -> vector<128x128xf32>
    %cst_83 = arith.constant dense<0.000000e+00> : vector<128x128xf32>
    %149 = tpu.matmul %147, %143, %cst_83 {dimension_numbers = #tpu.dot_dimension_numbers<[1], [0], [0], [1], [0, 0, 1, 1], [], []>} : vector<128x128xf32>, vector<128x128xf32>, vector<128x128xf32> -> vector<128x128xf32>
    %c16_i32 = arith.constant 16 : i32
    %cst_84 = arith.constant dense<0.000000e+00> : vector<128x128xf32>
    %150 = tpu.matmul %149, %148, %cst_84 {dimension_numbers = #tpu.dot_dimension_numbers<[1], [0], [0], [1], [0, 0, 1, 1], [], []>} : vector<128x128xf32>, vector<128x128xf32>, vector<128x128xf32> -> vector<128x128xf32>
    %cst_85 = arith.constant 5.000000e-01 : f32
    %151 = vector.broadcast %cst_85 : f32 to vector<128x128xf32>
    %152 = arith.mulf %151, %150 : vector<128x128xf32>
    %153 = arith.subf %43, %152 : vector<128x128xf32>
    %cst_86 = arith.constant dense<0.000000e+00> : vector<128x128xf32>
    %154 = tpu.matmul %148, %153, %cst_86 {dimension_numbers = #tpu.dot_dimension_numbers<[1], [0], [0], [1], [0, 0, 1, 1], [], []>} : vector<128x128xf32>, vector<128x128xf32>, vector<128x128xf32> -> vector<128x128xf32>
    %cst_87 = arith.constant dense<0.000000e+00> : vector<128x128xf32>
    %155 = tpu.matmul %153, %149, %cst_87 {dimension_numbers = #tpu.dot_dimension_numbers<[1], [0], [0], [1], [0, 0, 1, 1], [], []>} : vector<128x128xf32>, vector<128x128xf32>, vector<128x128xf32> -> vector<128x128xf32>
    %c17_i32 = arith.constant 17 : i32
    %cst_88 = arith.constant dense<0.000000e+00> : vector<128x128xf32>
    %156 = tpu.matmul %155, %154, %cst_88 {dimension_numbers = #tpu.dot_dimension_numbers<[1], [0], [0], [1], [0, 0, 1, 1], [], []>} : vector<128x128xf32>, vector<128x128xf32>, vector<128x128xf32> -> vector<128x128xf32>
    %cst_89 = arith.constant 5.000000e-01 : f32
    %157 = vector.broadcast %cst_89 : f32 to vector<128x128xf32>
    %158 = arith.mulf %157, %156 : vector<128x128xf32>
    %159 = arith.subf %43, %158 : vector<128x128xf32>
    %cst_90 = arith.constant dense<0.000000e+00> : vector<128x128xf32>
    %160 = tpu.matmul %154, %159, %cst_90 {dimension_numbers = #tpu.dot_dimension_numbers<[1], [0], [0], [1], [0, 0, 1, 1], [], []>} : vector<128x128xf32>, vector<128x128xf32>, vector<128x128xf32> -> vector<128x128xf32>
    %cst_91 = arith.constant dense<0.000000e+00> : vector<128x128xf32>
    %161 = tpu.matmul %159, %155, %cst_91 {dimension_numbers = #tpu.dot_dimension_numbers<[1], [0], [0], [1], [0, 0, 1, 1], [], []>} : vector<128x128xf32>, vector<128x128xf32>, vector<128x128xf32> -> vector<128x128xf32>
    %c18_i32 = arith.constant 18 : i32
    %cst_92 = arith.constant dense<0.000000e+00> : vector<128x128xf32>
    %162 = tpu.matmul %161, %160, %cst_92 {dimension_numbers = #tpu.dot_dimension_numbers<[1], [0], [0], [1], [0, 0, 1, 1], [], []>} : vector<128x128xf32>, vector<128x128xf32>, vector<128x128xf32> -> vector<128x128xf32>
    %cst_93 = arith.constant 5.000000e-01 : f32
    %163 = vector.broadcast %cst_93 : f32 to vector<128x128xf32>
    %164 = arith.mulf %163, %162 : vector<128x128xf32>
    %165 = arith.subf %43, %164 : vector<128x128xf32>
    %cst_94 = arith.constant dense<0.000000e+00> : vector<128x128xf32>
    %166 = tpu.matmul %160, %165, %cst_94 {dimension_numbers = #tpu.dot_dimension_numbers<[1], [0], [0], [1], [0, 0, 1, 1], [], []>} : vector<128x128xf32>, vector<128x128xf32>, vector<128x128xf32> -> vector<128x128xf32>
    %cst_95 = arith.constant dense<0.000000e+00> : vector<128x128xf32>
    %167 = tpu.matmul %165, %161, %cst_95 {dimension_numbers = #tpu.dot_dimension_numbers<[1], [0], [0], [1], [0, 0, 1, 1], [], []>} : vector<128x128xf32>, vector<128x128xf32>, vector<128x128xf32> -> vector<128x128xf32>
    %c19_i32 = arith.constant 19 : i32
    %cst_96 = arith.constant dense<0.000000e+00> : vector<128x128xf32>
    %168 = tpu.matmul %167, %166, %cst_96 {dimension_numbers = #tpu.dot_dimension_numbers<[1], [0], [0], [1], [0, 0, 1, 1], [], []>} : vector<128x128xf32>, vector<128x128xf32>, vector<128x128xf32> -> vector<128x128xf32>
    %cst_97 = arith.constant 5.000000e-01 : f32
    %169 = vector.broadcast %cst_97 : f32 to vector<128x128xf32>
    %170 = arith.mulf %169, %168 : vector<128x128xf32>
    %171 = arith.subf %43, %170 : vector<128x128xf32>
    %cst_98 = arith.constant dense<0.000000e+00> : vector<128x128xf32>
    %172 = tpu.matmul %166, %171, %cst_98 {dimension_numbers = #tpu.dot_dimension_numbers<[1], [0], [0], [1], [0, 0, 1, 1], [], []>} : vector<128x128xf32>, vector<128x128xf32>, vector<128x128xf32> -> vector<128x128xf32>
    %cst_99 = arith.constant dense<0.000000e+00> : vector<128x128xf32>
    %173 = tpu.matmul %171, %167, %cst_99 {dimension_numbers = #tpu.dot_dimension_numbers<[1], [0], [0], [1], [0, 0, 1, 1], [], []>} : vector<128x128xf32>, vector<128x128xf32>, vector<128x128xf32> -> vector<128x128xf32>
    %cst_100 = arith.constant 0.000000e+00 : f32
    %174 = vector.broadcast %cst_100 : f32 to vector<128x128xf32>
    %175 = arith.select %38, %172, %174 : vector<128x128xi1>, vector<128x128xf32>
    %176 = vector.shape_cast %175 : vector<128x128xf32> to vector<1x128x128xf32>
    %cst_101 = arith.constant dense<0.000000e+00> : vector<1xf32>
    %177 = vector.multi_reduction <add>, %176, %cst_101 [1, 2] : vector<1x128x128xf32> to vector<1xf32>
    %178 = vector.shape_cast %177 : vector<1xf32> to vector<1x1x1xf32>
    %179 = vector.extract %178[0, 0, 0] : f32 from vector<1x1x1xf32>
    %180 = arith.addf %28, %50 : f32
    %181 = math.sqrt %35 : f32
    %cst_102 = arith.constant 2.000000e+00 : f32
    %182 = arith.mulf %cst_102, %181 : f32
    %183 = arith.mulf %182, %179 : f32
    %184 = arith.subf %180, %183 : f32
    %185 = vector.broadcast %184 : f32 to vector<1x1xf32>
    %c0_103 = arith.constant 0 : index
    %c0_104 = arith.constant 0 : index
    %186 = vector.load %arg3[%c0_103, %c0_104] : memref<1x1xf32, #tpu.memory_space<vmem>>, vector<1x1xf32>
    tpu.vector_store %arg3[%c0_103, %c0_104], %185 {strides = array<i32>} : memref<1x1xf32, #tpu.memory_space<vmem>>, vector<1x1xf32>,
    return
  }
  func.func @transform_0(%arg0: i32) -> (i32, i32) {
    %c0_i32 = arith.constant 0 : i32
    %c0_i32_0 = arith.constant 0 : i32
    %c0_i32_1 = arith.constant 0 : i32
    return %c0_i32, %c0_i32_0 : i32, i32
  }
  func.func @transform_1(%arg0: i32) -> (i32, i32) {
    %c0_i32 = arith.constant 0 : i32
    %c0_i32_0 = arith.constant 0 : i32
    %c0_i32_1 = arith.constant 0 : i32
    return %c0_i32, %c0_i32_0 : i32, i32
  }
  func.func @transform_2(%arg0: i32) -> (i32, i32) {
    %c0_i32 = arith.constant 0 : i32
    %c0_i32_0 = arith.constant 0 : i32
    %c0_i32_1 = arith.constant 0 : i32
    return %c0_i32, %c0_i32_0 : i32, i32
  }
}

</mosaic_0001>

<bundles_post_ra>
// kernel: frechet_inception_distance.1
= control target key start
LH: loop header
LB: loop body
LE: loop exit
PB: predicated region body
PF: predicated region fallthrough
CT: control target
= control target key end

     0   :  { %7 = vsyncpa [#allocation3], 0  ;;  %s19854_s0 = inlined_call_operand.vmem [shape: f32[4,1024], index: 0, kind: input, shape index: {}]   ;;  %s19855_s1 = inlined_call_operand.hbm [shape: f32[1024,128], index: 1, kind: input, shape index: {}]   ;;  %s19856_s2 = inlined_call_operand.hbm [shape: f32[1,1], index: 2, kind: output, shape index: {}]  }
   0x1   :  { %8 = vsyncpa [#allocation4], 0  ;;  %s16194_s9 = smov [#allocation2]  }
   0x2   :  { %s16_s10 = sshll.u32 %s16194_s9, 4  ;;  %s17_s10 = int_to_ptr.vmem [resolvable:$true] %s16_s10 }
   0x3   :  { %s16158_s11 = scalar_lea.vmem %s17_s10, 16384  ;;  %p16163_p1 = scmp.lt.s32.totalorder %s17_s10, %s17_s10 }
   0x4   :  { %p16159_p0 = scmp.ne.s32.totalorder %s17_s10, %s16158_s11  ;;  %p16164_p2 = scmp.lt.s32.totalorder %s16158_s11, %s16158_s11 }
   0x6   :  { %p16165_p3 = por %p16164_p2, %p16163_p1 }
   0x8   :  { %p16166_p4 = pnand %p16165_p3, %p16159_p0 }
   0xa   :  { %16169 = shalt.err (!%p16166_p4)
}
   0xb   :  { %s16195_s12 = smov 128   ;;  %s16196_s13 = smov 8  }
   0xc   :  { %22 = dma.hbm_to_vmem [thread:$0]  %s19855_s1, 16384, %s17_s10, [#allocation3], %s16195_s12, %s16195_s12, %s16196_s13  }
   0xd   :  { %16190 = dma.done.wait [#allocation3], 16384  }
   0xe   :  { %16191 = vsyncadd [#allocation3], 4294950912  ;;  %v61_v0 = vld [vmem:[#allocation2 + $0xf8] sm:$0xff]  ;;  %v60_v4 = vld [vmem:[#allocation2 + $0xf0] sm:$0xff]  ;;  %vm450_vm0 = vcmask 1041408   ;;  %vm934_vm1 = vcmask 1040384  }
   0xf   :  { %v93_v1 = vld [vmem:[#allocation2 + $0x1f8] sm:$0xff]  ;;  %10614 = vmatprep.subr.mxu0 %v61_v0  ;;  %v92_v5 = vld [vmem:[#allocation2 + $0x1f0] sm:$0xff]  ;;  %v59_v8 = vld [vmem:[#allocation2 + $0xe8] sm:$0xff]  ;;  %vm493_vm2 = vcmask 15360   ;;  %s16199_s4 = smov [#allocation5]  }
  0x10   :  { %v45_v2 = vld [vmem:[#allocation2 + $0x78] sm:$0xff]  ;;  %10649 = vmatprep.subr.mxu1 %v93_v1  ;;  %v44_v6 = vld [vmem:[#allocation2 + $0x70] sm:$0xff]  ;;  %v91_v9 = vld [vmem:[#allocation2 + $0x1e8] sm:$0xff]  ;;  %s10539_s5 = sshll.u32 %s16199_s4, 4  ;;  %s10540_s5 = int_to_ptr.vmem [resolvable:$true] %s10539_s5 }
  0x11   :  { %v77_v3 = vld [vmem:[#allocation2 + $0x178] sm:$0xff]  ;;  %10615 = vmatpush3.msra.mxu0 %v45_v2  ;;  %v76_v7 = vld [vmem:[#allocation2 + $0x170] sm:$0xff]  ;;  %v43_v10 = vld [vmem:[#allocation2 + $0x68] sm:$0xff]  ;;  %s16170_s7 = scalar_lea.vmem %s10540_s5, 16  ;;  %s16174_s8 = scalar_lea.vmem %s10540_s5, 32 }
  0x12   :  { %10650 = vmatpush3.msra.mxu1 %v77_v3  ;;  %10616 = vmatprep.subr.mxu0 %v60_v4  ;;  %v75_v11 = vld [vmem:[#allocation2 + $0x168] sm:$0xff]  ;;  %v58_v12 = vld [vmem:[#allocation2 + $0xe0] sm:$0xff]  ;;  %v57_v16 = vld [vmem:[#allocation2 + $0xd8] sm:$0xff]  ;;  %p16171_p5 = scmp.ne.s32.totalorder %s10540_s5, %s16170_s7  ;;  %p16175_p6 = scmp.lt.s32.totalorder %s10540_s5, %s10540_s5 }
  0x13   :  { %10651 = vmatprep.subr.mxu1 %v92_v5  ;;  %10617 = vmatpush3.msra.mxu0 %v44_v6  ;;  %v90_v13 = vld [vmem:[#allocation2 + $0x1e0] sm:$0xff]  ;;  %v89_v17 = vld [vmem:[#allocation2 + $0x1d8] sm:$0xff]  ;;  %v56_v20 = vld [vmem:[#allocation2 + $0xd0] sm:$0xff]  ;;  %p16176_p7 = scmp.lt.s32.totalorder %s16174_s8, %s16170_s7 }
  0x14   :  { %10652 = vmatpush3.msra.mxu1 %v76_v7  ;;  %10618 = vmatprep.subr.mxu0 %v59_v8  ;;  %v42_v14 = vld [vmem:[#allocation2 + $0x60] sm:$0xff]  ;;  %v41_v18 = vld [vmem:[#allocation2 + $0x58] sm:$0xff]  ;;  %v88_v21 = vld [vmem:[#allocation2 + $0x1d0] sm:$0xff] }
  0x15   :  { %10653 = vmatprep.subr.mxu1 %v91_v9  ;;  %v74_v15 = vld [vmem:[#allocation2 + $0x160] sm:$0xff]  ;;  %10619 = vmatpush3.msra.mxu0 %v43_v10  ;;  %v73_v19 = vld [vmem:[#allocation2 + $0x158] sm:$0xff]  ;;  %v40_v22 = vld [vmem:[#allocation2 + $0x50] sm:$0xff]  ;;  %p16177_p8 = por %p16176_p7, %p16175_p6 }
  0x16   :  { %10654 = vmatpush3.msra.mxu1 %v75_v11  ;;  %10620 = vmatprep.subr.mxu0 %v58_v12  ;;  %v72_v23 = vld [vmem:[#allocation2 + $0x150] sm:$0xff]  ;;  %v55_v24 = vld [vmem:[#allocation2 + $0xc8] sm:$0xff]  ;;  %v54_v28 = vld [vmem:[#allocation2 + $0xc0] sm:$0xff] }
  0x17   :  { %10655 = vmatprep.subr.mxu1 %v90_v13  ;;  %10621 = vmatpush3.msra.mxu0 %v42_v14  ;;  %v87_v25 = vld [vmem:[#allocation2 + $0x1c8] sm:$0xff]  ;;  %v86_v29 = vld [vmem:[#allocation2 + $0x1c0] sm:$0xff]  ;;  %v53_v32 = vld [vmem:[#allocation2 + $0xb8] sm:$0xff]  ;;  %p16178_p9 = pnand %p16177_p8, %p16171_p5 }
  0x18   :  { %10656 = vmatpush3.msra.mxu1 %v74_v15  ;;  %10622 = vmatprep.subr.mxu0 %v57_v16  ;;  %v39_v26 = vld [vmem:[#allocation2 + $0x48] sm:$0xff]  ;;  %v38_v30 = vld [vmem:[#allocation2 + $0x40] sm:$0xff]  ;;  %v85_v33 = vld [vmem:[#allocation2 + $0x1b8] sm:$0xff] }
  0x19   :  { %10657 = vmatprep.subr.mxu1 %v89_v17  ;;  %10623 = vmatpush3.msra.mxu0 %v41_v18  ;;  %v71_v27 = vld [vmem:[#allocation2 + $0x148] sm:$0xff]  ;;  %v70_v31 = vld [vmem:[#allocation2 + $0x140] sm:$0xff]  ;;  %v37_v34 = vld [vmem:[#allocation2 + $0x38] sm:$0xff] }
  0x1a   :  { %10658 = vmatpush3.msra.mxu1 %v73_v19  ;;  %10624 = vmatprep.subr.mxu0 %v56_v20  ;;  %v69_v35 = vld [vmem:[#allocation2 + $0x138] sm:$0xff]  ;;  %v52_v36 = vld [vmem:[#allocation2 + $0xb0] sm:$0xff]  ;;  %v51_v40 = vld [vmem:[#allocation2 + $0xa8] sm:$0xff] }
  0x1b   :  { %10659 = vmatprep.subr.mxu1 %v88_v21  ;;  %10625 = vmatpush3.msra.mxu0 %v40_v22  ;;  %v84_v37 = vld [vmem:[#allocation2 + $0x1b0] sm:$0xff]  ;;  %v83_v41 = vld [vmem:[#allocation2 + $0x1a8] sm:$0xff]  ;;  %v50_v44 = vld [vmem:[#allocation2 + $0xa0] sm:$0xff] }
  0x1c   :  { %10660 = vmatpush3.msra.mxu1 %v72_v23  ;;  %10626 = vmatprep.subr.mxu0 %v55_v24  ;;  %v36_v38 = vld [vmem:[#allocation2 + $0x30] sm:$0xff]  ;;  %v35_v42 = vld [vmem:[#allocation2 + $0x28] sm:$0xff]  ;;  %v82_v45 = vld [vmem:[#allocation2 + $0x1a0] sm:$0xff] }
  0x1d   :  { %10661 = vmatprep.subr.mxu1 %v87_v25  ;;  %10627 = vmatpush3.msra.mxu0 %v39_v26  ;;  %v68_v39 = vld [vmem:[#allocation2 + $0x130] sm:$0xff]  ;;  %v67_v43 = vld [vmem:[#allocation2 + $0x128] sm:$0xff]  ;;  %v34_v46 = vld [vmem:[#allocation2 + $0x20] sm:$0xff] }
  0x1e   :  { %10662 = vmatpush3.msra.mxu1 %v71_v27  ;;  %10628 = vmatprep.subr.mxu0 %v54_v28  ;;  %v66_v47 = vld [vmem:[#allocation2 + $0x120] sm:$0xff]  ;;  %v49_v48 = vld [vmem:[#allocation2 + $0x98] sm:$0xff]  ;;  %v48_v52 = vld [vmem:[#allocation2 + $0x90] sm:$0xff] }
  0x1f   :  { %10663 = vmatprep.subr.mxu1 %v86_v29  ;;  %10629 = vmatpush3.msra.mxu0 %v38_v30  ;;  %v81_v49 = vld [vmem:[#allocation2 + $0x198] sm:$0xff]  ;;  %v80_v53 = vld [vmem:[#allocation2 + $0x190] sm:$0xff]  ;;  %v26_v56 = vld [vmem:[%s19854_s0] sm:$0xff] }
  0x20   :  { %10664 = vmatpush3.msra.mxu1 %v70_v31  ;;  %10630 = vmatprep.subr.mxu0 %v53_v32  ;;  %v33_v50 = vld [vmem:[#allocation2 + $0x18] sm:$0xff]  ;;  %v32_v54 = vld [vmem:[#allocation2 + $0x10] sm:$0xff]  ;;  %v47_v57 = vld [vmem:[#allocation2 + $0x88] sm:$0xff]  ;;  %v162_v0 = vcombine.high %v26_v56, %v26_v56 }
  0x21   :  { %10665 = vmatprep.subr.mxu1 %v85_v33  ;;  %10631 = vmatpush3.msra.mxu0 %v37_v34  ;;  %v65_v51 = vld [vmem:[#allocation2 + $0x118] sm:$0xff]  ;;  %v64_v55 = vld [vmem:[#allocation2 + $0x110] sm:$0xff]  ;;  %v79_v58 = vld [vmem:[#allocation2 + $0x188] sm:$0xff] }
  0x22   :  { %10666 = vmatpush3.msra.mxu1 %v69_v35  ;;  %10632 = vmatprep.subr.mxu0 %v52_v36  ;;  %v27_v59 = vld [vmem:[%s19854_s0 + $0x8] sm:$0xff]  ;;  %v46_v62 = vld [vmem:[#allocation2 + $0x80] sm:$0xff]  ;;  %v125_v4 = vld [vmem:[#allocation2 + $0x2f8] sm:$0xff] }
  0x23   :  { %10667 = vmatprep.subr.mxu1 %v84_v37  ;;  %10633 = vmatpush3.msra.mxu0 %v36_v38  ;;  %v31_v60 = vld [vmem:[#allocation2 + $0x8] sm:$0xff]  ;;  %v78_v63 = vld [vmem:[#allocation2 + $0x180] sm:$0xff]  ;;  %v163_v2 = vcombine.high %v27_v59, %v27_v59  ;;  %v157_v5 = vld [vmem:[#allocation2 + $0x3f8] sm:$0xff] }
  0x24   :  { %10668 = vmatpush3.msra.mxu1 %v68_v39  ;;  %10634 = vmatprep.subr.mxu0 %v51_v40  ;;  %v63_v61 = vld [vmem:[#allocation2 + $0x108] sm:$0xff]  ;;  %v30_v1 = vld [vmem:[#allocation2] sm:$0xff]  ;;  %v109_v6 = vld [vmem:[#allocation2 + $0x278] sm:$0xff] }
  0x25   :  { %10669 = vmatprep.subr.mxu1 %v83_v41  ;;  %10635 = vmatpush3.msra.mxu0 %v35_v42  ;;  %v62_v3 = vld [vmem:[#allocation2 + $0x100] sm:$0xff]  ;;  %v141_v7 = vld [vmem:[#allocation2 + $0x378] sm:$0xff]  ;;  %v124_v8 = vld [vmem:[#allocation2 + $0x2f0] sm:$0xff] }
  0x26   :  { %10670 = vmatpush3.msra.mxu1 %v67_v43  ;;  %10636 = vmatprep.subr.mxu0 %v50_v44  ;;  %v156_v9 = vld [vmem:[#allocation2 + $0x3f0] sm:$0xff]  ;;  %v123_v12 = vld [vmem:[#allocation2 + $0x2e8] sm:$0xff]  ;;  %v122_v16 = vld [vmem:[#allocation2 + $0x2e0] sm:$0xff] }
  0x27   :  { %10671 = vmatprep.subr.mxu1 %v82_v45  ;;  %10637 = vmatpush3.msra.mxu0 %v34_v46  ;;  %v108_v10 = vld [vmem:[#allocation2 + $0x270] sm:$0xff]  ;;  %v155_v13 = vld [vmem:[#allocation2 + $0x3e8] sm:$0xff]  ;;  %v154_v17 = vld [vmem:[#allocation2 + $0x3e0] sm:$0xff] }
  0x28   :  { %10672 = vmatpush3.msra.mxu1 %v66_v47  ;;  %10638 = vmatprep.subr.mxu0 %v49_v48  ;;  %v140_v11 = vld [vmem:[#allocation2 + $0x370] sm:$0xff]  ;;  %v107_v14 = vld [vmem:[#allocation2 + $0x268] sm:$0xff]  ;;  %v106_v18 = vld [vmem:[#allocation2 + $0x260] sm:$0xff] }
  0x29   :  { %10673 = vmatprep.subr.mxu1 %v81_v49  ;;  %10639 = vmatpush3.msra.mxu0 %v33_v50  ;;  %v139_v15 = vld [vmem:[#allocation2 + $0x368] sm:$0xff]  ;;  %v138_v19 = vld [vmem:[#allocation2 + $0x360] sm:$0xff]  ;;  %v121_v20 = vld [vmem:[#allocation2 + $0x2d8] sm:$0xff] }
  0x2a   :  { %10674 = vmatpush3.msra.mxu1 %v65_v51  ;;  %10640 = vmatprep.subr.mxu0 %v48_v52  ;;  %v153_v21 = vld [vmem:[#allocation2 + $0x3d8] sm:$0xff]  ;;  %v120_v24 = vld [vmem:[#allocation2 + $0x2d0] sm:$0xff]  ;;  %v119_v28 = vld [vmem:[#allocation2 + $0x2c8] sm:$0xff] }
  0x2b   :  { %10675 = vmatprep.subr.mxu1 %v80_v53  ;;  %10641 = vmatpush3.msra.mxu0 %v32_v54  ;;  %v105_v22 = vld [vmem:[#allocation2 + $0x258] sm:$0xff]  ;;  %v152_v25 = vld [vmem:[#allocation2 + $0x3d0] sm:$0xff]  ;;  %v151_v29 = vld [vmem:[#allocation2 + $0x3c8] sm:$0xff] }
  0x2c   :  { %10676 = vmatpush3.msra.mxu1 %v64_v55  ;;  %10642 = vmatprep.subr.mxu0 %v47_v57  ;;  %v137_v23 = vld [vmem:[#allocation2 + $0x358] sm:$0xff]  ;;  %v104_v26 = vld [vmem:[#allocation2 + $0x250] sm:$0xff]  ;;  %v103_v30 = vld [vmem:[#allocation2 + $0x248] sm:$0xff] }
  0x2d   :  { %10677 = vmatprep.subr.mxu1 %v79_v58  ;;  %10643 = vmatpush3.msra.mxu0 %v31_v60  ;;  %v136_v27 = vld [vmem:[#allocation2 + $0x350] sm:$0xff]  ;;  %v135_v31 = vld [vmem:[#allocation2 + $0x348] sm:$0xff]  ;;  %v118_v32 = vld [vmem:[#allocation2 + $0x2c0] sm:$0xff] }
  0x2e   :  { %10678 = vmatpush3.msra.mxu1 %v63_v61  ;;  %10644 = vmatprep.subr.mxu0 %v46_v62  ;;  %v150_v33 = vld [vmem:[#allocation2 + $0x3c0] sm:$0xff]  ;;  %v117_v36 = vld [vmem:[#allocation2 + $0x2b8] sm:$0xff]  ;;  %v116_v40 = vld [vmem:[#allocation2 + $0x2b0] sm:$0xff] }
  0x2f   :  { %10679 = vmatprep.subr.mxu1 %v78_v63  ;;  %10645 = vmatpush3.msra.mxu0 %v30_v1  ;;  %v102_v34 = vld [vmem:[#allocation2 + $0x240] sm:$0xff]  ;;  %v149_v37 = vld [vmem:[#allocation2 + $0x3b8] sm:$0xff]  ;;  %v148_v41 = vld [vmem:[#allocation2 + $0x3b0] sm:$0xff] }
  0x30   :  { %234 = vmatprep.mubr.f32.mxu0 %v162_v0  ;;  %10680 = vmatpush3.msra.mxu1 %v62_v3  ;;  %v134_v35 = vld [vmem:[#allocation2 + $0x340] sm:$0xff]  ;;  %v101_v38 = vld [vmem:[#allocation2 + $0x238] sm:$0xff]  ;;  %v100_v42 = vld [vmem:[#allocation2 + $0x230] sm:$0xff] }
  0x31   :  { %304 = vmatprep.mubr.f32.mxu1 %v163_v2  ;;  %235 = vmatmul.mubr.f32.vlgmr.msra.gmra.mxu0 %v26_v56  ;;  %v133_v39 = vld [vmem:[#allocation2 + $0x338] sm:$0xff]  ;;  %v132_v43 = vld [vmem:[#allocation2 + $0x330] sm:$0xff]  ;;  %v115_v44 = vld [vmem:[#allocation2 + $0x2a8] sm:$0xff] }
  0x32   :  { %305 = vmatmul.mubr.f32.vlgmr.msra.gmra.mxu1 %v27_v59  ;;  %10684 = vmatprep.subr.mxu0 %v125_v4  ;;  %v147_v45 = vld [vmem:[#allocation2 + $0x3a8] sm:$0xff]  ;;  %v114_v48 = vld [vmem:[#allocation2 + $0x2a0] sm:$0xff]  ;;  %v113_v52 = vld [vmem:[#allocation2 + $0x298] sm:$0xff] }
  0x33   :  { %10719 = vmatprep.subr.mxu1 %v157_v5  ;;  %10685 = vmatpush3.msra.mxu0 %v109_v6  ;;  %v99_v46 = vld [vmem:[#allocation2 + $0x228] sm:$0xff]  ;;  %v146_v49 = vld [vmem:[#allocation2 + $0x3a0] sm:$0xff]  ;;  %v145_v53 = vld [vmem:[#allocation2 + $0x398] sm:$0xff] }
  0x34   :  { %10720 = vmatpush3.msra.mxu1 %v141_v7  ;;  %10686 = vmatprep.subr.mxu0 %v124_v8  ;;  %v131_v47 = vld [vmem:[#allocation2 + $0x328] sm:$0xff]  ;;  %v98_v50 = vld [vmem:[#allocation2 + $0x220] sm:$0xff]  ;;  %v97_v54 = vld [vmem:[#allocation2 + $0x218] sm:$0xff] }
  0x35   :  { %10721 = vmatprep.subr.mxu1 %v156_v9  ;;  %10687 = vmatpush3.msra.mxu0 %v108_v10  ;;  %v130_v51 = vld [vmem:[#allocation2 + $0x320] sm:$0xff]  ;;  %v129_v55 = vld [vmem:[#allocation2 + $0x318] sm:$0xff]  ;;  %v112_v56 = vld [vmem:[#allocation2 + $0x290] sm:$0xff] }
  0x36   :  { %10722 = vmatpush3.msra.mxu1 %v140_v11  ;;  %10688 = vmatprep.subr.mxu0 %v123_v12  ;;  %v144_v57 = vld [vmem:[#allocation2 + $0x390] sm:$0xff]  ;;  %v111_v61 = vld [vmem:[#allocation2 + $0x288] sm:$0xff]  ;;  %v29_v63 = vld [vmem:[%s19854_s0 + $0x18] sm:$0xff] }
  0x37   :  { %10723 = vmatprep.subr.mxu1 %v155_v13  ;;  %10689 = vmatpush3.msra.mxu0 %v107_v14  ;;  %v96_v58 = vld [vmem:[#allocation2 + $0x210] sm:$0xff]  ;;  %v143_v62 = vld [vmem:[#allocation2 + $0x388] sm:$0xff]  ;;  %v110_v2 = vld [vmem:[#allocation2 + $0x280] sm:$0xff]  ;;  %v165_v6 = vcombine.high %v29_v63, %v29_v63 }
  0x38   :  { %10724 = vmatpush3.msra.mxu1 %v139_v15  ;;  %10690 = vmatprep.subr.mxu0 %v122_v16  ;;  %v128_v59 = vld [vmem:[#allocation2 + $0x310] sm:$0xff]  ;;  %v95_v0 = vld [vmem:[#allocation2 + $0x208] sm:$0xff]  ;;  %v142_v3 = vld [vmem:[#allocation2 + $0x380] sm:$0xff] }
  0x39   :  { %10725 = vmatprep.subr.mxu1 %v154_v17  ;;  %10691 = vmatpush3.msra.mxu0 %v106_v18  ;;  %v28_v60 = vld [vmem:[%s19854_s0 + $0x10] sm:$0xff]  ;;  %v127_v1 = vld [vmem:[#allocation2 + $0x308] sm:$0xff]  ;;  %v94_v5 = vld [vmem:[#allocation2 + $0x200] sm:$0xff] }
  0x3a   :  { %10726 = vmatpush3.msra.mxu1 %v138_v19  ;;  %10692 = vmatprep.subr.mxu0 %v121_v20  ;;  %v164_v4 = vcombine.high %v28_v60, %v28_v60  ;;  %v126_v7 = vld [vmem:[#allocation2 + $0x300] sm:$0xff] }
  0x3b   :  { %10727 = vmatprep.subr.mxu1 %v153_v21  ;;  %10693 = vmatpush3.msra.mxu0 %v105_v22 }
  0x3c   :  { %10728 = vmatpush3.msra.mxu1 %v137_v23  ;;  %10694 = vmatprep.subr.mxu0 %v120_v24 }
  0x3d   :  { %10729 = vmatprep.subr.mxu1 %v152_v25  ;;  %10695 = vmatpush3.msra.mxu0 %v104_v26 }
  0x3e   :  { %10730 = vmatpush3.msra.mxu1 %v136_v27  ;;  %10696 = vmatprep.subr.mxu0 %v119_v28 }
  0x3f   :  { %10731 = vmatprep.subr.mxu1 %v151_v29  ;;  %10697 = vmatpush3.msra.mxu0 %v103_v30 }
  0x40   :  { %10732 = vmatpush3.msra.mxu1 %v135_v31  ;;  %10698 = vmatprep.subr.mxu0 %v118_v32 }
  0x41   :  { %10733 = vmatprep.subr.mxu1 %v150_v33  ;;  %10699 = vmatpush3.msra.mxu0 %v102_v34 }
  0x42   :  { %10734 = vmatpush3.msra.mxu1 %v134_v35  ;;  %10700 = vmatprep.subr.mxu0 %v117_v36 }
  0x43   :  { %10735 = vmatprep.subr.mxu1 %v149_v37  ;;  %10701 = vmatpush3.msra.mxu0 %v101_v38 }
  0x44   :  { %10736 = vmatpush3.msra.mxu1 %v133_v39  ;;  %10702 = vmatprep.subr.mxu0 %v116_v40 }
  0x45   :  { %10737 = vmatprep.subr.mxu1 %v148_v41  ;;  %10703 = vmatpush3.msra.mxu0 %v100_v42 }
  0x46   :  { %10738 = vmatpush3.msra.mxu1 %v132_v43  ;;  %10704 = vmatprep.subr.mxu0 %v115_v44 }
  0x47   :  { %10739 = vmatprep.subr.mxu1 %v147_v45  ;;  %10705 = vmatpush3.msra.mxu0 %v99_v46 }
  0x48   :  { %10740 = vmatpush3.msra.mxu1 %v131_v47  ;;  %10706 = vmatprep.subr.mxu0 %v114_v48 }
  0x49   :  { %10741 = vmatprep.subr.mxu1 %v146_v49  ;;  %10707 = vmatpush3.msra.mxu0 %v98_v50 }
  0x4a   :  { %10742 = vmatpush3.msra.mxu1 %v130_v51  ;;  %10708 = vmatprep.subr.mxu0 %v113_v52 }
  0x4b   :  { %10743 = vmatprep.subr.mxu1 %v145_v53  ;;  %10709 = vmatpush3.msra.mxu0 %v97_v54 }
  0x4c   :  { %10744 = vmatpush3.msra.mxu1 %v129_v55  ;;  %10710 = vmatprep.subr.mxu0 %v112_v56 }
  0x4d   :  { %10745 = vmatprep.subr.mxu1 %v144_v57  ;;  %10711 = vmatpush3.msra.mxu0 %v96_v58 }
  0x4e   :  { %10746 = vmatpush3.msra.mxu1 %v128_v59  ;;  %10712 = vmatprep.subr.mxu0 %v111_v61 }
  0x4f   :  { %10747 = vmatprep.subr.mxu1 %v143_v62  ;;  %10713 = vmatpush3.msra.mxu0 %v95_v0 }
  0x50   :  { %10748 = vmatpush3.msra.mxu1 %v127_v1  ;;  %10714 = vmatprep.subr.mxu0 %v110_v2 }
  0x51   :  { %10749 = vmatprep.subr.mxu1 %v142_v3  ;;  %10715 = vmatpush3.msra.mxu0 %v94_v5 }
  0x52   :  { %374 = vmatprep.mubr.f32.mxu0 %v164_v4  ;;  %10750 = vmatpush3.msra.mxu1 %v126_v7 }
  0x53   :  { %444 = vmatprep.mubr.f32.mxu1 %v165_v6  ;;  %375 = vmatmul.mubr.f32.vlgmr.msra.gmra.mxu0 %v28_v60 }
  0x54   :  { %445 = vmatmul.mubr.f32.vlgmr.msra.gmra.mxu1 %v29_v63 }
  0xf1   :  { %v10646_v8 = vpop.f32.mrf.mxu0 }
  0xf2   :  { %v10681_v9 = vpop.f32.mrf.mxu1 }
  0xf3   :  { %v10647_v10 = vpop.f32.mrf.mxu0 }
  0xf4   :  { %v10682_v11 = vpop.f32.mrf.mxu1  ;;  %v10648_v12 = vadd.f32 %v10647_v10, %v10646_v8 }
  0xf5   :  { %v10683_v13 = vadd.f32 %v10682_v11, %v10681_v9 }
  0xf7   :  { %v307_v18 = vadd.f32 %v10683_v13, %v10648_v12 }
 0x113   :  { %v10716_v14 = vpop.f32.mrf.mxu0 }
 0x114   :  { %v10751_v15 = vpop.f32.mrf.mxu1 }
 0x115   :  { %v10717_v16 = vpop.f32.mrf.mxu0 }
 0x116   :  { %v10752_v17 = vpop.f32.mrf.mxu1  ;;  %v10718_v19 = vadd.f32 %v10717_v16, %v10716_v14 }
 0x117   :  { %v10753_v21 = vadd.f32 %v10752_v17, %v10751_v15 }
 0x118   :  { %v377_v20 = vadd.f32 %v10718_v19, %v307_v18 }
 0x11a   :  { %v447_v22 = vadd.f32 %v10753_v21, %v377_v20 }
 0x11c   :  { %v691_v23 = vrot.slane %v447_v22, 2  ;;  %v451_v24 = vsel %vm450_vm0, %v447_v22, 0.0 }
 0x11d   :  { %v452_v25 = vrot.slane %v451_v24, 4 }
 0x11e   :  { %v693_v26 = vsel %vm450_vm0, %v691_v23, 0.0 }
 0x11f   :  { %v453_v27 = vadd.f32 %v452_v25, %v451_v24  ;;  %v694_v28 = vrot.slane %v693_v26, 4 }
 0x121   :  { %v454_v29 = vrot.slane %v453_v27, 2  ;;  %v695_v30 = vadd.f32 %v694_v28, %v693_v26 }
 0x123   :  { %v455_v31 = vadd.f32 %v454_v29, %v453_v27  ;;  %v696_v32 = vrot.slane %v695_v30, 2 }
 0x125   :  { %v456_v33 = vrot.slane %v455_v31, 1  ;;  %v697_v34 = vadd.f32 %v696_v32, %v695_v30 }
 0x127   :  { %v457_v35 = vadd.f32 %v456_v33, %v455_v31  ;;  %v698_v36 = vrot.slane %v697_v34, 1 }
 0x129   :  { %v459_v37 = vmul.f32 0.5, %v457_v35  ;;  %v699_v38 = vadd.f32 %v698_v36, %v697_v34 }
 0x12b   :  { %v460_v39 = vsub.f32 %v447_v22, %v459_v37  ;;  %v700_v40 = vmul.f32 0.5, %v699_v38 }
 0x12d   :  { %12708 = vmatprep.subr.msk.mxu0 %vm450_vm0, %v460_v39  ;;  %v701_v41 = vsub.f32 %v447_v22, %v700_v40  ;;  %v932_v42 = vsub.f32 %v459_v37, %v700_v40  ;;  %v1139_v37 = vlaneseq }
 0x12e   :  { %12709 = vmatpush3.msk.msra.mxu0 %vm450_vm0, %v460_v39 }
 0x12f   :  { %v703_v43 = vrot.slane %v701_v41, 2  ;;  %v933_v44 = vmul.f32 %v932_v42, %v932_v42  ;;  %v16316_v42 = vand.u32 127, %v1139_v37 }
 0x131   :  { %705 = vxpose.xlu0.b32.start.end [1/1] (short) %v703_v43, 128  ;;  %12734 = vmatprep.subr.msk.mxu1 %vm450_vm0, %v703_v43  ;;  %v935_v45 = vsel %vm934_vm1, %v933_v44, 0.0 }
 0x132   :  { %12735 = vmatpush3.msk.msra.mxu1 %vm450_vm0, %v703_v43  ;;  %936 = vadd.xlane.f32.xlu1 %v935_v45 }
 0x16e   :  { %461 = vxpose.xlu0.b32.start.end [1/1] (short) %v460_v39, 128  ;;  %v16309_v39 = vshrl.u32 %v1139_v37, 7  ;;  %v19892_v37 = vmov 0 }
 0x170   :  { %v1141_v41 = vadd.s32 8, %v16309_v39  ;;  %vm16323_vm3 = vcmp.eq.s32.totalorder %v16309_v39, %v16316_v42  ;;  %v1142_v45 = vadd.s32 16, %v16309_v39 }
 0x172   :  { %vm16333_vm4 = vcmp.eq.s32.totalorder %v1141_v41, %v16316_v42  ;;  %vm16343_vm5 = vcmp.eq.s32.totalorder %v1142_v45, %v16316_v42  ;;  %v1151_v45 = vadd.s32 88, %v16309_v39 }
 0x174   :  { %vm16440_vm14 = vcmp.eq.s32.totalorder %v1151_v45, %v16316_v42 }
 0x1ad   :  { %v721_v46 = vpop.trf.xlu0 }
 0x1ae   :  { %12736 = vmatprep.mubr.msk.f32.mxu1 %vm493_vm2, %v721_v46 }
 0x1b1   :  { %v722_v47 = vpop.trf.xlu0 }
 0x1b2   :  { %12737 = vmatmul.mubr.msk.f32.vlgmr.msra.gmra.mxu1 %vm493_vm2, %v722_v47 }
 0x1b5   :  { %v723_v48 = vpop.trf.xlu0 }
 0x1b6   :  { %12739 = vmatprep.mubr.msk.f32.mxu1 %vm493_vm2, %v723_v48 }
 0x1b9   :  { %v724_v49 = vpop.trf.xlu0 }
 0x1ba   :  { %12740 = vmatmul.mubr.msk.f32.gmra.mxu1 %vm493_vm2, %v724_v49  ;;  %v1143_v49 = vadd.s32 24, %v16309_v39 }
 0x1bb   :  { %v937_v50 = vpop.xlane.xlu1 %936 }
 0x1bc   :  { %v938_v51 = vrot.slane %v937_v50, 4  ;;  %vm16354_vm6 = vcmp.eq.s32.totalorder %v1143_v49, %v16316_v42  ;;  %v19895_v49 = vmov 0 }
 0x1bd   :  { %v725_v52 = vpop.trf.xlu0 }
 0x1be   :  { %v939_v53 = vadd.f32 %v938_v51, %v937_v50  ;;  %12742 = vmatprep.mubr.msk.f32.mxu1 %vm493_vm2, %v725_v52 }
 0x1c0   :  { %v940_v54 = vrot.slane %v939_v53, 2 }
 0x1c1   :  { %v726_v55 = vpop.trf.xlu0 }
 0x1c2   :  { %12743 = vmatmul.mubr.msk.f32.gmra.mxu1 %vm493_vm2, %v726_v55  ;;  %v941_v56 = vadd.f32 %v940_v54, %v939_v53 }
 0x1c4   :  { %v942_v57 = vrot.slane %v941_v56, 1 }
 0x1c5   :  { %v727_v58 = vpop.trf.xlu0 }
 0x1c6   :  { %12745 = vmatprep.mubr.msk.f32.mxu1 %vm493_vm2, %v727_v58  ;;  %v943_v59 = vadd.f32 %v942_v57, %v941_v56 }
 0x1c8   :  { %16120 = vpush %v943_v59 }
 0x1c9   :  { %v728_v60 = vpop.trf.xlu0 }
 0x1ca   :  { %12746 = vmatmul.mubr.msk.f32.gmra.mxu1 %vm493_vm2, %v728_v60  ;;  %v1144_v60 = vadd.s32 32, %v16309_v39 }
 0x1cc   :  { %vm16372_vm7 = vcmp.eq.s32.totalorder %v1144_v60, %v16316_v42 }
 0x1cd   :  { %v729_v61 = vpop.trf.xlu0 }
 0x1ce   :  { %12748 = vmatprep.mubr.msk.f32.mxu1 %vm493_vm2, %v729_v61 }
 0x1d1   :  { %v730_v62 = vpop.trf.xlu0 }
 0x1d2   :  { %12749 = vmatmul.mubr.msk.f32.gmra.mxu1 %vm493_vm2, %v730_v62 }
 0x1d5   :  { %v731_v63 = vpop.trf.xlu0 }
 0x1d6   :  { %12751 = vmatprep.mubr.msk.f32.mxu1 %vm493_vm2, %v731_v63  ;;  %v1145_v63 = vadd.s32 40, %v16309_v39 }
 0x1d8   :  { %vm16380_vm8 = vcmp.eq.s32.totalorder %v1145_v63, %v16316_v42  ;;  %v19904_v63 = vmov 0 }
 0x1d9   :  { %v732_v0 = vpop.trf.xlu0 }
 0x1da   :  { %12752 = vmatmul.mubr.msk.f32.gmra.mxu1 %vm493_vm2, %v732_v0 }
 0x1dd   :  { %v733_v1 = vpop.trf.xlu0 }
 0x1de   :  { %12754 = vmatprep.mubr.msk.f32.mxu1 %vm493_vm2, %v733_v1 }
 0x1e1   :  { %v734_v2 = vpop.trf.xlu0 }
 0x1e2   :  { %12755 = vmatmul.mubr.msk.f32.gmra.mxu1 %vm493_vm2, %v734_v2 }
 0x1e5   :  { %v735_v3 = vpop.trf.xlu0 }
 0x1e6   :  { %12757 = vmatprep.mubr.msk.f32.mxu1 %vm493_vm2, %v735_v3 }
 0x1e9   :  { %v736_v4 = vpop.trf.xlu0 }
 0x1ea   :  { %12758 = vmatmul.mubr.msk.f32.gmra.mxu1 %vm493_vm2, %v736_v4 }
 0x1ed   :  { %v477_v5 = vpop.trf.xlu0 }
 0x1ee   :  { %12710 = vmatprep.mubr.msk.f32.mxu0 %vm493_vm2, %v477_v5 }
 0x1f1   :  { %v478_v6 = vpop.trf.xlu0 }
 0x1f2   :  { %12711 = vmatmul.mubr.msk.f32.vlgmr.msra.gmra.mxu0 %vm493_vm2, %v478_v6 }
 0x1f5   :  { %v479_v7 = vpop.trf.xlu0 }
 0x1f6   :  { %12713 = vmatprep.mubr.msk.f32.mxu0 %vm493_vm2, %v479_v7 }
 0x1f9   :  { %v480_v8 = vpop.trf.xlu0  ;;  %s16536_s0 = spop %16120 }
 0x1fa   :  { %12714 = vmatmul.mubr.msk.f32.gmra.mxu0 %vm493_vm2, %v480_v8  ;;  %v1146_v8 = vadd.s32 48, %v16309_v39 }
 0x1fc   :  { %vm16398_vm9 = vcmp.eq.s32.totalorder %v1146_v8, %v16316_v42 }
 0x1fd   :  { %v481_v9 = vpop.trf.xlu0 }
 0x1fe   :  { %12716 = vmatprep.mubr.msk.f32.mxu0 %vm493_vm2, %v481_v9 }
 0x201   :  { %v482_v10 = vpop.trf.xlu0 }
 0x202   :  { %12717 = vmatmul.mubr.msk.f32.gmra.mxu0 %vm493_vm2, %v482_v10 }
 0x205   :  { %v483_v11 = vpop.trf.xlu0 }
 0x206   :  { %12719 = vmatprep.mubr.msk.f32.mxu0 %vm493_vm2, %v483_v11  ;;  %v1147_v11 = vadd.s32 56, %v16309_v39 }
 0x208   :  { %vm16404_vm10 = vcmp.eq.s32.totalorder %v1147_v11, %v16316_v42  ;;  %v19910_v11 = vmov 0 }
 0x209   :  { %v484_v12 = vpop.trf.xlu0 }
 0x20a   :  { %12720 = vmatmul.mubr.msk.f32.gmra.mxu0 %vm493_vm2, %v484_v12 }
 0x20d   :  { %v485_v13 = vpop.trf.xlu0 }
 0x20e   :  { %12722 = vmatprep.mubr.msk.f32.mxu0 %vm493_vm2, %v485_v13 }
 0x211   :  { %v486_v14 = vpop.trf.xlu0 }
 0x212   :  { %12723 = vmatmul.mubr.msk.f32.gmra.mxu0 %vm493_vm2, %v486_v14 }
 0x215   :  { %v487_v15 = vpop.trf.xlu0 }
 0x216   :  { %12725 = vmatprep.mubr.msk.f32.mxu0 %vm493_vm2, %v487_v15 }
 0x219   :  { %v488_v16 = vpop.trf.xlu0 }
 0x21a   :  { %12726 = vmatmul.mubr.msk.f32.gmra.mxu0 %vm493_vm2, %v488_v16 }
 0x21d   :  { %v489_v17 = vpop.trf.xlu0 }
 0x21e   :  { %12728 = vmatprep.mubr.msk.f32.mxu0 %vm493_vm2, %v489_v17  ;;  %v19886_v17 = vmov 0 }
 0x21f   :  { %v19887_v17 = vsel %vm16404_vm10, 4294967295, %v19886_v17 }
 0x220   :  { %19888 = vst [vmem:[#allocation8_spill] sm:$0xff] %v19887_v17 }
 0x221   :  { %v490_v18 = vpop.trf.xlu0 }
 0x222   :  { %12729 = vmatmul.mubr.msk.f32.gmra.mxu0 %vm493_vm2, %v490_v18 }
 0x225   :  { %v491_v19 = vpop.trf.xlu0 }
 0x226   :  { %12731 = vmatprep.mubr.msk.f32.mxu0 %vm493_vm2, %v491_v19 }
 0x229   :  { %v492_v20 = vpop.trf.xlu0 }
 0x22a   :  { %12732 = vmatmul.mubr.msk.f32.gmra.mxu0 %vm493_vm2, %v492_v20  ;;  %v1148_v20 = vadd.s32 64, %v16309_v39 }
 0x22c   :  { %vm16416_vm11 = vcmp.eq.s32.totalorder %v1148_v20, %v16316_v42 }
 0x272   :  { %v16268_v21 = vpop.f32.mrf.mxu1 }
 0x274   :  { %v16270_v22 = vpop.f32.mrf.mxu1 }
 0x27a   :  { %v16272_v23 = vpop.f32.mrf.mxu1 }
 0x27c   :  { %v16274_v24 = vpop.f32.mrf.mxu1 }
 0x282   :  { %v16276_v25 = vpop.f32.mrf.mxu1 }
 0x284   :  { %v16278_v26 = vpop.f32.mrf.mxu1 }
 0x28a   :  { %v16280_v27 = vpop.f32.mrf.mxu1 }
 0x28c   :  { %v16282_v28 = vpop.f32.mrf.mxu1 }
 0x292   :  { %v16284_v29 = vpop.f32.mrf.mxu1 }
 0x294   :  { %v16286_v30 = vpop.f32.mrf.mxu1 }
 0x29a   :  { %v16288_v31 = vpop.f32.mrf.mxu1 }
 0x29c   :  { %v16290_v32 = vpop.f32.mrf.mxu1 }
 0x2a2   :  { %v16292_v33 = vpop.f32.mrf.mxu1 }
 0x2a4   :  { %v16294_v34 = vpop.f32.mrf.mxu1 }
 0x2aa   :  { %v16296_v35 = vpop.f32.mrf.mxu1 }
 0x2ab   :  { %12760 = vmatprep.subr.mxu0 %v16296_v35 }
 0x2ac   :  { %v16299_v36 = vpop.f32.mrf.mxu1  ;;  %12761 = vmatpush3.msra.mxu0 %v16296_v35 }
 0x2ad   :  { %12762 = vmatprep.subr.mxu0 %v16299_v36 }
 0x2ae   :  { %12763 = vmatpush3.msra.mxu0 %v16299_v36 }
 0x2af   :  { %12764 = vmatprep.subr.mxu0 %v16292_v33 }
 0x2b0   :  { %12765 = vmatpush3.msra.mxu0 %v16292_v33 }
 0x2b1   :  { %12766 = vmatprep.subr.mxu0 %v16294_v34 }
 0x2b2   :  { %v16307_v38 = vpop.f32.mrf.mxu0  ;;  %12767 = vmatpush3.msra.mxu0 %v16294_v34 }
 0x2b3   :  { %12768 = vmatprep.subr.mxu0 %v16288_v31  ;;  %v1207_v46 = vadd.f32 %v16268_v21, %v16307_v38 }
 0x2b4   :  { %v611_v40 = vpop.f32.mrf.mxu0  ;;  %12769 = vmatpush3.msra.mxu0 %v16288_v31 }
 0x2b5   :  { %12770 = vmatprep.subr.mxu0 %v16290_v32  ;;  %12792 = vmatprep.mubr.f32.mxu0 %v611_v40  ;;  %v1206_v43 = vadd.f32 %v16270_v22, %v611_v40  ;;  %v1223_v53 = vsel %vm16333_vm4, %v1207_v46, 0.0  ;;  %v1150_v40 = vadd.s32 80, %v16309_v39 }
 0x2b6   :  { %12771 = vmatpush3.msra.mxu0 %v16290_v32 }
 0x2b7   :  { %12772 = vmatprep.subr.mxu0 %v16284_v29  ;;  %v1222_v50 = vsel %vm16323_vm3, %v1206_v43, 0.0  ;;  %vm16434_vm13 = vcmp.eq.s32.totalorder %v1150_v40, %v16316_v42 }
 0x2b8   :  { %12773 = vmatpush3.msra.mxu0 %v16284_v29  ;;  %v1238_v56 = vadd.f32 %v1223_v53, %v1222_v50  ;;  %v19896_v49 = vsel %vm16434_vm13, 4294967295, %v19895_v49 }
 0x2b9   :  { %12774 = vmatprep.subr.mxu0 %v16286_v30  ;;  %19897 = vst [vmem:[#allocation11_spill] sm:$0xff] %v19896_v49 }
 0x2ba   :  { %v12715_v48 = vpop.f32.mrf.mxu0  ;;  %12775 = vmatpush3.msra.mxu0 %v16286_v30 }
 0x2bb   :  { %12776 = vmatprep.subr.mxu0 %v16280_v27  ;;  %v1209_v54 = vadd.f32 %v16272_v23, %v12715_v48 }
 0x2bc   :  { %v621_v51 = vpop.f32.mrf.mxu0  ;;  %12777 = vmatpush3.msra.mxu0 %v16280_v27 }
 0x2bd   :  { %v1208_v55 = vadd.f32 %v16274_v24, %v621_v51  ;;  %12778 = vmatprep.subr.mxu0 %v16282_v28  ;;  %v1225_v61 = vsel %vm16354_vm6, %v1209_v54, 0.0  ;;  %v1152_v54 = vadd.s32 96, %v16309_v39 }
 0x2be   :  { %12779 = vmatpush3.msra.mxu0 %v16282_v28 }
 0x2bf   :  { %v1224_v58 = vsel %vm16343_vm5, %v1208_v55, 0.0  ;;  %12780 = vmatprep.subr.mxu0 %v16276_v25  ;;  %vm16452_vm15 = vcmp.eq.s32.totalorder %v1152_v54, %v16316_v42 }
 0x2c0   :  { %v1239_v59 = vadd.f32 %v1238_v56, %v1224_v58  ;;  %12781 = vmatpush3.msra.mxu0 %v16276_v25  ;;  %v1153_v58 = vadd.s32 104, %v16309_v39 }
 0x2c1   :  { %12782 = vmatprep.subr.mxu0 %v16278_v26 }
 0x2c2   :  { %v12718_v62 = vpop.f32.mrf.mxu0  ;;  %12783 = vmatpush3.msra.mxu0 %v16278_v26  ;;  %v1240_v0 = vadd.f32 %v1239_v59, %v1225_v61  ;;  %v19901_v61 = vmov 0  ;;  %vm16458_vm0 = vcmp.eq.s32.totalorder %v1153_v58, %v16316_v42 }
 0x2c3   :  { %v1211_v1 = vadd.f32 %v16276_v25, %v12718_v62  ;;  %12784 = vmatprep.subr.mxu0 %v16272_v23  ;;  %v19902_v61 = vsel %vm16452_vm15, 4294967295, %v19901_v61  ;;  %v19905_v63 = vsel %vm16458_vm0, 4294967295, %v19904_v63 }
 0x2c4   :  { %v631_v2 = vpop.f32.mrf.mxu0  ;;  %12785 = vmatpush3.msra.mxu0 %v16272_v23  ;;  %v1149_v23 = vadd.s32 72, %v16309_v39  ;;  %19903 = vst [vmem:[#allocation13_spill] sm:$0xff] %v19902_v61  ;;  %19906 = vst [vmem:[#allocation14_spill] sm:$0xff] %v19905_v63 }
 0x2c5   :  { %v1210_v4 = vadd.f32 %v16278_v26, %v631_v2  ;;  %12786 = vmatprep.subr.mxu0 %v16274_v24  ;;  %v1227_v9 = vsel %vm16380_vm8, %v1211_v1, 0.0 }
 0x2c6   :  { %12787 = vmatpush3.msra.mxu0 %v16274_v24  ;;  %vm16422_vm12 = vcmp.eq.s32.totalorder %v1149_v23, %v16316_v42 }
 0x2c7   :  { %v1226_v6 = vsel %vm16372_vm7, %v1210_v4, 0.0  ;;  %12788 = vmatprep.subr.mxu0 %v16268_v21  ;;  %v19893_v37 = vsel %vm16422_vm12, 4294967295, %v19892_v37 }
 0x2c8   :  { %v1241_v7 = vadd.f32 %v1240_v0, %v1226_v6  ;;  %12789 = vmatpush3.msra.mxu0 %v16268_v21  ;;  %19894 = vst [vmem:[#allocation10_spill] sm:$0xff] %v19893_v37  ;;  %v1155_v6 = vadd.s32 120, %v16309_v39 }
 0x2c9   :  { %12790 = vmatprep.subr.mxu0 %v16270_v22 }
 0x2ca   :  { %v12721_v10 = vpop.f32.mrf.mxu0  ;;  %12791 = vmatpush3.msra.mxu0 %v16270_v22  ;;  %v1242_v12 = vadd.f32 %v1241_v7, %v1227_v9  ;;  %v19907_v9 = vmov 0  ;;  %vm16476_vm2 = vcmp.eq.s32.totalorder %v1155_v6, %v16316_v42 }
 0x2cb   :  { %v1213_v13 = vadd.f32 %v16280_v27, %v12721_v10  ;;  %12793 = vmatmul.mubr.f32.vlgmr.msra.gmra.mxu0 %v16307_v38  ;;  %v19889_v27 = vmov 0  ;;  %v19911_v11 = vsel %vm16476_vm2, 4294967295, %v19910_v11 }
 0x2cc   :  { %v641_v14 = vpop.f32.mrf.mxu0  ;;  %12795 = vmatprep.mubr.f32.mxu0 %v621_v51  ;;  %v19890_v27 = vsel %vm16416_vm11, 4294967295, %v19889_v27  ;;  %v19898_v51 = vmov 0  ;;  %19912 = vst [vmem:[#allocation16_spill] sm:$0xff] %v19911_v11 }
 0x2cd   :  { %v1212_v16 = vadd.f32 %v16282_v28, %v641_v14  ;;  %v1229_v21 = vsel %vm16404_vm10, %v1213_v13, 0.0  ;;  %19891 = vst [vmem:[#allocation9_spill] sm:$0xff] %v19890_v27  ;;  %v19899_v51 = vsel %vm16440_vm14, 4294967295, %v19898_v51 }
 0x2ce   :  { %19900 = vst [vmem:[#allocation12_spill] sm:$0xff] %v19899_v51 }
 0x2cf   :  { %v1228_v18 = vsel %vm16398_vm9, %v1212_v16, 0.0  ;;  %12796 = vmatmul.mubr.f32.gmra.mxu0 %v12715_v48 }
 0x2d0   :  { %v1243_v19 = vadd.f32 %v1242_v12, %v1228_v18  ;;  %12798 = vmatprep.mubr.f32.mxu0 %v631_v2 }
 0x2d2   :  { %v12724_v22 = vpop.f32.mrf.mxu0  ;;  %v1244_v24 = vadd.f32 %v1243_v19, %v1229_v21 }
 0x2d3   :  { %v1215_v25 = vadd.f32 %v16284_v29, %v12724_v22  ;;  %12799 = vmatmul.mubr.f32.gmra.mxu0 %v12718_v62 }
 0x2d4   :  { %v651_v26 = vpop.f32.mrf.mxu0  ;;  %12801 = vmatprep.mubr.f32.mxu0 %v641_v14 }
 0x2d5   :  { %v1214_v28 = vadd.f32 %v16286_v30, %v651_v26  ;;  %v1231_v41 = vsel %vm16422_vm12, %v1215_v25, 0.0 }
 0x2d7   :  { %v1230_v38 = vsel %vm16416_vm11, %v1214_v28, 0.0  ;;  %12802 = vmatmul.mubr.f32.gmra.mxu0 %v12721_v10 }
 0x2d8   :  { %v1245_v29 = vadd.f32 %v1244_v24, %v1230_v38  ;;  %12804 = vmatprep.mubr.f32.mxu0 %v651_v26 }
 0x2da   :  { %v12727_v43 = vpop.f32.mrf.mxu0  ;;  %v1246_v30 = vadd.f32 %v1245_v29, %v1231_v41 }
 0x2db   :  { %v1217_v46 = vadd.f32 %v16288_v31, %v12727_v43  ;;  %12805 = vmatmul.mubr.f32.gmra.mxu0 %v12724_v22 }
 0x2dc   :  { %v661_v48 = vpop.f32.mrf.mxu0 }
 0x2dd   :  { %v1216_v50 = vadd.f32 %v16290_v32, %v661_v48  ;;  %12807 = vmatprep.mubr.f32.mxu0 %v661_v48  ;;  %v1233_v55 = vsel %vm16440_vm14, %v1217_v46, 0.0 }
 0x2df   :  { %v1232_v53 = vsel %vm16434_vm13, %v1216_v50, 0.0  ;;  %12808 = vmatmul.mubr.f32.gmra.mxu0 %v12727_v43 }
 0x2e0   :  { %v1247_v31 = vadd.f32 %v1246_v30, %v1232_v53 }
 0x2e2   :  { %v12730_v56 = vpop.f32.mrf.mxu0  ;;  %v1248_v32 = vadd.f32 %v1247_v31, %v1233_v55 }
 0x2e3   :  { %v1219_v59 = vadd.f32 %v16292_v33, %v12730_v56  ;;  %v1154_v33 = vadd.s32 112, %v16309_v39 }
 0x2e4   :  { %v671_v60 = vpop.f32.mrf.mxu0 }
 0x2e5   :  { %v1218_v62 = vadd.f32 %v16294_v34, %v671_v60  ;;  %12810 = vmatprep.mubr.f32.mxu0 %v671_v60  ;;  %v1235_v2 = vsel %vm16458_vm0, %v1219_v59, 0.0  ;;  %vm16470_vm1 = vcmp.eq.s32.totalorder %v1154_v33, %v16316_v42 }
 0x2e6   :  { %12811 = vmatmul.mubr.f32.gmra.mxu0 %v12730_v56  ;;  %v19908_v9 = vsel %vm16470_vm1, 4294967295, %v19907_v9 }
 0x2e7   :  { %v1234_v0 = vsel %vm16452_vm15, %v1218_v62, 0.0  ;;  %19909 = vst [vmem:[#allocation15_spill] sm:$0xff] %v19908_v9 }
 0x2e8   :  { %v1249_v1 = vadd.f32 %v1248_v32, %v1234_v0 }
 0x2ea   :  { %v12733_v4 = vpop.f32.mrf.mxu0  ;;  %v1250_v34 = vadd.f32 %v1249_v1, %v1235_v2 }
 0x2eb   :  { %v1221_v7 = vadd.f32 %v16296_v35, %v12733_v4 }
 0x2ec   :  { %v681_v8 = vpop.f32.mrf.mxu0 }
 0x2ed   :  { %v1220_v10 = vadd.f32 %v16299_v36, %v681_v8  ;;  %12813 = vmatprep.mubr.f32.mxu0 %v681_v8  ;;  %v1237_v35 = vsel %vm16476_vm2, %v1221_v7, 0.0 }
 0x2ee   :  { %12814 = vmatmul.mubr.f32.gmra.mxu0 %v12733_v4 }
 0x2ef   :  { %v1236_v39 = vsel %vm16470_vm1, %v1220_v10, 0.0 }
 0x2f0   :  { %v1251_v12 = vadd.f32 %v1250_v34, %v1236_v39 }
 0x2f2   :  { %v1252_v13 = vadd.f32 %v1251_v12, %v1237_v35 }
 0x38b   :  { %v16484_v14 = vpop.f32.mrf.mxu0 }
 0x38c   :  { %v1091_v42 = vmul.f32 %v16484_v14, %v16484_v14 }
 0x38d   :  { %v16486_v16 = vpop.f32.mrf.mxu0 }
 0x38e   :  { %v1090_v36 = vmul.f32 %v16486_v16, %v16486_v16 }
 0x38f   :  { %v16490_v18 = vpop.f32.mrf.mxu0 }
 0x390   :  { %v1106_v20 = vadd.f32 %v1091_v42, %v1090_v36  ;;  %v1093_v23 = vmul.f32 %v16490_v18, %v16490_v18 }
 0x391   :  { %v16494_v19 = vpop.f32.mrf.mxu0 }
 0x392   :  { %v1092_v21 = vmul.f32 %v16494_v19, %v16494_v19 }
 0x393   :  { %v16498_v22 = vpop.f32.mrf.mxu0 }
 0x394   :  { %v1107_v24 = vadd.f32 %v1106_v20, %v1092_v21  ;;  %v1095_v29 = vmul.f32 %v16498_v22, %v16498_v22 }
 0x395   :  { %v16502_v25 = vpop.f32.mrf.mxu0 }
 0x396   :  { %v1094_v26 = vmul.f32 %v16502_v25, %v16502_v25  ;;  %v1108_v28 = vadd.f32 %v1107_v24, %v1093_v23 }
 0x397   :  { %v16506_v38 = vpop.f32.mrf.mxu0 }
 0x398   :  { %v1109_v40 = vadd.f32 %v1108_v28, %v1094_v26  ;;  %v1097_v46 = vmul.f32 %v16506_v38, %v16506_v38 }
 0x399   :  { %v16510_v41 = vpop.f32.mrf.mxu0 }
 0x39a   :  { %v1096_v43 = vmul.f32 %v16510_v41, %v16510_v41  ;;  %v1110_v45 = vadd.f32 %v1109_v40, %v1095_v29 }
 0x39b   :  { %v16514_v30 = vpop.f32.mrf.mxu0 }
 0x39c   :  { %v1111_v48 = vadd.f32 %v1110_v45, %v1096_v43  ;;  %v1099_v56 = vmul.f32 %v16514_v30, %v16514_v30 }
 0x39d   :  { %v16518_v50 = vpop.f32.mrf.mxu0 }
 0x39e   :  { %v1098_v53 = vmul.f32 %v16518_v50, %v16518_v50  ;;  %v1112_v31 = vadd.f32 %v1111_v48, %v1097_v46 }
 0x39f   :  { %v16522_v54 = vpop.f32.mrf.mxu0 }
 0x3a0   :  { %v1113_v55 = vadd.f32 %v1112_v31, %v1098_v53  ;;  %v1101_v1 = vmul.f32 %v16522_v54, %v16522_v54 }
 0x3a1   :  { %v16526_v58 = vpop.f32.mrf.mxu0 }
 0x3a2   :  { %v1100_v32 = vmul.f32 %v16526_v58, %v16526_v58  ;;  %v1114_v59 = vadd.f32 %v1113_v55, %v1099_v56 }
 0x3a4   :  { %v1115_v62 = vadd.f32 %v1114_v59, %v1100_v32  ;;  %v16197_v59 = vmov 1.0  }
 0x3a5   :  { %12848 = vmatprep.mubr.msk.f32.mxu1 %vm16323_vm3, %v16197_v59 }
 0x3a6   :  { %v12812_v60 = vpop.f32.mrf.mxu0  ;;  %v1116_v2 = vadd.f32 %v1115_v62, %v1101_v1 }
 0x3a7   :  { %v1103_v34 = vmul.f32 %v12812_v60, %v12812_v60 }
 0x3a8   :  { %v16530_v0 = vpop.f32.mrf.mxu0 }
 0x3a9   :  { %v1102_v33 = vmul.f32 %v16530_v0, %v16530_v0 }
 0x3ab   :  { %v1117_v4 = vadd.f32 %v1116_v2, %v1102_v33 }
 0x3ad   :  { %v1118_v10 = vadd.f32 %v1117_v4, %v1103_v34 }
 0x3ae   :  { %v12815_v6 = vpop.f32.mrf.mxu0 }
 0x3af   :  { %v1105_v39 = vmul.f32 %v12815_v6, %v12815_v6 }
 0x3b0   :  { %v1081_v7 = vpop.f32.mrf.mxu0 }
 0x3b1   :  { %v1104_v8 = vmul.f32 %v1081_v7, %v1081_v7 }
 0x3b3   :  { %v1119_v12 = vadd.f32 %v1118_v10, %v1104_v8 }
 0x3b5   :  { %v1120_v35 = vadd.f32 %v1119_v12, %v1105_v39 }
 0x3b7   :  { %1121 = vadd.xlane.f32.xlu1 %v1120_v35 }
 0x3bb   :  { %1253 = vadd.xlane.f32.xlu1 %v1252_v13 }
 0x440   :  { %v1122_v36 = vpop.xlane.xlu1 %1121 }
 0x441   :  { %v1123_v42 = vrot.slane %v1122_v36, 4 }
 0x443   :  { %v1124_v20 = vadd.f32 %v1123_v42, %v1122_v36 }
 0x444   :  { %v1254_v28 = vpop.xlane.xlu1 %1253 }
 0x445   :  { %v1125_v21 = vrot.slane %v1124_v20, 2  ;;  %v1255_v29 = vrot.slane %v1254_v28, 4 }
 0x447   :  { %v1126_v23 = vadd.f32 %v1125_v21, %v1124_v20  ;;  %v1256_v43 = vadd.f32 %v1255_v29, %v1254_v28 }
 0x449   :  { %v1127_v24 = vrot.slane %v1126_v23, 1  ;;  %v1257_v45 = vrot.slane %v1256_v43, 2 }
 0x44b   :  { %v1128_v26 = vadd.f32 %v1127_v24, %v1126_v23  ;;  %v1258_v46 = vadd.f32 %v1257_v45, %v1256_v43 }
 0x44d   :  { %16122 = vpush %v1128_v26  ;;  %v1259_v13 = vrot.slane %v1258_v46, 1 }
 0x44f   :  { %v1260_v32 = vadd.f32 %v1259_v13, %v1258_v46 }
 0x47e   :  { %s16123_s23 = spop %16122 }
 0x47f   :  { %v1130_v40 = vstv %s16123_s23 }
 0x480   :  { %16144 = vrsqrt.f32 %v1130_v40  ;;  %vm1133_vm11 = vcmp.eq.f32.partialorder %v1130_v40, inf  ;;  %v1136_v31 = vand.u32 2147483648, %v1130_v40  ;;  %vm1135_vm12 = vcmp.eq.f32.partialorder %v1130_v40, 0.0 }
 0x48d   :  { %v16145_v48 = vpop.eup %16144 }
 0x48e   :  { %v1132_v53 = vmul.f32 %v16145_v48, %v1130_v40 }
 0x490   :  { %v1134_v55 = vsel %vm1133_vm11, %v1130_v40, %v1132_v53  ;;  %vm19914_vm11 = vnez %v19893_v37 }
 0x491   :  { %v1137_v56 = vsel %vm1135_vm12, %v1136_v31, %v1134_v55  ;;  %vm19915_vm12 = vnez %v19890_v27 }
 0x492   :  { %16124 = vpush %v1137_v56 }
 0x493   :  { %16126 = vpush %v1260_v32 }
 0x4c3   :  { %s16125_s24 = spop %16124 }
 0x4c4   :  { %v16541_v62 = vstv %s16125_s24  ;;  %s16544_s25 = spop %16126 }
 0x4c5   :  { %19913 = vst [vmem:[#allocation17_spill] sm:$0xff] %v16541_v62  ;;  %16146 = vrcp.f32 %v16541_v62  ;;  %s10517_s30 = sadd.f32 %s16544_s25, %s16536_s0 }
 0x4d2   :  { %v16147_v1 = vpop.eup %16146 }
 0x4d3   :  { %16128 = vpush %v16147_v1 }
 0x504   :  { %s16129_s26 = spop %16128 }
 0x505   :  { %v1265_v33 = vstv %s16129_s26 }
 0x506   :  { %v16546_v2 = vmul.f32 %v12815_v6, %v1265_v33  ;;  %v1266_v4 = vmul.f32 %v1265_v33, %v16486_v16  ;;  %v16550_v34 = vmul.f32 %v1265_v33, %v1081_v7  ;;  %v16554_v8 = vmul.f32 %v12812_v60, %v1265_v33 }
 0x507   :  { %v16559_v6 = vmul.f32 %v1265_v33, %v16530_v0  ;;  %v16564_v16 = vmul.f32 %v16522_v54, %v1265_v33  ;;  %v16569_v60 = vmul.f32 %v1265_v33, %v16526_v58  ;;  %v16574_v0 = vmul.f32 %v16514_v30, %v1265_v33 }
 0x508   :  { %12816 = vmatprep.subr.mxu1 %v16546_v2  ;;  %12904 = vmatprep.mubr.f32.mxu0 %v1266_v4  ;;  %v16579_v54 = vmul.f32 %v1265_v33, %v16518_v50  ;;  %v16584_v58 = vmul.f32 %v16506_v38, %v1265_v33  ;;  %v16589_v30 = vmul.f32 %v1265_v33, %v16510_v41 }
 0x509   :  { %12817 = vmatpush3.msra.mxu1 %v16546_v2  ;;  %v16594_v50 = vmul.f32 %v16498_v22, %v1265_v33  ;;  %v16599_v38 = vmul.f32 %v1265_v33, %v16502_v25  ;;  %v16604_v41 = vmul.f32 %v16490_v18, %v1265_v33  ;;  %v16609_v22 = vmul.f32 %v1265_v33, %v16494_v19 }
 0x50a   :  { %12818 = vmatprep.subr.mxu1 %v16550_v34  ;;  %v16614_v25 = vmul.f32 %v16484_v14, %v1265_v33  ;;  %v16198_v14 = vmov 0.0  }
 0x50b   :  { %12819 = vmatpush3.msra.mxu1 %v16550_v34  ;;  %v1174_v18 = vsel %vm16323_vm3, 1.0, %v16198_v14  ;;  %v1175_v19 = vsel %vm16333_vm4, 1.0, %v16198_v14  ;;  %v1176_v12 = vsel %vm16343_vm5, 1.0, %v16198_v14  ;;  %v1177_v42 = vsel %vm16354_vm6, 1.0, %v16198_v14 }
 0x50c   :  { %12820 = vmatprep.subr.mxu1 %v16554_v8  ;;  %v16766_v10 = vmul.f32 1.5, %v1174_v18  ;;  %v16768_v39 = vmul.f32 1.5, %v1175_v19  ;;  %v16776_v23 = vmul.f32 1.5, %v1176_v12  ;;  %v16781_v26 = vmul.f32 1.5, %v1177_v42 }
 0x50d   :  { %12821 = vmatpush3.msra.mxu1 %v16554_v8  ;;  %v1178_v28 = vsel %vm16372_vm7, 1.0, %v16198_v14  ;;  %v1179_v45 = vsel %vm16380_vm8, 1.0, %v16198_v14  ;;  %v1180_v55 = vsel %vm16398_vm9, 1.0, %v16198_v14  ;;  %v1181_v1 = vsel %vm16404_vm10, 1.0, %v16198_v14 }
 0x50e   :  { %12822 = vmatprep.subr.mxu1 %v16559_v6  ;;  %v16794_v13 = vmul.f32 1.5, %v1178_v28  ;;  %v16799_v31 = vmul.f32 1.5, %v1179_v45  ;;  %v16812_v18 = vmul.f32 1.5, %v1180_v55  ;;  %v1182_v12 = vsel %vm19915_vm12, 1.0, %v16198_v14 }
 0x50f   :  { %12823 = vmatpush3.msra.mxu1 %v16559_v6 }
 0x510   :  { %12824 = vmatprep.subr.mxu1 %v16564_v16 }
 0x511   :  { %12825 = vmatpush3.msra.mxu1 %v16564_v16 }
 0x512   :  { %12826 = vmatprep.subr.mxu1 %v16569_v60 }
 0x513   :  { %12827 = vmatpush3.msra.mxu1 %v16569_v60 }
 0x514   :  { %12828 = vmatprep.subr.mxu1 %v16574_v0 }
 0x515   :  { %12829 = vmatpush3.msra.mxu1 %v16574_v0 }
 0x516   :  { %12830 = vmatprep.subr.mxu1 %v16579_v54 }
 0x517   :  { %12831 = vmatpush3.msra.mxu1 %v16579_v54 }
 0x518   :  { %12832 = vmatprep.subr.mxu1 %v16584_v58 }
 0x519   :  { %12833 = vmatpush3.msra.mxu1 %v16584_v58 }
 0x51a   :  { %12834 = vmatprep.subr.mxu1 %v16589_v30 }
 0x51b   :  { %12835 = vmatpush3.msra.mxu1 %v16589_v30 }
 0x51c   :  { %12836 = vmatprep.subr.mxu1 %v16594_v50 }
 0x51d   :  { %12837 = vmatpush3.msra.mxu1 %v16594_v50 }
 0x51e   :  { %12838 = vmatprep.subr.mxu1 %v16599_v38 }
 0x51f   :  { %12839 = vmatpush3.msra.mxu1 %v16599_v38 }
 0x520   :  { %12840 = vmatprep.subr.mxu1 %v16604_v41 }
 0x521   :  { %12841 = vmatpush3.msra.mxu1 %v16604_v41 }
 0x522   :  { %12842 = vmatprep.subr.mxu1 %v16609_v22 }
 0x523   :  { %12843 = vmatpush3.msra.mxu1 %v16609_v22 }
 0x524   :  { %12844 = vmatprep.subr.mxu1 %v16614_v25 }
 0x525   :  { %12845 = vmatpush3.msra.mxu1 %v16614_v25 }
 0x526   :  { %12846 = vmatprep.subr.mxu1 %v1266_v4 }
 0x527   :  { %12847 = vmatpush3.msra.mxu1 %v1266_v4 }
 0x528   :  { %12849 = vmatmul.mubr.msk.f32.vlgmr.msra.gmra.mxu1 %vm16333_vm4, %v16197_v59  ;;  %12928 = vmatprep.subr.msk.mxu1 %vm16476_vm2, %v16197_v59 }
 0x529   :  { %12851 = vmatprep.mubr.msk.f32.mxu1 %vm16343_vm5, %v16197_v59  ;;  %12929 = vmatpush3.msk.msra.mxu1 %vm16476_vm2, %v16197_v59 }
 0x52a   :  { %12930 = vmatprep.subr.msk.mxu1 %vm16470_vm1, %v16197_v59 }
 0x52b   :  { %12931 = vmatpush3.msk.msra.mxu1 %vm16470_vm1, %v16197_v59 }
 0x52c   :  { %12852 = vmatmul.mubr.msk.f32.gmra.mxu1 %vm16354_vm6, %v16197_v59  ;;  %12932 = vmatprep.subr.msk.mxu1 %vm16458_vm0, %v16197_v59 }
 0x52d   :  { %12854 = vmatprep.mubr.msk.f32.mxu1 %vm16372_vm7, %v16197_v59  ;;  %12933 = vmatpush3.msk.msra.mxu1 %vm16458_vm0, %v16197_v59 }
 0x52e   :  { %12934 = vmatprep.subr.msk.mxu1 %vm16452_vm15, %v16197_v59 }
 0x52f   :  { %12935 = vmatpush3.msk.msra.mxu1 %vm16452_vm15, %v16197_v59 }
 0x530   :  { %12855 = vmatmul.mubr.msk.f32.gmra.mxu1 %vm16380_vm8, %v16197_v59  ;;  %12936 = vmatprep.subr.msk.mxu1 %vm16440_vm14, %v16197_v59 }
 0x531   :  { %12857 = vmatprep.mubr.msk.f32.mxu1 %vm16398_vm9, %v16197_v59  ;;  %12937 = vmatpush3.msk.msra.mxu1 %vm16440_vm14, %v16197_v59 }
 0x532   :  { %12938 = vmatprep.subr.msk.mxu1 %vm16434_vm13, %v16197_v59 }
 0x533   :  { %12939 = vmatpush3.msk.msra.mxu1 %vm16434_vm13, %v16197_v59 }
 0x534   :  { %12858 = vmatmul.mubr.msk.f32.gmra.mxu1 %vm16404_vm10, %v16197_v59  ;;  %12940 = vmatprep.subr.msk.mxu1 %vm19914_vm11, %v16197_v59 }
 0x535   :  { %12860 = vmatprep.mubr.msk.f32.mxu1 %vm19915_vm12, %v16197_v59  ;;  %12941 = vmatpush3.msk.msra.mxu1 %vm19914_vm11, %v16197_v59 }
 0x536   :  { %12942 = vmatprep.subr.msk.mxu1 %vm19915_vm12, %v16197_v59 }
 0x537   :  { %12943 = vmatpush3.msk.msra.mxu1 %vm19915_vm12, %v16197_v59 }
 0x538   :  { %12861 = vmatmul.mubr.msk.f32.gmra.mxu1 %vm19914_vm11, %v16197_v59  ;;  %12944 = vmatprep.subr.msk.mxu1 %vm16404_vm10, %v16197_v59 }
 0x539   :  { %12863 = vmatprep.mubr.msk.f32.mxu1 %vm16434_vm13, %v16197_v59  ;;  %12945 = vmatpush3.msk.msra.mxu1 %vm16404_vm10, %v16197_v59 }
 0x53a   :  { %12946 = vmatprep.subr.msk.mxu1 %vm16398_vm9, %v16197_v59 }
 0x53b   :  { %12947 = vmatpush3.msk.msra.mxu1 %vm16398_vm9, %v16197_v59 }
 0x53c   :  { %12864 = vmatmul.mubr.msk.f32.gmra.mxu1 %vm16440_vm14, %v16197_v59  ;;  %12948 = vmatprep.subr.msk.mxu1 %vm16380_vm8, %v16197_v59 }
 0x53d   :  { %12866 = vmatprep.mubr.msk.f32.mxu1 %vm16452_vm15, %v16197_v59  ;;  %12949 = vmatpush3.msk.msra.mxu1 %vm16380_vm8, %v16197_v59 }
 0x53e   :  { %12950 = vmatprep.subr.msk.mxu1 %vm16372_vm7, %v16197_v59 }
 0x53f   :  { %12951 = vmatpush3.msk.msra.mxu1 %vm16372_vm7, %v16197_v59 }
 0x540   :  { %12867 = vmatmul.mubr.msk.f32.gmra.mxu1 %vm16458_vm0, %v16197_v59  ;;  %12952 = vmatprep.subr.msk.mxu1 %vm16354_vm6, %v16197_v59 }
 0x541   :  { %12869 = vmatprep.mubr.msk.f32.mxu1 %vm16470_vm1, %v16197_v59  ;;  %12953 = vmatpush3.msk.msra.mxu1 %vm16354_vm6, %v16197_v59 }
 0x542   :  { %12954 = vmatprep.subr.msk.mxu1 %vm16343_vm5, %v16197_v59 }
 0x543   :  { %12955 = vmatpush3.msk.msra.mxu1 %vm16343_vm5, %v16197_v59 }
 0x544   :  { %12870 = vmatmul.mubr.msk.f32.gmra.mxu1 %vm16476_vm2, %v16197_v59  ;;  %12956 = vmatprep.subr.msk.mxu1 %vm16333_vm4, %v16197_v59 }
 0x545   :  { %12957 = vmatpush3.msk.msra.mxu1 %vm16333_vm4, %v16197_v59 }
 0x546   :  { %12958 = vmatprep.subr.msk.mxu1 %vm16323_vm3, %v16197_v59 }
 0x547   :  { %12959 = vmatpush3.msk.msra.mxu1 %vm16323_vm3, %v16197_v59 }
 0x5e8   :  { %v12850_v7 = vpop.f32.mrf.mxu1 }
 0x5e9   :  { %v1428_v35 = vmul.f32 0.5, %v12850_v7  ;;  %v16817_v7 = vmul.f32 1.5, %v1181_v1 }
 0x5ea   :  { %v1348_v36 = vpop.f32.mrf.mxu1 }
 0x5eb   :  { %v1427_v20 = vmul.f32 0.5, %v1348_v36  ;;  %v16787_v29 = vsub.f32 %v16768_v39, %v1428_v35 }
 0x5ec   :  { %v12853_v21 = vpop.f32.mrf.mxu1 }
 0x5ed   :  { %v16779_v24 = vsub.f32 %v16766_v10, %v1427_v20  ;;  %v1430_v40 = vmul.f32 0.5, %v12853_v21  ;;  %v1183_v20 = vsel %vm19914_vm11, 1.0, %v16198_v14 }
 0x5ee   :  { %v1358_v43 = vpop.f32.mrf.mxu1  ;;  %v16835_v45 = vmul.f32 1.5, %v1183_v20 }
 0x5ef   :  { %v1429_v46 = vmul.f32 0.5, %v1358_v43  ;;  %12960 = vmatprep.mubr.f32.mxu1 %v16779_v24  ;;  %v16805_v56 = vsub.f32 %v16781_v26, %v1430_v40  ;;  %v16830_v40 = vmul.f32 1.5, %v1182_v12 }
 0x5f0   :  { %v12856_v48 = vpop.f32.mrf.mxu1  ;;  %12961 = vmatmul.mubr.f32.vlgmr.msra.gmra.mxu1 %v16787_v29 }
 0x5f1   :  { %v16797_v53 = vsub.f32 %v16776_v23, %v1429_v46  ;;  %v1432_v32 = vmul.f32 0.5, %v12856_v48  ;;  %v1184_v46 = vsel %vm16434_vm13, 1.0, %v16198_v14 }
 0x5f2   :  { %v1368_v59 = vpop.f32.mrf.mxu1 }
 0x5f3   :  { %v1431_v33 = vmul.f32 0.5, %v1368_v59  ;;  %12963 = vmatprep.mubr.f32.mxu1 %v16797_v53  ;;  %v16823_v35 = vsub.f32 %v16799_v31, %v1432_v32  ;;  %v1185_v59 = vsel %vm16440_vm14, 1.0, %v16198_v14 }
 0x5f4   :  { %v12859_v4 = vpop.f32.mrf.mxu1  ;;  %12964 = vmatmul.mubr.f32.gmra.mxu1 %v16805_v56 }
 0x5f5   :  { %v16815_v19 = vsub.f32 %v16794_v13, %v1431_v33  ;;  %v1434_v36 = vmul.f32 0.5, %v12859_v4  ;;  %v16845_v4 = vmul.f32 1.5, %v1184_v46  ;;  %v1189_v46 = vsel %vm16476_vm2, 1.0, %v16198_v14 }
 0x5f6   :  { %v1378_v42 = vpop.f32.mrf.mxu1  ;;  %v16869_v49 = vmul.f32 1.5, %v1189_v46 }
 0x5f7   :  { %v1433_v21 = vmul.f32 0.5, %v1378_v42  ;;  %12966 = vmatprep.mubr.f32.mxu1 %v16815_v19  ;;  %v1450_v48 = vsub.f32 %v16817_v7, %v1434_v36  ;;  %v16848_v42 = vmul.f32 1.5, %v1185_v59  ;;  %v1186_v36 = vsel %vm16452_vm15, 1.0, %v16198_v14 }
 0x5f8   :  { %v12862_v28 = vpop.f32.mrf.mxu1  ;;  %12967 = vmatmul.mubr.f32.gmra.mxu1 %v16823_v35 }
 0x5f9   :  { %v16833_v43 = vsub.f32 %v16812_v18, %v1433_v21  ;;  %v1436_v55 = vmul.f32 0.5, %v12862_v28 }
 0x5fa   :  { %v1388_v32 = vpop.f32.mrf.mxu1 }
 0x5fb   :  { %v1435_v1 = vmul.f32 0.5, %v1388_v32  ;;  %12969 = vmatprep.mubr.f32.mxu1 %v16833_v43  ;;  %v1452_v20 = vsub.f32 %v16835_v45, %v1436_v55  ;;  %v1187_v32 = vsel %vm16458_vm0, 1.0, %v16198_v14  ;;  %v1188_v55 = vsel %vm16470_vm1, 1.0, %v16198_v14 }
 0x5fc   :  { %v12865_v33 = vpop.f32.mrf.mxu1  ;;  %12970 = vmatmul.mubr.f32.gmra.mxu1 %v1450_v48  ;;  %v16863_v51 = vmul.f32 1.5, %v1187_v32 }
 0x5fd   :  { %v1451_v12 = vsub.f32 %v16830_v40, %v1435_v1  ;;  %v1438_v21 = vmul.f32 0.5, %v12865_v33  ;;  %v16860_v1 = vmul.f32 1.5, %v1186_v36  ;;  %v16871_v36 = vmul.f32 1.5, %v1188_v55 }
 0x5fe   :  { %v1398_v28 = vpop.f32.mrf.mxu1 }
 0x5ff   :  { %v1437_v62 = vmul.f32 0.5, %v1398_v28  ;;  %12972 = vmatprep.mubr.f32.mxu1 %v1451_v12  ;;  %v1454_v33 = vsub.f32 %v16848_v42, %v1438_v21 }
 0x600   :  { %v12868_v59 = vpop.f32.mrf.mxu1  ;;  %12973 = vmatmul.mubr.f32.gmra.mxu1 %v1452_v20 }
 0x601   :  { %v1453_v61 = vsub.f32 %v16845_v4, %v1437_v62  ;;  %v1440_v28 = vmul.f32 0.5, %v12868_v59 }
 0x602   :  { %v1408_v63 = vpop.f32.mrf.mxu1 }
 0x603   :  { %v1439_v11 = vmul.f32 0.5, %v1408_v63  ;;  %12975 = vmatprep.mubr.f32.mxu1 %v1453_v61  ;;  %v1456_v27 = vsub.f32 %v16863_v51, %v1440_v28 }
 0x604   :  { %v12871_v37 = vpop.f32.mrf.mxu1  ;;  %12976 = vmatmul.mubr.f32.gmra.mxu1 %v1454_v33 }
 0x605   :  { %v1455_v62 = vsub.f32 %v16860_v1, %v1439_v11  ;;  %v1442_v32 = vmul.f32 0.5, %v12871_v37 }
 0x606   :  { %v1418_v17 = vpop.f32.mrf.mxu1 }
 0x607   :  { %v1458_v14 = vsub.f32 %v16869_v49, %v1442_v32  ;;  %v1441_v9 = vmul.f32 0.5, %v1418_v17  ;;  %12978 = vmatprep.mubr.f32.mxu1 %v1455_v62 }
 0x608   :  { %12979 = vmatmul.mubr.f32.gmra.mxu1 %v1456_v27 }
 0x609   :  { %v1457_v21 = vsub.f32 %v16871_v36, %v1441_v9  ;;  %12872 = vmatprep.subr.mxu0 %v1458_v14 }
 0x60a   :  { %12873 = vmatpush3.msra.mxu0 %v1458_v14 }
 0x60b   :  { %12874 = vmatprep.subr.mxu0 %v1457_v21  ;;  %12981 = vmatprep.mubr.f32.mxu1 %v1457_v21 }
 0x60c   :  { %12875 = vmatpush3.msra.mxu0 %v1457_v21  ;;  %12982 = vmatmul.mubr.f32.gmra.mxu1 %v1458_v14 }
 0x60d   :  { %12876 = vmatprep.subr.mxu0 %v1456_v27 }
 0x60e   :  { %12877 = vmatpush3.msra.mxu0 %v1456_v27 }
 0x60f   :  { %12878 = vmatprep.subr.mxu0 %v1455_v62 }
 0x610   :  { %12879 = vmatpush3.msra.mxu0 %v1455_v62 }
 0x611   :  { %12880 = vmatprep.subr.mxu0 %v1454_v33 }
 0x612   :  { %12881 = vmatpush3.msra.mxu0 %v1454_v33 }
 0x613   :  { %12882 = vmatprep.subr.mxu0 %v1453_v61 }
 0x614   :  { %12883 = vmatpush3.msra.mxu0 %v1453_v61 }
 0x615   :  { %12884 = vmatprep.subr.mxu0 %v1452_v20 }
 0x616   :  { %12885 = vmatpush3.msra.mxu0 %v1452_v20 }
 0x617   :  { %12886 = vmatprep.subr.mxu0 %v1451_v12 }
 0x618   :  { %12887 = vmatpush3.msra.mxu0 %v1451_v12 }
 0x619   :  { %12888 = vmatprep.subr.mxu0 %v1450_v48 }
 0x61a   :  { %12889 = vmatpush3.msra.mxu0 %v1450_v48 }
 0x61b   :  { %12890 = vmatprep.subr.mxu0 %v16833_v43 }
 0x61c   :  { %12891 = vmatpush3.msra.mxu0 %v16833_v43 }
 0x61d   :  { %12892 = vmatprep.subr.mxu0 %v16823_v35 }
 0x61e   :  { %12893 = vmatpush3.msra.mxu0 %v16823_v35 }
 0x61f   :  { %12894 = vmatprep.subr.mxu0 %v16815_v19 }
 0x620   :  { %12895 = vmatpush3.msra.mxu0 %v16815_v19 }
 0x621   :  { %12896 = vmatprep.subr.mxu0 %v16805_v56 }
 0x622   :  { %12897 = vmatpush3.msra.mxu0 %v16805_v56 }
 0x623   :  { %12898 = vmatprep.subr.mxu0 %v16797_v53 }
 0x624   :  { %12899 = vmatpush3.msra.mxu0 %v16797_v53 }
 0x625   :  { %12900 = vmatprep.subr.mxu0 %v16787_v29 }
 0x626   :  { %12901 = vmatpush3.msra.mxu0 %v16787_v29 }
 0x627   :  { %12902 = vmatprep.subr.mxu0 %v16779_v24 }
 0x628   :  { %12903 = vmatpush3.msra.mxu0 %v16779_v24 }
 0x629   :  { %12905 = vmatmul.mubr.f32.vlgmr.msra.gmra.mxu0 %v16614_v25 }
 0x62a   :  { %12907 = vmatprep.mubr.f32.mxu0 %v16609_v22 }
 0x62d   :  { %12908 = vmatmul.mubr.f32.gmra.mxu0 %v16604_v41 }
 0x62e   :  { %12910 = vmatprep.mubr.f32.mxu0 %v16599_v38 }
 0x631   :  { %12911 = vmatmul.mubr.f32.gmra.mxu0 %v16594_v50 }
 0x632   :  { %12913 = vmatprep.mubr.f32.mxu0 %v16589_v30 }
 0x635   :  { %12914 = vmatmul.mubr.f32.gmra.mxu0 %v16584_v58 }
 0x636   :  { %12916 = vmatprep.mubr.f32.mxu0 %v16579_v54 }
 0x639   :  { %12917 = vmatmul.mubr.f32.gmra.mxu0 %v16574_v0 }
 0x63a   :  { %12919 = vmatprep.mubr.f32.mxu0 %v16569_v60 }
 0x63d   :  { %12920 = vmatmul.mubr.f32.gmra.mxu0 %v16564_v16 }
 0x63e   :  { %12922 = vmatprep.mubr.f32.mxu0 %v16559_v6 }
 0x641   :  { %12923 = vmatmul.mubr.f32.gmra.mxu0 %v16554_v8 }
 0x642   :  { %12925 = vmatprep.mubr.f32.mxu0 %v16550_v34 }
 0x645   :  { %12926 = vmatmul.mubr.f32.gmra.mxu0 %v16546_v2 }
 0x6b0   :  { %v16906_v17 = vpop.f32.mrf.mxu1 }
 0x6b2   :  { %v16908_v27 = vpop.f32.mrf.mxu1 }
 0x6b3   :  { %13016 = vmatprep.mubr.f32.mxu0 %v16908_v27 }
 0x6b4   :  { %v16919_v8 = vpop.f32.mrf.mxu1 }
 0x6b6   :  { %v16925_v6 = vpop.f32.mrf.mxu1 }
 0x6b8   :  { %v16931_v0 = vpop.f32.mrf.mxu1 }
 0x6ba   :  { %v16937_v30 = vpop.f32.mrf.mxu1 }
 0x6bc   :  { %v16943_v41 = vpop.f32.mrf.mxu1 }
 0x6be   :  { %v16950_v24 = vpop.f32.mrf.mxu1 }
 0x6c0   :  { %v12974_v53 = vpop.f32.mrf.mxu1 }
 0x6c2   :  { %v1710_v56 = vpop.f32.mrf.mxu1 }
 0x6c4   :  { %v12977_v19 = vpop.f32.mrf.mxu1 }
 0x6c6   :  { %v1720_v35 = vpop.f32.mrf.mxu1 }
 0x6c8   :  { %v12980_v43 = vpop.f32.mrf.mxu1 }
 0x6ca   :  { %v1730_v48 = vpop.f32.mrf.mxu1 }
 0x6cc   :  { %v12983_v12 = vpop.f32.mrf.mxu1 }
 0x6ce   :  { %v1740_v20 = vpop.f32.mrf.mxu1 }
 0x6e9   :  { %v16911_v37 = vpop.f32.mrf.mxu0 }
 0x6eb   :  { %v1525_v61 = vpop.f32.mrf.mxu0 }
 0x6ec   :  { %13072 = vmatprep.mubr.f32.mxu1 %v1525_v61 }
 0x6ed   :  { %v16913_v63 = vpop.f32.mrf.mxu0 }
 0x6ef   :  { %v16915_v9 = vpop.f32.mrf.mxu0 }
 0x6f1   :  { %v16917_v11 = vpop.f32.mrf.mxu0 }
 0x6f3   :  { %v16921_v34 = vpop.f32.mrf.mxu0 }
 0x6f5   :  { %v16923_v2 = vpop.f32.mrf.mxu0 }
 0x6f7   :  { %v16927_v16 = vpop.f32.mrf.mxu0 }
 0x6f9   :  { %v16929_v60 = vpop.f32.mrf.mxu0 }
 0x6fb   :  { %v16933_v54 = vpop.f32.mrf.mxu0 }
 0x6fd   :  { %v16935_v58 = vpop.f32.mrf.mxu0 }
 0x6ff   :  { %v16939_v50 = vpop.f32.mrf.mxu0 }
 0x701   :  { %v16941_v38 = vpop.f32.mrf.mxu0 }
 0x703   :  { %v16945_v22 = vpop.f32.mrf.mxu0 }
 0x705   :  { %v16947_v25 = vpop.f32.mrf.mxu0 }
 0x706   :  { %12984 = vmatprep.subr.mxu0 %v16947_v25 }
 0x707   :  { %v16952_v29 = vpop.f32.mrf.mxu0  ;;  %12985 = vmatpush3.msra.mxu0 %v16947_v25 }
 0x708   :  { %12986 = vmatprep.subr.mxu0 %v16952_v29 }
 0x709   :  { %12987 = vmatpush3.msra.mxu0 %v16952_v29 }
 0x70a   :  { %12988 = vmatprep.subr.mxu0 %v16941_v38 }
 0x70b   :  { %12989 = vmatpush3.msra.mxu0 %v16941_v38 }
 0x70c   :  { %12990 = vmatprep.subr.mxu0 %v16945_v22 }
 0x70d   :  { %12991 = vmatpush3.msra.mxu0 %v16945_v22 }
 0x70e   :  { %12992 = vmatprep.subr.mxu0 %v16935_v58 }
 0x70f   :  { %12993 = vmatpush3.msra.mxu0 %v16935_v58 }
 0x710   :  { %12994 = vmatprep.subr.mxu0 %v16939_v50 }
 0x711   :  { %12995 = vmatpush3.msra.mxu0 %v16939_v50 }
 0x712   :  { %12996 = vmatprep.subr.mxu0 %v16929_v60 }
 0x713   :  { %12997 = vmatpush3.msra.mxu0 %v16929_v60 }
 0x714   :  { %12998 = vmatprep.subr.mxu0 %v16933_v54 }
 0x715   :  { %12999 = vmatpush3.msra.mxu0 %v16933_v54 }
 0x716   :  { %13000 = vmatprep.subr.mxu0 %v16923_v2 }
 0x717   :  { %13001 = vmatpush3.msra.mxu0 %v16923_v2 }
 0x718   :  { %13002 = vmatprep.subr.mxu0 %v16927_v16 }
 0x719   :  { %13003 = vmatpush3.msra.mxu0 %v16927_v16 }
 0x71a   :  { %13004 = vmatprep.subr.mxu0 %v16917_v11 }
 0x71b   :  { %13005 = vmatpush3.msra.mxu0 %v16917_v11 }
 0x71c   :  { %13006 = vmatprep.subr.mxu0 %v16921_v34 }
 0x71d   :  { %13007 = vmatpush3.msra.mxu0 %v16921_v34 }
 0x71e   :  { %13008 = vmatprep.subr.mxu0 %v16913_v63 }
 0x71f   :  { %13009 = vmatpush3.msra.mxu0 %v16913_v63 }
 0x720   :  { %13010 = vmatprep.subr.mxu0 %v16915_v9 }
 0x721   :  { %13011 = vmatpush3.msra.mxu0 %v16915_v9 }
 0x722   :  { %13012 = vmatprep.subr.mxu0 %v16911_v37 }
 0x723   :  { %13013 = vmatpush3.msra.mxu0 %v16911_v37 }
 0x724   :  { %13014 = vmatprep.subr.mxu0 %v1525_v61 }
 0x725   :  { %13015 = vmatpush3.msra.mxu0 %v1525_v61 }
 0x726   :  { %13017 = vmatmul.mubr.f32.vlgmr.msra.gmra.mxu0 %v16906_v17  ;;  %13096 = vmatprep.subr.mxu0 %v12983_v12 }
 0x727   :  { %13019 = vmatprep.mubr.f32.mxu0 %v16925_v6  ;;  %13097 = vmatpush3.msra.mxu0 %v12983_v12 }
 0x728   :  { %13098 = vmatprep.subr.mxu0 %v1740_v20 }
 0x729   :  { %13099 = vmatpush3.msra.mxu0 %v1740_v20 }
 0x72a   :  { %13020 = vmatmul.mubr.f32.gmra.mxu0 %v16919_v8  ;;  %13100 = vmatprep.subr.mxu0 %v12980_v43 }
 0x72b   :  { %13022 = vmatprep.mubr.f32.mxu0 %v16937_v30  ;;  %13101 = vmatpush3.msra.mxu0 %v12980_v43 }
 0x72c   :  { %13102 = vmatprep.subr.mxu0 %v1730_v48 }
 0x72d   :  { %13103 = vmatpush3.msra.mxu0 %v1730_v48 }
 0x72e   :  { %13023 = vmatmul.mubr.f32.gmra.mxu0 %v16931_v0  ;;  %13104 = vmatprep.subr.mxu0 %v12977_v19 }
 0x72f   :  { %13025 = vmatprep.mubr.f32.mxu0 %v16950_v24  ;;  %13105 = vmatpush3.msra.mxu0 %v12977_v19 }
 0x730   :  { %13106 = vmatprep.subr.mxu0 %v1720_v35 }
 0x731   :  { %13107 = vmatpush3.msra.mxu0 %v1720_v35 }
 0x732   :  { %13026 = vmatmul.mubr.f32.gmra.mxu0 %v16943_v41  ;;  %13108 = vmatprep.subr.mxu0 %v12974_v53 }
 0x733   :  { %13028 = vmatprep.mubr.f32.mxu0 %v1710_v56  ;;  %13109 = vmatpush3.msra.mxu0 %v12974_v53 }
 0x734   :  { %13110 = vmatprep.subr.mxu0 %v1710_v56 }
 0x735   :  { %13111 = vmatpush3.msra.mxu0 %v1710_v56 }
 0x736   :  { %13029 = vmatmul.mubr.f32.gmra.mxu0 %v12974_v53  ;;  %13112 = vmatprep.subr.mxu0 %v16943_v41 }
 0x737   :  { %13031 = vmatprep.mubr.f32.mxu0 %v1720_v35  ;;  %13113 = vmatpush3.msra.mxu0 %v16943_v41 }
 0x738   :  { %13114 = vmatprep.subr.mxu0 %v16950_v24 }
 0x739   :  { %13115 = vmatpush3.msra.mxu0 %v16950_v24 }
 0x73a   :  { %13032 = vmatmul.mubr.f32.gmra.mxu0 %v12977_v19  ;;  %13116 = vmatprep.subr.mxu0 %v16931_v0 }
 0x73b   :  { %13034 = vmatprep.mubr.f32.mxu0 %v1730_v48  ;;  %13117 = vmatpush3.msra.mxu0 %v16931_v0 }
 0x73c   :  { %13118 = vmatprep.subr.mxu0 %v16937_v30 }
 0x73d   :  { %13119 = vmatpush3.msra.mxu0 %v16937_v30 }
 0x73e   :  { %13035 = vmatmul.mubr.f32.gmra.mxu0 %v12980_v43  ;;  %13120 = vmatprep.subr.mxu0 %v16919_v8 }
 0x73f   :  { %13037 = vmatprep.mubr.f32.mxu0 %v1740_v20  ;;  %13121 = vmatpush3.msra.mxu0 %v16919_v8 }
 0x740   :  { %13122 = vmatprep.subr.mxu0 %v16925_v6 }
 0x741   :  { %13123 = vmatpush3.msra.mxu0 %v16925_v6 }
 0x742   :  { %13038 = vmatmul.mubr.f32.gmra.mxu0 %v12983_v12  ;;  %13124 = vmatprep.subr.mxu0 %v16906_v17 }
 0x743   :  { %13125 = vmatpush3.msra.mxu0 %v16906_v17 }
 0x744   :  { %13126 = vmatprep.subr.mxu0 %v16908_v27 }
 0x745   :  { %13127 = vmatpush3.msra.mxu0 %v16908_v27 }
 0x7e6   :  { %v13018_v46 = vpop.f32.mrf.mxu0 }
 0x7e7   :  { %v1895_v59 = vmul.f32 0.5, %v13018_v46 }
 0x7e8   :  { %v1815_v55 = vpop.f32.mrf.mxu0 }
 0x7e9   :  { %v1894_v33 = vmul.f32 0.5, %v1815_v55  ;;  %v17010_v32 = vsub.f32 %v16768_v39, %v1895_v59 }
 0x7ea   :  { %v13021_v28 = vpop.f32.mrf.mxu0 }
 0x7eb   :  { %v17007_v62 = vsub.f32 %v16766_v10, %v1894_v33  ;;  %v1897_v14 = vmul.f32 0.5, %v13021_v28 }
 0x7ec   :  { %v1825_v21 = vpop.f32.mrf.mxu0 }
 0x7ed   :  { %v1896_v61 = vmul.f32 0.5, %v1825_v21  ;;  %13128 = vmatprep.mubr.f32.mxu0 %v17007_v62  ;;  %v17018_v8 = vsub.f32 %v16781_v26, %v1897_v14 }
 0x7ee   :  { %v13024_v17 = vpop.f32.mrf.mxu0  ;;  %13129 = vmatmul.mubr.f32.vlgmr.msra.gmra.mxu0 %v17010_v32 }
 0x7ef   :  { %v17015_v27 = vsub.f32 %v16776_v23, %v1896_v61  ;;  %v1899_v6 = vmul.f32 0.5, %v13024_v17 }
 0x7f0   :  { %v1835_v0 = vpop.f32.mrf.mxu0 }
 0x7f1   :  { %v1898_v30 = vmul.f32 0.5, %v1835_v0  ;;  %13131 = vmatprep.mubr.f32.mxu0 %v17015_v27  ;;  %v1915_v53 = vsub.f32 %v16799_v31, %v1899_v6 }
 0x7f2   :  { %v13027_v41 = vpop.f32.mrf.mxu0  ;;  %13132 = vmatmul.mubr.f32.gmra.mxu0 %v17018_v8 }
 0x7f3   :  { %v17023_v24 = vsub.f32 %v16794_v13, %v1898_v30  ;;  %v1901_v56 = vmul.f32 0.5, %v13027_v41 }
 0x7f4   :  { %v1845_v19 = vpop.f32.mrf.mxu0 }
 0x7f5   :  { %v1900_v35 = vmul.f32 0.5, %v1845_v19  ;;  %13134 = vmatprep.mubr.f32.mxu0 %v17023_v24  ;;  %v1917_v12 = vsub.f32 %v16817_v7, %v1901_v56 }
 0x7f6   :  { %v13030_v43 = vpop.f32.mrf.mxu0  ;;  %13135 = vmatmul.mubr.f32.gmra.mxu0 %v1915_v53 }
 0x7f7   :  { %v1916_v48 = vsub.f32 %v16812_v18, %v1900_v35  ;;  %v1903_v20 = vmul.f32 0.5, %v13030_v43 }
 0x7f8   :  { %v1855_v46 = vpop.f32.mrf.mxu0 }
 0x7f9   :  { %v1902_v59 = vmul.f32 0.5, %v1855_v46  ;;  %13137 = vmatprep.mubr.f32.mxu0 %v1916_v48  ;;  %v1919_v28 = vsub.f32 %v16835_v45, %v1903_v20 }
 0x7fa   :  { %v13033_v55 = vpop.f32.mrf.mxu0  ;;  %13138 = vmatmul.mubr.f32.gmra.mxu0 %v1917_v12 }
 0x7fb   :  { %v1918_v33 = vsub.f32 %v16830_v40, %v1902_v59  ;;  %v1905_v14 = vmul.f32 0.5, %v13033_v55 }
 0x7fc   :  { %v1865_v21 = vpop.f32.mrf.mxu0 }
 0x7fd   :  { %v1904_v61 = vmul.f32 0.5, %v1865_v21  ;;  %13140 = vmatprep.mubr.f32.mxu0 %v1918_v33  ;;  %v1921_v0 = vsub.f32 %v16848_v42, %v1905_v14 }
 0x7fe   :  { %v13036_v17 = vpop.f32.mrf.mxu0  ;;  %13141 = vmatmul.mubr.f32.gmra.mxu0 %v1919_v28 }
 0x7ff   :  { %v1920_v6 = vsub.f32 %v16845_v4, %v1904_v61  ;;  %v1907_v30 = vmul.f32 0.5, %v13036_v17 }
 0x800   :  { %v1875_v41 = vpop.f32.mrf.mxu0 }
 0x801   :  { %v1906_v56 = vmul.f32 0.5, %v1875_v41  ;;  %13143 = vmatprep.mubr.f32.mxu0 %v1920_v6  ;;  %v1923_v20 = vsub.f32 %v16863_v51, %v1907_v30 }
 0x802   :  { %v13039_v19 = vpop.f32.mrf.mxu0  ;;  %13144 = vmatmul.mubr.f32.gmra.mxu0 %v1921_v0 }
 0x803   :  { %v1922_v35 = vsub.f32 %v16860_v1, %v1906_v56  ;;  %v1909_v43 = vmul.f32 0.5, %v13039_v19 }
 0x804   :  { %v1885_v46 = vpop.f32.mrf.mxu0 }
 0x805   :  { %v1925_v59 = vsub.f32 %v16869_v49, %v1909_v43  ;;  %v1908_v55 = vmul.f32 0.5, %v1885_v46  ;;  %13146 = vmatprep.mubr.f32.mxu0 %v1922_v35 }
 0x806   :  { %13147 = vmatmul.mubr.f32.gmra.mxu0 %v1923_v20 }
 0x807   :  { %v1924_v21 = vsub.f32 %v16871_v36, %v1908_v55  ;;  %13040 = vmatprep.subr.mxu1 %v1925_v59 }
 0x808   :  { %13041 = vmatpush3.msra.mxu1 %v1925_v59 }
 0x809   :  { %13042 = vmatprep.subr.mxu1 %v1924_v21  ;;  %13149 = vmatprep.mubr.f32.mxu0 %v1924_v21 }
 0x80a   :  { %13043 = vmatpush3.msra.mxu1 %v1924_v21  ;;  %13150 = vmatmul.mubr.f32.gmra.mxu0 %v1925_v59 }
 0x80b   :  { %13044 = vmatprep.subr.mxu1 %v1923_v20 }
 0x80c   :  { %13045 = vmatpush3.msra.mxu1 %v1923_v20 }
 0x80d   :  { %13046 = vmatprep.subr.mxu1 %v1922_v35 }
 0x80e   :  { %13047 = vmatpush3.msra.mxu1 %v1922_v35 }
 0x80f   :  { %13048 = vmatprep.subr.mxu1 %v1921_v0 }
 0x810   :  { %13049 = vmatpush3.msra.mxu1 %v1921_v0 }
 0x811   :  { %13050 = vmatprep.subr.mxu1 %v1920_v6 }
 0x812   :  { %13051 = vmatpush3.msra.mxu1 %v1920_v6 }
 0x813   :  { %13052 = vmatprep.subr.mxu1 %v1919_v28 }
 0x814   :  { %13053 = vmatpush3.msra.mxu1 %v1919_v28 }
 0x815   :  { %13054 = vmatprep.subr.mxu1 %v1918_v33 }
 0x816   :  { %13055 = vmatpush3.msra.mxu1 %v1918_v33 }
 0x817   :  { %13056 = vmatprep.subr.mxu1 %v1917_v12 }
 0x818   :  { %13057 = vmatpush3.msra.mxu1 %v1917_v12 }
 0x819   :  { %13058 = vmatprep.subr.mxu1 %v1916_v48 }
 0x81a   :  { %13059 = vmatpush3.msra.mxu1 %v1916_v48 }
 0x81b   :  { %13060 = vmatprep.subr.mxu1 %v1915_v53 }
 0x81c   :  { %13061 = vmatpush3.msra.mxu1 %v1915_v53 }
 0x81d   :  { %13062 = vmatprep.subr.mxu1 %v17023_v24 }
 0x81e   :  { %13063 = vmatpush3.msra.mxu1 %v17023_v24 }
 0x81f   :  { %13064 = vmatprep.subr.mxu1 %v17018_v8 }
 0x820   :  { %13065 = vmatpush3.msra.mxu1 %v17018_v8 }
 0x821   :  { %13066 = vmatprep.subr.mxu1 %v17015_v27 }
 0x822   :  { %13067 = vmatpush3.msra.mxu1 %v17015_v27 }
 0x823   :  { %13068 = vmatprep.subr.mxu1 %v17010_v32 }
 0x824   :  { %13069 = vmatpush3.msra.mxu1 %v17010_v32 }
 0x825   :  { %13070 = vmatprep.subr.mxu1 %v17007_v62 }
 0x826   :  { %13071 = vmatpush3.msra.mxu1 %v17007_v62 }
 0x827   :  { %13073 = vmatmul.mubr.f32.vlgmr.msra.gmra.mxu1 %v16911_v37 }
 0x828   :  { %13075 = vmatprep.mubr.f32.mxu1 %v16915_v9 }
 0x82b   :  { %13076 = vmatmul.mubr.f32.gmra.mxu1 %v16913_v63 }
 0x82c   :  { %13078 = vmatprep.mubr.f32.mxu1 %v16921_v34 }
 0x82f   :  { %13079 = vmatmul.mubr.f32.gmra.mxu1 %v16917_v11 }
 0x830   :  { %13081 = vmatprep.mubr.f32.mxu1 %v16927_v16 }
 0x833   :  { %13082 = vmatmul.mubr.f32.gmra.mxu1 %v16923_v2 }
 0x834   :  { %13084 = vmatprep.mubr.f32.mxu1 %v16933_v54 }
 0x837   :  { %13085 = vmatmul.mubr.f32.gmra.mxu1 %v16929_v60 }
 0x838   :  { %13087 = vmatprep.mubr.f32.mxu1 %v16939_v50 }
 0x83b   :  { %13088 = vmatmul.mubr.f32.gmra.mxu1 %v16935_v58 }
 0x83c   :  { %13090 = vmatprep.mubr.f32.mxu1 %v16945_v22 }
 0x83f   :  { %13091 = vmatmul.mubr.f32.gmra.mxu1 %v16941_v38 }
 0x840   :  { %13093 = vmatprep.mubr.f32.mxu1 %v16952_v29 }
 0x843   :  { %13094 = vmatmul.mubr.f32.gmra.mxu1 %v16947_v25 }
 0x8ae   :  { %v17062_v37 = vpop.f32.mrf.mxu0 }
 0x8b0   :  { %v17064_v63 = vpop.f32.mrf.mxu0 }
 0x8b1   :  { %13184 = vmatprep.mubr.f32.mxu1 %v17064_v63 }
 0x8b2   :  { %v17075_v60 = vpop.f32.mrf.mxu0 }
 0x8b4   :  { %v17081_v50 = vpop.f32.mrf.mxu0 }
 0x8b6   :  { %v17087_v25 = vpop.f32.mrf.mxu0 }
 0x8b8   :  { %v17093_v32 = vpop.f32.mrf.mxu0 }
 0x8ba   :  { %v17099_v24 = vpop.f32.mrf.mxu0 }
 0x8bc   :  { %v17106_v12 = vpop.f32.mrf.mxu0 }
 0x8be   :  { %v13142_v28 = vpop.f32.mrf.mxu0 }
 0x8c0   :  { %v2177_v14 = vpop.f32.mrf.mxu0 }
 0x8c2   :  { %v13145_v61 = vpop.f32.mrf.mxu0 }
 0x8c4   :  { %v2187_v17 = vpop.f32.mrf.mxu0 }
 0x8c6   :  { %v13148_v6 = vpop.f32.mrf.mxu0 }
 0x8c8   :  { %v2197_v0 = vpop.f32.mrf.mxu0 }
 0x8ca   :  { %v13151_v30 = vpop.f32.mrf.mxu0 }
 0x8cc   :  { %v2207_v41 = vpop.f32.mrf.mxu0 }
 0x8e7   :  { %v17067_v9 = vpop.f32.mrf.mxu1 }
 0x8e9   :  { %v1992_v11 = vpop.f32.mrf.mxu1 }
 0x8ea   :  { %13240 = vmatprep.mubr.f32.mxu0 %v1992_v11 }
 0x8eb   :  { %v17069_v34 = vpop.f32.mrf.mxu1 }
 0x8ed   :  { %v17071_v2 = vpop.f32.mrf.mxu1 }
 0x8ef   :  { %v17073_v16 = vpop.f32.mrf.mxu1 }
 0x8f1   :  { %v17077_v54 = vpop.f32.mrf.mxu1 }
 0x8f3   :  { %v17079_v58 = vpop.f32.mrf.mxu1 }
 0x8f5   :  { %v17083_v38 = vpop.f32.mrf.mxu1 }
 0x8f7   :  { %v17085_v22 = vpop.f32.mrf.mxu1 }
 0x8f9   :  { %v17089_v29 = vpop.f32.mrf.mxu1 }
 0x8fb   :  { %v17091_v62 = vpop.f32.mrf.mxu1 }
 0x8fd   :  { %v17095_v27 = vpop.f32.mrf.mxu1 }
 0x8ff   :  { %v17097_v8 = vpop.f32.mrf.mxu1 }
 0x901   :  { %v17101_v53 = vpop.f32.mrf.mxu1 }
 0x903   :  { %v17103_v48 = vpop.f32.mrf.mxu1 }
 0x904   :  { %13152 = vmatprep.subr.mxu1 %v17103_v48 }
 0x905   :  { %v17108_v33 = vpop.f32.mrf.mxu1  ;;  %13153 = vmatpush3.msra.mxu1 %v17103_v48 }
 0x906   :  { %13154 = vmatprep.subr.mxu1 %v17108_v33 }
 0x907   :  { %13155 = vmatpush3.msra.mxu1 %v17108_v33 }
 0x908   :  { %13156 = vmatprep.subr.mxu1 %v17097_v8 }
 0x909   :  { %13157 = vmatpush3.msra.mxu1 %v17097_v8 }
 0x90a   :  { %13158 = vmatprep.subr.mxu1 %v17101_v53 }
 0x90b   :  { %13159 = vmatpush3.msra.mxu1 %v17101_v53 }
 0x90c   :  { %13160 = vmatprep.subr.mxu1 %v17091_v62 }
 0x90d   :  { %13161 = vmatpush3.msra.mxu1 %v17091_v62 }
 0x90e   :  { %13162 = vmatprep.subr.mxu1 %v17095_v27 }
 0x90f   :  { %13163 = vmatpush3.msra.mxu1 %v17095_v27 }
 0x910   :  { %13164 = vmatprep.subr.mxu1 %v17085_v22 }
 0x911   :  { %13165 = vmatpush3.msra.mxu1 %v17085_v22 }
 0x912   :  { %13166 = vmatprep.subr.mxu1 %v17089_v29 }
 0x913   :  { %13167 = vmatpush3.msra.mxu1 %v17089_v29 }
 0x914   :  { %13168 = vmatprep.subr.mxu1 %v17079_v58 }
 0x915   :  { %13169 = vmatpush3.msra.mxu1 %v17079_v58 }
 0x916   :  { %13170 = vmatprep.subr.mxu1 %v17083_v38 }
 0x917   :  { %13171 = vmatpush3.msra.mxu1 %v17083_v38 }
 0x918   :  { %13172 = vmatprep.subr.mxu1 %v17073_v16 }
 0x919   :  { %13173 = vmatpush3.msra.mxu1 %v17073_v16 }
 0x91a   :  { %13174 = vmatprep.subr.mxu1 %v17077_v54 }
 0x91b   :  { %13175 = vmatpush3.msra.mxu1 %v17077_v54 }
 0x91c   :  { %13176 = vmatprep.subr.mxu1 %v17069_v34 }
 0x91d   :  { %13177 = vmatpush3.msra.mxu1 %v17069_v34 }
 0x91e   :  { %13178 = vmatprep.subr.mxu1 %v17071_v2 }
 0x91f   :  { %13179 = vmatpush3.msra.mxu1 %v17071_v2 }
 0x920   :  { %13180 = vmatprep.subr.mxu1 %v17067_v9 }
 0x921   :  { %13181 = vmatpush3.msra.mxu1 %v17067_v9 }
 0x922   :  { %13182 = vmatprep.subr.mxu1 %v1992_v11 }
 0x923   :  { %13183 = vmatpush3.msra.mxu1 %v1992_v11 }
 0x924   :  { %13185 = vmatmul.mubr.f32.vlgmr.msra.gmra.mxu1 %v17062_v37  ;;  %13264 = vmatprep.subr.mxu1 %v13151_v30 }
 0x925   :  { %13187 = vmatprep.mubr.f32.mxu1 %v17081_v50  ;;  %13265 = vmatpush3.msra.mxu1 %v13151_v30 }
 0x926   :  { %13266 = vmatprep.subr.mxu1 %v2207_v41 }
 0x927   :  { %13267 = vmatpush3.msra.mxu1 %v2207_v41 }
 0x928   :  { %13188 = vmatmul.mubr.f32.gmra.mxu1 %v17075_v60  ;;  %13268 = vmatprep.subr.mxu1 %v13148_v6 }
 0x929   :  { %13190 = vmatprep.mubr.f32.mxu1 %v17093_v32  ;;  %13269 = vmatpush3.msra.mxu1 %v13148_v6 }
 0x92a   :  { %13270 = vmatprep.subr.mxu1 %v2197_v0 }
 0x92b   :  { %13271 = vmatpush3.msra.mxu1 %v2197_v0 }
 0x92c   :  { %13191 = vmatmul.mubr.f32.gmra.mxu1 %v17087_v25  ;;  %13272 = vmatprep.subr.mxu1 %v13145_v61 }
 0x92d   :  { %13193 = vmatprep.mubr.f32.mxu1 %v17106_v12  ;;  %13273 = vmatpush3.msra.mxu1 %v13145_v61 }
 0x92e   :  { %13274 = vmatprep.subr.mxu1 %v2187_v17 }
 0x92f   :  { %13275 = vmatpush3.msra.mxu1 %v2187_v17 }
 0x930   :  { %13194 = vmatmul.mubr.f32.gmra.mxu1 %v17099_v24  ;;  %13276 = vmatprep.subr.mxu1 %v13142_v28 }
 0x931   :  { %13196 = vmatprep.mubr.f32.mxu1 %v2177_v14  ;;  %13277 = vmatpush3.msra.mxu1 %v13142_v28 }
 0x932   :  { %13278 = vmatprep.subr.mxu1 %v2177_v14 }
 0x933   :  { %13279 = vmatpush3.msra.mxu1 %v2177_v14 }
 0x934   :  { %13197 = vmatmul.mubr.f32.gmra.mxu1 %v13142_v28  ;;  %13280 = vmatprep.subr.mxu1 %v17099_v24 }
 0x935   :  { %13199 = vmatprep.mubr.f32.mxu1 %v2187_v17  ;;  %13281 = vmatpush3.msra.mxu1 %v17099_v24 }
 0x936   :  { %13282 = vmatprep.subr.mxu1 %v17106_v12 }
 0x937   :  { %13283 = vmatpush3.msra.mxu1 %v17106_v12 }
 0x938   :  { %13200 = vmatmul.mubr.f32.gmra.mxu1 %v13145_v61  ;;  %13284 = vmatprep.subr.mxu1 %v17087_v25 }
 0x939   :  { %13202 = vmatprep.mubr.f32.mxu1 %v2197_v0  ;;  %13285 = vmatpush3.msra.mxu1 %v17087_v25 }
 0x93a   :  { %13286 = vmatprep.subr.mxu1 %v17093_v32 }
 0x93b   :  { %13287 = vmatpush3.msra.mxu1 %v17093_v32 }
 0x93c   :  { %13203 = vmatmul.mubr.f32.gmra.mxu1 %v13148_v6  ;;  %13288 = vmatprep.subr.mxu1 %v17075_v60 }
 0x93d   :  { %13205 = vmatprep.mubr.f32.mxu1 %v2207_v41  ;;  %13289 = vmatpush3.msra.mxu1 %v17075_v60 }
 0x93e   :  { %13290 = vmatprep.subr.mxu1 %v17081_v50 }
 0x93f   :  { %13291 = vmatpush3.msra.mxu1 %v17081_v50 }
 0x940   :  { %13206 = vmatmul.mubr.f32.gmra.mxu1 %v13151_v30  ;;  %13292 = vmatprep.subr.mxu1 %v17062_v37 }
 0x941   :  { %13293 = vmatpush3.msra.mxu1 %v17062_v37 }
 0x942   :  { %13294 = vmatprep.subr.mxu1 %v17064_v63 }
 0x943   :  { %13295 = vmatpush3.msra.mxu1 %v17064_v63 }
 0x9e4   :  { %v13186_v56 = vpop.f32.mrf.mxu1 }
 0x9e5   :  { %v2362_v19 = vmul.f32 0.5, %v13186_v56 }
 0x9e6   :  { %v2282_v35 = vpop.f32.mrf.mxu1 }
 0x9e7   :  { %v2361_v43 = vmul.f32 0.5, %v2282_v35  ;;  %v17166_v59 = vsub.f32 %v16768_v39, %v2362_v19 }
 0x9e8   :  { %v13189_v20 = vpop.f32.mrf.mxu1 }
 0x9e9   :  { %v17163_v46 = vsub.f32 %v16766_v10, %v2361_v43  ;;  %v2364_v55 = vmul.f32 0.5, %v13189_v20 }
 0x9ea   :  { %v2292_v21 = vpop.f32.mrf.mxu1 }
 0x9eb   :  { %v2363_v11 = vmul.f32 0.5, %v2292_v21  ;;  %13296 = vmatprep.mubr.f32.mxu1 %v17163_v46  ;;  %v17174_v60 = vsub.f32 %v16781_v26, %v2364_v55 }
 0x9ec   :  { %v13192_v37 = vpop.f32.mrf.mxu1  ;;  %13297 = vmatmul.mubr.f32.vlgmr.msra.gmra.mxu1 %v17166_v59 }
 0x9ed   :  { %v17171_v63 = vsub.f32 %v16776_v23, %v2363_v11  ;;  %v2366_v50 = vmul.f32 0.5, %v13192_v37 }
 0x9ee   :  { %v2302_v25 = vpop.f32.mrf.mxu1 }
 0x9ef   :  { %v2365_v32 = vmul.f32 0.5, %v2302_v25  ;;  %13299 = vmatprep.mubr.f32.mxu1 %v17171_v63  ;;  %v2382_v28 = vsub.f32 %v16799_v31, %v2366_v50 }
 0x9f0   :  { %v13195_v24 = vpop.f32.mrf.mxu1  ;;  %13300 = vmatmul.mubr.f32.gmra.mxu1 %v17174_v60 }
 0x9f1   :  { %v17179_v12 = vsub.f32 %v16794_v13, %v2365_v32  ;;  %v2368_v14 = vmul.f32 0.5, %v13195_v24 }
 0x9f2   :  { %v2312_v61 = vpop.f32.mrf.mxu1 }
 0x9f3   :  { %v2367_v17 = vmul.f32 0.5, %v2312_v61  ;;  %13302 = vmatprep.mubr.f32.mxu1 %v17179_v12  ;;  %v2384_v30 = vsub.f32 %v16817_v7, %v2368_v14 }
 0x9f4   :  { %v13198_v6 = vpop.f32.mrf.mxu1  ;;  %13303 = vmatmul.mubr.f32.gmra.mxu1 %v2382_v28 }
 0x9f5   :  { %v2383_v0 = vsub.f32 %v16812_v18, %v2367_v17  ;;  %v2370_v41 = vmul.f32 0.5, %v13198_v6 }
 0x9f6   :  { %v2322_v56 = vpop.f32.mrf.mxu1 }
 0x9f7   :  { %v2369_v19 = vmul.f32 0.5, %v2322_v56  ;;  %13305 = vmatprep.mubr.f32.mxu1 %v2383_v0  ;;  %v2386_v20 = vsub.f32 %v16835_v45, %v2370_v41 }
 0x9f8   :  { %v13201_v35 = vpop.f32.mrf.mxu1  ;;  %13306 = vmatmul.mubr.f32.gmra.mxu1 %v2384_v30 }
 0x9f9   :  { %v2385_v43 = vsub.f32 %v16830_v40, %v2369_v19  ;;  %v2372_v55 = vmul.f32 0.5, %v13201_v35 }
 0x9fa   :  { %v2332_v21 = vpop.f32.mrf.mxu1 }
 0x9fb   :  { %v2371_v11 = vmul.f32 0.5, %v2332_v21  ;;  %13308 = vmatprep.mubr.f32.mxu1 %v2385_v43  ;;  %v2388_v25 = vsub.f32 %v16848_v42, %v2372_v55 }
 0x9fc   :  { %v13204_v37 = vpop.f32.mrf.mxu1  ;;  %13309 = vmatmul.mubr.f32.gmra.mxu1 %v2386_v20 }
 0x9fd   :  { %v2387_v50 = vsub.f32 %v16845_v4, %v2371_v11  ;;  %v2374_v32 = vmul.f32 0.5, %v13204_v37 }
 0x9fe   :  { %v2342_v24 = vpop.f32.mrf.mxu1 }
 0x9ff   :  { %v2373_v14 = vmul.f32 0.5, %v2342_v24  ;;  %13311 = vmatprep.mubr.f32.mxu1 %v2387_v50  ;;  %v2390_v41 = vsub.f32 %v16863_v51, %v2374_v32 }
 0xa00   :  { %v13207_v61 = vpop.f32.mrf.mxu1  ;;  %13312 = vmatmul.mubr.f32.gmra.mxu1 %v2388_v25 }
 0xa01   :  { %v2389_v17 = vsub.f32 %v16860_v1, %v2373_v14  ;;  %v2376_v6 = vmul.f32 0.5, %v13207_v61 }
 0xa02   :  { %v2352_v56 = vpop.f32.mrf.mxu1 }
 0xa03   :  { %v2392_v19 = vsub.f32 %v16869_v49, %v2376_v6  ;;  %v2375_v35 = vmul.f32 0.5, %v2352_v56  ;;  %13314 = vmatprep.mubr.f32.mxu1 %v2389_v17 }
 0xa04   :  { %13315 = vmatmul.mubr.f32.gmra.mxu1 %v2390_v41 }
 0xa05   :  { %v2391_v21 = vsub.f32 %v16871_v36, %v2375_v35  ;;  %13208 = vmatprep.subr.mxu0 %v2392_v19 }
 0xa06   :  { %13209 = vmatpush3.msra.mxu0 %v2392_v19 }
 0xa07   :  { %13210 = vmatprep.subr.mxu0 %v2391_v21  ;;  %13317 = vmatprep.mubr.f32.mxu1 %v2391_v21 }
 0xa08   :  { %13211 = vmatpush3.msra.mxu0 %v2391_v21  ;;  %13318 = vmatmul.mubr.f32.gmra.mxu1 %v2392_v19 }
 0xa09   :  { %13212 = vmatprep.subr.mxu0 %v2390_v41 }
 0xa0a   :  { %13213 = vmatpush3.msra.mxu0 %v2390_v41 }
 0xa0b   :  { %13214 = vmatprep.subr.mxu0 %v2389_v17 }
 0xa0c   :  { %13215 = vmatpush3.msra.mxu0 %v2389_v17 }
 0xa0d   :  { %13216 = vmatprep.subr.mxu0 %v2388_v25 }
 0xa0e   :  { %13217 = vmatpush3.msra.mxu0 %v2388_v25 }
 0xa0f   :  { %13218 = vmatprep.subr.mxu0 %v2387_v50 }
 0xa10   :  { %13219 = vmatpush3.msra.mxu0 %v2387_v50 }
 0xa11   :  { %13220 = vmatprep.subr.mxu0 %v2386_v20 }
 0xa12   :  { %13221 = vmatpush3.msra.mxu0 %v2386_v20 }
 0xa13   :  { %13222 = vmatprep.subr.mxu0 %v2385_v43 }
 0xa14   :  { %13223 = vmatpush3.msra.mxu0 %v2385_v43 }
 0xa15   :  { %13224 = vmatprep.subr.mxu0 %v2384_v30 }
 0xa16   :  { %13225 = vmatpush3.msra.mxu0 %v2384_v30 }
 0xa17   :  { %13226 = vmatprep.subr.mxu0 %v2383_v0 }
 0xa18   :  { %13227 = vmatpush3.msra.mxu0 %v2383_v0 }
 0xa19   :  { %13228 = vmatprep.subr.mxu0 %v2382_v28 }
 0xa1a   :  { %13229 = vmatpush3.msra.mxu0 %v2382_v28 }
 0xa1b   :  { %13230 = vmatprep.subr.mxu0 %v17179_v12 }
 0xa1c   :  { %13231 = vmatpush3.msra.mxu0 %v17179_v12 }
 0xa1d   :  { %13232 = vmatprep.subr.mxu0 %v17174_v60 }
 0xa1e   :  { %13233 = vmatpush3.msra.mxu0 %v17174_v60 }
 0xa1f   :  { %13234 = vmatprep.subr.mxu0 %v17171_v63 }
 0xa20   :  { %13235 = vmatpush3.msra.mxu0 %v17171_v63 }
 0xa21   :  { %13236 = vmatprep.subr.mxu0 %v17166_v59 }
 0xa22   :  { %13237 = vmatpush3.msra.mxu0 %v17166_v59 }
 0xa23   :  { %13238 = vmatprep.subr.mxu0 %v17163_v46 }
 0xa24   :  { %13239 = vmatpush3.msra.mxu0 %v17163_v46 }
 0xa25   :  { %13241 = vmatmul.mubr.f32.vlgmr.msra.gmra.mxu0 %v17067_v9 }
 0xa26   :  { %13243 = vmatprep.mubr.f32.mxu0 %v17071_v2 }
 0xa29   :  { %13244 = vmatmul.mubr.f32.gmra.mxu0 %v17069_v34 }
 0xa2a   :  { %13246 = vmatprep.mubr.f32.mxu0 %v17077_v54 }
 0xa2d   :  { %13247 = vmatmul.mubr.f32.gmra.mxu0 %v17073_v16 }
 0xa2e   :  { %13249 = vmatprep.mubr.f32.mxu0 %v17083_v38 }
 0xa31   :  { %13250 = vmatmul.mubr.f32.gmra.mxu0 %v17079_v58 }
 0xa32   :  { %13252 = vmatprep.mubr.f32.mxu0 %v17089_v29 }
 0xa35   :  { %13253 = vmatmul.mubr.f32.gmra.mxu0 %v17085_v22 }
 0xa36   :  { %13255 = vmatprep.mubr.f32.mxu0 %v17095_v27 }
 0xa39   :  { %13256 = vmatmul.mubr.f32.gmra.mxu0 %v17091_v62 }
 0xa3a   :  { %13258 = vmatprep.mubr.f32.mxu0 %v17101_v53 }
 0xa3d   :  { %13259 = vmatmul.mubr.f32.gmra.mxu0 %v17097_v8 }
 0xa3e   :  { %13261 = vmatprep.mubr.f32.mxu0 %v17108_v33 }
 0xa41   :  { %13262 = vmatmul.mubr.f32.gmra.mxu0 %v17103_v48 }
 0xaac   :  { %v17218_v9 = vpop.f32.mrf.mxu1 }
 0xaae   :  { %v17220_v34 = vpop.f32.mrf.mxu1 }
 0xaaf   :  { %13352 = vmatprep.mubr.f32.mxu0 %v17220_v34 }
 0xab0   :  { %v17231_v22 = vpop.f32.mrf.mxu1 }
 0xab2   :  { %v17237_v27 = vpop.f32.mrf.mxu1 }
 0xab4   :  { %v17243_v48 = vpop.f32.mrf.mxu1 }
 0xab6   :  { %v17249_v59 = vpop.f32.mrf.mxu1 }
 0xab8   :  { %v17255_v12 = vpop.f32.mrf.mxu1 }
 0xaba   :  { %v17262_v30 = vpop.f32.mrf.mxu1 }
 0xabc   :  { %v13310_v20 = vpop.f32.mrf.mxu1 }
 0xabe   :  { %v2644_v55 = vpop.f32.mrf.mxu1 }
 0xac0   :  { %v13313_v11 = vpop.f32.mrf.mxu1 }
 0xac2   :  { %v2654_v37 = vpop.f32.mrf.mxu1 }
 0xac4   :  { %v13316_v50 = vpop.f32.mrf.mxu1 }
 0xac6   :  { %v2664_v25 = vpop.f32.mrf.mxu1 }
 0xac8   :  { %v13319_v32 = vpop.f32.mrf.mxu1 }
 0xaca   :  { %v2674_v24 = vpop.f32.mrf.mxu1 }
 0xae5   :  { %v17223_v2 = vpop.f32.mrf.mxu0 }
 0xae7   :  { %v2459_v16 = vpop.f32.mrf.mxu0 }
 0xae8   :  { %13408 = vmatprep.mubr.f32.mxu1 %v2459_v16 }
 0xae9   :  { %v17225_v54 = vpop.f32.mrf.mxu0 }
 0xaeb   :  { %v17227_v58 = vpop.f32.mrf.mxu0 }
 0xaed   :  { %v17229_v38 = vpop.f32.mrf.mxu0 }
 0xaef   :  { %v17233_v29 = vpop.f32.mrf.mxu0 }
 0xaf1   :  { %v17235_v62 = vpop.f32.mrf.mxu0 }
 0xaf3   :  { %v17239_v8 = vpop.f32.mrf.mxu0 }
 0xaf5   :  { %v17241_v53 = vpop.f32.mrf.mxu0 }
 0xaf7   :  { %v17245_v33 = vpop.f32.mrf.mxu0 }
 0xaf9   :  { %v17247_v46 = vpop.f32.mrf.mxu0 }
 0xafb   :  { %v17251_v63 = vpop.f32.mrf.mxu0 }
 0xafd   :  { %v17253_v60 = vpop.f32.mrf.mxu0 }
 0xaff   :  { %v17257_v28 = vpop.f32.mrf.mxu0 }
 0xb01   :  { %v17259_v0 = vpop.f32.mrf.mxu0 }
 0xb02   :  { %13320 = vmatprep.subr.mxu0 %v17259_v0 }
 0xb03   :  { %v17264_v43 = vpop.f32.mrf.mxu0  ;;  %13321 = vmatpush3.msra.mxu0 %v17259_v0 }
 0xb04   :  { %13322 = vmatprep.subr.mxu0 %v17264_v43 }
 0xb05   :  { %13323 = vmatpush3.msra.mxu0 %v17264_v43 }
 0xb06   :  { %13324 = vmatprep.subr.mxu0 %v17253_v60 }
 0xb07   :  { %13325 = vmatpush3.msra.mxu0 %v17253_v60 }
 0xb08   :  { %13326 = vmatprep.subr.mxu0 %v17257_v28 }
 0xb09   :  { %13327 = vmatpush3.msra.mxu0 %v17257_v28 }
 0xb0a   :  { %13328 = vmatprep.subr.mxu0 %v17247_v46 }
 0xb0b   :  { %13329 = vmatpush3.msra.mxu0 %v17247_v46 }
 0xb0c   :  { %13330 = vmatprep.subr.mxu0 %v17251_v63 }
 0xb0d   :  { %13331 = vmatpush3.msra.mxu0 %v17251_v63 }
 0xb0e   :  { %13332 = vmatprep.subr.mxu0 %v17241_v53 }
 0xb0f   :  { %13333 = vmatpush3.msra.mxu0 %v17241_v53 }
 0xb10   :  { %13334 = vmatprep.subr.mxu0 %v17245_v33 }
 0xb11   :  { %13335 = vmatpush3.msra.mxu0 %v17245_v33 }
 0xb12   :  { %13336 = vmatprep.subr.mxu0 %v17235_v62 }
 0xb13   :  { %13337 = vmatpush3.msra.mxu0 %v17235_v62 }
 0xb14   :  { %13338 = vmatprep.subr.mxu0 %v17239_v8 }
 0xb15   :  { %13339 = vmatpush3.msra.mxu0 %v17239_v8 }
 0xb16   :  { %13340 = vmatprep.subr.mxu0 %v17229_v38 }
 0xb17   :  { %13341 = vmatpush3.msra.mxu0 %v17229_v38 }
 0xb18   :  { %13342 = vmatprep.subr.mxu0 %v17233_v29 }
 0xb19   :  { %13343 = vmatpush3.msra.mxu0 %v17233_v29 }
 0xb1a   :  { %13344 = vmatprep.subr.mxu0 %v17225_v54 }
 0xb1b   :  { %13345 = vmatpush3.msra.mxu0 %v17225_v54 }
 0xb1c   :  { %13346 = vmatprep.subr.mxu0 %v17227_v58 }
 0xb1d   :  { %13347 = vmatpush3.msra.mxu0 %v17227_v58 }
 0xb1e   :  { %13348 = vmatprep.subr.mxu0 %v17223_v2 }
 0xb1f   :  { %13349 = vmatpush3.msra.mxu0 %v17223_v2 }
 0xb20   :  { %13350 = vmatprep.subr.mxu0 %v2459_v16 }
 0xb21   :  { %13351 = vmatpush3.msra.mxu0 %v2459_v16 }
 0xb22   :  { %13353 = vmatmul.mubr.f32.vlgmr.msra.gmra.mxu0 %v17218_v9  ;;  %13432 = vmatprep.subr.mxu0 %v13319_v32 }
 0xb23   :  { %13355 = vmatprep.mubr.f32.mxu0 %v17237_v27  ;;  %13433 = vmatpush3.msra.mxu0 %v13319_v32 }
 0xb24   :  { %13434 = vmatprep.subr.mxu0 %v2674_v24 }
 0xb25   :  { %13435 = vmatpush3.msra.mxu0 %v2674_v24 }
 0xb26   :  { %13356 = vmatmul.mubr.f32.gmra.mxu0 %v17231_v22  ;;  %13436 = vmatprep.subr.mxu0 %v13316_v50 }
 0xb27   :  { %13358 = vmatprep.mubr.f32.mxu0 %v17249_v59  ;;  %13437 = vmatpush3.msra.mxu0 %v13316_v50 }
 0xb28   :  { %13438 = vmatprep.subr.mxu0 %v2664_v25 }
 0xb29   :  { %13439 = vmatpush3.msra.mxu0 %v2664_v25 }
 0xb2a   :  { %13359 = vmatmul.mubr.f32.gmra.mxu0 %v17243_v48  ;;  %13440 = vmatprep.subr.mxu0 %v13313_v11 }
 0xb2b   :  { %13361 = vmatprep.mubr.f32.mxu0 %v17262_v30  ;;  %13441 = vmatpush3.msra.mxu0 %v13313_v11 }
 0xb2c   :  { %13442 = vmatprep.subr.mxu0 %v2654_v37 }
 0xb2d   :  { %13443 = vmatpush3.msra.mxu0 %v2654_v37 }
 0xb2e   :  { %13362 = vmatmul.mubr.f32.gmra.mxu0 %v17255_v12  ;;  %13444 = vmatprep.subr.mxu0 %v13310_v20 }
 0xb2f   :  { %13364 = vmatprep.mubr.f32.mxu0 %v2644_v55  ;;  %13445 = vmatpush3.msra.mxu0 %v13310_v20 }
 0xb30   :  { %13446 = vmatprep.subr.mxu0 %v2644_v55 }
 0xb31   :  { %13447 = vmatpush3.msra.mxu0 %v2644_v55 }
 0xb32   :  { %13365 = vmatmul.mubr.f32.gmra.mxu0 %v13310_v20  ;;  %13448 = vmatprep.subr.mxu0 %v17255_v12 }
 0xb33   :  { %13367 = vmatprep.mubr.f32.mxu0 %v2654_v37  ;;  %13449 = vmatpush3.msra.mxu0 %v17255_v12 }
 0xb34   :  { %13450 = vmatprep.subr.mxu0 %v17262_v30 }
 0xb35   :  { %13451 = vmatpush3.msra.mxu0 %v17262_v30 }
 0xb36   :  { %13368 = vmatmul.mubr.f32.gmra.mxu0 %v13313_v11  ;;  %13452 = vmatprep.subr.mxu0 %v17243_v48 }
 0xb37   :  { %13370 = vmatprep.mubr.f32.mxu0 %v2664_v25  ;;  %13453 = vmatpush3.msra.mxu0 %v17243_v48 }
 0xb38   :  { %13454 = vmatprep.subr.mxu0 %v17249_v59 }
 0xb39   :  { %13455 = vmatpush3.msra.mxu0 %v17249_v59 }
 0xb3a   :  { %13371 = vmatmul.mubr.f32.gmra.mxu0 %v13316_v50  ;;  %13456 = vmatprep.subr.mxu0 %v17231_v22 }
 0xb3b   :  { %13373 = vmatprep.mubr.f32.mxu0 %v2674_v24  ;;  %13457 = vmatpush3.msra.mxu0 %v17231_v22 }
 0xb3c   :  { %13458 = vmatprep.subr.mxu0 %v17237_v27 }
 0xb3d   :  { %13459 = vmatpush3.msra.mxu0 %v17237_v27 }
 0xb3e   :  { %13374 = vmatmul.mubr.f32.gmra.mxu0 %v13319_v32  ;;  %13460 = vmatprep.subr.mxu0 %v17218_v9 }
 0xb3f   :  { %13461 = vmatpush3.msra.mxu0 %v17218_v9 }
 0xb40   :  { %13462 = vmatprep.subr.mxu0 %v17220_v34 }
 0xb41   :  { %13463 = vmatpush3.msra.mxu0 %v17220_v34 }
 0xbe2   :  { %v13354_v14 = vpop.f32.mrf.mxu0 }
 0xbe3   :  { %v2829_v61 = vmul.f32 0.5, %v13354_v14 }
 0xbe4   :  { %v2749_v17 = vpop.f32.mrf.mxu0 }
 0xbe5   :  { %v2828_v6 = vmul.f32 0.5, %v2749_v17  ;;  %v17322_v19 = vsub.f32 %v16768_v39, %v2829_v61 }
 0xbe6   :  { %v13357_v41 = vpop.f32.mrf.mxu0 }
 0xbe7   :  { %v17319_v56 = vsub.f32 %v16766_v10, %v2828_v6  ;;  %v2831_v35 = vmul.f32 0.5, %v13357_v41 }
 0xbe8   :  { %v2759_v21 = vpop.f32.mrf.mxu0 }
 0xbe9   :  { %v2830_v16 = vmul.f32 0.5, %v2759_v21  ;;  %13464 = vmatprep.mubr.f32.mxu0 %v17319_v56  ;;  %v17330_v22 = vsub.f32 %v16781_v26, %v2831_v35 }
 0xbea   :  { %v13360_v9 = vpop.f32.mrf.mxu0  ;;  %13465 = vmatmul.mubr.f32.vlgmr.msra.gmra.mxu0 %v17322_v19 }
 0xbeb   :  { %v17327_v34 = vsub.f32 %v16776_v23, %v2830_v16  ;;  %v2833_v27 = vmul.f32 0.5, %v13360_v9 }
 0xbec   :  { %v2769_v48 = vpop.f32.mrf.mxu0 }
 0xbed   :  { %v2832_v59 = vmul.f32 0.5, %v2769_v48  ;;  %13467 = vmatprep.mubr.f32.mxu0 %v17327_v34  ;;  %v2849_v20 = vsub.f32 %v16799_v31, %v2833_v27 }
 0xbee   :  { %v13363_v12 = vpop.f32.mrf.mxu0  ;;  %13468 = vmatmul.mubr.f32.gmra.mxu0 %v17330_v22 }
 0xbef   :  { %v17335_v30 = vsub.f32 %v16794_v13, %v2832_v59  ;;  %v2835_v55 = vmul.f32 0.5, %v13363_v12 }
 0xbf0   :  { %v2779_v11 = vpop.f32.mrf.mxu0 }
 0xbf1   :  { %v2834_v37 = vmul.f32 0.5, %v2779_v11  ;;  %13470 = vmatprep.mubr.f32.mxu0 %v17335_v30  ;;  %v2851_v32 = vsub.f32 %v16817_v7, %v2835_v55 }
 0xbf2   :  { %v13366_v50 = vpop.f32.mrf.mxu0  ;;  %13471 = vmatmul.mubr.f32.gmra.mxu0 %v2849_v20 }
 0xbf3   :  { %v2850_v25 = vsub.f32 %v16812_v18, %v2834_v37  ;;  %v2837_v24 = vmul.f32 0.5, %v13366_v50 }
 0xbf4   :  { %v2789_v14 = vpop.f32.mrf.mxu0 }
 0xbf5   :  { %v2836_v61 = vmul.f32 0.5, %v2789_v14  ;;  %13473 = vmatprep.mubr.f32.mxu0 %v2850_v25  ;;  %v2853_v41 = vsub.f32 %v16835_v45, %v2837_v24 }
 0xbf6   :  { %v13369_v17 = vpop.f32.mrf.mxu0  ;;  %13474 = vmatmul.mubr.f32.gmra.mxu0 %v2851_v32 }
 0xbf7   :  { %v2852_v6 = vsub.f32 %v16830_v40, %v2836_v61  ;;  %v2839_v35 = vmul.f32 0.5, %v13369_v17 }
 0xbf8   :  { %v2799_v21 = vpop.f32.mrf.mxu0 }
 0xbf9   :  { %v2838_v16 = vmul.f32 0.5, %v2799_v21  ;;  %13476 = vmatprep.mubr.f32.mxu0 %v2852_v6  ;;  %v2855_v48 = vsub.f32 %v16848_v42, %v2839_v35 }
 0xbfa   :  { %v13372_v9 = vpop.f32.mrf.mxu0  ;;  %13477 = vmatmul.mubr.f32.gmra.mxu0 %v2853_v41 }
 0xbfb   :  { %v2854_v27 = vsub.f32 %v16845_v4, %v2838_v16  ;;  %v2841_v59 = vmul.f32 0.5, %v13372_v9 }
 0xbfc   :  { %v2809_v12 = vpop.f32.mrf.mxu0 }
 0xbfd   :  { %v2840_v55 = vmul.f32 0.5, %v2809_v12  ;;  %13479 = vmatprep.mubr.f32.mxu0 %v2854_v27  ;;  %v2857_v24 = vsub.f32 %v16863_v51, %v2841_v59 }
 0xbfe   :  { %v13375_v11 = vpop.f32.mrf.mxu0  ;;  %13480 = vmatmul.mubr.f32.gmra.mxu0 %v2855_v48 }
 0xbff   :  { %v2856_v37 = vsub.f32 %v16860_v1, %v2840_v55  ;;  %v2843_v50 = vmul.f32 0.5, %v13375_v11 }
 0xc00   :  { %v2819_v14 = vpop.f32.mrf.mxu0 }
 0xc01   :  { %v2859_v61 = vsub.f32 %v16869_v49, %v2843_v50  ;;  %v2842_v17 = vmul.f32 0.5, %v2819_v14  ;;  %13482 = vmatprep.mubr.f32.mxu0 %v2856_v37 }
 0xc02   :  { %13483 = vmatmul.mubr.f32.gmra.mxu0 %v2857_v24 }
 0xc03   :  { %v2858_v21 = vsub.f32 %v16871_v36, %v2842_v17  ;;  %13376 = vmatprep.subr.mxu1 %v2859_v61 }
 0xc04   :  { %13377 = vmatpush3.msra.mxu1 %v2859_v61 }
 0xc05   :  { %13378 = vmatprep.subr.mxu1 %v2858_v21  ;;  %13485 = vmatprep.mubr.f32.mxu0 %v2858_v21 }
 0xc06   :  { %13379 = vmatpush3.msra.mxu1 %v2858_v21  ;;  %13486 = vmatmul.mubr.f32.gmra.mxu0 %v2859_v61 }
 0xc07   :  { %13380 = vmatprep.subr.mxu1 %v2857_v24 }
 0xc08   :  { %13381 = vmatpush3.msra.mxu1 %v2857_v24 }
 0xc09   :  { %13382 = vmatprep.subr.mxu1 %v2856_v37 }
 0xc0a   :  { %13383 = vmatpush3.msra.mxu1 %v2856_v37 }
 0xc0b   :  { %13384 = vmatprep.subr.mxu1 %v2855_v48 }
 0xc0c   :  { %13385 = vmatpush3.msra.mxu1 %v2855_v48 }
 0xc0d   :  { %13386 = vmatprep.subr.mxu1 %v2854_v27 }
 0xc0e   :  { %13387 = vmatpush3.msra.mxu1 %v2854_v27 }
 0xc0f   :  { %13388 = vmatprep.subr.mxu1 %v2853_v41 }
 0xc10   :  { %13389 = vmatpush3.msra.mxu1 %v2853_v41 }
 0xc11   :  { %13390 = vmatprep.subr.mxu1 %v2852_v6 }
 0xc12   :  { %13391 = vmatpush3.msra.mxu1 %v2852_v6 }
 0xc13   :  { %13392 = vmatprep.subr.mxu1 %v2851_v32 }
 0xc14   :  { %13393 = vmatpush3.msra.mxu1 %v2851_v32 }
 0xc15   :  { %13394 = vmatprep.subr.mxu1 %v2850_v25 }
 0xc16   :  { %13395 = vmatpush3.msra.mxu1 %v2850_v25 }
 0xc17   :  { %13396 = vmatprep.subr.mxu1 %v2849_v20 }
 0xc18   :  { %13397 = vmatpush3.msra.mxu1 %v2849_v20 }
 0xc19   :  { %13398 = vmatprep.subr.mxu1 %v17335_v30 }
 0xc1a   :  { %13399 = vmatpush3.msra.mxu1 %v17335_v30 }
 0xc1b   :  { %13400 = vmatprep.subr.mxu1 %v17330_v22 }
 0xc1c   :  { %13401 = vmatpush3.msra.mxu1 %v17330_v22 }
 0xc1d   :  { %13402 = vmatprep.subr.mxu1 %v17327_v34 }
 0xc1e   :  { %13403 = vmatpush3.msra.mxu1 %v17327_v34 }
 0xc1f   :  { %13404 = vmatprep.subr.mxu1 %v17322_v19 }
 0xc20   :  { %13405 = vmatpush3.msra.mxu1 %v17322_v19 }
 0xc21   :  { %13406 = vmatprep.subr.mxu1 %v17319_v56 }
 0xc22   :  { %13407 = vmatpush3.msra.mxu1 %v17319_v56 }
 0xc23   :  { %13409 = vmatmul.mubr.f32.vlgmr.msra.gmra.mxu1 %v17223_v2 }
 0xc24   :  { %13411 = vmatprep.mubr.f32.mxu1 %v17227_v58 }
 0xc27   :  { %13412 = vmatmul.mubr.f32.gmra.mxu1 %v17225_v54 }
 0xc28   :  { %13414 = vmatprep.mubr.f32.mxu1 %v17233_v29 }
 0xc2b   :  { %13415 = vmatmul.mubr.f32.gmra.mxu1 %v17229_v38 }
 0xc2c   :  { %13417 = vmatprep.mubr.f32.mxu1 %v17239_v8 }
 0xc2f   :  { %13418 = vmatmul.mubr.f32.gmra.mxu1 %v17235_v62 }
 0xc30   :  { %13420 = vmatprep.mubr.f32.mxu1 %v17245_v33 }
 0xc33   :  { %13421 = vmatmul.mubr.f32.gmra.mxu1 %v17241_v53 }
 0xc34   :  { %13423 = vmatprep.mubr.f32.mxu1 %v17251_v63 }
 0xc37   :  { %13424 = vmatmul.mubr.f32.gmra.mxu1 %v17247_v46 }
 0xc38   :  { %13426 = vmatprep.mubr.f32.mxu1 %v17257_v28 }
 0xc3b   :  { %13427 = vmatmul.mubr.f32.gmra.mxu1 %v17253_v60 }
 0xc3c   :  { %13429 = vmatprep.mubr.f32.mxu1 %v17264_v43 }
 0xc3f   :  { %13430 = vmatmul.mubr.f32.gmra.mxu1 %v17259_v0 }
 0xcaa   :  { %v17374_v2 = vpop.f32.mrf.mxu0 }
 0xcac   :  { %v17376_v54 = vpop.f32.mrf.mxu0 }
 0xcad   :  { %13520 = vmatprep.mubr.f32.mxu1 %v17376_v54 }
 0xcae   :  { %v17387_v53 = vpop.f32.mrf.mxu0 }
 0xcb0   :  { %v17393_v63 = vpop.f32.mrf.mxu0 }
 0xcb2   :  { %v17399_v0 = vpop.f32.mrf.mxu0 }
 0xcb4   :  { %v17405_v19 = vpop.f32.mrf.mxu0 }
 0xcb6   :  { %v17411_v30 = vpop.f32.mrf.mxu0 }
 0xcb8   :  { %v17418_v32 = vpop.f32.mrf.mxu0 }
 0xcba   :  { %v13478_v41 = vpop.f32.mrf.mxu0 }
 0xcbc   :  { %v3111_v35 = vpop.f32.mrf.mxu0 }
 0xcbe   :  { %v13481_v16 = vpop.f32.mrf.mxu0 }
 0xcc0   :  { %v3121_v9 = vpop.f32.mrf.mxu0 }
 0xcc2   :  { %v13484_v27 = vpop.f32.mrf.mxu0 }
 0xcc4   :  { %v3131_v48 = vpop.f32.mrf.mxu0 }
 0xcc6   :  { %v13487_v59 = vpop.f32.mrf.mxu0 }
 0xcc8   :  { %v3141_v12 = vpop.f32.mrf.mxu0 }
 0xce3   :  { %v17379_v58 = vpop.f32.mrf.mxu1 }
 0xce5   :  { %v2926_v38 = vpop.f32.mrf.mxu1 }
 0xce6   :  { %13576 = vmatprep.mubr.f32.mxu0 %v2926_v38 }
 0xce7   :  { %v17381_v29 = vpop.f32.mrf.mxu1 }
 0xce9   :  { %v17383_v62 = vpop.f32.mrf.mxu1 }
 0xceb   :  { %v17385_v8 = vpop.f32.mrf.mxu1 }
 0xced   :  { %v17389_v33 = vpop.f32.mrf.mxu1 }
 0xcef   :  { %v17391_v46 = vpop.f32.mrf.mxu1 }
 0xcf1   :  { %v17395_v60 = vpop.f32.mrf.mxu1 }
 0xcf3   :  { %v17397_v28 = vpop.f32.mrf.mxu1 }
 0xcf5   :  { %v17401_v43 = vpop.f32.mrf.mxu1 }
 0xcf7   :  { %v17403_v56 = vpop.f32.mrf.mxu1 }
 0xcf9   :  { %v17407_v34 = vpop.f32.mrf.mxu1 }
 0xcfb   :  { %v17409_v22 = vpop.f32.mrf.mxu1 }
 0xcfd   :  { %v17413_v20 = vpop.f32.mrf.mxu1 }
 0xcff   :  { %v17415_v25 = vpop.f32.mrf.mxu1 }
 0xd00   :  { %13488 = vmatprep.subr.mxu1 %v17415_v25 }
 0xd01   :  { %v17420_v6 = vpop.f32.mrf.mxu1  ;;  %13489 = vmatpush3.msra.mxu1 %v17415_v25 }
 0xd02   :  { %13490 = vmatprep.subr.mxu1 %v17420_v6 }
 0xd03   :  { %13491 = vmatpush3.msra.mxu1 %v17420_v6 }
 0xd04   :  { %13492 = vmatprep.subr.mxu1 %v17409_v22 }
 0xd05   :  { %13493 = vmatpush3.msra.mxu1 %v17409_v22 }
 0xd06   :  { %13494 = vmatprep.subr.mxu1 %v17413_v20 }
 0xd07   :  { %13495 = vmatpush3.msra.mxu1 %v17413_v20 }
 0xd08   :  { %13496 = vmatprep.subr.mxu1 %v17403_v56 }
 0xd09   :  { %13497 = vmatpush3.msra.mxu1 %v17403_v56 }
 0xd0a   :  { %13498 = vmatprep.subr.mxu1 %v17407_v34 }
 0xd0b   :  { %13499 = vmatpush3.msra.mxu1 %v17407_v34 }
 0xd0c   :  { %13500 = vmatprep.subr.mxu1 %v17397_v28 }
 0xd0d   :  { %13501 = vmatpush3.msra.mxu1 %v17397_v28 }
 0xd0e   :  { %13502 = vmatprep.subr.mxu1 %v17401_v43 }
 0xd0f   :  { %13503 = vmatpush3.msra.mxu1 %v17401_v43 }
 0xd10   :  { %13504 = vmatprep.subr.mxu1 %v17391_v46 }
 0xd11   :  { %13505 = vmatpush3.msra.mxu1 %v17391_v46 }
 0xd12   :  { %13506 = vmatprep.subr.mxu1 %v17395_v60 }
 0xd13   :  { %13507 = vmatpush3.msra.mxu1 %v17395_v60 }
 0xd14   :  { %13508 = vmatprep.subr.mxu1 %v17385_v8 }
 0xd15   :  { %13509 = vmatpush3.msra.mxu1 %v17385_v8 }
 0xd16   :  { %13510 = vmatprep.subr.mxu1 %v17389_v33 }
 0xd17   :  { %13511 = vmatpush3.msra.mxu1 %v17389_v33 }
 0xd18   :  { %13512 = vmatprep.subr.mxu1 %v17381_v29 }
 0xd19   :  { %13513 = vmatpush3.msra.mxu1 %v17381_v29 }
 0xd1a   :  { %13514 = vmatprep.subr.mxu1 %v17383_v62 }
 0xd1b   :  { %13515 = vmatpush3.msra.mxu1 %v17383_v62 }
 0xd1c   :  { %13516 = vmatprep.subr.mxu1 %v17379_v58 }
 0xd1d   :  { %13517 = vmatpush3.msra.mxu1 %v17379_v58 }
 0xd1e   :  { %13518 = vmatprep.subr.mxu1 %v2926_v38 }
 0xd1f   :  { %13519 = vmatpush3.msra.mxu1 %v2926_v38 }
 0xd20   :  { %13521 = vmatmul.mubr.f32.vlgmr.msra.gmra.mxu1 %v17374_v2  ;;  %13600 = vmatprep.subr.mxu1 %v13487_v59 }
 0xd21   :  { %13523 = vmatprep.mubr.f32.mxu1 %v17393_v63  ;;  %13601 = vmatpush3.msra.mxu1 %v13487_v59 }
 0xd22   :  { %13602 = vmatprep.subr.mxu1 %v3141_v12 }
 0xd23   :  { %13603 = vmatpush3.msra.mxu1 %v3141_v12 }
 0xd24   :  { %13524 = vmatmul.mubr.f32.gmra.mxu1 %v17387_v53  ;;  %13604 = vmatprep.subr.mxu1 %v13484_v27 }
 0xd25   :  { %13526 = vmatprep.mubr.f32.mxu1 %v17405_v19  ;;  %13605 = vmatpush3.msra.mxu1 %v13484_v27 }
 0xd26   :  { %13606 = vmatprep.subr.mxu1 %v3131_v48 }
 0xd27   :  { %13607 = vmatpush3.msra.mxu1 %v3131_v48 }
 0xd28   :  { %13527 = vmatmul.mubr.f32.gmra.mxu1 %v17399_v0  ;;  %13608 = vmatprep.subr.mxu1 %v13481_v16 }
 0xd29   :  { %13529 = vmatprep.mubr.f32.mxu1 %v17418_v32  ;;  %13609 = vmatpush3.msra.mxu1 %v13481_v16 }
 0xd2a   :  { %13610 = vmatprep.subr.mxu1 %v3121_v9 }
 0xd2b   :  { %13611 = vmatpush3.msra.mxu1 %v3121_v9 }
 0xd2c   :  { %13530 = vmatmul.mubr.f32.gmra.mxu1 %v17411_v30  ;;  %13612 = vmatprep.subr.mxu1 %v13478_v41 }
 0xd2d   :  { %13532 = vmatprep.mubr.f32.mxu1 %v3111_v35  ;;  %13613 = vmatpush3.msra.mxu1 %v13478_v41 }
 0xd2e   :  { %13614 = vmatprep.subr.mxu1 %v3111_v35 }
 0xd2f   :  { %13615 = vmatpush3.msra.mxu1 %v3111_v35 }
 0xd30   :  { %13533 = vmatmul.mubr.f32.gmra.mxu1 %v13478_v41  ;;  %13616 = vmatprep.subr.mxu1 %v17411_v30 }
 0xd31   :  { %13535 = vmatprep.mubr.f32.mxu1 %v3121_v9  ;;  %13617 = vmatpush3.msra.mxu1 %v17411_v30 }
 0xd32   :  { %13618 = vmatprep.subr.mxu1 %v17418_v32 }
 0xd33   :  { %13619 = vmatpush3.msra.mxu1 %v17418_v32 }
 0xd34   :  { %13536 = vmatmul.mubr.f32.gmra.mxu1 %v13481_v16  ;;  %13620 = vmatprep.subr.mxu1 %v17399_v0 }
 0xd35   :  { %13538 = vmatprep.mubr.f32.mxu1 %v3131_v48  ;;  %13621 = vmatpush3.msra.mxu1 %v17399_v0 }
 0xd36   :  { %13622 = vmatprep.subr.mxu1 %v17405_v19 }
 0xd37   :  { %13623 = vmatpush3.msra.mxu1 %v17405_v19 }
 0xd38   :  { %13539 = vmatmul.mubr.f32.gmra.mxu1 %v13484_v27  ;;  %13624 = vmatprep.subr.mxu1 %v17387_v53 }
 0xd39   :  { %13541 = vmatprep.mubr.f32.mxu1 %v3141_v12  ;;  %13625 = vmatpush3.msra.mxu1 %v17387_v53 }
 0xd3a   :  { %13626 = vmatprep.subr.mxu1 %v17393_v63 }
 0xd3b   :  { %13627 = vmatpush3.msra.mxu1 %v17393_v63 }
 0xd3c   :  { %13542 = vmatmul.mubr.f32.gmra.mxu1 %v13487_v59  ;;  %13628 = vmatprep.subr.mxu1 %v17374_v2 }
 0xd3d   :  { %13629 = vmatpush3.msra.mxu1 %v17374_v2 }
 0xd3e   :  { %13630 = vmatprep.subr.mxu1 %v17376_v54 }
 0xd3f   :  { %13631 = vmatpush3.msra.mxu1 %v17376_v54 }
 0xde0   :  { %v13522_v55 = vpop.f32.mrf.mxu1 }
 0xde1   :  { %v3296_v11 = vmul.f32 0.5, %v13522_v55 }
 0xde2   :  { %v3216_v37 = vpop.f32.mrf.mxu1 }
 0xde3   :  { %v3295_v50 = vmul.f32 0.5, %v3216_v37  ;;  %v17478_v61 = vsub.f32 %v16768_v39, %v3296_v11 }
 0xde4   :  { %v13525_v24 = vpop.f32.mrf.mxu1 }
 0xde5   :  { %v17475_v14 = vsub.f32 %v16766_v10, %v3295_v50  ;;  %v3298_v17 = vmul.f32 0.5, %v13525_v24 }
 0xde6   :  { %v3226_v21 = vpop.f32.mrf.mxu1 }
 0xde7   :  { %v3297_v38 = vmul.f32 0.5, %v3226_v21  ;;  %13632 = vmatprep.mubr.f32.mxu1 %v17475_v14  ;;  %v17486_v53 = vsub.f32 %v16781_v26, %v3298_v17 }
 0xde8   :  { %v13528_v2 = vpop.f32.mrf.mxu1  ;;  %13633 = vmatmul.mubr.f32.vlgmr.msra.gmra.mxu1 %v17478_v61 }
 0xde9   :  { %v17483_v54 = vsub.f32 %v16776_v23, %v3297_v38  ;;  %v3300_v63 = vmul.f32 0.5, %v13528_v2 }
 0xdea   :  { %v3236_v0 = vpop.f32.mrf.mxu1 }
 0xdeb   :  { %v3299_v19 = vmul.f32 0.5, %v3236_v0  ;;  %13635 = vmatprep.mubr.f32.mxu1 %v17483_v54  ;;  %v3316_v41 = vsub.f32 %v16799_v31, %v3300_v63 }
 0xdec   :  { %v13531_v30 = vpop.f32.mrf.mxu1  ;;  %13636 = vmatmul.mubr.f32.gmra.mxu1 %v17486_v53 }
 0xded   :  { %v17491_v32 = vsub.f32 %v16794_v13, %v3299_v19  ;;  %v3302_v35 = vmul.f32 0.5, %v13531_v30 }
 0xdee   :  { %v3246_v16 = vpop.f32.mrf.mxu1 }
 0xdef   :  { %v3301_v9 = vmul.f32 0.5, %v3246_v16  ;;  %13638 = vmatprep.mubr.f32.mxu1 %v17491_v32  ;;  %v3318_v59 = vsub.f32 %v16817_v7, %v3302_v35 }
 0xdf0   :  { %v13534_v27 = vpop.f32.mrf.mxu1  ;;  %13639 = vmatmul.mubr.f32.gmra.mxu1 %v3316_v41 }
 0xdf1   :  { %v3317_v48 = vsub.f32 %v16812_v18, %v3301_v9  ;;  %v3304_v12 = vmul.f32 0.5, %v13534_v27 }
 0xdf2   :  { %v3256_v55 = vpop.f32.mrf.mxu1 }
 0xdf3   :  { %v3303_v11 = vmul.f32 0.5, %v3256_v55  ;;  %13641 = vmatprep.mubr.f32.mxu1 %v3317_v48  ;;  %v3320_v24 = vsub.f32 %v16835_v45, %v3304_v12 }
 0xdf4   :  { %v13537_v37 = vpop.f32.mrf.mxu1  ;;  %13642 = vmatmul.mubr.f32.gmra.mxu1 %v3318_v59 }
 0xdf5   :  { %v3319_v50 = vsub.f32 %v16830_v40, %v3303_v11  ;;  %v3306_v17 = vmul.f32 0.5, %v13537_v37 }
 0xdf6   :  { %v3266_v21 = vpop.f32.mrf.mxu1 }
 0xdf7   :  { %v3305_v38 = vmul.f32 0.5, %v3266_v21  ;;  %13644 = vmatprep.mubr.f32.mxu1 %v3319_v50  ;;  %v3322_v0 = vsub.f32 %v16848_v42, %v3306_v17 }
 0xdf8   :  { %v13540_v2 = vpop.f32.mrf.mxu1  ;;  %13645 = vmatmul.mubr.f32.gmra.mxu1 %v3320_v24 }
 0xdf9   :  { %v3321_v63 = vsub.f32 %v16845_v4, %v3305_v38  ;;  %v3308_v19 = vmul.f32 0.5, %v13540_v2 }
 0xdfa   :  { %v3276_v30 = vpop.f32.mrf.mxu1 }
 0xdfb   :  { %v3307_v35 = vmul.f32 0.5, %v3276_v30  ;;  %13647 = vmatprep.mubr.f32.mxu1 %v3321_v63  ;;  %v3324_v12 = vsub.f32 %v16863_v51, %v3308_v19 }
 0xdfc   :  { %v13543_v16 = vpop.f32.mrf.mxu1  ;;  %13648 = vmatmul.mubr.f32.gmra.mxu1 %v3322_v0 }
 0xdfd   :  { %v3323_v9 = vsub.f32 %v16860_v1, %v3307_v35  ;;  %v3310_v27 = vmul.f32 0.5, %v13543_v16 }
 0xdfe   :  { %v3286_v55 = vpop.f32.mrf.mxu1 }
 0xdff   :  { %v3326_v11 = vsub.f32 %v16869_v49, %v3310_v27  ;;  %v3309_v37 = vmul.f32 0.5, %v3286_v55  ;;  %13650 = vmatprep.mubr.f32.mxu1 %v3323_v9 }
 0xe00   :  { %13651 = vmatmul.mubr.f32.gmra.mxu1 %v3324_v12 }
 0xe01   :  { %v3325_v21 = vsub.f32 %v16871_v36, %v3309_v37  ;;  %13544 = vmatprep.subr.mxu0 %v3326_v11 }
 0xe02   :  { %13545 = vmatpush3.msra.mxu0 %v3326_v11 }
 0xe03   :  { %13546 = vmatprep.subr.mxu0 %v3325_v21  ;;  %13653 = vmatprep.mubr.f32.mxu1 %v3325_v21 }
 0xe04   :  { %13547 = vmatpush3.msra.mxu0 %v3325_v21  ;;  %13654 = vmatmul.mubr.f32.gmra.mxu1 %v3326_v11 }
 0xe05   :  { %13548 = vmatprep.subr.mxu0 %v3324_v12 }
 0xe06   :  { %13549 = vmatpush3.msra.mxu0 %v3324_v12 }
 0xe07   :  { %13550 = vmatprep.subr.mxu0 %v3323_v9 }
 0xe08   :  { %13551 = vmatpush3.msra.mxu0 %v3323_v9 }
 0xe09   :  { %13552 = vmatprep.subr.mxu0 %v3322_v0 }
 0xe0a   :  { %13553 = vmatpush3.msra.mxu0 %v3322_v0 }
 0xe0b   :  { %13554 = vmatprep.subr.mxu0 %v3321_v63 }
 0xe0c   :  { %13555 = vmatpush3.msra.mxu0 %v3321_v63 }
 0xe0d   :  { %13556 = vmatprep.subr.mxu0 %v3320_v24 }
 0xe0e   :  { %13557 = vmatpush3.msra.mxu0 %v3320_v24 }
 0xe0f   :  { %13558 = vmatprep.subr.mxu0 %v3319_v50 }
 0xe10   :  { %13559 = vmatpush3.msra.mxu0 %v3319_v50 }
 0xe11   :  { %13560 = vmatprep.subr.mxu0 %v3318_v59 }
 0xe12   :  { %13561 = vmatpush3.msra.mxu0 %v3318_v59 }
 0xe13   :  { %13562 = vmatprep.subr.mxu0 %v3317_v48 }
 0xe14   :  { %13563 = vmatpush3.msra.mxu0 %v3317_v48 }
 0xe15   :  { %13564 = vmatprep.subr.mxu0 %v3316_v41 }
 0xe16   :  { %13565 = vmatpush3.msra.mxu0 %v3316_v41 }
 0xe17   :  { %13566 = vmatprep.subr.mxu0 %v17491_v32 }
 0xe18   :  { %13567 = vmatpush3.msra.mxu0 %v17491_v32 }
 0xe19   :  { %13568 = vmatprep.subr.mxu0 %v17486_v53 }
 0xe1a   :  { %13569 = vmatpush3.msra.mxu0 %v17486_v53 }
 0xe1b   :  { %13570 = vmatprep.subr.mxu0 %v17483_v54 }
 0xe1c   :  { %13571 = vmatpush3.msra.mxu0 %v17483_v54 }
 0xe1d   :  { %13572 = vmatprep.subr.mxu0 %v17478_v61 }
 0xe1e   :  { %13573 = vmatpush3.msra.mxu0 %v17478_v61 }
 0xe1f   :  { %13574 = vmatprep.subr.mxu0 %v17475_v14 }
 0xe20   :  { %13575 = vmatpush3.msra.mxu0 %v17475_v14 }
 0xe21   :  { %13577 = vmatmul.mubr.f32.vlgmr.msra.gmra.mxu0 %v17379_v58 }
 0xe22   :  { %13579 = vmatprep.mubr.f32.mxu0 %v17383_v62 }
 0xe25   :  { %13580 = vmatmul.mubr.f32.gmra.mxu0 %v17381_v29 }
 0xe26   :  { %13582 = vmatprep.mubr.f32.mxu0 %v17389_v33 }
 0xe29   :  { %13583 = vmatmul.mubr.f32.gmra.mxu0 %v17385_v8 }
 0xe2a   :  { %13585 = vmatprep.mubr.f32.mxu0 %v17395_v60 }
 0xe2d   :  { %13586 = vmatmul.mubr.f32.gmra.mxu0 %v17391_v46 }
 0xe2e   :  { %13588 = vmatprep.mubr.f32.mxu0 %v17401_v43 }
 0xe31   :  { %13589 = vmatmul.mubr.f32.gmra.mxu0 %v17397_v28 }
 0xe32   :  { %13591 = vmatprep.mubr.f32.mxu0 %v17407_v34 }
 0xe35   :  { %13592 = vmatmul.mubr.f32.gmra.mxu0 %v17403_v56 }
 0xe36   :  { %13594 = vmatprep.mubr.f32.mxu0 %v17413_v20 }
 0xe39   :  { %13595 = vmatmul.mubr.f32.gmra.mxu0 %v17409_v22 }
 0xe3a   :  { %13597 = vmatprep.mubr.f32.mxu0 %v17420_v6 }
 0xe3d   :  { %13598 = vmatmul.mubr.f32.gmra.mxu0 %v17415_v25 }
 0xea8   :  { %v17530_v58 = vpop.f32.mrf.mxu1 }
 0xeaa   :  { %v17532_v29 = vpop.f32.mrf.mxu1 }
 0xeab   :  { %13688 = vmatprep.mubr.f32.mxu0 %v17532_v29 }
 0xeac   :  { %v17543_v28 = vpop.f32.mrf.mxu1 }
 0xeae   :  { %v17549_v34 = vpop.f32.mrf.mxu1 }
 0xeb0   :  { %v17555_v25 = vpop.f32.mrf.mxu1 }
 0xeb2   :  { %v17561_v61 = vpop.f32.mrf.mxu1 }
 0xeb4   :  { %v17567_v32 = vpop.f32.mrf.mxu1 }
 0xeb6   :  { %v17574_v59 = vpop.f32.mrf.mxu1 }
 0xeb8   :  { %v13646_v24 = vpop.f32.mrf.mxu1 }
 0xeba   :  { %v3578_v17 = vpop.f32.mrf.mxu1 }
 0xebc   :  { %v13649_v38 = vpop.f32.mrf.mxu1 }
 0xebe   :  { %v3588_v2 = vpop.f32.mrf.mxu1 }
 0xec0   :  { %v13652_v63 = vpop.f32.mrf.mxu1 }
 0xec2   :  { %v3598_v0 = vpop.f32.mrf.mxu1 }
 0xec4   :  { %v13655_v19 = vpop.f32.mrf.mxu1 }
 0xec6   :  { %v3608_v30 = vpop.f32.mrf.mxu1 }
 0xee1   :  { %v17535_v62 = vpop.f32.mrf.mxu0 }
 0xee3   :  { %v3393_v8 = vpop.f32.mrf.mxu0 }
 0xee4   :  { %13744 = vmatprep.mubr.f32.mxu1 %v3393_v8 }
 0xee5   :  { %v17537_v33 = vpop.f32.mrf.mxu0 }
 0xee7   :  { %v17539_v46 = vpop.f32.mrf.mxu0 }
 0xee9   :  { %v17541_v60 = vpop.f32.mrf.mxu0 }
 0xeeb   :  { %v17545_v43 = vpop.f32.mrf.mxu0 }
 0xeed   :  { %v17547_v56 = vpop.f32.mrf.mxu0 }
 0xeef   :  { %v17551_v22 = vpop.f32.mrf.mxu0 }
 0xef1   :  { %v17553_v20 = vpop.f32.mrf.mxu0 }
 0xef3   :  { %v17557_v6 = vpop.f32.mrf.mxu0 }
 0xef5   :  { %v17559_v14 = vpop.f32.mrf.mxu0 }
 0xef7   :  { %v17563_v54 = vpop.f32.mrf.mxu0 }
 0xef9   :  { %v17565_v53 = vpop.f32.mrf.mxu0 }
 0xefb   :  { %v17569_v41 = vpop.f32.mrf.mxu0 }
 0xefd   :  { %v17571_v48 = vpop.f32.mrf.mxu0 }
 0xefe   :  { %13656 = vmatprep.subr.mxu0 %v17571_v48 }
 0xeff   :  { %v17576_v50 = vpop.f32.mrf.mxu0  ;;  %13657 = vmatpush3.msra.mxu0 %v17571_v48 }
 0xf00   :  { %13658 = vmatprep.subr.mxu0 %v17576_v50 }
 0xf01   :  { %13659 = vmatpush3.msra.mxu0 %v17576_v50 }
 0xf02   :  { %13660 = vmatprep.subr.mxu0 %v17565_v53 }
 0xf03   :  { %13661 = vmatpush3.msra.mxu0 %v17565_v53 }
 0xf04   :  { %13662 = vmatprep.subr.mxu0 %v17569_v41 }
 0xf05   :  { %13663 = vmatpush3.msra.mxu0 %v17569_v41 }
 0xf06   :  { %13664 = vmatprep.subr.mxu0 %v17559_v14 }
 0xf07   :  { %13665 = vmatpush3.msra.mxu0 %v17559_v14 }
 0xf08   :  { %13666 = vmatprep.subr.mxu0 %v17563_v54 }
 0xf09   :  { %13667 = vmatpush3.msra.mxu0 %v17563_v54 }
 0xf0a   :  { %13668 = vmatprep.subr.mxu0 %v17553_v20 }
 0xf0b   :  { %13669 = vmatpush3.msra.mxu0 %v17553_v20 }
 0xf0c   :  { %13670 = vmatprep.subr.mxu0 %v17557_v6 }
 0xf0d   :  { %13671 = vmatpush3.msra.mxu0 %v17557_v6 }
 0xf0e   :  { %13672 = vmatprep.subr.mxu0 %v17547_v56 }
 0xf0f   :  { %13673 = vmatpush3.msra.mxu0 %v17547_v56 }
 0xf10   :  { %13674 = vmatprep.subr.mxu0 %v17551_v22 }
 0xf11   :  { %13675 = vmatpush3.msra.mxu0 %v17551_v22 }
 0xf12   :  { %13676 = vmatprep.subr.mxu0 %v17541_v60 }
 0xf13   :  { %13677 = vmatpush3.msra.mxu0 %v17541_v60 }
 0xf14   :  { %13678 = vmatprep.subr.mxu0 %v17545_v43 }
 0xf15   :  { %13679 = vmatpush3.msra.mxu0 %v17545_v43 }
 0xf16   :  { %13680 = vmatprep.subr.mxu0 %v17537_v33 }
 0xf17   :  { %13681 = vmatpush3.msra.mxu0 %v17537_v33 }
 0xf18   :  { %13682 = vmatprep.subr.mxu0 %v17539_v46 }
 0xf19   :  { %13683 = vmatpush3.msra.mxu0 %v17539_v46 }
 0xf1a   :  { %13684 = vmatprep.subr.mxu0 %v17535_v62 }
 0xf1b   :  { %13685 = vmatpush3.msra.mxu0 %v17535_v62 }
 0xf1c   :  { %13686 = vmatprep.subr.mxu0 %v3393_v8 }
 0xf1d   :  { %13687 = vmatpush3.msra.mxu0 %v3393_v8 }
 0xf1e   :  { %13689 = vmatmul.mubr.f32.vlgmr.msra.gmra.mxu0 %v17530_v58  ;;  %13768 = vmatprep.subr.mxu0 %v13655_v19 }
 0xf1f   :  { %13691 = vmatprep.mubr.f32.mxu0 %v17549_v34  ;;  %13769 = vmatpush3.msra.mxu0 %v13655_v19 }
 0xf20   :  { %13770 = vmatprep.subr.mxu0 %v3608_v30 }
 0xf21   :  { %13771 = vmatpush3.msra.mxu0 %v3608_v30 }
 0xf22   :  { %13692 = vmatmul.mubr.f32.gmra.mxu0 %v17543_v28  ;;  %13772 = vmatprep.subr.mxu0 %v13652_v63 }
 0xf23   :  { %13694 = vmatprep.mubr.f32.mxu0 %v17561_v61  ;;  %13773 = vmatpush3.msra.mxu0 %v13652_v63 }
 0xf24   :  { %13774 = vmatprep.subr.mxu0 %v3598_v0 }
 0xf25   :  { %13775 = vmatpush3.msra.mxu0 %v3598_v0 }
 0xf26   :  { %13695 = vmatmul.mubr.f32.gmra.mxu0 %v17555_v25  ;;  %13776 = vmatprep.subr.mxu0 %v13649_v38 }
 0xf27   :  { %13697 = vmatprep.mubr.f32.mxu0 %v17574_v59  ;;  %13777 = vmatpush3.msra.mxu0 %v13649_v38 }
 0xf28   :  { %13778 = vmatprep.subr.mxu0 %v3588_v2 }
 0xf29   :  { %13779 = vmatpush3.msra.mxu0 %v3588_v2 }
 0xf2a   :  { %13698 = vmatmul.mubr.f32.gmra.mxu0 %v17567_v32  ;;  %13780 = vmatprep.subr.mxu0 %v13646_v24 }
 0xf2b   :  { %13700 = vmatprep.mubr.f32.mxu0 %v3578_v17  ;;  %13781 = vmatpush3.msra.mxu0 %v13646_v24 }
 0xf2c   :  { %13782 = vmatprep.subr.mxu0 %v3578_v17 }
 0xf2d   :  { %13783 = vmatpush3.msra.mxu0 %v3578_v17 }
 0xf2e   :  { %13701 = vmatmul.mubr.f32.gmra.mxu0 %v13646_v24  ;;  %13784 = vmatprep.subr.mxu0 %v17567_v32 }
 0xf2f   :  { %13703 = vmatprep.mubr.f32.mxu0 %v3588_v2  ;;  %13785 = vmatpush3.msra.mxu0 %v17567_v32 }
 0xf30   :  { %13786 = vmatprep.subr.mxu0 %v17574_v59 }
 0xf31   :  { %13787 = vmatpush3.msra.mxu0 %v17574_v59 }
 0xf32   :  { %13704 = vmatmul.mubr.f32.gmra.mxu0 %v13649_v38  ;;  %13788 = vmatprep.subr.mxu0 %v17555_v25 }
 0xf33   :  { %13706 = vmatprep.mubr.f32.mxu0 %v3598_v0  ;;  %13789 = vmatpush3.msra.mxu0 %v17555_v25 }
 0xf34   :  { %13790 = vmatprep.subr.mxu0 %v17561_v61 }
 0xf35   :  { %13791 = vmatpush3.msra.mxu0 %v17561_v61 }
 0xf36   :  { %13707 = vmatmul.mubr.f32.gmra.mxu0 %v13652_v63  ;;  %13792 = vmatprep.subr.mxu0 %v17543_v28 }
 0xf37   :  { %13709 = vmatprep.mubr.f32.mxu0 %v3608_v30  ;;  %13793 = vmatpush3.msra.mxu0 %v17543_v28 }
 0xf38   :  { %13794 = vmatprep.subr.mxu0 %v17549_v34 }
 0xf39   :  { %13795 = vmatpush3.msra.mxu0 %v17549_v34 }
 0xf3a   :  { %13710 = vmatmul.mubr.f32.gmra.mxu0 %v13655_v19  ;;  %13796 = vmatprep.subr.mxu0 %v17530_v58 }
 0xf3b   :  { %13797 = vmatpush3.msra.mxu0 %v17530_v58 }
 0xf3c   :  { %13798 = vmatprep.subr.mxu0 %v17532_v29 }
 0xf3d   :  { %13799 = vmatpush3.msra.mxu0 %v17532_v29 }
 0xfde   :  { %v13690_v35 = vpop.f32.mrf.mxu0 }
 0xfdf   :  { %v3763_v16 = vmul.f32 0.5, %v13690_v35 }
 0xfe0   :  { %v3683_v9 = vpop.f32.mrf.mxu0 }
 0xfe1   :  { %v3762_v27 = vmul.f32 0.5, %v3683_v9  ;;  %v17634_v11 = vsub.f32 %v16768_v39, %v3763_v16 }
 0xfe2   :  { %v13693_v12 = vpop.f32.mrf.mxu0 }
 0xfe3   :  { %v17631_v55 = vsub.f32 %v16766_v10, %v3762_v27  ;;  %v3765_v37 = vmul.f32 0.5, %v13693_v12 }
 0xfe4   :  { %v3693_v21 = vpop.f32.mrf.mxu0 }
 0xfe5   :  { %v3764_v8 = vmul.f32 0.5, %v3693_v21  ;;  %13800 = vmatprep.mubr.f32.mxu0 %v17631_v55  ;;  %v17642_v28 = vsub.f32 %v16781_v26, %v3765_v37 }
 0xfe6   :  { %v13696_v58 = vpop.f32.mrf.mxu0  ;;  %13801 = vmatmul.mubr.f32.vlgmr.msra.gmra.mxu0 %v17634_v11 }
 0xfe7   :  { %v17639_v29 = vsub.f32 %v16776_v23, %v3764_v8  ;;  %v3767_v34 = vmul.f32 0.5, %v13696_v58 }
 0xfe8   :  { %v3703_v25 = vpop.f32.mrf.mxu0 }
 0xfe9   :  { %v3766_v61 = vmul.f32 0.5, %v3703_v25  ;;  %13803 = vmatprep.mubr.f32.mxu0 %v17639_v29  ;;  %v3783_v24 = vsub.f32 %v16799_v31, %v3767_v34 }
 0xfea   :  { %v13699_v32 = vpop.f32.mrf.mxu0  ;;  %13804 = vmatmul.mubr.f32.gmra.mxu0 %v17642_v28 }
 0xfeb   :  { %v17647_v59 = vsub.f32 %v16794_v13, %v3766_v61  ;;  %v3769_v17 = vmul.f32 0.5, %v13699_v32 }
 0xfec   :  { %v3713_v38 = vpop.f32.mrf.mxu0 }
 0xfed   :  { %v3768_v2 = vmul.f32 0.5, %v3713_v38  ;;  %13806 = vmatprep.mubr.f32.mxu0 %v17647_v59  ;;  %v3785_v19 = vsub.f32 %v16817_v7, %v3769_v17 }
 0xfee   :  { %v13702_v63 = vpop.f32.mrf.mxu0  ;;  %13807 = vmatmul.mubr.f32.gmra.mxu0 %v3783_v24 }
 0xfef   :  { %v3784_v0 = vsub.f32 %v16812_v18, %v3768_v2  ;;  %v3771_v30 = vmul.f32 0.5, %v13702_v63 }
 0xff0   :  { %v3723_v35 = vpop.f32.mrf.mxu0 }
 0xff1   :  { %v3770_v16 = vmul.f32 0.5, %v3723_v35  ;;  %13809 = vmatprep.mubr.f32.mxu0 %v3784_v0  ;;  %v3787_v12 = vsub.f32 %v16835_v45, %v3771_v30 }
 0xff2   :  { %v13705_v9 = vpop.f32.mrf.mxu0  ;;  %13810 = vmatmul.mubr.f32.gmra.mxu0 %v3785_v19 }
 0xff3   :  { %v3786_v27 = vsub.f32 %v16830_v40, %v3770_v16  ;;  %v3773_v37 = vmul.f32 0.5, %v13705_v9 }
 0xff4   :  { %v3733_v21 = vpop.f32.mrf.mxu0 }
 0xff5   :  { %v3772_v8 = vmul.f32 0.5, %v3733_v21  ;;  %13812 = vmatprep.mubr.f32.mxu0 %v3786_v27  ;;  %v3789_v25 = vsub.f32 %v16848_v42, %v3773_v37 }
 0xff6   :  { %v13708_v58 = vpop.f32.mrf.mxu0  ;;  %13813 = vmatmul.mubr.f32.gmra.mxu0 %v3787_v12 }
 0xff7   :  { %v3788_v34 = vsub.f32 %v16845_v4, %v3772_v8  ;;  %v3775_v61 = vmul.f32 0.5, %v13708_v58 }
 0xff8   :  { %v3743_v32 = vpop.f32.mrf.mxu0 }
 0xff9   :  { %v3774_v17 = vmul.f32 0.5, %v3743_v32  ;;  %13815 = vmatprep.mubr.f32.mxu0 %v3788_v34  ;;  %v3791_v30 = vsub.f32 %v16863_v51, %v3775_v61 }
 0xffa   :  { %v13711_v38 = vpop.f32.mrf.mxu0  ;;  %13816 = vmatmul.mubr.f32.gmra.mxu0 %v3789_v25 }
 0xffb   :  { %v3790_v2 = vsub.f32 %v16860_v1, %v3774_v17  ;;  %v3777_v63 = vmul.f32 0.5, %v13711_v38 }
 0xffc   :  { %v3753_v35 = vpop.f32.mrf.mxu0 }
 0xffd   :  { %v3793_v16 = vsub.f32 %v16869_v49, %v3777_v63  ;;  %v3776_v9 = vmul.f32 0.5, %v3753_v35  ;;  %13818 = vmatprep.mubr.f32.mxu0 %v3790_v2 }
 0xffe   :  { %13819 = vmatmul.mubr.f32.gmra.mxu0 %v3791_v30 }
 0xfff   :  { %v3792_v21 = vsub.f32 %v16871_v36, %v3776_v9  ;;  %13712 = vmatprep.subr.mxu1 %v3793_v16 }
0x1000   :  { %13713 = vmatpush3.msra.mxu1 %v3793_v16 }
0x1001   :  { %13714 = vmatprep.subr.mxu1 %v3792_v21  ;;  %13821 = vmatprep.mubr.f32.mxu0 %v3792_v21 }
0x1002   :  { %13715 = vmatpush3.msra.mxu1 %v3792_v21  ;;  %13822 = vmatmul.mubr.f32.gmra.mxu0 %v3793_v16 }
0x1003   :  { %13716 = vmatprep.subr.mxu1 %v3791_v30 }
0x1004   :  { %13717 = vmatpush3.msra.mxu1 %v3791_v30 }
0x1005   :  { %13718 = vmatprep.subr.mxu1 %v3790_v2 }
0x1006   :  { %13719 = vmatpush3.msra.mxu1 %v3790_v2 }
0x1007   :  { %13720 = vmatprep.subr.mxu1 %v3789_v25 }
0x1008   :  { %13721 = vmatpush3.msra.mxu1 %v3789_v25 }
0x1009   :  { %13722 = vmatprep.subr.mxu1 %v3788_v34 }
0x100a   :  { %13723 = vmatpush3.msra.mxu1 %v3788_v34 }
0x100b   :  { %13724 = vmatprep.subr.mxu1 %v3787_v12 }
0x100c   :  { %13725 = vmatpush3.msra.mxu1 %v3787_v12 }
0x100d   :  { %13726 = vmatprep.subr.mxu1 %v3786_v27 }
0x100e   :  { %13727 = vmatpush3.msra.mxu1 %v3786_v27 }
0x100f   :  { %13728 = vmatprep.subr.mxu1 %v3785_v19 }
0x1010   :  { %13729 = vmatpush3.msra.mxu1 %v3785_v19 }
0x1011   :  { %13730 = vmatprep.subr.mxu1 %v3784_v0 }
0x1012   :  { %13731 = vmatpush3.msra.mxu1 %v3784_v0 }
0x1013   :  { %13732 = vmatprep.subr.mxu1 %v3783_v24 }
0x1014   :  { %13733 = vmatpush3.msra.mxu1 %v3783_v24 }
0x1015   :  { %13734 = vmatprep.subr.mxu1 %v17647_v59 }
0x1016   :  { %13735 = vmatpush3.msra.mxu1 %v17647_v59 }
0x1017   :  { %13736 = vmatprep.subr.mxu1 %v17642_v28 }
0x1018   :  { %13737 = vmatpush3.msra.mxu1 %v17642_v28 }
0x1019   :  { %13738 = vmatprep.subr.mxu1 %v17639_v29 }
0x101a   :  { %13739 = vmatpush3.msra.mxu1 %v17639_v29 }
0x101b   :  { %13740 = vmatprep.subr.mxu1 %v17634_v11 }
0x101c   :  { %13741 = vmatpush3.msra.mxu1 %v17634_v11 }
0x101d   :  { %13742 = vmatprep.subr.mxu1 %v17631_v55 }
0x101e   :  { %13743 = vmatpush3.msra.mxu1 %v17631_v55 }
0x101f   :  { %13745 = vmatmul.mubr.f32.vlgmr.msra.gmra.mxu1 %v17535_v62 }
0x1020   :  { %13747 = vmatprep.mubr.f32.mxu1 %v17539_v46 }
0x1023   :  { %13748 = vmatmul.mubr.f32.gmra.mxu1 %v17537_v33 }
0x1024   :  { %13750 = vmatprep.mubr.f32.mxu1 %v17545_v43 }
0x1027   :  { %13751 = vmatmul.mubr.f32.gmra.mxu1 %v17541_v60 }
0x1028   :  { %13753 = vmatprep.mubr.f32.mxu1 %v17551_v22 }
0x102b   :  { %13754 = vmatmul.mubr.f32.gmra.mxu1 %v17547_v56 }
0x102c   :  { %13756 = vmatprep.mubr.f32.mxu1 %v17557_v6 }
0x102f   :  { %13757 = vmatmul.mubr.f32.gmra.mxu1 %v17553_v20 }
0x1030   :  { %13759 = vmatprep.mubr.f32.mxu1 %v17563_v54 }
0x1033   :  { %13760 = vmatmul.mubr.f32.gmra.mxu1 %v17559_v14 }
0x1034   :  { %13762 = vmatprep.mubr.f32.mxu1 %v17569_v41 }
0x1037   :  { %13763 = vmatmul.mubr.f32.gmra.mxu1 %v17565_v53 }
0x1038   :  { %13765 = vmatprep.mubr.f32.mxu1 %v17576_v50 }
0x103b   :  { %13766 = vmatmul.mubr.f32.gmra.mxu1 %v17571_v48 }
0x10a6   :  { %v17686_v62 = vpop.f32.mrf.mxu0 }
0x10a8   :  { %v17688_v33 = vpop.f32.mrf.mxu0 }
0x10a9   :  { %13856 = vmatprep.mubr.f32.mxu1 %v17688_v33 }
0x10aa   :  { %v17699_v20 = vpop.f32.mrf.mxu0 }
0x10ac   :  { %v17705_v54 = vpop.f32.mrf.mxu0 }
0x10ae   :  { %v17711_v48 = vpop.f32.mrf.mxu0 }
0x10b0   :  { %v17717_v11 = vpop.f32.mrf.mxu0 }
0x10b2   :  { %v17723_v59 = vpop.f32.mrf.mxu0 }
0x10b4   :  { %v17730_v19 = vpop.f32.mrf.mxu0 }
0x10b6   :  { %v13814_v12 = vpop.f32.mrf.mxu0 }
0x10b8   :  { %v4045_v37 = vpop.f32.mrf.mxu0 }
0x10ba   :  { %v13817_v8 = vpop.f32.mrf.mxu0 }
0x10bc   :  { %v4055_v58 = vpop.f32.mrf.mxu0 }
0x10be   :  { %v13820_v34 = vpop.f32.mrf.mxu0 }
0x10c0   :  { %v4065_v25 = vpop.f32.mrf.mxu0 }
0x10c2   :  { %v13823_v61 = vpop.f32.mrf.mxu0 }
0x10c4   :  { %v4075_v32 = vpop.f32.mrf.mxu0 }
0x10df   :  { %v17691_v46 = vpop.f32.mrf.mxu1 }
0x10e1   :  { %v3860_v60 = vpop.f32.mrf.mxu1 }
0x10e2   :  { %13912 = vmatprep.mubr.f32.mxu0 %v3860_v60 }
0x10e3   :  { %v17693_v43 = vpop.f32.mrf.mxu1 }
0x10e5   :  { %v17695_v56 = vpop.f32.mrf.mxu1 }
0x10e7   :  { %v17697_v22 = vpop.f32.mrf.mxu1 }
0x10e9   :  { %v17701_v6 = vpop.f32.mrf.mxu1 }
0x10eb   :  { %v17703_v14 = vpop.f32.mrf.mxu1 }
0x10ed   :  { %v17707_v53 = vpop.f32.mrf.mxu1 }
0x10ef   :  { %v17709_v41 = vpop.f32.mrf.mxu1 }
0x10f1   :  { %v17713_v50 = vpop.f32.mrf.mxu1 }
0x10f3   :  { %v17715_v55 = vpop.f32.mrf.mxu1 }
0x10f5   :  { %v17719_v29 = vpop.f32.mrf.mxu1 }
0x10f7   :  { %v17721_v28 = vpop.f32.mrf.mxu1 }
0x10f9   :  { %v17725_v24 = vpop.f32.mrf.mxu1 }
0x10fb   :  { %v17727_v0 = vpop.f32.mrf.mxu1 }
0x10fc   :  { %13824 = vmatprep.subr.mxu1 %v17727_v0 }
0x10fd   :  { %v17732_v27 = vpop.f32.mrf.mxu1  ;;  %13825 = vmatpush3.msra.mxu1 %v17727_v0 }
0x10fe   :  { %13826 = vmatprep.subr.mxu1 %v17732_v27 }
0x10ff   :  { %13827 = vmatpush3.msra.mxu1 %v17732_v27 }
0x1100   :  { %13828 = vmatprep.subr.mxu1 %v17721_v28 }
0x1101   :  { %13829 = vmatpush3.msra.mxu1 %v17721_v28 }
0x1102   :  { %13830 = vmatprep.subr.mxu1 %v17725_v24 }
0x1103   :  { %13831 = vmatpush3.msra.mxu1 %v17725_v24 }
0x1104   :  { %13832 = vmatprep.subr.mxu1 %v17715_v55 }
0x1105   :  { %13833 = vmatpush3.msra.mxu1 %v17715_v55 }
0x1106   :  { %13834 = vmatprep.subr.mxu1 %v17719_v29 }
0x1107   :  { %13835 = vmatpush3.msra.mxu1 %v17719_v29 }
0x1108   :  { %13836 = vmatprep.subr.mxu1 %v17709_v41 }
0x1109   :  { %13837 = vmatpush3.msra.mxu1 %v17709_v41 }
0x110a   :  { %13838 = vmatprep.subr.mxu1 %v17713_v50 }
0x110b   :  { %13839 = vmatpush3.msra.mxu1 %v17713_v50 }
0x110c   :  { %13840 = vmatprep.subr.mxu1 %v17703_v14 }
0x110d   :  { %13841 = vmatpush3.msra.mxu1 %v17703_v14 }
0x110e   :  { %13842 = vmatprep.subr.mxu1 %v17707_v53 }
0x110f   :  { %13843 = vmatpush3.msra.mxu1 %v17707_v53 }
0x1110   :  { %13844 = vmatprep.subr.mxu1 %v17697_v22 }
0x1111   :  { %13845 = vmatpush3.msra.mxu1 %v17697_v22 }
0x1112   :  { %13846 = vmatprep.subr.mxu1 %v17701_v6 }
0x1113   :  { %13847 = vmatpush3.msra.mxu1 %v17701_v6 }
0x1114   :  { %13848 = vmatprep.subr.mxu1 %v17693_v43 }
0x1115   :  { %13849 = vmatpush3.msra.mxu1 %v17693_v43 }
0x1116   :  { %13850 = vmatprep.subr.mxu1 %v17695_v56 }
0x1117   :  { %13851 = vmatpush3.msra.mxu1 %v17695_v56 }
0x1118   :  { %13852 = vmatprep.subr.mxu1 %v17691_v46 }
0x1119   :  { %13853 = vmatpush3.msra.mxu1 %v17691_v46 }
0x111a   :  { %13854 = vmatprep.subr.mxu1 %v3860_v60 }
0x111b   :  { %13855 = vmatpush3.msra.mxu1 %v3860_v60 }
0x111c   :  { %13857 = vmatmul.mubr.f32.vlgmr.msra.gmra.mxu1 %v17686_v62  ;;  %13936 = vmatprep.subr.mxu1 %v13823_v61 }
0x111d   :  { %13859 = vmatprep.mubr.f32.mxu1 %v17705_v54  ;;  %13937 = vmatpush3.msra.mxu1 %v13823_v61 }
0x111e   :  { %13938 = vmatprep.subr.mxu1 %v4075_v32 }
0x111f   :  { %13939 = vmatpush3.msra.mxu1 %v4075_v32 }
0x1120   :  { %13860 = vmatmul.mubr.f32.gmra.mxu1 %v17699_v20  ;;  %13940 = vmatprep.subr.mxu1 %v13820_v34 }
0x1121   :  { %13862 = vmatprep.mubr.f32.mxu1 %v17717_v11  ;;  %13941 = vmatpush3.msra.mxu1 %v13820_v34 }
0x1122   :  { %13942 = vmatprep.subr.mxu1 %v4065_v25 }
0x1123   :  { %13943 = vmatpush3.msra.mxu1 %v4065_v25 }
0x1124   :  { %13863 = vmatmul.mubr.f32.gmra.mxu1 %v17711_v48  ;;  %13944 = vmatprep.subr.mxu1 %v13817_v8 }
0x1125   :  { %13865 = vmatprep.mubr.f32.mxu1 %v17730_v19  ;;  %13945 = vmatpush3.msra.mxu1 %v13817_v8 }
0x1126   :  { %13946 = vmatprep.subr.mxu1 %v4055_v58 }
0x1127   :  { %13947 = vmatpush3.msra.mxu1 %v4055_v58 }
0x1128   :  { %13866 = vmatmul.mubr.f32.gmra.mxu1 %v17723_v59  ;;  %13948 = vmatprep.subr.mxu1 %v13814_v12 }
0x1129   :  { %13868 = vmatprep.mubr.f32.mxu1 %v4045_v37  ;;  %13949 = vmatpush3.msra.mxu1 %v13814_v12 }
0x112a   :  { %13950 = vmatprep.subr.mxu1 %v4045_v37 }
0x112b   :  { %13951 = vmatpush3.msra.mxu1 %v4045_v37 }
0x112c   :  { %13869 = vmatmul.mubr.f32.gmra.mxu1 %v13814_v12  ;;  %13952 = vmatprep.subr.mxu1 %v17723_v59 }
0x112d   :  { %13871 = vmatprep.mubr.f32.mxu1 %v4055_v58  ;;  %13953 = vmatpush3.msra.mxu1 %v17723_v59 }
0x112e   :  { %13954 = vmatprep.subr.mxu1 %v17730_v19 }
0x112f   :  { %13955 = vmatpush3.msra.mxu1 %v17730_v19 }
0x1130   :  { %13872 = vmatmul.mubr.f32.gmra.mxu1 %v13817_v8  ;;  %13956 = vmatprep.subr.mxu1 %v17711_v48 }
0x1131   :  { %13874 = vmatprep.mubr.f32.mxu1 %v4065_v25  ;;  %13957 = vmatpush3.msra.mxu1 %v17711_v48 }
0x1132   :  { %13958 = vmatprep.subr.mxu1 %v17717_v11 }
0x1133   :  { %13959 = vmatpush3.msra.mxu1 %v17717_v11 }
0x1134   :  { %13875 = vmatmul.mubr.f32.gmra.mxu1 %v13820_v34  ;;  %13960 = vmatprep.subr.mxu1 %v17699_v20 }
0x1135   :  { %13877 = vmatprep.mubr.f32.mxu1 %v4075_v32  ;;  %13961 = vmatpush3.msra.mxu1 %v17699_v20 }
0x1136   :  { %13962 = vmatprep.subr.mxu1 %v17705_v54 }
0x1137   :  { %13963 = vmatpush3.msra.mxu1 %v17705_v54 }
0x1138   :  { %13878 = vmatmul.mubr.f32.gmra.mxu1 %v13823_v61  ;;  %13964 = vmatprep.subr.mxu1 %v17686_v62 }
0x1139   :  { %13965 = vmatpush3.msra.mxu1 %v17686_v62 }
0x113a   :  { %13966 = vmatprep.subr.mxu1 %v17688_v33 }
0x113b   :  { %13967 = vmatpush3.msra.mxu1 %v17688_v33 }
0x11dc   :  { %v13858_v17 = vpop.f32.mrf.mxu1 }
0x11dd   :  { %v4230_v38 = vmul.f32 0.5, %v13858_v17 }
0x11de   :  { %v4150_v2 = vpop.f32.mrf.mxu1 }
0x11df   :  { %v4229_v63 = vmul.f32 0.5, %v4150_v2  ;;  %v17790_v16 = vsub.f32 %v16768_v39, %v4230_v38 }
0x11e0   :  { %v13861_v30 = vpop.f32.mrf.mxu1 }
0x11e1   :  { %v17787_v35 = vsub.f32 %v16766_v10, %v4229_v63  ;;  %v4232_v9 = vmul.f32 0.5, %v13861_v30 }
0x11e2   :  { %v4160_v21 = vpop.f32.mrf.mxu1 }
0x11e3   :  { %v4231_v60 = vmul.f32 0.5, %v4160_v21  ;;  %13968 = vmatprep.mubr.f32.mxu1 %v17787_v35  ;;  %v17798_v20 = vsub.f32 %v16781_v26, %v4232_v9 }
0x11e4   :  { %v13864_v62 = vpop.f32.mrf.mxu1  ;;  %13969 = vmatmul.mubr.f32.vlgmr.msra.gmra.mxu1 %v17790_v16 }
0x11e5   :  { %v17795_v33 = vsub.f32 %v16776_v23, %v4231_v60  ;;  %v4234_v54 = vmul.f32 0.5, %v13864_v62 }
0x11e6   :  { %v4170_v48 = vpop.f32.mrf.mxu1 }
0x11e7   :  { %v4233_v11 = vmul.f32 0.5, %v4170_v48  ;;  %13971 = vmatprep.mubr.f32.mxu1 %v17795_v33  ;;  %v4250_v12 = vsub.f32 %v16799_v31, %v4234_v54 }
0x11e8   :  { %v13867_v59 = vpop.f32.mrf.mxu1  ;;  %13972 = vmatmul.mubr.f32.gmra.mxu1 %v17798_v20 }
0x11e9   :  { %v17803_v19 = vsub.f32 %v16794_v13, %v4233_v11  ;;  %v4236_v37 = vmul.f32 0.5, %v13867_v59 }
0x11ea   :  { %v4180_v8 = vpop.f32.mrf.mxu1 }
0x11eb   :  { %v4235_v58 = vmul.f32 0.5, %v4180_v8  ;;  %13974 = vmatprep.mubr.f32.mxu1 %v17803_v19  ;;  %v4252_v61 = vsub.f32 %v16817_v7, %v4236_v37 }
0x11ec   :  { %v13870_v34 = vpop.f32.mrf.mxu1  ;;  %13975 = vmatmul.mubr.f32.gmra.mxu1 %v4250_v12 }
0x11ed   :  { %v4251_v25 = vsub.f32 %v16812_v18, %v4235_v58  ;;  %v4238_v32 = vmul.f32 0.5, %v13870_v34 }
0x11ee   :  { %v4190_v17 = vpop.f32.mrf.mxu1 }
0x11ef   :  { %v4237_v38 = vmul.f32 0.5, %v4190_v17  ;;  %13977 = vmatprep.mubr.f32.mxu1 %v4251_v25  ;;  %v4254_v30 = vsub.f32 %v16835_v45, %v4238_v32 }
0x11f0   :  { %v13873_v2 = vpop.f32.mrf.mxu1  ;;  %13978 = vmatmul.mubr.f32.gmra.mxu1 %v4252_v61 }
0x11f1   :  { %v4253_v63 = vsub.f32 %v16830_v40, %v4237_v38  ;;  %v4240_v9 = vmul.f32 0.5, %v13873_v2 }
0x11f2   :  { %v4200_v21 = vpop.f32.mrf.mxu1 }
0x11f3   :  { %v4239_v60 = vmul.f32 0.5, %v4200_v21  ;;  %13980 = vmatprep.mubr.f32.mxu1 %v4253_v63  ;;  %v4256_v48 = vsub.f32 %v16848_v42, %v4240_v9 }
0x11f4   :  { %v13876_v62 = vpop.f32.mrf.mxu1  ;;  %13981 = vmatmul.mubr.f32.gmra.mxu1 %v4254_v30 }
0x11f5   :  { %v4255_v54 = vsub.f32 %v16845_v4, %v4239_v60  ;;  %v4242_v11 = vmul.f32 0.5, %v13876_v62 }
0x11f6   :  { %v4210_v59 = vpop.f32.mrf.mxu1 }
0x11f7   :  { %v4241_v37 = vmul.f32 0.5, %v4210_v59  ;;  %13983 = vmatprep.mubr.f32.mxu1 %v4255_v54  ;;  %v4258_v32 = vsub.f32 %v16863_v51, %v4242_v11 }
0x11f8   :  { %v13879_v8 = vpop.f32.mrf.mxu1  ;;  %13984 = vmatmul.mubr.f32.gmra.mxu1 %v4256_v48 }
0x11f9   :  { %v4257_v58 = vsub.f32 %v16860_v1, %v4241_v37  ;;  %v4244_v34 = vmul.f32 0.5, %v13879_v8 }
0x11fa   :  { %v4220_v17 = vpop.f32.mrf.mxu1 }
0x11fb   :  { %v4260_v38 = vsub.f32 %v16869_v49, %v4244_v34  ;;  %v4243_v2 = vmul.f32 0.5, %v4220_v17  ;;  %13986 = vmatprep.mubr.f32.mxu1 %v4257_v58 }
0x11fc   :  { %13987 = vmatmul.mubr.f32.gmra.mxu1 %v4258_v32 }
0x11fd   :  { %v4259_v21 = vsub.f32 %v16871_v36, %v4243_v2  ;;  %13880 = vmatprep.subr.mxu0 %v4260_v38 }
0x11fe   :  { %13881 = vmatpush3.msra.mxu0 %v4260_v38 }
0x11ff   :  { %13882 = vmatprep.subr.mxu0 %v4259_v21  ;;  %13989 = vmatprep.mubr.f32.mxu1 %v4259_v21 }
0x1200   :  { %13883 = vmatpush3.msra.mxu0 %v4259_v21  ;;  %13990 = vmatmul.mubr.f32.gmra.mxu1 %v4260_v38 }
0x1201   :  { %13884 = vmatprep.subr.mxu0 %v4258_v32 }
0x1202   :  { %13885 = vmatpush3.msra.mxu0 %v4258_v32 }
0x1203   :  { %13886 = vmatprep.subr.mxu0 %v4257_v58 }
0x1204   :  { %13887 = vmatpush3.msra.mxu0 %v4257_v58 }
0x1205   :  { %13888 = vmatprep.subr.mxu0 %v4256_v48 }
0x1206   :  { %13889 = vmatpush3.msra.mxu0 %v4256_v48 }
0x1207   :  { %13890 = vmatprep.subr.mxu0 %v4255_v54 }
0x1208   :  { %13891 = vmatpush3.msra.mxu0 %v4255_v54 }
0x1209   :  { %13892 = vmatprep.subr.mxu0 %v4254_v30 }
0x120a   :  { %13893 = vmatpush3.msra.mxu0 %v4254_v30 }
0x120b   :  { %13894 = vmatprep.subr.mxu0 %v4253_v63 }
0x120c   :  { %13895 = vmatpush3.msra.mxu0 %v4253_v63 }
0x120d   :  { %13896 = vmatprep.subr.mxu0 %v4252_v61 }
0x120e   :  { %13897 = vmatpush3.msra.mxu0 %v4252_v61 }
0x120f   :  { %13898 = vmatprep.subr.mxu0 %v4251_v25 }
0x1210   :  { %13899 = vmatpush3.msra.mxu0 %v4251_v25 }
0x1211   :  { %13900 = vmatprep.subr.mxu0 %v4250_v12 }
0x1212   :  { %13901 = vmatpush3.msra.mxu0 %v4250_v12 }
0x1213   :  { %13902 = vmatprep.subr.mxu0 %v17803_v19 }
0x1214   :  { %13903 = vmatpush3.msra.mxu0 %v17803_v19 }
0x1215   :  { %13904 = vmatprep.subr.mxu0 %v17798_v20 }
0x1216   :  { %13905 = vmatpush3.msra.mxu0 %v17798_v20 }
0x1217   :  { %13906 = vmatprep.subr.mxu0 %v17795_v33 }
0x1218   :  { %13907 = vmatpush3.msra.mxu0 %v17795_v33 }
0x1219   :  { %13908 = vmatprep.subr.mxu0 %v17790_v16 }
0x121a   :  { %13909 = vmatpush3.msra.mxu0 %v17790_v16 }
0x121b   :  { %13910 = vmatprep.subr.mxu0 %v17787_v35 }
0x121c   :  { %13911 = vmatpush3.msra.mxu0 %v17787_v35 }
0x121d   :  { %13913 = vmatmul.mubr.f32.vlgmr.msra.gmra.mxu0 %v17691_v46 }
0x121e   :  { %13915 = vmatprep.mubr.f32.mxu0 %v17695_v56 }
0x1221   :  { %13916 = vmatmul.mubr.f32.gmra.mxu0 %v17693_v43 }
0x1222   :  { %13918 = vmatprep.mubr.f32.mxu0 %v17701_v6 }
0x1225   :  { %13919 = vmatmul.mubr.f32.gmra.mxu0 %v17697_v22 }
0x1226   :  { %13921 = vmatprep.mubr.f32.mxu0 %v17707_v53 }
0x1229   :  { %13922 = vmatmul.mubr.f32.gmra.mxu0 %v17703_v14 }
0x122a   :  { %13924 = vmatprep.mubr.f32.mxu0 %v17713_v50 }
0x122d   :  { %13925 = vmatmul.mubr.f32.gmra.mxu0 %v17709_v41 }
0x122e   :  { %13927 = vmatprep.mubr.f32.mxu0 %v17719_v29 }
0x1231   :  { %13928 = vmatmul.mubr.f32.gmra.mxu0 %v17715_v55 }
0x1232   :  { %13930 = vmatprep.mubr.f32.mxu0 %v17725_v24 }
0x1235   :  { %13931 = vmatmul.mubr.f32.gmra.mxu0 %v17721_v28 }
0x1236   :  { %13933 = vmatprep.mubr.f32.mxu0 %v17732_v27 }
0x1239   :  { %13934 = vmatmul.mubr.f32.gmra.mxu0 %v17727_v0 }
0x12a4   :  { %v17842_v46 = vpop.f32.mrf.mxu1 }
0x12a6   :  { %v17844_v43 = vpop.f32.mrf.mxu1 }
0x12a7   :  { %14024 = vmatprep.mubr.f32.mxu0 %v17844_v43 }
0x12a8   :  { %v17855_v41 = vpop.f32.mrf.mxu1 }
0x12aa   :  { %v17861_v29 = vpop.f32.mrf.mxu1 }
0x12ac   :  { %v17867_v0 = vpop.f32.mrf.mxu1 }
0x12ae   :  { %v17873_v16 = vpop.f32.mrf.mxu1 }
0x12b0   :  { %v17879_v19 = vpop.f32.mrf.mxu1 }
0x12b2   :  { %v17886_v61 = vpop.f32.mrf.mxu1 }
0x12b4   :  { %v13982_v30 = vpop.f32.mrf.mxu1 }
0x12b6   :  { %v4512_v9 = vpop.f32.mrf.mxu1 }
0x12b8   :  { %v13985_v60 = vpop.f32.mrf.mxu1 }
0x12ba   :  { %v4522_v62 = vpop.f32.mrf.mxu1 }
0x12bc   :  { %v13988_v54 = vpop.f32.mrf.mxu1 }
0x12be   :  { %v4532_v48 = vpop.f32.mrf.mxu1 }
0x12c0   :  { %v13991_v11 = vpop.f32.mrf.mxu1 }
0x12c2   :  { %v4542_v59 = vpop.f32.mrf.mxu1 }
0x12dd   :  { %v17847_v56 = vpop.f32.mrf.mxu0 }
0x12df   :  { %v4327_v22 = vpop.f32.mrf.mxu0 }
0x12e0   :  { %14080 = vmatprep.mubr.f32.mxu1 %v4327_v22 }
0x12e1   :  { %v17849_v6 = vpop.f32.mrf.mxu0 }
0x12e3   :  { %v17851_v14 = vpop.f32.mrf.mxu0 }
0x12e5   :  { %v17853_v53 = vpop.f32.mrf.mxu0 }
0x12e7   :  { %v17857_v50 = vpop.f32.mrf.mxu0 }
0x12e9   :  { %v17859_v55 = vpop.f32.mrf.mxu0 }
0x12eb   :  { %v17863_v28 = vpop.f32.mrf.mxu0 }
0x12ed   :  { %v17865_v24 = vpop.f32.mrf.mxu0 }
0x12ef   :  { %v17869_v27 = vpop.f32.mrf.mxu0 }
0x12f1   :  { %v17871_v35 = vpop.f32.mrf.mxu0 }
0x12f3   :  { %v17875_v33 = vpop.f32.mrf.mxu0 }
0x12f5   :  { %v17877_v20 = vpop.f32.mrf.mxu0 }
0x12f7   :  { %v17881_v12 = vpop.f32.mrf.mxu0 }
0x12f9   :  { %v17883_v25 = vpop.f32.mrf.mxu0 }
0x12fa   :  { %13992 = vmatprep.subr.mxu0 %v17883_v25 }
0x12fb   :  { %v17888_v63 = vpop.f32.mrf.mxu0  ;;  %13993 = vmatpush3.msra.mxu0 %v17883_v25 }
0x12fc   :  { %13994 = vmatprep.subr.mxu0 %v17888_v63 }
0x12fd   :  { %13995 = vmatpush3.msra.mxu0 %v17888_v63 }
0x12fe   :  { %13996 = vmatprep.subr.mxu0 %v17877_v20 }
0x12ff   :  { %13997 = vmatpush3.msra.mxu0 %v17877_v20 }
0x1300   :  { %13998 = vmatprep.subr.mxu0 %v17881_v12 }
0x1301   :  { %13999 = vmatpush3.msra.mxu0 %v17881_v12 }
0x1302   :  { %14000 = vmatprep.subr.mxu0 %v17871_v35 }
0x1303   :  { %14001 = vmatpush3.msra.mxu0 %v17871_v35 }
0x1304   :  { %14002 = vmatprep.subr.mxu0 %v17875_v33 }
0x1305   :  { %14003 = vmatpush3.msra.mxu0 %v17875_v33 }
0x1306   :  { %14004 = vmatprep.subr.mxu0 %v17865_v24 }
0x1307   :  { %14005 = vmatpush3.msra.mxu0 %v17865_v24 }
0x1308   :  { %14006 = vmatprep.subr.mxu0 %v17869_v27 }
0x1309   :  { %14007 = vmatpush3.msra.mxu0 %v17869_v27 }
0x130a   :  { %14008 = vmatprep.subr.mxu0 %v17859_v55 }
0x130b   :  { %14009 = vmatpush3.msra.mxu0 %v17859_v55 }
0x130c   :  { %14010 = vmatprep.subr.mxu0 %v17863_v28 }
0x130d   :  { %14011 = vmatpush3.msra.mxu0 %v17863_v28 }
0x130e   :  { %14012 = vmatprep.subr.mxu0 %v17853_v53 }
0x130f   :  { %14013 = vmatpush3.msra.mxu0 %v17853_v53 }
0x1310   :  { %14014 = vmatprep.subr.mxu0 %v17857_v50 }
0x1311   :  { %14015 = vmatpush3.msra.mxu0 %v17857_v50 }
0x1312   :  { %14016 = vmatprep.subr.mxu0 %v17849_v6 }
0x1313   :  { %14017 = vmatpush3.msra.mxu0 %v17849_v6 }
0x1314   :  { %14018 = vmatprep.subr.mxu0 %v17851_v14 }
0x1315   :  { %14019 = vmatpush3.msra.mxu0 %v17851_v14 }
0x1316   :  { %14020 = vmatprep.subr.mxu0 %v17847_v56 }
0x1317   :  { %14021 = vmatpush3.msra.mxu0 %v17847_v56 }
0x1318   :  { %14022 = vmatprep.subr.mxu0 %v4327_v22 }
0x1319   :  { %14023 = vmatpush3.msra.mxu0 %v4327_v22 }
0x131a   :  { %14025 = vmatmul.mubr.f32.vlgmr.msra.gmra.mxu0 %v17842_v46  ;;  %14104 = vmatprep.subr.mxu0 %v13991_v11 }
0x131b   :  { %14027 = vmatprep.mubr.f32.mxu0 %v17861_v29  ;;  %14105 = vmatpush3.msra.mxu0 %v13991_v11 }
0x131c   :  { %14106 = vmatprep.subr.mxu0 %v4542_v59 }
0x131d   :  { %14107 = vmatpush3.msra.mxu0 %v4542_v59 }
0x131e   :  { %14028 = vmatmul.mubr.f32.gmra.mxu0 %v17855_v41  ;;  %14108 = vmatprep.subr.mxu0 %v13988_v54 }
0x131f   :  { %14030 = vmatprep.mubr.f32.mxu0 %v17873_v16  ;;  %14109 = vmatpush3.msra.mxu0 %v13988_v54 }
0x1320   :  { %14110 = vmatprep.subr.mxu0 %v4532_v48 }
0x1321   :  { %14111 = vmatpush3.msra.mxu0 %v4532_v48 }
0x1322   :  { %14031 = vmatmul.mubr.f32.gmra.mxu0 %v17867_v0  ;;  %14112 = vmatprep.subr.mxu0 %v13985_v60 }
0x1323   :  { %14033 = vmatprep.mubr.f32.mxu0 %v17886_v61  ;;  %14113 = vmatpush3.msra.mxu0 %v13985_v60 }
0x1324   :  { %14114 = vmatprep.subr.mxu0 %v4522_v62 }
0x1325   :  { %14115 = vmatpush3.msra.mxu0 %v4522_v62 }
0x1326   :  { %14034 = vmatmul.mubr.f32.gmra.mxu0 %v17879_v19  ;;  %14116 = vmatprep.subr.mxu0 %v13982_v30 }
0x1327   :  { %14036 = vmatprep.mubr.f32.mxu0 %v4512_v9  ;;  %14117 = vmatpush3.msra.mxu0 %v13982_v30 }
0x1328   :  { %14118 = vmatprep.subr.mxu0 %v4512_v9 }
0x1329   :  { %14119 = vmatpush3.msra.mxu0 %v4512_v9 }
0x132a   :  { %14037 = vmatmul.mubr.f32.gmra.mxu0 %v13982_v30  ;;  %14120 = vmatprep.subr.mxu0 %v17879_v19 }
0x132b   :  { %14039 = vmatprep.mubr.f32.mxu0 %v4522_v62  ;;  %14121 = vmatpush3.msra.mxu0 %v17879_v19 }
0x132c   :  { %14122 = vmatprep.subr.mxu0 %v17886_v61 }
0x132d   :  { %14123 = vmatpush3.msra.mxu0 %v17886_v61 }
0x132e   :  { %14040 = vmatmul.mubr.f32.gmra.mxu0 %v13985_v60  ;;  %14124 = vmatprep.subr.mxu0 %v17867_v0 }
0x132f   :  { %14042 = vmatprep.mubr.f32.mxu0 %v4532_v48  ;;  %14125 = vmatpush3.msra.mxu0 %v17867_v0 }
0x1330   :  { %14126 = vmatprep.subr.mxu0 %v17873_v16 }
0x1331   :  { %14127 = vmatpush3.msra.mxu0 %v17873_v16 }
0x1332   :  { %14043 = vmatmul.mubr.f32.gmra.mxu0 %v13988_v54  ;;  %14128 = vmatprep.subr.mxu0 %v17855_v41 }
0x1333   :  { %14045 = vmatprep.mubr.f32.mxu0 %v4542_v59  ;;  %14129 = vmatpush3.msra.mxu0 %v17855_v41 }
0x1334   :  { %14130 = vmatprep.subr.mxu0 %v17861_v29 }
0x1335   :  { %14131 = vmatpush3.msra.mxu0 %v17861_v29 }
0x1336   :  { %14046 = vmatmul.mubr.f32.gmra.mxu0 %v13991_v11  ;;  %14132 = vmatprep.subr.mxu0 %v17842_v46 }
0x1337   :  { %14133 = vmatpush3.msra.mxu0 %v17842_v46 }
0x1338   :  { %14134 = vmatprep.subr.mxu0 %v17844_v43 }
0x1339   :  { %14135 = vmatpush3.msra.mxu0 %v17844_v43 }
0x13da   :  { %v14026_v37 = vpop.f32.mrf.mxu0 }
0x13db   :  { %v4697_v8 = vmul.f32 0.5, %v14026_v37 }
0x13dc   :  { %v4617_v58 = vpop.f32.mrf.mxu0 }
0x13dd   :  { %v4696_v34 = vmul.f32 0.5, %v4617_v58  ;;  %v17946_v38 = vsub.f32 %v16768_v39, %v4697_v8 }
0x13de   :  { %v14029_v32 = vpop.f32.mrf.mxu0 }
0x13df   :  { %v17943_v17 = vsub.f32 %v16766_v10, %v4696_v34  ;;  %v4699_v2 = vmul.f32 0.5, %v14029_v32 }
0x13e0   :  { %v4627_v21 = vpop.f32.mrf.mxu0 }
0x13e1   :  { %v4698_v22 = vmul.f32 0.5, %v4627_v21  ;;  %14136 = vmatprep.mubr.f32.mxu0 %v17943_v17  ;;  %v17954_v41 = vsub.f32 %v16781_v26, %v4699_v2 }
0x13e2   :  { %v14032_v46 = vpop.f32.mrf.mxu0  ;;  %14137 = vmatmul.mubr.f32.vlgmr.msra.gmra.mxu0 %v17946_v38 }
0x13e3   :  { %v17951_v43 = vsub.f32 %v16776_v23, %v4698_v22  ;;  %v4701_v29 = vmul.f32 0.5, %v14032_v46 }
0x13e4   :  { %v4637_v0 = vpop.f32.mrf.mxu0 }
0x13e5   :  { %v4700_v16 = vmul.f32 0.5, %v4637_v0  ;;  %14139 = vmatprep.mubr.f32.mxu0 %v17951_v43  ;;  %v4717_v30 = vsub.f32 %v16799_v31, %v4701_v29 }
0x13e6   :  { %v14035_v19 = vpop.f32.mrf.mxu0  ;;  %14140 = vmatmul.mubr.f32.gmra.mxu0 %v17954_v41 }
0x13e7   :  { %v17959_v61 = vsub.f32 %v16794_v13, %v4700_v16  ;;  %v4703_v9 = vmul.f32 0.5, %v14035_v19 }
0x13e8   :  { %v4647_v60 = vpop.f32.mrf.mxu0 }
0x13e9   :  { %v4702_v62 = vmul.f32 0.5, %v4647_v60  ;;  %14142 = vmatprep.mubr.f32.mxu0 %v17959_v61  ;;  %v4719_v11 = vsub.f32 %v16817_v7, %v4703_v9 }
0x13ea   :  { %v14038_v54 = vpop.f32.mrf.mxu0  ;;  %14143 = vmatmul.mubr.f32.gmra.mxu0 %v4717_v30 }
0x13eb   :  { %v4718_v48 = vsub.f32 %v16812_v18, %v4702_v62  ;;  %v4705_v59 = vmul.f32 0.5, %v14038_v54 }
0x13ec   :  { %v4657_v37 = vpop.f32.mrf.mxu0 }
0x13ed   :  { %v4704_v8 = vmul.f32 0.5, %v4657_v37  ;;  %14145 = vmatprep.mubr.f32.mxu0 %v4718_v48  ;;  %v4721_v32 = vsub.f32 %v16835_v45, %v4705_v59 }
0x13ee   :  { %v14041_v58 = vpop.f32.mrf.mxu0  ;;  %14146 = vmatmul.mubr.f32.gmra.mxu0 %v4719_v11 }
0x13ef   :  { %v4720_v34 = vsub.f32 %v16830_v40, %v4704_v8  ;;  %v4707_v2 = vmul.f32 0.5, %v14041_v58 }
0x13f0   :  { %v4667_v21 = vpop.f32.mrf.mxu0 }
0x13f1   :  { %v4706_v22 = vmul.f32 0.5, %v4667_v21  ;;  %14148 = vmatprep.mubr.f32.mxu0 %v4720_v34  ;;  %v4723_v0 = vsub.f32 %v16848_v42, %v4707_v2 }
0x13f2   :  { %v14044_v46 = vpop.f32.mrf.mxu0  ;;  %14149 = vmatmul.mubr.f32.gmra.mxu0 %v4721_v32 }
0x13f3   :  { %v4722_v29 = vsub.f32 %v16845_v4, %v4706_v22  ;;  %v4709_v16 = vmul.f32 0.5, %v14044_v46 }
0x13f4   :  { %v4677_v19 = vpop.f32.mrf.mxu0 }
0x13f5   :  { %v4708_v9 = vmul.f32 0.5, %v4677_v19  ;;  %14151 = vmatprep.mubr.f32.mxu0 %v4722_v29  ;;  %v4725_v59 = vsub.f32 %v16863_v51, %v4709_v16 }
0x13f6   :  { %v14047_v60 = vpop.f32.mrf.mxu0  ;;  %14152 = vmatmul.mubr.f32.gmra.mxu0 %v4723_v0 }
0x13f7   :  { %v4724_v62 = vsub.f32 %v16860_v1, %v4708_v9  ;;  %v4711_v54 = vmul.f32 0.5, %v14047_v60 }
0x13f8   :  { %v4687_v37 = vpop.f32.mrf.mxu0 }
0x13f9   :  { %v4727_v8 = vsub.f32 %v16869_v49, %v4711_v54  ;;  %v4710_v58 = vmul.f32 0.5, %v4687_v37  ;;  %14154 = vmatprep.mubr.f32.mxu0 %v4724_v62 }
0x13fa   :  { %14155 = vmatmul.mubr.f32.gmra.mxu0 %v4725_v59 }
0x13fb   :  { %v4726_v21 = vsub.f32 %v16871_v36, %v4710_v58  ;;  %14048 = vmatprep.subr.mxu1 %v4727_v8 }
0x13fc   :  { %14049 = vmatpush3.msra.mxu1 %v4727_v8 }
0x13fd   :  { %14050 = vmatprep.subr.mxu1 %v4726_v21  ;;  %14157 = vmatprep.mubr.f32.mxu0 %v4726_v21 }
0x13fe   :  { %14051 = vmatpush3.msra.mxu1 %v4726_v21  ;;  %14158 = vmatmul.mubr.f32.gmra.mxu0 %v4727_v8 }
0x13ff   :  { %14052 = vmatprep.subr.mxu1 %v4725_v59 }
0x1400   :  { %14053 = vmatpush3.msra.mxu1 %v4725_v59 }
0x1401   :  { %14054 = vmatprep.subr.mxu1 %v4724_v62 }
0x1402   :  { %14055 = vmatpush3.msra.mxu1 %v4724_v62 }
0x1403   :  { %14056 = vmatprep.subr.mxu1 %v4723_v0 }
0x1404   :  { %14057 = vmatpush3.msra.mxu1 %v4723_v0 }
0x1405   :  { %14058 = vmatprep.subr.mxu1 %v4722_v29 }
0x1406   :  { %14059 = vmatpush3.msra.mxu1 %v4722_v29 }
0x1407   :  { %14060 = vmatprep.subr.mxu1 %v4721_v32 }
0x1408   :  { %14061 = vmatpush3.msra.mxu1 %v4721_v32 }
0x1409   :  { %14062 = vmatprep.subr.mxu1 %v4720_v34 }
0x140a   :  { %14063 = vmatpush3.msra.mxu1 %v4720_v34 }
0x140b   :  { %14064 = vmatprep.subr.mxu1 %v4719_v11 }
0x140c   :  { %14065 = vmatpush3.msra.mxu1 %v4719_v11 }
0x140d   :  { %14066 = vmatprep.subr.mxu1 %v4718_v48 }
0x140e   :  { %14067 = vmatpush3.msra.mxu1 %v4718_v48 }
0x140f   :  { %14068 = vmatprep.subr.mxu1 %v4717_v30 }
0x1410   :  { %14069 = vmatpush3.msra.mxu1 %v4717_v30 }
0x1411   :  { %14070 = vmatprep.subr.mxu1 %v17959_v61 }
0x1412   :  { %14071 = vmatpush3.msra.mxu1 %v17959_v61 }
0x1413   :  { %14072 = vmatprep.subr.mxu1 %v17954_v41 }
0x1414   :  { %14073 = vmatpush3.msra.mxu1 %v17954_v41 }
0x1415   :  { %14074 = vmatprep.subr.mxu1 %v17951_v43 }
0x1416   :  { %14075 = vmatpush3.msra.mxu1 %v17951_v43 }
0x1417   :  { %14076 = vmatprep.subr.mxu1 %v17946_v38 }
0x1418   :  { %14077 = vmatpush3.msra.mxu1 %v17946_v38 }
0x1419   :  { %14078 = vmatprep.subr.mxu1 %v17943_v17 }
0x141a   :  { %14079 = vmatpush3.msra.mxu1 %v17943_v17 }
0x141b   :  { %14081 = vmatmul.mubr.f32.vlgmr.msra.gmra.mxu1 %v17847_v56 }
0x141c   :  { %14083 = vmatprep.mubr.f32.mxu1 %v17851_v14 }
0x141f   :  { %14084 = vmatmul.mubr.f32.gmra.mxu1 %v17849_v6 }
0x1420   :  { %14086 = vmatprep.mubr.f32.mxu1 %v17857_v50 }
0x1423   :  { %14087 = vmatmul.mubr.f32.gmra.mxu1 %v17853_v53 }
0x1424   :  { %14089 = vmatprep.mubr.f32.mxu1 %v17863_v28 }
0x1427   :  { %14090 = vmatmul.mubr.f32.gmra.mxu1 %v17859_v55 }
0x1428   :  { %14092 = vmatprep.mubr.f32.mxu1 %v17869_v27 }
0x142b   :  { %14093 = vmatmul.mubr.f32.gmra.mxu1 %v17865_v24 }
0x142c   :  { %14095 = vmatprep.mubr.f32.mxu1 %v17875_v33 }
0x142f   :  { %14096 = vmatmul.mubr.f32.gmra.mxu1 %v17871_v35 }
0x1430   :  { %14098 = vmatprep.mubr.f32.mxu1 %v17881_v12 }
0x1433   :  { %14099 = vmatmul.mubr.f32.gmra.mxu1 %v17877_v20 }
0x1434   :  { %14101 = vmatprep.mubr.f32.mxu1 %v17888_v63 }
0x1437   :  { %14102 = vmatmul.mubr.f32.gmra.mxu1 %v17883_v25 }
0x14a2   :  { %v17998_v56 = vpop.f32.mrf.mxu0 }
0x14a4   :  { %v18000_v6 = vpop.f32.mrf.mxu0 }
0x14a5   :  { %14192 = vmatprep.mubr.f32.mxu1 %v18000_v6 }
0x14a6   :  { %v18011_v24 = vpop.f32.mrf.mxu0 }
0x14a8   :  { %v18017_v33 = vpop.f32.mrf.mxu0 }
0x14aa   :  { %v18023_v25 = vpop.f32.mrf.mxu0 }
0x14ac   :  { %v18029_v38 = vpop.f32.mrf.mxu0 }
0x14ae   :  { %v18035_v61 = vpop.f32.mrf.mxu0 }
0x14b0   :  { %v18042_v11 = vpop.f32.mrf.mxu0 }
0x14b2   :  { %v14150_v32 = vpop.f32.mrf.mxu0 }
0x14b4   :  { %v4979_v2 = vpop.f32.mrf.mxu0 }
0x14b6   :  { %v14153_v22 = vpop.f32.mrf.mxu0 }
0x14b8   :  { %v4989_v46 = vpop.f32.mrf.mxu0 }
0x14ba   :  { %v14156_v29 = vpop.f32.mrf.mxu0 }
0x14bc   :  { %v4999_v0 = vpop.f32.mrf.mxu0 }
0x14be   :  { %v14159_v16 = vpop.f32.mrf.mxu0 }
0x14c0   :  { %v5009_v19 = vpop.f32.mrf.mxu0 }
0x14db   :  { %v18003_v14 = vpop.f32.mrf.mxu1 }
0x14dd   :  { %v4794_v53 = vpop.f32.mrf.mxu1 }
0x14de   :  { %14248 = vmatprep.mubr.f32.mxu0 %v4794_v53 }
0x14df   :  { %v18005_v50 = vpop.f32.mrf.mxu1 }
0x14e1   :  { %v18007_v55 = vpop.f32.mrf.mxu1 }
0x14e3   :  { %v18009_v28 = vpop.f32.mrf.mxu1 }
0x14e5   :  { %v18013_v27 = vpop.f32.mrf.mxu1 }
0x14e7   :  { %v18015_v35 = vpop.f32.mrf.mxu1 }
0x14e9   :  { %v18019_v20 = vpop.f32.mrf.mxu1 }
0x14eb   :  { %v18021_v12 = vpop.f32.mrf.mxu1 }
0x14ed   :  { %v18025_v63 = vpop.f32.mrf.mxu1 }
0x14ef   :  { %v18027_v17 = vpop.f32.mrf.mxu1 }
0x14f1   :  { %v18031_v43 = vpop.f32.mrf.mxu1 }
0x14f3   :  { %v18033_v41 = vpop.f32.mrf.mxu1 }
0x14f5   :  { %v18037_v30 = vpop.f32.mrf.mxu1 }
0x14f7   :  { %v18039_v48 = vpop.f32.mrf.mxu1 }
0x14f8   :  { %14160 = vmatprep.subr.mxu1 %v18039_v48 }
0x14f9   :  { %v18044_v34 = vpop.f32.mrf.mxu1  ;;  %14161 = vmatpush3.msra.mxu1 %v18039_v48 }
0x14fa   :  { %14162 = vmatprep.subr.mxu1 %v18044_v34 }
0x14fb   :  { %14163 = vmatpush3.msra.mxu1 %v18044_v34 }
0x14fc   :  { %14164 = vmatprep.subr.mxu1 %v18033_v41 }
0x14fd   :  { %14165 = vmatpush3.msra.mxu1 %v18033_v41 }
0x14fe   :  { %14166 = vmatprep.subr.mxu1 %v18037_v30 }
0x14ff   :  { %14167 = vmatpush3.msra.mxu1 %v18037_v30 }
0x1500   :  { %14168 = vmatprep.subr.mxu1 %v18027_v17 }
0x1501   :  { %14169 = vmatpush3.msra.mxu1 %v18027_v17 }
0x1502   :  { %14170 = vmatprep.subr.mxu1 %v18031_v43 }
0x1503   :  { %14171 = vmatpush3.msra.mxu1 %v18031_v43 }
0x1504   :  { %14172 = vmatprep.subr.mxu1 %v18021_v12 }
0x1505   :  { %14173 = vmatpush3.msra.mxu1 %v18021_v12 }
0x1506   :  { %14174 = vmatprep.subr.mxu1 %v18025_v63 }
0x1507   :  { %14175 = vmatpush3.msra.mxu1 %v18025_v63 }
0x1508   :  { %14176 = vmatprep.subr.mxu1 %v18015_v35 }
0x1509   :  { %14177 = vmatpush3.msra.mxu1 %v18015_v35 }
0x150a   :  { %14178 = vmatprep.subr.mxu1 %v18019_v20 }
0x150b   :  { %14179 = vmatpush3.msra.mxu1 %v18019_v20 }
0x150c   :  { %14180 = vmatprep.subr.mxu1 %v18009_v28 }
0x150d   :  { %14181 = vmatpush3.msra.mxu1 %v18009_v28 }
0x150e   :  { %14182 = vmatprep.subr.mxu1 %v18013_v27 }
0x150f   :  { %14183 = vmatpush3.msra.mxu1 %v18013_v27 }
0x1510   :  { %14184 = vmatprep.subr.mxu1 %v18005_v50 }
0x1511   :  { %14185 = vmatpush3.msra.mxu1 %v18005_v50 }
0x1512   :  { %14186 = vmatprep.subr.mxu1 %v18007_v55 }
0x1513   :  { %14187 = vmatpush3.msra.mxu1 %v18007_v55 }
0x1514   :  { %14188 = vmatprep.subr.mxu1 %v18003_v14 }
0x1515   :  { %14189 = vmatpush3.msra.mxu1 %v18003_v14 }
0x1516   :  { %14190 = vmatprep.subr.mxu1 %v4794_v53 }
0x1517   :  { %14191 = vmatpush3.msra.mxu1 %v4794_v53 }
0x1518   :  { %14193 = vmatmul.mubr.f32.vlgmr.msra.gmra.mxu1 %v17998_v56  ;;  %14272 = vmatprep.subr.mxu1 %v14159_v16 }
0x1519   :  { %14195 = vmatprep.mubr.f32.mxu1 %v18017_v33  ;;  %14273 = vmatpush3.msra.mxu1 %v14159_v16 }
0x151a   :  { %14274 = vmatprep.subr.mxu1 %v5009_v19 }
0x151b   :  { %14275 = vmatpush3.msra.mxu1 %v5009_v19 }
0x151c   :  { %14196 = vmatmul.mubr.f32.gmra.mxu1 %v18011_v24  ;;  %14276 = vmatprep.subr.mxu1 %v14156_v29 }
0x151d   :  { %14198 = vmatprep.mubr.f32.mxu1 %v18029_v38  ;;  %14277 = vmatpush3.msra.mxu1 %v14156_v29 }
0x151e   :  { %14278 = vmatprep.subr.mxu1 %v4999_v0 }
0x151f   :  { %14279 = vmatpush3.msra.mxu1 %v4999_v0 }
0x1520   :  { %14199 = vmatmul.mubr.f32.gmra.mxu1 %v18023_v25  ;;  %14280 = vmatprep.subr.mxu1 %v14153_v22 }
0x1521   :  { %14201 = vmatprep.mubr.f32.mxu1 %v18042_v11  ;;  %14281 = vmatpush3.msra.mxu1 %v14153_v22 }
0x1522   :  { %14282 = vmatprep.subr.mxu1 %v4989_v46 }
0x1523   :  { %14283 = vmatpush3.msra.mxu1 %v4989_v46 }
0x1524   :  { %14202 = vmatmul.mubr.f32.gmra.mxu1 %v18035_v61  ;;  %14284 = vmatprep.subr.mxu1 %v14150_v32 }
0x1525   :  { %14204 = vmatprep.mubr.f32.mxu1 %v4979_v2  ;;  %14285 = vmatpush3.msra.mxu1 %v14150_v32 }
0x1526   :  { %14286 = vmatprep.subr.mxu1 %v4979_v2 }
0x1527   :  { %14287 = vmatpush3.msra.mxu1 %v4979_v2 }
0x1528   :  { %14205 = vmatmul.mubr.f32.gmra.mxu1 %v14150_v32  ;;  %14288 = vmatprep.subr.mxu1 %v18035_v61 }
0x1529   :  { %14207 = vmatprep.mubr.f32.mxu1 %v4989_v46  ;;  %14289 = vmatpush3.msra.mxu1 %v18035_v61 }
0x152a   :  { %14290 = vmatprep.subr.mxu1 %v18042_v11 }
0x152b   :  { %14291 = vmatpush3.msra.mxu1 %v18042_v11 }
0x152c   :  { %14208 = vmatmul.mubr.f32.gmra.mxu1 %v14153_v22  ;;  %14292 = vmatprep.subr.mxu1 %v18023_v25 }
0x152d   :  { %14210 = vmatprep.mubr.f32.mxu1 %v4999_v0  ;;  %14293 = vmatpush3.msra.mxu1 %v18023_v25 }
0x152e   :  { %14294 = vmatprep.subr.mxu1 %v18029_v38 }
0x152f   :  { %14295 = vmatpush3.msra.mxu1 %v18029_v38 }
0x1530   :  { %14211 = vmatmul.mubr.f32.gmra.mxu1 %v14156_v29  ;;  %14296 = vmatprep.subr.mxu1 %v18011_v24 }
0x1531   :  { %14213 = vmatprep.mubr.f32.mxu1 %v5009_v19  ;;  %14297 = vmatpush3.msra.mxu1 %v18011_v24 }
0x1532   :  { %14298 = vmatprep.subr.mxu1 %v18017_v33 }
0x1533   :  { %14299 = vmatpush3.msra.mxu1 %v18017_v33 }
0x1534   :  { %14214 = vmatmul.mubr.f32.gmra.mxu1 %v14159_v16  ;;  %14300 = vmatprep.subr.mxu1 %v17998_v56 }
0x1535   :  { %14301 = vmatpush3.msra.mxu1 %v17998_v56 }
0x1536   :  { %14302 = vmatprep.subr.mxu1 %v18000_v6 }
0x1537   :  { %14303 = vmatpush3.msra.mxu1 %v18000_v6 }
0x15d8   :  { %v14194_v9 = vpop.f32.mrf.mxu1 }
0x15d9   :  { %v5164_v60 = vmul.f32 0.5, %v14194_v9 }
0x15da   :  { %v5084_v62 = vpop.f32.mrf.mxu1 }
0x15db   :  { %v5163_v54 = vmul.f32 0.5, %v5084_v62  ;;  %v18102_v8 = vsub.f32 %v16768_v39, %v5164_v60 }
0x15dc   :  { %v14197_v59 = vpop.f32.mrf.mxu1 }
0x15dd   :  { %v18099_v37 = vsub.f32 %v16766_v10, %v5163_v54  ;;  %v5166_v58 = vmul.f32 0.5, %v14197_v59 }
0x15de   :  { %v5094_v21 = vpop.f32.mrf.mxu1 }
0x15df   :  { %v5165_v53 = vmul.f32 0.5, %v5094_v21  ;;  %14304 = vmatprep.mubr.f32.mxu1 %v18099_v37  ;;  %v18110_v24 = vsub.f32 %v16781_v26, %v5166_v58 }
0x15e0   :  { %v14200_v56 = vpop.f32.mrf.mxu1  ;;  %14305 = vmatmul.mubr.f32.vlgmr.msra.gmra.mxu1 %v18102_v8 }
0x15e1   :  { %v18107_v6 = vsub.f32 %v16776_v23, %v5165_v53  ;;  %v5168_v33 = vmul.f32 0.5, %v14200_v56 }
0x15e2   :  { %v5104_v25 = vpop.f32.mrf.mxu1 }
0x15e3   :  { %v5167_v38 = vmul.f32 0.5, %v5104_v25  ;;  %14307 = vmatprep.mubr.f32.mxu1 %v18107_v6  ;;  %v5184_v32 = vsub.f32 %v16799_v31, %v5168_v33 }
0x15e4   :  { %v14203_v61 = vpop.f32.mrf.mxu1  ;;  %14308 = vmatmul.mubr.f32.gmra.mxu1 %v18110_v24 }
0x15e5   :  { %v18115_v11 = vsub.f32 %v16794_v13, %v5167_v38  ;;  %v5170_v2 = vmul.f32 0.5, %v14203_v61 }
0x15e6   :  { %v5114_v22 = vpop.f32.mrf.mxu1 }
0x15e7   :  { %v5169_v46 = vmul.f32 0.5, %v5114_v22  ;;  %14310 = vmatprep.mubr.f32.mxu1 %v18115_v11  ;;  %v5186_v16 = vsub.f32 %v16817_v7, %v5170_v2 }
0x15e8   :  { %v14206_v29 = vpop.f32.mrf.mxu1  ;;  %14311 = vmatmul.mubr.f32.gmra.mxu1 %v5184_v32 }
0x15e9   :  { %v5185_v0 = vsub.f32 %v16812_v18, %v5169_v46  ;;  %v5172_v19 = vmul.f32 0.5, %v14206_v29 }
0x15ea   :  { %v5124_v9 = vpop.f32.mrf.mxu1 }
0x15eb   :  { %v5171_v60 = vmul.f32 0.5, %v5124_v9  ;;  %14313 = vmatprep.mubr.f32.mxu1 %v5185_v0  ;;  %v5188_v59 = vsub.f32 %v16835_v45, %v5172_v19 }
0x15ec   :  { %v14209_v62 = vpop.f32.mrf.mxu1  ;;  %14314 = vmatmul.mubr.f32.gmra.mxu1 %v5186_v16 }
0x15ed   :  { %v5187_v54 = vsub.f32 %v16830_v40, %v5171_v60  ;;  %v5174_v58 = vmul.f32 0.5, %v14209_v62 }
0x15ee   :  { %v5134_v21 = vpop.f32.mrf.mxu1 }
0x15ef   :  { %v5173_v53 = vmul.f32 0.5, %v5134_v21  ;;  %14316 = vmatprep.mubr.f32.mxu1 %v5187_v54  ;;  %v5190_v25 = vsub.f32 %v16848_v42, %v5174_v58 }
0x15f0   :  { %v14212_v56 = vpop.f32.mrf.mxu1  ;;  %14317 = vmatmul.mubr.f32.gmra.mxu1 %v5188_v59 }
0x15f1   :  { %v5189_v33 = vsub.f32 %v16845_v4, %v5173_v53  ;;  %v5176_v38 = vmul.f32 0.5, %v14212_v56 }
0x15f2   :  { %v5144_v61 = vpop.f32.mrf.mxu1 }
0x15f3   :  { %v5175_v2 = vmul.f32 0.5, %v5144_v61  ;;  %14319 = vmatprep.mubr.f32.mxu1 %v5189_v33  ;;  %v5192_v19 = vsub.f32 %v16863_v51, %v5176_v38 }
0x15f4   :  { %v14215_v22 = vpop.f32.mrf.mxu1  ;;  %14320 = vmatmul.mubr.f32.gmra.mxu1 %v5190_v25 }
0x15f5   :  { %v5191_v46 = vsub.f32 %v16860_v1, %v5175_v2  ;;  %v5178_v29 = vmul.f32 0.5, %v14215_v22 }
0x15f6   :  { %v5154_v9 = vpop.f32.mrf.mxu1 }
0x15f7   :  { %v5194_v60 = vsub.f32 %v16869_v49, %v5178_v29  ;;  %v5177_v62 = vmul.f32 0.5, %v5154_v9  ;;  %14322 = vmatprep.mubr.f32.mxu1 %v5191_v46 }
0x15f8   :  { %14323 = vmatmul.mubr.f32.gmra.mxu1 %v5192_v19 }
0x15f9   :  { %v5193_v21 = vsub.f32 %v16871_v36, %v5177_v62  ;;  %14216 = vmatprep.subr.mxu0 %v5194_v60 }
0x15fa   :  { %14217 = vmatpush3.msra.mxu0 %v5194_v60 }
0x15fb   :  { %14218 = vmatprep.subr.mxu0 %v5193_v21  ;;  %14325 = vmatprep.mubr.f32.mxu1 %v5193_v21 }
0x15fc   :  { %14219 = vmatpush3.msra.mxu0 %v5193_v21  ;;  %14326 = vmatmul.mubr.f32.gmra.mxu1 %v5194_v60 }
0x15fd   :  { %14220 = vmatprep.subr.mxu0 %v5192_v19 }
0x15fe   :  { %14221 = vmatpush3.msra.mxu0 %v5192_v19 }
0x15ff   :  { %14222 = vmatprep.subr.mxu0 %v5191_v46 }
0x1600   :  { %14223 = vmatpush3.msra.mxu0 %v5191_v46 }
0x1601   :  { %14224 = vmatprep.subr.mxu0 %v5190_v25 }
0x1602   :  { %14225 = vmatpush3.msra.mxu0 %v5190_v25 }
0x1603   :  { %14226 = vmatprep.subr.mxu0 %v5189_v33 }
0x1604   :  { %14227 = vmatpush3.msra.mxu0 %v5189_v33 }
0x1605   :  { %14228 = vmatprep.subr.mxu0 %v5188_v59 }
0x1606   :  { %14229 = vmatpush3.msra.mxu0 %v5188_v59 }
0x1607   :  { %14230 = vmatprep.subr.mxu0 %v5187_v54 }
0x1608   :  { %14231 = vmatpush3.msra.mxu0 %v5187_v54 }
0x1609   :  { %14232 = vmatprep.subr.mxu0 %v5186_v16 }
0x160a   :  { %14233 = vmatpush3.msra.mxu0 %v5186_v16 }
0x160b   :  { %14234 = vmatprep.subr.mxu0 %v5185_v0 }
0x160c   :  { %14235 = vmatpush3.msra.mxu0 %v5185_v0 }
0x160d   :  { %14236 = vmatprep.subr.mxu0 %v5184_v32 }
0x160e   :  { %14237 = vmatpush3.msra.mxu0 %v5184_v32 }
0x160f   :  { %14238 = vmatprep.subr.mxu0 %v18115_v11 }
0x1610   :  { %14239 = vmatpush3.msra.mxu0 %v18115_v11 }
0x1611   :  { %14240 = vmatprep.subr.mxu0 %v18110_v24 }
0x1612   :  { %14241 = vmatpush3.msra.mxu0 %v18110_v24 }
0x1613   :  { %14242 = vmatprep.subr.mxu0 %v18107_v6 }
0x1614   :  { %14243 = vmatpush3.msra.mxu0 %v18107_v6 }
0x1615   :  { %14244 = vmatprep.subr.mxu0 %v18102_v8 }
0x1616   :  { %14245 = vmatpush3.msra.mxu0 %v18102_v8 }
0x1617   :  { %14246 = vmatprep.subr.mxu0 %v18099_v37 }
0x1618   :  { %14247 = vmatpush3.msra.mxu0 %v18099_v37 }
0x1619   :  { %14249 = vmatmul.mubr.f32.vlgmr.msra.gmra.mxu0 %v18003_v14 }
0x161a   :  { %14251 = vmatprep.mubr.f32.mxu0 %v18007_v55 }
0x161d   :  { %14252 = vmatmul.mubr.f32.gmra.mxu0 %v18005_v50 }
0x161e   :  { %14254 = vmatprep.mubr.f32.mxu0 %v18013_v27 }
0x1621   :  { %14255 = vmatmul.mubr.f32.gmra.mxu0 %v18009_v28 }
0x1622   :  { %14257 = vmatprep.mubr.f32.mxu0 %v18019_v20 }
0x1625   :  { %14258 = vmatmul.mubr.f32.gmra.mxu0 %v18015_v35 }
0x1626   :  { %14260 = vmatprep.mubr.f32.mxu0 %v18025_v63 }
0x1629   :  { %14261 = vmatmul.mubr.f32.gmra.mxu0 %v18021_v12 }
0x162a   :  { %14263 = vmatprep.mubr.f32.mxu0 %v18031_v43 }
0x162d   :  { %14264 = vmatmul.mubr.f32.gmra.mxu0 %v18027_v17 }
0x162e   :  { %14266 = vmatprep.mubr.f32.mxu0 %v18037_v30 }
0x1631   :  { %14267 = vmatmul.mubr.f32.gmra.mxu0 %v18033_v41 }
0x1632   :  { %14269 = vmatprep.mubr.f32.mxu0 %v18044_v34 }
0x1635   :  { %14270 = vmatmul.mubr.f32.gmra.mxu0 %v18039_v48 }
0x16a0   :  { %v18154_v14 = vpop.f32.mrf.mxu1 }
0x16a2   :  { %v18156_v50 = vpop.f32.mrf.mxu1 }
0x16a3   :  { %14360 = vmatprep.mubr.f32.mxu0 %v18156_v50 }
0x16a4   :  { %v18167_v12 = vpop.f32.mrf.mxu1 }
0x16a6   :  { %v18173_v43 = vpop.f32.mrf.mxu1 }
0x16a8   :  { %v18179_v48 = vpop.f32.mrf.mxu1 }
0x16aa   :  { %v18185_v8 = vpop.f32.mrf.mxu1 }
0x16ac   :  { %v18191_v11 = vpop.f32.mrf.mxu1 }
0x16ae   :  { %v18198_v16 = vpop.f32.mrf.mxu1 }
0x16b0   :  { %v14318_v59 = vpop.f32.mrf.mxu1 }
0x16b2   :  { %v5446_v58 = vpop.f32.mrf.mxu1 }
0x16b4   :  { %v14321_v53 = vpop.f32.mrf.mxu1 }
0x16b6   :  { %v5456_v56 = vpop.f32.mrf.mxu1 }
0x16b8   :  { %v14324_v33 = vpop.f32.mrf.mxu1 }
0x16ba   :  { %v5466_v25 = vpop.f32.mrf.mxu1 }
0x16bc   :  { %v14327_v38 = vpop.f32.mrf.mxu1 }
0x16be   :  { %v5476_v61 = vpop.f32.mrf.mxu1 }
0x16d9   :  { %v18159_v55 = vpop.f32.mrf.mxu0 }
0x16db   :  { %v5261_v28 = vpop.f32.mrf.mxu0 }
0x16dc   :  { %14416 = vmatprep.mubr.f32.mxu1 %v5261_v28 }
0x16dd   :  { %v18161_v27 = vpop.f32.mrf.mxu0 }
0x16df   :  { %v18163_v35 = vpop.f32.mrf.mxu0 }
0x16e1   :  { %v18165_v20 = vpop.f32.mrf.mxu0 }
0x16e3   :  { %v18169_v63 = vpop.f32.mrf.mxu0 }
0x16e5   :  { %v18171_v17 = vpop.f32.mrf.mxu0 }
0x16e7   :  { %v18175_v41 = vpop.f32.mrf.mxu0 }
0x16e9   :  { %v18177_v30 = vpop.f32.mrf.mxu0 }
0x16eb   :  { %v18181_v34 = vpop.f32.mrf.mxu0 }
0x16ed   :  { %v18183_v37 = vpop.f32.mrf.mxu0 }
0x16ef   :  { %v18187_v6 = vpop.f32.mrf.mxu0 }
0x16f1   :  { %v18189_v24 = vpop.f32.mrf.mxu0 }
0x16f3   :  { %v18193_v32 = vpop.f32.mrf.mxu0 }
0x16f5   :  { %v18195_v0 = vpop.f32.mrf.mxu0 }
0x16f6   :  { %14328 = vmatprep.subr.mxu0 %v18195_v0 }
0x16f7   :  { %v18200_v54 = vpop.f32.mrf.mxu0  ;;  %14329 = vmatpush3.msra.mxu0 %v18195_v0 }
0x16f8   :  { %14330 = vmatprep.subr.mxu0 %v18200_v54 }
0x16f9   :  { %14331 = vmatpush3.msra.mxu0 %v18200_v54 }
0x16fa   :  { %14332 = vmatprep.subr.mxu0 %v18189_v24 }
0x16fb   :  { %14333 = vmatpush3.msra.mxu0 %v18189_v24 }
0x16fc   :  { %14334 = vmatprep.subr.mxu0 %v18193_v32 }
0x16fd   :  { %14335 = vmatpush3.msra.mxu0 %v18193_v32 }
0x16fe   :  { %14336 = vmatprep.subr.mxu0 %v18183_v37 }
0x16ff   :  { %14337 = vmatpush3.msra.mxu0 %v18183_v37 }
0x1700   :  { %14338 = vmatprep.subr.mxu0 %v18187_v6 }
0x1701   :  { %14339 = vmatpush3.msra.mxu0 %v18187_v6 }
0x1702   :  { %14340 = vmatprep.subr.mxu0 %v18177_v30 }
0x1703   :  { %14341 = vmatpush3.msra.mxu0 %v18177_v30 }
0x1704   :  { %14342 = vmatprep.subr.mxu0 %v18181_v34 }
0x1705   :  { %14343 = vmatpush3.msra.mxu0 %v18181_v34 }
0x1706   :  { %14344 = vmatprep.subr.mxu0 %v18171_v17 }
0x1707   :  { %14345 = vmatpush3.msra.mxu0 %v18171_v17 }
0x1708   :  { %14346 = vmatprep.subr.mxu0 %v18175_v41 }
0x1709   :  { %14347 = vmatpush3.msra.mxu0 %v18175_v41 }
0x170a   :  { %14348 = vmatprep.subr.mxu0 %v18165_v20 }
0x170b   :  { %14349 = vmatpush3.msra.mxu0 %v18165_v20 }
0x170c   :  { %14350 = vmatprep.subr.mxu0 %v18169_v63 }
0x170d   :  { %14351 = vmatpush3.msra.mxu0 %v18169_v63 }
0x170e   :  { %14352 = vmatprep.subr.mxu0 %v18161_v27 }
0x170f   :  { %14353 = vmatpush3.msra.mxu0 %v18161_v27 }
0x1710   :  { %14354 = vmatprep.subr.mxu0 %v18163_v35 }
0x1711   :  { %14355 = vmatpush3.msra.mxu0 %v18163_v35 }
0x1712   :  { %14356 = vmatprep.subr.mxu0 %v18159_v55 }
0x1713   :  { %14357 = vmatpush3.msra.mxu0 %v18159_v55 }
0x1714   :  { %14358 = vmatprep.subr.mxu0 %v5261_v28 }
0x1715   :  { %14359 = vmatpush3.msra.mxu0 %v5261_v28 }
0x1716   :  { %14361 = vmatmul.mubr.f32.vlgmr.msra.gmra.mxu0 %v18154_v14  ;;  %14440 = vmatprep.subr.mxu0 %v14327_v38 }
0x1717   :  { %14363 = vmatprep.mubr.f32.mxu0 %v18173_v43  ;;  %14441 = vmatpush3.msra.mxu0 %v14327_v38 }
0x1718   :  { %14442 = vmatprep.subr.mxu0 %v5476_v61 }
0x1719   :  { %14443 = vmatpush3.msra.mxu0 %v5476_v61 }
0x171a   :  { %14364 = vmatmul.mubr.f32.gmra.mxu0 %v18167_v12  ;;  %14444 = vmatprep.subr.mxu0 %v14324_v33 }
0x171b   :  { %14366 = vmatprep.mubr.f32.mxu0 %v18185_v8  ;;  %14445 = vmatpush3.msra.mxu0 %v14324_v33 }
0x171c   :  { %14446 = vmatprep.subr.mxu0 %v5466_v25 }
0x171d   :  { %14447 = vmatpush3.msra.mxu0 %v5466_v25 }
0x171e   :  { %14367 = vmatmul.mubr.f32.gmra.mxu0 %v18179_v48  ;;  %14448 = vmatprep.subr.mxu0 %v14321_v53 }
0x171f   :  { %14369 = vmatprep.mubr.f32.mxu0 %v18198_v16  ;;  %14449 = vmatpush3.msra.mxu0 %v14321_v53 }
0x1720   :  { %14450 = vmatprep.subr.mxu0 %v5456_v56 }
0x1721   :  { %14451 = vmatpush3.msra.mxu0 %v5456_v56 }
0x1722   :  { %14370 = vmatmul.mubr.f32.gmra.mxu0 %v18191_v11  ;;  %14452 = vmatprep.subr.mxu0 %v14318_v59 }
0x1723   :  { %14372 = vmatprep.mubr.f32.mxu0 %v5446_v58  ;;  %14453 = vmatpush3.msra.mxu0 %v14318_v59 }
0x1724   :  { %14454 = vmatprep.subr.mxu0 %v5446_v58 }
0x1725   :  { %14455 = vmatpush3.msra.mxu0 %v5446_v58 }
0x1726   :  { %14373 = vmatmul.mubr.f32.gmra.mxu0 %v14318_v59  ;;  %14456 = vmatprep.subr.mxu0 %v18191_v11 }
0x1727   :  { %14375 = vmatprep.mubr.f32.mxu0 %v5456_v56  ;;  %14457 = vmatpush3.msra.mxu0 %v18191_v11 }
0x1728   :  { %14458 = vmatprep.subr.mxu0 %v18198_v16 }
0x1729   :  { %14459 = vmatpush3.msra.mxu0 %v18198_v16 }
0x172a   :  { %14376 = vmatmul.mubr.f32.gmra.mxu0 %v14321_v53  ;;  %14460 = vmatprep.subr.mxu0 %v18179_v48 }
0x172b   :  { %14378 = vmatprep.mubr.f32.mxu0 %v5466_v25  ;;  %14461 = vmatpush3.msra.mxu0 %v18179_v48 }
0x172c   :  { %14462 = vmatprep.subr.mxu0 %v18185_v8 }
0x172d   :  { %14463 = vmatpush3.msra.mxu0 %v18185_v8 }
0x172e   :  { %14379 = vmatmul.mubr.f32.gmra.mxu0 %v14324_v33  ;;  %14464 = vmatprep.subr.mxu0 %v18167_v12 }
0x172f   :  { %14381 = vmatprep.mubr.f32.mxu0 %v5476_v61  ;;  %14465 = vmatpush3.msra.mxu0 %v18167_v12 }
0x1730   :  { %14466 = vmatprep.subr.mxu0 %v18173_v43 }
0x1731   :  { %14467 = vmatpush3.msra.mxu0 %v18173_v43 }
0x1732   :  { %14382 = vmatmul.mubr.f32.gmra.mxu0 %v14327_v38  ;;  %14468 = vmatprep.subr.mxu0 %v18154_v14 }
0x1733   :  { %14469 = vmatpush3.msra.mxu0 %v18154_v14 }
0x1734   :  { %14470 = vmatprep.subr.mxu0 %v18156_v50 }
0x1735   :  { %14471 = vmatpush3.msra.mxu0 %v18156_v50 }
0x17d6   :  { %v14362_v2 = vpop.f32.mrf.mxu0 }
0x17d7   :  { %v5631_v22 = vmul.f32 0.5, %v14362_v2 }
0x17d8   :  { %v5551_v46 = vpop.f32.mrf.mxu0 }
0x17d9   :  { %v5630_v29 = vmul.f32 0.5, %v5551_v46  ;;  %v18258_v60 = vsub.f32 %v16768_v39, %v5631_v22 }
0x17da   :  { %v14365_v19 = vpop.f32.mrf.mxu0 }
0x17db   :  { %v18255_v9 = vsub.f32 %v16766_v10, %v5630_v29  ;;  %v5633_v62 = vmul.f32 0.5, %v14365_v19 }
0x17dc   :  { %v5561_v21 = vpop.f32.mrf.mxu0 }
0x17dd   :  { %v5632_v28 = vmul.f32 0.5, %v5561_v21  ;;  %14472 = vmatprep.mubr.f32.mxu0 %v18255_v9  ;;  %v18266_v12 = vsub.f32 %v16781_v26, %v5633_v62 }
0x17de   :  { %v14368_v14 = vpop.f32.mrf.mxu0  ;;  %14473 = vmatmul.mubr.f32.vlgmr.msra.gmra.mxu0 %v18258_v60 }
0x17df   :  { %v18263_v50 = vsub.f32 %v16776_v23, %v5632_v28  ;;  %v5635_v43 = vmul.f32 0.5, %v14368_v14 }
0x17e0   :  { %v5571_v48 = vpop.f32.mrf.mxu0 }
0x17e1   :  { %v5634_v8 = vmul.f32 0.5, %v5571_v48  ;;  %14475 = vmatprep.mubr.f32.mxu0 %v18263_v50  ;;  %v5651_v59 = vsub.f32 %v16799_v31, %v5635_v43 }
0x17e2   :  { %v14371_v11 = vpop.f32.mrf.mxu0  ;;  %14476 = vmatmul.mubr.f32.gmra.mxu0 %v18266_v12 }
0x17e3   :  { %v18271_v16 = vsub.f32 %v16794_v13, %v5634_v8  ;;  %v5637_v58 = vmul.f32 0.5, %v14371_v11 }
0x17e4   :  { %v5581_v53 = vpop.f32.mrf.mxu0 }
0x17e5   :  { %v5636_v56 = vmul.f32 0.5, %v5581_v53  ;;  %14478 = vmatprep.mubr.f32.mxu0 %v18271_v16  ;;  %v5653_v38 = vsub.f32 %v16817_v7, %v5637_v58 }
0x17e6   :  { %v14374_v33 = vpop.f32.mrf.mxu0  ;;  %14479 = vmatmul.mubr.f32.gmra.mxu0 %v5651_v59 }
0x17e7   :  { %v5652_v25 = vsub.f32 %v16812_v18, %v5636_v56  ;;  %v5639_v61 = vmul.f32 0.5, %v14374_v33 }
0x17e8   :  { %v5591_v2 = vpop.f32.mrf.mxu0 }
0x17e9   :  { %v5638_v22 = vmul.f32 0.5, %v5591_v2  ;;  %14481 = vmatprep.mubr.f32.mxu0 %v5652_v25  ;;  %v5655_v19 = vsub.f32 %v16835_v45, %v5639_v61 }
0x17ea   :  { %v14377_v46 = vpop.f32.mrf.mxu0  ;;  %14482 = vmatmul.mubr.f32.gmra.mxu0 %v5653_v38 }
0x17eb   :  { %v5654_v29 = vsub.f32 %v16830_v40, %v5638_v22  ;;  %v5641_v62 = vmul.f32 0.5, %v14377_v46 }
0x17ec   :  { %v5601_v21 = vpop.f32.mrf.mxu0 }
0x17ed   :  { %v5640_v28 = vmul.f32 0.5, %v5601_v21  ;;  %14484 = vmatprep.mubr.f32.mxu0 %v5654_v29  ;;  %v5657_v48 = vsub.f32 %v16848_v42, %v5641_v62 }
0x17ee   :  { %v14380_v14 = vpop.f32.mrf.mxu0  ;;  %14485 = vmatmul.mubr.f32.gmra.mxu0 %v5655_v19 }
0x17ef   :  { %v5656_v43 = vsub.f32 %v16845_v4, %v5640_v28  ;;  %v5643_v8 = vmul.f32 0.5, %v14380_v14 }
0x17f0   :  { %v5611_v11 = vpop.f32.mrf.mxu0 }
0x17f1   :  { %v5642_v58 = vmul.f32 0.5, %v5611_v11  ;;  %14487 = vmatprep.mubr.f32.mxu0 %v5656_v43  ;;  %v5659_v61 = vsub.f32 %v16863_v51, %v5643_v8 }
0x17f2   :  { %v14383_v53 = vpop.f32.mrf.mxu0  ;;  %14488 = vmatmul.mubr.f32.gmra.mxu0 %v5657_v48 }
0x17f3   :  { %v5658_v56 = vsub.f32 %v16860_v1, %v5642_v58  ;;  %v5645_v33 = vmul.f32 0.5, %v14383_v53 }
0x17f4   :  { %v5621_v2 = vpop.f32.mrf.mxu0 }
0x17f5   :  { %v5661_v22 = vsub.f32 %v16869_v49, %v5645_v33  ;;  %v5644_v46 = vmul.f32 0.5, %v5621_v2  ;;  %14490 = vmatprep.mubr.f32.mxu0 %v5658_v56 }
0x17f6   :  { %14491 = vmatmul.mubr.f32.gmra.mxu0 %v5659_v61 }
0x17f7   :  { %v5660_v21 = vsub.f32 %v16871_v36, %v5644_v46  ;;  %14384 = vmatprep.subr.mxu1 %v5661_v22 }
0x17f8   :  { %14385 = vmatpush3.msra.mxu1 %v5661_v22 }
0x17f9   :  { %14386 = vmatprep.subr.mxu1 %v5660_v21  ;;  %14493 = vmatprep.mubr.f32.mxu0 %v5660_v21 }
0x17fa   :  { %14387 = vmatpush3.msra.mxu1 %v5660_v21  ;;  %14494 = vmatmul.mubr.f32.gmra.mxu0 %v5661_v22 }
0x17fb   :  { %14388 = vmatprep.subr.mxu1 %v5659_v61 }
0x17fc   :  { %14389 = vmatpush3.msra.mxu1 %v5659_v61 }
0x17fd   :  { %14390 = vmatprep.subr.mxu1 %v5658_v56 }
0x17fe   :  { %14391 = vmatpush3.msra.mxu1 %v5658_v56 }
0x17ff   :  { %14392 = vmatprep.subr.mxu1 %v5657_v48 }
0x1800   :  { %14393 = vmatpush3.msra.mxu1 %v5657_v48 }
0x1801   :  { %14394 = vmatprep.subr.mxu1 %v5656_v43 }
0x1802   :  { %14395 = vmatpush3.msra.mxu1 %v5656_v43 }
0x1803   :  { %14396 = vmatprep.subr.mxu1 %v5655_v19 }
0x1804   :  { %14397 = vmatpush3.msra.mxu1 %v5655_v19 }
0x1805   :  { %14398 = vmatprep.subr.mxu1 %v5654_v29 }
0x1806   :  { %14399 = vmatpush3.msra.mxu1 %v5654_v29 }
0x1807   :  { %14400 = vmatprep.subr.mxu1 %v5653_v38 }
0x1808   :  { %14401 = vmatpush3.msra.mxu1 %v5653_v38 }
0x1809   :  { %14402 = vmatprep.subr.mxu1 %v5652_v25 }
0x180a   :  { %14403 = vmatpush3.msra.mxu1 %v5652_v25 }
0x180b   :  { %14404 = vmatprep.subr.mxu1 %v5651_v59 }
0x180c   :  { %14405 = vmatpush3.msra.mxu1 %v5651_v59 }
0x180d   :  { %14406 = vmatprep.subr.mxu1 %v18271_v16 }
0x180e   :  { %14407 = vmatpush3.msra.mxu1 %v18271_v16 }
0x180f   :  { %14408 = vmatprep.subr.mxu1 %v18266_v12 }
0x1810   :  { %14409 = vmatpush3.msra.mxu1 %v18266_v12 }
0x1811   :  { %14410 = vmatprep.subr.mxu1 %v18263_v50 }
0x1812   :  { %14411 = vmatpush3.msra.mxu1 %v18263_v50 }
0x1813   :  { %14412 = vmatprep.subr.mxu1 %v18258_v60 }
0x1814   :  { %14413 = vmatpush3.msra.mxu1 %v18258_v60 }
0x1815   :  { %14414 = vmatprep.subr.mxu1 %v18255_v9 }
0x1816   :  { %14415 = vmatpush3.msra.mxu1 %v18255_v9 }
0x1817   :  { %14417 = vmatmul.mubr.f32.vlgmr.msra.gmra.mxu1 %v18159_v55 }
0x1818   :  { %14419 = vmatprep.mubr.f32.mxu1 %v18163_v35 }
0x181b   :  { %14420 = vmatmul.mubr.f32.gmra.mxu1 %v18161_v27 }
0x181c   :  { %14422 = vmatprep.mubr.f32.mxu1 %v18169_v63 }
0x181f   :  { %14423 = vmatmul.mubr.f32.gmra.mxu1 %v18165_v20 }
0x1820   :  { %14425 = vmatprep.mubr.f32.mxu1 %v18175_v41 }
0x1823   :  { %14426 = vmatmul.mubr.f32.gmra.mxu1 %v18171_v17 }
0x1824   :  { %14428 = vmatprep.mubr.f32.mxu1 %v18181_v34 }
0x1827   :  { %14429 = vmatmul.mubr.f32.gmra.mxu1 %v18177_v30 }
0x1828   :  { %14431 = vmatprep.mubr.f32.mxu1 %v18187_v6 }
0x182b   :  { %14432 = vmatmul.mubr.f32.gmra.mxu1 %v18183_v37 }
0x182c   :  { %14434 = vmatprep.mubr.f32.mxu1 %v18193_v32 }
0x182f   :  { %14435 = vmatmul.mubr.f32.gmra.mxu1 %v18189_v24 }
0x1830   :  { %14437 = vmatprep.mubr.f32.mxu1 %v18200_v54 }
0x1833   :  { %14438 = vmatmul.mubr.f32.gmra.mxu1 %v18195_v0 }
0x189e   :  { %v18310_v55 = vpop.f32.mrf.mxu0 }
0x18a0   :  { %v18312_v27 = vpop.f32.mrf.mxu0 }
0x18a1   :  { %14528 = vmatprep.mubr.f32.mxu1 %v18312_v27 }
0x18a2   :  { %v18323_v30 = vpop.f32.mrf.mxu0 }
0x18a4   :  { %v18329_v6 = vpop.f32.mrf.mxu0 }
0x18a6   :  { %v18335_v0 = vpop.f32.mrf.mxu0 }
0x18a8   :  { %v18341_v60 = vpop.f32.mrf.mxu0 }
0x18aa   :  { %v18347_v16 = vpop.f32.mrf.mxu0 }
0x18ac   :  { %v18354_v38 = vpop.f32.mrf.mxu0 }
0x18ae   :  { %v14486_v19 = vpop.f32.mrf.mxu0 }
0x18b0   :  { %v5913_v62 = vpop.f32.mrf.mxu0 }
0x18b2   :  { %v14489_v28 = vpop.f32.mrf.mxu0 }
0x18b4   :  { %v5923_v14 = vpop.f32.mrf.mxu0 }
0x18b6   :  { %v14492_v43 = vpop.f32.mrf.mxu0 }
0x18b8   :  { %v5933_v48 = vpop.f32.mrf.mxu0 }
0x18ba   :  { %v14495_v8 = vpop.f32.mrf.mxu0 }
0x18bc   :  { %v5943_v11 = vpop.f32.mrf.mxu0 }
0x18d7   :  { %v18315_v35 = vpop.f32.mrf.mxu1 }
0x18d9   :  { %v5728_v20 = vpop.f32.mrf.mxu1 }
0x18da   :  { %14584 = vmatprep.mubr.f32.mxu0 %v5728_v20 }
0x18db   :  { %v18317_v63 = vpop.f32.mrf.mxu1 }
0x18dd   :  { %v18319_v17 = vpop.f32.mrf.mxu1 }
0x18df   :  { %v18321_v41 = vpop.f32.mrf.mxu1 }
0x18e1   :  { %v18325_v34 = vpop.f32.mrf.mxu1 }
0x18e3   :  { %v18327_v37 = vpop.f32.mrf.mxu1 }
0x18e5   :  { %v18331_v24 = vpop.f32.mrf.mxu1 }
0x18e7   :  { %v18333_v32 = vpop.f32.mrf.mxu1 }
0x18e9   :  { %v18337_v54 = vpop.f32.mrf.mxu1 }
0x18eb   :  { %v18339_v9 = vpop.f32.mrf.mxu1 }
0x18ed   :  { %v18343_v50 = vpop.f32.mrf.mxu1 }
0x18ef   :  { %v18345_v12 = vpop.f32.mrf.mxu1 }
0x18f1   :  { %v18349_v59 = vpop.f32.mrf.mxu1 }
0x18f3   :  { %v18351_v25 = vpop.f32.mrf.mxu1 }
0x18f4   :  { %14496 = vmatprep.subr.mxu1 %v18351_v25 }
0x18f5   :  { %v18356_v29 = vpop.f32.mrf.mxu1  ;;  %14497 = vmatpush3.msra.mxu1 %v18351_v25 }
0x18f6   :  { %14498 = vmatprep.subr.mxu1 %v18356_v29 }
0x18f7   :  { %14499 = vmatpush3.msra.mxu1 %v18356_v29 }
0x18f8   :  { %14500 = vmatprep.subr.mxu1 %v18345_v12 }
0x18f9   :  { %14501 = vmatpush3.msra.mxu1 %v18345_v12 }
0x18fa   :  { %14502 = vmatprep.subr.mxu1 %v18349_v59 }
0x18fb   :  { %14503 = vmatpush3.msra.mxu1 %v18349_v59 }
0x18fc   :  { %14504 = vmatprep.subr.mxu1 %v18339_v9 }
0x18fd   :  { %14505 = vmatpush3.msra.mxu1 %v18339_v9 }
0x18fe   :  { %14506 = vmatprep.subr.mxu1 %v18343_v50 }
0x18ff   :  { %14507 = vmatpush3.msra.mxu1 %v18343_v50 }
0x1900   :  { %14508 = vmatprep.subr.mxu1 %v18333_v32 }
0x1901   :  { %14509 = vmatpush3.msra.mxu1 %v18333_v32 }
0x1902   :  { %14510 = vmatprep.subr.mxu1 %v18337_v54 }
0x1903   :  { %14511 = vmatpush3.msra.mxu1 %v18337_v54 }
0x1904   :  { %14512 = vmatprep.subr.mxu1 %v18327_v37 }
0x1905   :  { %14513 = vmatpush3.msra.mxu1 %v18327_v37 }
0x1906   :  { %14514 = vmatprep.subr.mxu1 %v18331_v24 }
0x1907   :  { %14515 = vmatpush3.msra.mxu1 %v18331_v24 }
0x1908   :  { %14516 = vmatprep.subr.mxu1 %v18321_v41 }
0x1909   :  { %14517 = vmatpush3.msra.mxu1 %v18321_v41 }
0x190a   :  { %14518 = vmatprep.subr.mxu1 %v18325_v34 }
0x190b   :  { %14519 = vmatpush3.msra.mxu1 %v18325_v34 }
0x190c   :  { %14520 = vmatprep.subr.mxu1 %v18317_v63 }
0x190d   :  { %14521 = vmatpush3.msra.mxu1 %v18317_v63 }
0x190e   :  { %14522 = vmatprep.subr.mxu1 %v18319_v17 }
0x190f   :  { %14523 = vmatpush3.msra.mxu1 %v18319_v17 }
0x1910   :  { %14524 = vmatprep.subr.mxu1 %v18315_v35 }
0x1911   :  { %14525 = vmatpush3.msra.mxu1 %v18315_v35 }
0x1912   :  { %14526 = vmatprep.subr.mxu1 %v5728_v20 }
0x1913   :  { %14527 = vmatpush3.msra.mxu1 %v5728_v20 }
0x1914   :  { %14529 = vmatmul.mubr.f32.vlgmr.msra.gmra.mxu1 %v18310_v55  ;;  %14608 = vmatprep.subr.mxu1 %v14495_v8 }
0x1915   :  { %14531 = vmatprep.mubr.f32.mxu1 %v18329_v6  ;;  %14609 = vmatpush3.msra.mxu1 %v14495_v8 }
0x1916   :  { %14610 = vmatprep.subr.mxu1 %v5943_v11 }
0x1917   :  { %14611 = vmatpush3.msra.mxu1 %v5943_v11 }
0x1918   :  { %14532 = vmatmul.mubr.f32.gmra.mxu1 %v18323_v30  ;;  %14612 = vmatprep.subr.mxu1 %v14492_v43 }
0x1919   :  { %14534 = vmatprep.mubr.f32.mxu1 %v18341_v60  ;;  %14613 = vmatpush3.msra.mxu1 %v14492_v43 }
0x191a   :  { %14614 = vmatprep.subr.mxu1 %v5933_v48 }
0x191b   :  { %14615 = vmatpush3.msra.mxu1 %v5933_v48 }
0x191c   :  { %14535 = vmatmul.mubr.f32.gmra.mxu1 %v18335_v0  ;;  %14616 = vmatprep.subr.mxu1 %v14489_v28 }
0x191d   :  { %14537 = vmatprep.mubr.f32.mxu1 %v18354_v38  ;;  %14617 = vmatpush3.msra.mxu1 %v14489_v28 }
0x191e   :  { %14618 = vmatprep.subr.mxu1 %v5923_v14 }
0x191f   :  { %14619 = vmatpush3.msra.mxu1 %v5923_v14 }
0x1920   :  { %14538 = vmatmul.mubr.f32.gmra.mxu1 %v18347_v16  ;;  %14620 = vmatprep.subr.mxu1 %v14486_v19 }
0x1921   :  { %14540 = vmatprep.mubr.f32.mxu1 %v5913_v62  ;;  %14621 = vmatpush3.msra.mxu1 %v14486_v19 }
0x1922   :  { %14622 = vmatprep.subr.mxu1 %v5913_v62 }
0x1923   :  { %14623 = vmatpush3.msra.mxu1 %v5913_v62 }
0x1924   :  { %14541 = vmatmul.mubr.f32.gmra.mxu1 %v14486_v19  ;;  %14624 = vmatprep.subr.mxu1 %v18347_v16 }
0x1925   :  { %14543 = vmatprep.mubr.f32.mxu1 %v5923_v14  ;;  %14625 = vmatpush3.msra.mxu1 %v18347_v16 }
0x1926   :  { %14626 = vmatprep.subr.mxu1 %v18354_v38 }
0x1927   :  { %14627 = vmatpush3.msra.mxu1 %v18354_v38 }
0x1928   :  { %14544 = vmatmul.mubr.f32.gmra.mxu1 %v14489_v28  ;;  %14628 = vmatprep.subr.mxu1 %v18335_v0 }
0x1929   :  { %14546 = vmatprep.mubr.f32.mxu1 %v5933_v48  ;;  %14629 = vmatpush3.msra.mxu1 %v18335_v0 }
0x192a   :  { %14630 = vmatprep.subr.mxu1 %v18341_v60 }
0x192b   :  { %14631 = vmatpush3.msra.mxu1 %v18341_v60 }
0x192c   :  { %14547 = vmatmul.mubr.f32.gmra.mxu1 %v14492_v43  ;;  %14632 = vmatprep.subr.mxu1 %v18323_v30 }
0x192d   :  { %14549 = vmatprep.mubr.f32.mxu1 %v5943_v11  ;;  %14633 = vmatpush3.msra.mxu1 %v18323_v30 }
0x192e   :  { %14634 = vmatprep.subr.mxu1 %v18329_v6 }
0x192f   :  { %14635 = vmatpush3.msra.mxu1 %v18329_v6 }
0x1930   :  { %14550 = vmatmul.mubr.f32.gmra.mxu1 %v14495_v8  ;;  %14636 = vmatprep.subr.mxu1 %v18310_v55 }
0x1931   :  { %14637 = vmatpush3.msra.mxu1 %v18310_v55 }
0x1932   :  { %14638 = vmatprep.subr.mxu1 %v18312_v27 }
0x1933   :  { %14639 = vmatpush3.msra.mxu1 %v18312_v27 }
0x19d4   :  { %v14530_v58 = vpop.f32.mrf.mxu1 }
0x19d5   :  { %v6098_v53 = vmul.f32 0.5, %v14530_v58 }
0x19d6   :  { %v6018_v56 = vpop.f32.mrf.mxu1 }
0x19d7   :  { %v6097_v33 = vmul.f32 0.5, %v6018_v56  ;;  %v18414_v22 = vsub.f32 %v16768_v39, %v6098_v53 }
0x19d8   :  { %v14533_v61 = vpop.f32.mrf.mxu1 }
0x19d9   :  { %v18411_v2 = vsub.f32 %v16766_v10, %v6097_v33  ;;  %v6100_v46 = vmul.f32 0.5, %v14533_v61 }
0x19da   :  { %v6028_v21 = vpop.f32.mrf.mxu1 }
0x19db   :  { %v6099_v20 = vmul.f32 0.5, %v6028_v21  ;;  %14640 = vmatprep.mubr.f32.mxu1 %v18411_v2  ;;  %v18422_v30 = vsub.f32 %v16781_v26, %v6100_v46 }
0x19dc   :  { %v14536_v55 = vpop.f32.mrf.mxu1  ;;  %14641 = vmatmul.mubr.f32.vlgmr.msra.gmra.mxu1 %v18414_v22 }
0x19dd   :  { %v18419_v27 = vsub.f32 %v16776_v23, %v6099_v20  ;;  %v6102_v6 = vmul.f32 0.5, %v14536_v55 }
0x19de   :  { %v6038_v0 = vpop.f32.mrf.mxu1 }
0x19df   :  { %v6101_v60 = vmul.f32 0.5, %v6038_v0  ;;  %14643 = vmatprep.mubr.f32.mxu1 %v18419_v27  ;;  %v6118_v19 = vsub.f32 %v16799_v31, %v6102_v6 }
0x19e0   :  { %v14539_v16 = vpop.f32.mrf.mxu1  ;;  %14644 = vmatmul.mubr.f32.gmra.mxu1 %v18422_v30 }
0x19e1   :  { %v18427_v38 = vsub.f32 %v16794_v13, %v6101_v60  ;;  %v6104_v62 = vmul.f32 0.5, %v14539_v16 }
0x19e2   :  { %v6048_v28 = vpop.f32.mrf.mxu1 }
0x19e3   :  { %v6103_v14 = vmul.f32 0.5, %v6048_v28  ;;  %14646 = vmatprep.mubr.f32.mxu1 %v18427_v38  ;;  %v6120_v8 = vsub.f32 %v16817_v7, %v6104_v62 }
0x19e4   :  { %v14542_v43 = vpop.f32.mrf.mxu1  ;;  %14647 = vmatmul.mubr.f32.gmra.mxu1 %v6118_v19 }
0x19e5   :  { %v6119_v48 = vsub.f32 %v16812_v18, %v6103_v14  ;;  %v6106_v11 = vmul.f32 0.5, %v14542_v43 }
0x19e6   :  { %v6058_v58 = vpop.f32.mrf.mxu1 }
0x19e7   :  { %v6105_v53 = vmul.f32 0.5, %v6058_v58  ;;  %14649 = vmatprep.mubr.f32.mxu1 %v6119_v48  ;;  %v6122_v61 = vsub.f32 %v16835_v45, %v6106_v11 }
0x19e8   :  { %v14545_v56 = vpop.f32.mrf.mxu1  ;;  %14650 = vmatmul.mubr.f32.gmra.mxu1 %v6120_v8 }
0x19e9   :  { %v6121_v33 = vsub.f32 %v16830_v40, %v6105_v53  ;;  %v6108_v46 = vmul.f32 0.5, %v14545_v56 }
0x19ea   :  { %v6068_v21 = vpop.f32.mrf.mxu1 }
0x19eb   :  { %v6107_v20 = vmul.f32 0.5, %v6068_v21  ;;  %14652 = vmatprep.mubr.f32.mxu1 %v6121_v33  ;;  %v6124_v0 = vsub.f32 %v16848_v42, %v6108_v46 }
0x19ec   :  { %v14548_v55 = vpop.f32.mrf.mxu1  ;;  %14653 = vmatmul.mubr.f32.gmra.mxu1 %v6122_v61 }
0x19ed   :  { %v6123_v6 = vsub.f32 %v16845_v4, %v6107_v20  ;;  %v6110_v60 = vmul.f32 0.5, %v14548_v55 }
0x19ee   :  { %v6078_v16 = vpop.f32.mrf.mxu1 }
0x19ef   :  { %v6109_v62 = vmul.f32 0.5, %v6078_v16  ;;  %14655 = vmatprep.mubr.f32.mxu1 %v6123_v6  ;;  %v6126_v11 = vsub.f32 %v16863_v51, %v6110_v60 }
0x19f0   :  { %v14551_v28 = vpop.f32.mrf.mxu1  ;;  %14656 = vmatmul.mubr.f32.gmra.mxu1 %v6124_v0 }
0x19f1   :  { %v6125_v14 = vsub.f32 %v16860_v1, %v6109_v62  ;;  %v6112_v43 = vmul.f32 0.5, %v14551_v28 }
0x19f2   :  { %v6088_v58 = vpop.f32.mrf.mxu1 }
0x19f3   :  { %v6128_v53 = vsub.f32 %v16869_v49, %v6112_v43  ;;  %v6111_v56 = vmul.f32 0.5, %v6088_v58  ;;  %14658 = vmatprep.mubr.f32.mxu1 %v6125_v14 }
0x19f4   :  { %14659 = vmatmul.mubr.f32.gmra.mxu1 %v6126_v11 }
0x19f5   :  { %v6127_v21 = vsub.f32 %v16871_v36, %v6111_v56  ;;  %14552 = vmatprep.subr.mxu0 %v6128_v53 }
0x19f6   :  { %14553 = vmatpush3.msra.mxu0 %v6128_v53 }
0x19f7   :  { %14554 = vmatprep.subr.mxu0 %v6127_v21  ;;  %14661 = vmatprep.mubr.f32.mxu1 %v6127_v21 }
0x19f8   :  { %14555 = vmatpush3.msra.mxu0 %v6127_v21  ;;  %14662 = vmatmul.mubr.f32.gmra.mxu1 %v6128_v53 }
0x19f9   :  { %14556 = vmatprep.subr.mxu0 %v6126_v11 }
0x19fa   :  { %14557 = vmatpush3.msra.mxu0 %v6126_v11 }
0x19fb   :  { %14558 = vmatprep.subr.mxu0 %v6125_v14 }
0x19fc   :  { %14559 = vmatpush3.msra.mxu0 %v6125_v14 }
0x19fd   :  { %14560 = vmatprep.subr.mxu0 %v6124_v0 }
0x19fe   :  { %14561 = vmatpush3.msra.mxu0 %v6124_v0 }
0x19ff   :  { %14562 = vmatprep.subr.mxu0 %v6123_v6 }
0x1a00   :  { %14563 = vmatpush3.msra.mxu0 %v6123_v6 }
0x1a01   :  { %14564 = vmatprep.subr.mxu0 %v6122_v61 }
0x1a02   :  { %14565 = vmatpush3.msra.mxu0 %v6122_v61 }
0x1a03   :  { %14566 = vmatprep.subr.mxu0 %v6121_v33 }
0x1a04   :  { %14567 = vmatpush3.msra.mxu0 %v6121_v33 }
0x1a05   :  { %14568 = vmatprep.subr.mxu0 %v6120_v8 }
0x1a06   :  { %14569 = vmatpush3.msra.mxu0 %v6120_v8 }
0x1a07   :  { %14570 = vmatprep.subr.mxu0 %v6119_v48 }
0x1a08   :  { %14571 = vmatpush3.msra.mxu0 %v6119_v48 }
0x1a09   :  { %14572 = vmatprep.subr.mxu0 %v6118_v19 }
0x1a0a   :  { %14573 = vmatpush3.msra.mxu0 %v6118_v19 }
0x1a0b   :  { %14574 = vmatprep.subr.mxu0 %v18427_v38 }
0x1a0c   :  { %14575 = vmatpush3.msra.mxu0 %v18427_v38 }
0x1a0d   :  { %14576 = vmatprep.subr.mxu0 %v18422_v30 }
0x1a0e   :  { %14577 = vmatpush3.msra.mxu0 %v18422_v30 }
0x1a0f   :  { %14578 = vmatprep.subr.mxu0 %v18419_v27 }
0x1a10   :  { %14579 = vmatpush3.msra.mxu0 %v18419_v27 }
0x1a11   :  { %14580 = vmatprep.subr.mxu0 %v18414_v22 }
0x1a12   :  { %14581 = vmatpush3.msra.mxu0 %v18414_v22 }
0x1a13   :  { %14582 = vmatprep.subr.mxu0 %v18411_v2 }
0x1a14   :  { %14583 = vmatpush3.msra.mxu0 %v18411_v2 }
0x1a15   :  { %14585 = vmatmul.mubr.f32.vlgmr.msra.gmra.mxu0 %v18315_v35 }
0x1a16   :  { %14587 = vmatprep.mubr.f32.mxu0 %v18319_v17 }
0x1a19   :  { %14588 = vmatmul.mubr.f32.gmra.mxu0 %v18317_v63 }
0x1a1a   :  { %14590 = vmatprep.mubr.f32.mxu0 %v18325_v34 }
0x1a1d   :  { %14591 = vmatmul.mubr.f32.gmra.mxu0 %v18321_v41 }
0x1a1e   :  { %14593 = vmatprep.mubr.f32.mxu0 %v18331_v24 }
0x1a21   :  { %14594 = vmatmul.mubr.f32.gmra.mxu0 %v18327_v37 }
0x1a22   :  { %14596 = vmatprep.mubr.f32.mxu0 %v18337_v54 }
0x1a25   :  { %14597 = vmatmul.mubr.f32.gmra.mxu0 %v18333_v32 }
0x1a26   :  { %14599 = vmatprep.mubr.f32.mxu0 %v18343_v50 }
0x1a29   :  { %14600 = vmatmul.mubr.f32.gmra.mxu0 %v18339_v9 }
0x1a2a   :  { %14602 = vmatprep.mubr.f32.mxu0 %v18349_v59 }
0x1a2d   :  { %14603 = vmatmul.mubr.f32.gmra.mxu0 %v18345_v12 }
0x1a2e   :  { %14605 = vmatprep.mubr.f32.mxu0 %v18356_v29 }
0x1a31   :  { %14606 = vmatmul.mubr.f32.gmra.mxu0 %v18351_v25 }
0x1a9c   :  { %v18466_v35 = vpop.f32.mrf.mxu1 }
0x1a9e   :  { %v18468_v63 = vpop.f32.mrf.mxu1 }
0x1a9f   :  { %14696 = vmatprep.mubr.f32.mxu0 %v18468_v63 }
0x1aa0   :  { %v18479_v32 = vpop.f32.mrf.mxu1 }
0x1aa2   :  { %v18485_v50 = vpop.f32.mrf.mxu1 }
0x1aa4   :  { %v18491_v25 = vpop.f32.mrf.mxu1 }
0x1aa6   :  { %v18497_v22 = vpop.f32.mrf.mxu1 }
0x1aa8   :  { %v18503_v38 = vpop.f32.mrf.mxu1 }
0x1aaa   :  { %v18510_v8 = vpop.f32.mrf.mxu1 }
0x1aac   :  { %v14654_v61 = vpop.f32.mrf.mxu1 }
0x1aae   :  { %v6380_v46 = vpop.f32.mrf.mxu1 }
0x1ab0   :  { %v14657_v20 = vpop.f32.mrf.mxu1 }
0x1ab2   :  { %v6390_v55 = vpop.f32.mrf.mxu1 }
0x1ab4   :  { %v14660_v6 = vpop.f32.mrf.mxu1 }
0x1ab6   :  { %v6400_v0 = vpop.f32.mrf.mxu1 }
0x1ab8   :  { %v14663_v60 = vpop.f32.mrf.mxu1 }
0x1aba   :  { %v6410_v16 = vpop.f32.mrf.mxu1 }
0x1ad5   :  { %v18471_v17 = vpop.f32.mrf.mxu0 }
0x1ad7   :  { %v6195_v41 = vpop.f32.mrf.mxu0 }
0x1ad8   :  { %14752 = vmatprep.mubr.f32.mxu1 %v6195_v41 }
0x1ad9   :  { %v18473_v34 = vpop.f32.mrf.mxu0 }
0x1adb   :  { %v18475_v37 = vpop.f32.mrf.mxu0 }
0x1add   :  { %v18477_v24 = vpop.f32.mrf.mxu0 }
0x1adf   :  { %v18481_v54 = vpop.f32.mrf.mxu0 }
0x1ae1   :  { %v18483_v9 = vpop.f32.mrf.mxu0 }
0x1ae3   :  { %v18487_v12 = vpop.f32.mrf.mxu0 }
0x1ae5   :  { %v18489_v59 = vpop.f32.mrf.mxu0 }
0x1ae7   :  { %v18493_v29 = vpop.f32.mrf.mxu0 }
0x1ae9   :  { %v18495_v2 = vpop.f32.mrf.mxu0 }
0x1aeb   :  { %v18499_v27 = vpop.f32.mrf.mxu0 }
0x1aed   :  { %v18501_v30 = vpop.f32.mrf.mxu0 }
0x1aef   :  { %v18505_v19 = vpop.f32.mrf.mxu0 }
0x1af1   :  { %v18507_v48 = vpop.f32.mrf.mxu0 }
0x1af2   :  { %14664 = vmatprep.subr.mxu0 %v18507_v48 }
0x1af3   :  { %v18512_v33 = vpop.f32.mrf.mxu0  ;;  %14665 = vmatpush3.msra.mxu0 %v18507_v48 }
0x1af4   :  { %14666 = vmatprep.subr.mxu0 %v18512_v33 }
0x1af5   :  { %14667 = vmatpush3.msra.mxu0 %v18512_v33 }
0x1af6   :  { %14668 = vmatprep.subr.mxu0 %v18501_v30 }
0x1af7   :  { %14669 = vmatpush3.msra.mxu0 %v18501_v30 }
0x1af8   :  { %14670 = vmatprep.subr.mxu0 %v18505_v19 }
0x1af9   :  { %14671 = vmatpush3.msra.mxu0 %v18505_v19 }
0x1afa   :  { %14672 = vmatprep.subr.mxu0 %v18495_v2 }
0x1afb   :  { %14673 = vmatpush3.msra.mxu0 %v18495_v2 }
0x1afc   :  { %14674 = vmatprep.subr.mxu0 %v18499_v27 }
0x1afd   :  { %14675 = vmatpush3.msra.mxu0 %v18499_v27 }
0x1afe   :  { %14676 = vmatprep.subr.mxu0 %v18489_v59 }
0x1aff   :  { %14677 = vmatpush3.msra.mxu0 %v18489_v59 }
0x1b00   :  { %14678 = vmatprep.subr.mxu0 %v18493_v29 }
0x1b01   :  { %14679 = vmatpush3.msra.mxu0 %v18493_v29 }
0x1b02   :  { %14680 = vmatprep.subr.mxu0 %v18483_v9 }
0x1b03   :  { %14681 = vmatpush3.msra.mxu0 %v18483_v9 }
0x1b04   :  { %14682 = vmatprep.subr.mxu0 %v18487_v12 }
0x1b05   :  { %14683 = vmatpush3.msra.mxu0 %v18487_v12 }
0x1b06   :  { %14684 = vmatprep.subr.mxu0 %v18477_v24 }
0x1b07   :  { %14685 = vmatpush3.msra.mxu0 %v18477_v24 }
0x1b08   :  { %14686 = vmatprep.subr.mxu0 %v18481_v54 }
0x1b09   :  { %14687 = vmatpush3.msra.mxu0 %v18481_v54 }
0x1b0a   :  { %14688 = vmatprep.subr.mxu0 %v18473_v34 }
0x1b0b   :  { %14689 = vmatpush3.msra.mxu0 %v18473_v34 }
0x1b0c   :  { %14690 = vmatprep.subr.mxu0 %v18475_v37 }
0x1b0d   :  { %14691 = vmatpush3.msra.mxu0 %v18475_v37 }
0x1b0e   :  { %14692 = vmatprep.subr.mxu0 %v18471_v17 }
0x1b0f   :  { %14693 = vmatpush3.msra.mxu0 %v18471_v17 }
0x1b10   :  { %14694 = vmatprep.subr.mxu0 %v6195_v41 }
0x1b11   :  { %14695 = vmatpush3.msra.mxu0 %v6195_v41 }
0x1b12   :  { %14697 = vmatmul.mubr.f32.vlgmr.msra.gmra.mxu0 %v18466_v35  ;;  %14776 = vmatprep.subr.mxu0 %v14663_v60 }
0x1b13   :  { %14699 = vmatprep.mubr.f32.mxu0 %v18485_v50  ;;  %14777 = vmatpush3.msra.mxu0 %v14663_v60 }
0x1b14   :  { %14778 = vmatprep.subr.mxu0 %v6410_v16 }
0x1b15   :  { %14779 = vmatpush3.msra.mxu0 %v6410_v16 }
0x1b16   :  { %14700 = vmatmul.mubr.f32.gmra.mxu0 %v18479_v32  ;;  %14780 = vmatprep.subr.mxu0 %v14660_v6 }
0x1b17   :  { %14702 = vmatprep.mubr.f32.mxu0 %v18497_v22  ;;  %14781 = vmatpush3.msra.mxu0 %v14660_v6 }
0x1b18   :  { %14782 = vmatprep.subr.mxu0 %v6400_v0 }
0x1b19   :  { %14783 = vmatpush3.msra.mxu0 %v6400_v0 }
0x1b1a   :  { %14703 = vmatmul.mubr.f32.gmra.mxu0 %v18491_v25  ;;  %14784 = vmatprep.subr.mxu0 %v14657_v20 }
0x1b1b   :  { %14705 = vmatprep.mubr.f32.mxu0 %v18510_v8  ;;  %14785 = vmatpush3.msra.mxu0 %v14657_v20 }
0x1b1c   :  { %14786 = vmatprep.subr.mxu0 %v6390_v55 }
0x1b1d   :  { %14787 = vmatpush3.msra.mxu0 %v6390_v55 }
0x1b1e   :  { %14706 = vmatmul.mubr.f32.gmra.mxu0 %v18503_v38  ;;  %14788 = vmatprep.subr.mxu0 %v14654_v61 }
0x1b1f   :  { %14708 = vmatprep.mubr.f32.mxu0 %v6380_v46  ;;  %14789 = vmatpush3.msra.mxu0 %v14654_v61 }
0x1b20   :  { %14790 = vmatprep.subr.mxu0 %v6380_v46 }
0x1b21   :  { %14791 = vmatpush3.msra.mxu0 %v6380_v46 }
0x1b22   :  { %14709 = vmatmul.mubr.f32.gmra.mxu0 %v14654_v61  ;;  %14792 = vmatprep.subr.mxu0 %v18503_v38 }
0x1b23   :  { %14711 = vmatprep.mubr.f32.mxu0 %v6390_v55  ;;  %14793 = vmatpush3.msra.mxu0 %v18503_v38 }
0x1b24   :  { %14794 = vmatprep.subr.mxu0 %v18510_v8 }
0x1b25   :  { %14795 = vmatpush3.msra.mxu0 %v18510_v8 }
0x1b26   :  { %14712 = vmatmul.mubr.f32.gmra.mxu0 %v14657_v20  ;;  %14796 = vmatprep.subr.mxu0 %v18491_v25 }
0x1b27   :  { %14714 = vmatprep.mubr.f32.mxu0 %v6400_v0  ;;  %14797 = vmatpush3.msra.mxu0 %v18491_v25 }
0x1b28   :  { %14798 = vmatprep.subr.mxu0 %v18497_v22 }
0x1b29   :  { %14799 = vmatpush3.msra.mxu0 %v18497_v22 }
0x1b2a   :  { %14715 = vmatmul.mubr.f32.gmra.mxu0 %v14660_v6  ;;  %14800 = vmatprep.subr.mxu0 %v18479_v32 }
0x1b2b   :  { %14717 = vmatprep.mubr.f32.mxu0 %v6410_v16  ;;  %14801 = vmatpush3.msra.mxu0 %v18479_v32 }
0x1b2c   :  { %14802 = vmatprep.subr.mxu0 %v18485_v50 }
0x1b2d   :  { %14803 = vmatpush3.msra.mxu0 %v18485_v50 }
0x1b2e   :  { %14718 = vmatmul.mubr.f32.gmra.mxu0 %v14663_v60  ;;  %14804 = vmatprep.subr.mxu0 %v18466_v35 }
0x1b2f   :  { %14805 = vmatpush3.msra.mxu0 %v18466_v35 }
0x1b30   :  { %14806 = vmatprep.subr.mxu0 %v18468_v63 }
0x1b31   :  { %14807 = vmatpush3.msra.mxu0 %v18468_v63 }
0x1bd2   :  { %v14698_v62 = vpop.f32.mrf.mxu0 }
0x1bd3   :  { %v6565_v28 = vmul.f32 0.5, %v14698_v62 }
0x1bd4   :  { %v6485_v14 = vpop.f32.mrf.mxu0 }
0x1bd5   :  { %v6564_v43 = vmul.f32 0.5, %v6485_v14  ;;  %v18570_v53 = vsub.f32 %v16768_v39, %v6565_v28 }
0x1bd6   :  { %v14701_v11 = vpop.f32.mrf.mxu0 }
0x1bd7   :  { %v18567_v58 = vsub.f32 %v16766_v10, %v6564_v43  ;;  %v6567_v56 = vmul.f32 0.5, %v14701_v11 }
0x1bd8   :  { %v6495_v21 = vpop.f32.mrf.mxu0 }
0x1bd9   :  { %v6566_v41 = vmul.f32 0.5, %v6495_v21  ;;  %14808 = vmatprep.mubr.f32.mxu0 %v18567_v58  ;;  %v18578_v32 = vsub.f32 %v16781_v26, %v6567_v56 }
0x1bda   :  { %v14704_v35 = vpop.f32.mrf.mxu0  ;;  %14809 = vmatmul.mubr.f32.vlgmr.msra.gmra.mxu0 %v18570_v53 }
0x1bdb   :  { %v18575_v63 = vsub.f32 %v16776_v23, %v6566_v41  ;;  %v6569_v50 = vmul.f32 0.5, %v14704_v35 }
0x1bdc   :  { %v6505_v25 = vpop.f32.mrf.mxu0 }
0x1bdd   :  { %v6568_v22 = vmul.f32 0.5, %v6505_v25  ;;  %14811 = vmatprep.mubr.f32.mxu0 %v18575_v63  ;;  %v6585_v61 = vsub.f32 %v16799_v31, %v6569_v50 }
0x1bde   :  { %v14707_v38 = vpop.f32.mrf.mxu0  ;;  %14812 = vmatmul.mubr.f32.gmra.mxu0 %v18578_v32 }
0x1bdf   :  { %v18583_v8 = vsub.f32 %v16794_v13, %v6568_v22  ;;  %v6571_v46 = vmul.f32 0.5, %v14707_v38 }
0x1be0   :  { %v6515_v20 = vpop.f32.mrf.mxu0 }
0x1be1   :  { %v6570_v55 = vmul.f32 0.5, %v6515_v20  ;;  %14814 = vmatprep.mubr.f32.mxu0 %v18583_v8  ;;  %v6587_v60 = vsub.f32 %v16817_v7, %v6571_v46 }
0x1be2   :  { %v14710_v6 = vpop.f32.mrf.mxu0  ;;  %14815 = vmatmul.mubr.f32.gmra.mxu0 %v6585_v61 }
0x1be3   :  { %v6586_v0 = vsub.f32 %v16812_v18, %v6570_v55  ;;  %v6573_v16 = vmul.f32 0.5, %v14710_v6 }
0x1be4   :  { %v6525_v62 = vpop.f32.mrf.mxu0 }
0x1be5   :  { %v6572_v28 = vmul.f32 0.5, %v6525_v62  ;;  %14817 = vmatprep.mubr.f32.mxu0 %v6586_v0  ;;  %v6589_v11 = vsub.f32 %v16835_v45, %v6573_v16 }
0x1be6   :  { %v14713_v14 = vpop.f32.mrf.mxu0  ;;  %14818 = vmatmul.mubr.f32.gmra.mxu0 %v6587_v60 }
0x1be7   :  { %v6588_v43 = vsub.f32 %v16830_v40, %v6572_v28  ;;  %v6575_v56 = vmul.f32 0.5, %v14713_v14 }
0x1be8   :  { %v6535_v21 = vpop.f32.mrf.mxu0 }
0x1be9   :  { %v6574_v41 = vmul.f32 0.5, %v6535_v21  ;;  %14820 = vmatprep.mubr.f32.mxu0 %v6588_v43  ;;  %v6591_v25 = vsub.f32 %v16848_v42, %v6575_v56 }
0x1bea   :  { %v14716_v35 = vpop.f32.mrf.mxu0  ;;  %14821 = vmatmul.mubr.f32.gmra.mxu0 %v6589_v11 }
0x1beb   :  { %v6590_v50 = vsub.f32 %v16845_v4, %v6574_v41  ;;  %v6577_v22 = vmul.f32 0.5, %v14716_v35 }
0x1bec   :  { %v6545_v38 = vpop.f32.mrf.mxu0 }
0x1bed   :  { %v6576_v46 = vmul.f32 0.5, %v6545_v38  ;;  %14823 = vmatprep.mubr.f32.mxu0 %v6590_v50  ;;  %v6593_v16 = vsub.f32 %v16863_v51, %v6577_v22 }
0x1bee   :  { %v14719_v20 = vpop.f32.mrf.mxu0  ;;  %14824 = vmatmul.mubr.f32.gmra.mxu0 %v6591_v25 }
0x1bef   :  { %v6592_v55 = vsub.f32 %v16860_v1, %v6576_v46  ;;  %v6579_v6 = vmul.f32 0.5, %v14719_v20 }
0x1bf0   :  { %v6555_v62 = vpop.f32.mrf.mxu0 }
0x1bf1   :  { %v6595_v28 = vsub.f32 %v16869_v49, %v6579_v6  ;;  %v6578_v14 = vmul.f32 0.5, %v6555_v62  ;;  %14826 = vmatprep.mubr.f32.mxu0 %v6592_v55 }
0x1bf2   :  { %14827 = vmatmul.mubr.f32.gmra.mxu0 %v6593_v16 }
0x1bf3   :  { %v6594_v21 = vsub.f32 %v16871_v36, %v6578_v14  ;;  %14720 = vmatprep.subr.mxu1 %v6595_v28 }
0x1bf4   :  { %14721 = vmatpush3.msra.mxu1 %v6595_v28 }
0x1bf5   :  { %14722 = vmatprep.subr.mxu1 %v6594_v21  ;;  %14829 = vmatprep.mubr.f32.mxu0 %v6594_v21 }
0x1bf6   :  { %14723 = vmatpush3.msra.mxu1 %v6594_v21  ;;  %14830 = vmatmul.mubr.f32.gmra.mxu0 %v6595_v28 }
0x1bf7   :  { %14724 = vmatprep.subr.mxu1 %v6593_v16 }
0x1bf8   :  { %14725 = vmatpush3.msra.mxu1 %v6593_v16 }
0x1bf9   :  { %14726 = vmatprep.subr.mxu1 %v6592_v55 }
0x1bfa   :  { %14727 = vmatpush3.msra.mxu1 %v6592_v55 }
0x1bfb   :  { %14728 = vmatprep.subr.mxu1 %v6591_v25 }
0x1bfc   :  { %14729 = vmatpush3.msra.mxu1 %v6591_v25 }
0x1bfd   :  { %14730 = vmatprep.subr.mxu1 %v6590_v50 }
0x1bfe   :  { %14731 = vmatpush3.msra.mxu1 %v6590_v50 }
0x1bff   :  { %14732 = vmatprep.subr.mxu1 %v6589_v11 }
0x1c00   :  { %14733 = vmatpush3.msra.mxu1 %v6589_v11 }
0x1c01   :  { %14734 = vmatprep.subr.mxu1 %v6588_v43 }
0x1c02   :  { %14735 = vmatpush3.msra.mxu1 %v6588_v43 }
0x1c03   :  { %14736 = vmatprep.subr.mxu1 %v6587_v60 }
0x1c04   :  { %14737 = vmatpush3.msra.mxu1 %v6587_v60 }
0x1c05   :  { %14738 = vmatprep.subr.mxu1 %v6586_v0 }
0x1c06   :  { %14739 = vmatpush3.msra.mxu1 %v6586_v0 }
0x1c07   :  { %14740 = vmatprep.subr.mxu1 %v6585_v61 }
0x1c08   :  { %14741 = vmatpush3.msra.mxu1 %v6585_v61 }
0x1c09   :  { %14742 = vmatprep.subr.mxu1 %v18583_v8 }
0x1c0a   :  { %14743 = vmatpush3.msra.mxu1 %v18583_v8 }
0x1c0b   :  { %14744 = vmatprep.subr.mxu1 %v18578_v32 }
0x1c0c   :  { %14745 = vmatpush3.msra.mxu1 %v18578_v32 }
0x1c0d   :  { %14746 = vmatprep.subr.mxu1 %v18575_v63 }
0x1c0e   :  { %14747 = vmatpush3.msra.mxu1 %v18575_v63 }
0x1c0f   :  { %14748 = vmatprep.subr.mxu1 %v18570_v53 }
0x1c10   :  { %14749 = vmatpush3.msra.mxu1 %v18570_v53 }
0x1c11   :  { %14750 = vmatprep.subr.mxu1 %v18567_v58 }
0x1c12   :  { %14751 = vmatpush3.msra.mxu1 %v18567_v58 }
0x1c13   :  { %14753 = vmatmul.mubr.f32.vlgmr.msra.gmra.mxu1 %v18471_v17 }
0x1c14   :  { %14755 = vmatprep.mubr.f32.mxu1 %v18475_v37 }
0x1c17   :  { %14756 = vmatmul.mubr.f32.gmra.mxu1 %v18473_v34 }
0x1c18   :  { %14758 = vmatprep.mubr.f32.mxu1 %v18481_v54 }
0x1c1b   :  { %14759 = vmatmul.mubr.f32.gmra.mxu1 %v18477_v24 }
0x1c1c   :  { %14761 = vmatprep.mubr.f32.mxu1 %v18487_v12 }
0x1c1f   :  { %14762 = vmatmul.mubr.f32.gmra.mxu1 %v18483_v9 }
0x1c20   :  { %14764 = vmatprep.mubr.f32.mxu1 %v18493_v29 }
0x1c23   :  { %14765 = vmatmul.mubr.f32.gmra.mxu1 %v18489_v59 }
0x1c24   :  { %14767 = vmatprep.mubr.f32.mxu1 %v18499_v27 }
0x1c27   :  { %14768 = vmatmul.mubr.f32.gmra.mxu1 %v18495_v2 }
0x1c28   :  { %14770 = vmatprep.mubr.f32.mxu1 %v18505_v19 }
0x1c2b   :  { %14771 = vmatmul.mubr.f32.gmra.mxu1 %v18501_v30 }
0x1c2c   :  { %14773 = vmatprep.mubr.f32.mxu1 %v18512_v33 }
0x1c2f   :  { %14774 = vmatmul.mubr.f32.gmra.mxu1 %v18507_v48 }
0x1c9a   :  { %v18622_v17 = vpop.f32.mrf.mxu0 }
0x1c9c   :  { %v18624_v34 = vpop.f32.mrf.mxu0 }
0x1c9d   :  { %14864 = vmatprep.mubr.f32.mxu1 %v18624_v34 }
0x1c9e   :  { %v18635_v59 = vpop.f32.mrf.mxu0 }
0x1ca0   :  { %v18641_v27 = vpop.f32.mrf.mxu0 }
0x1ca2   :  { %v18647_v48 = vpop.f32.mrf.mxu0 }
0x1ca4   :  { %v18653_v53 = vpop.f32.mrf.mxu0 }
0x1ca6   :  { %v18659_v8 = vpop.f32.mrf.mxu0 }
0x1ca8   :  { %v18666_v60 = vpop.f32.mrf.mxu0 }
0x1caa   :  { %v14822_v11 = vpop.f32.mrf.mxu0 }
0x1cac   :  { %v6847_v56 = vpop.f32.mrf.mxu0 }
0x1cae   :  { %v14825_v41 = vpop.f32.mrf.mxu0 }
0x1cb0   :  { %v6857_v35 = vpop.f32.mrf.mxu0 }
0x1cb2   :  { %v14828_v50 = vpop.f32.mrf.mxu0 }
0x1cb4   :  { %v6867_v25 = vpop.f32.mrf.mxu0 }
0x1cb6   :  { %v14831_v22 = vpop.f32.mrf.mxu0 }
0x1cb8   :  { %v6877_v38 = vpop.f32.mrf.mxu0 }
0x1cd3   :  { %v18627_v37 = vpop.f32.mrf.mxu1 }
0x1cd5   :  { %v6662_v24 = vpop.f32.mrf.mxu1 }
0x1cd6   :  { %14920 = vmatprep.mubr.f32.mxu0 %v6662_v24 }
0x1cd7   :  { %v18629_v54 = vpop.f32.mrf.mxu1 }
0x1cd9   :  { %v18631_v9 = vpop.f32.mrf.mxu1 }
0x1cdb   :  { %v18633_v12 = vpop.f32.mrf.mxu1 }
0x1cdd   :  { %v18637_v29 = vpop.f32.mrf.mxu1 }
0x1cdf   :  { %v18639_v2 = vpop.f32.mrf.mxu1 }
0x1ce1   :  { %v18643_v30 = vpop.f32.mrf.mxu1 }
0x1ce3   :  { %v18645_v19 = vpop.f32.mrf.mxu1 }
0x1ce5   :  { %v18649_v33 = vpop.f32.mrf.mxu1 }
0x1ce7   :  { %v18651_v58 = vpop.f32.mrf.mxu1 }
0x1ce9   :  { %v18655_v63 = vpop.f32.mrf.mxu1 }
0x1ceb   :  { %v18657_v32 = vpop.f32.mrf.mxu1 }
0x1ced   :  { %v18661_v61 = vpop.f32.mrf.mxu1 }
0x1cef   :  { %v18663_v0 = vpop.f32.mrf.mxu1 }
0x1cf0   :  { %14832 = vmatprep.subr.mxu1 %v18663_v0 }
0x1cf1   :  { %v18668_v43 = vpop.f32.mrf.mxu1  ;;  %14833 = vmatpush3.msra.mxu1 %v18663_v0 }
0x1cf2   :  { %14834 = vmatprep.subr.mxu1 %v18668_v43 }
0x1cf3   :  { %14835 = vmatpush3.msra.mxu1 %v18668_v43 }
0x1cf4   :  { %14836 = vmatprep.subr.mxu1 %v18657_v32 }
0x1cf5   :  { %14837 = vmatpush3.msra.mxu1 %v18657_v32 }
0x1cf6   :  { %14838 = vmatprep.subr.mxu1 %v18661_v61 }
0x1cf7   :  { %14839 = vmatpush3.msra.mxu1 %v18661_v61 }
0x1cf8   :  { %14840 = vmatprep.subr.mxu1 %v18651_v58 }
0x1cf9   :  { %14841 = vmatpush3.msra.mxu1 %v18651_v58 }
0x1cfa   :  { %14842 = vmatprep.subr.mxu1 %v18655_v63 }
0x1cfb   :  { %14843 = vmatpush3.msra.mxu1 %v18655_v63 }
0x1cfc   :  { %14844 = vmatprep.subr.mxu1 %v18645_v19 }
0x1cfd   :  { %14845 = vmatpush3.msra.mxu1 %v18645_v19 }
0x1cfe   :  { %14846 = vmatprep.subr.mxu1 %v18649_v33 }
0x1cff   :  { %14847 = vmatpush3.msra.mxu1 %v18649_v33 }
0x1d00   :  { %14848 = vmatprep.subr.mxu1 %v18639_v2 }
0x1d01   :  { %14849 = vmatpush3.msra.mxu1 %v18639_v2 }
0x1d02   :  { %14850 = vmatprep.subr.mxu1 %v18643_v30 }
0x1d03   :  { %14851 = vmatpush3.msra.mxu1 %v18643_v30 }
0x1d04   :  { %14852 = vmatprep.subr.mxu1 %v18633_v12 }
0x1d05   :  { %14853 = vmatpush3.msra.mxu1 %v18633_v12 }
0x1d06   :  { %14854 = vmatprep.subr.mxu1 %v18637_v29 }
0x1d07   :  { %14855 = vmatpush3.msra.mxu1 %v18637_v29 }
0x1d08   :  { %14856 = vmatprep.subr.mxu1 %v18629_v54 }
0x1d09   :  { %14857 = vmatpush3.msra.mxu1 %v18629_v54 }
0x1d0a   :  { %14858 = vmatprep.subr.mxu1 %v18631_v9 }
0x1d0b   :  { %14859 = vmatpush3.msra.mxu1 %v18631_v9 }
0x1d0c   :  { %14860 = vmatprep.subr.mxu1 %v18627_v37 }
0x1d0d   :  { %14861 = vmatpush3.msra.mxu1 %v18627_v37 }
0x1d0e   :  { %14862 = vmatprep.subr.mxu1 %v6662_v24 }
0x1d0f   :  { %14863 = vmatpush3.msra.mxu1 %v6662_v24 }
0x1d10   :  { %14865 = vmatmul.mubr.f32.vlgmr.msra.gmra.mxu1 %v18622_v17  ;;  %14944 = vmatprep.subr.mxu1 %v14831_v22 }
0x1d11   :  { %14867 = vmatprep.mubr.f32.mxu1 %v18641_v27  ;;  %14945 = vmatpush3.msra.mxu1 %v14831_v22 }
0x1d12   :  { %14946 = vmatprep.subr.mxu1 %v6877_v38 }
0x1d13   :  { %14947 = vmatpush3.msra.mxu1 %v6877_v38 }
0x1d14   :  { %14868 = vmatmul.mubr.f32.gmra.mxu1 %v18635_v59  ;;  %14948 = vmatprep.subr.mxu1 %v14828_v50 }
0x1d15   :  { %14870 = vmatprep.mubr.f32.mxu1 %v18653_v53  ;;  %14949 = vmatpush3.msra.mxu1 %v14828_v50 }
0x1d16   :  { %14950 = vmatprep.subr.mxu1 %v6867_v25 }
0x1d17   :  { %14951 = vmatpush3.msra.mxu1 %v6867_v25 }
0x1d18   :  { %14871 = vmatmul.mubr.f32.gmra.mxu1 %v18647_v48  ;;  %14952 = vmatprep.subr.mxu1 %v14825_v41 }
0x1d19   :  { %14873 = vmatprep.mubr.f32.mxu1 %v18666_v60  ;;  %14953 = vmatpush3.msra.mxu1 %v14825_v41 }
0x1d1a   :  { %14954 = vmatprep.subr.mxu1 %v6857_v35 }
0x1d1b   :  { %14955 = vmatpush3.msra.mxu1 %v6857_v35 }
0x1d1c   :  { %14874 = vmatmul.mubr.f32.gmra.mxu1 %v18659_v8  ;;  %14956 = vmatprep.subr.mxu1 %v14822_v11 }
0x1d1d   :  { %14876 = vmatprep.mubr.f32.mxu1 %v6847_v56  ;;  %14957 = vmatpush3.msra.mxu1 %v14822_v11 }
0x1d1e   :  { %14958 = vmatprep.subr.mxu1 %v6847_v56 }
0x1d1f   :  { %14959 = vmatpush3.msra.mxu1 %v6847_v56 }
0x1d20   :  { %14877 = vmatmul.mubr.f32.gmra.mxu1 %v14822_v11  ;;  %14960 = vmatprep.subr.mxu1 %v18659_v8 }
0x1d21   :  { %14879 = vmatprep.mubr.f32.mxu1 %v6857_v35  ;;  %14961 = vmatpush3.msra.mxu1 %v18659_v8 }
0x1d22   :  { %14962 = vmatprep.subr.mxu1 %v18666_v60 }
0x1d23   :  { %14963 = vmatpush3.msra.mxu1 %v18666_v60 }
0x1d24   :  { %14880 = vmatmul.mubr.f32.gmra.mxu1 %v14825_v41  ;;  %14964 = vmatprep.subr.mxu1 %v18647_v48 }
0x1d25   :  { %14882 = vmatprep.mubr.f32.mxu1 %v6867_v25  ;;  %14965 = vmatpush3.msra.mxu1 %v18647_v48 }
0x1d26   :  { %14966 = vmatprep.subr.mxu1 %v18653_v53 }
0x1d27   :  { %14967 = vmatpush3.msra.mxu1 %v18653_v53 }
0x1d28   :  { %14883 = vmatmul.mubr.f32.gmra.mxu1 %v14828_v50  ;;  %14968 = vmatprep.subr.mxu1 %v18635_v59 }
0x1d29   :  { %14885 = vmatprep.mubr.f32.mxu1 %v6877_v38  ;;  %14969 = vmatpush3.msra.mxu1 %v18635_v59 }
0x1d2a   :  { %14970 = vmatprep.subr.mxu1 %v18641_v27 }
0x1d2b   :  { %14971 = vmatpush3.msra.mxu1 %v18641_v27 }
0x1d2c   :  { %14886 = vmatmul.mubr.f32.gmra.mxu1 %v14831_v22  ;;  %14972 = vmatprep.subr.mxu1 %v18622_v17 }
0x1d2d   :  { %14973 = vmatpush3.msra.mxu1 %v18622_v17 }
0x1d2e   :  { %14974 = vmatprep.subr.mxu1 %v18624_v34 }
0x1d2f   :  { %14975 = vmatpush3.msra.mxu1 %v18624_v34 }
0x1dd0   :  { %v14866_v46 = vpop.f32.mrf.mxu1 }
0x1dd1   :  { %v7032_v20 = vmul.f32 0.5, %v14866_v46 }
0x1dd2   :  { %v6952_v55 = vpop.f32.mrf.mxu1 }
0x1dd3   :  { %v7031_v6 = vmul.f32 0.5, %v6952_v55  ;;  %v18726_v28 = vsub.f32 %v16768_v39, %v7032_v20 }
0x1dd4   :  { %v14869_v16 = vpop.f32.mrf.mxu1 }
0x1dd5   :  { %v18723_v62 = vsub.f32 %v16766_v10, %v7031_v6  ;;  %v7034_v14 = vmul.f32 0.5, %v14869_v16 }
0x1dd6   :  { %v6962_v21 = vpop.f32.mrf.mxu1 }
0x1dd7   :  { %v7033_v24 = vmul.f32 0.5, %v6962_v21  ;;  %14976 = vmatprep.mubr.f32.mxu1 %v18723_v62  ;;  %v18734_v59 = vsub.f32 %v16781_v26, %v7034_v14 }
0x1dd8   :  { %v14872_v17 = vpop.f32.mrf.mxu1  ;;  %14977 = vmatmul.mubr.f32.vlgmr.msra.gmra.mxu1 %v18726_v28 }
0x1dd9   :  { %v18731_v34 = vsub.f32 %v16776_v23, %v7033_v24  ;;  %v7036_v27 = vmul.f32 0.5, %v14872_v17 }
0x1dda   :  { %v6972_v48 = vpop.f32.mrf.mxu1 }
0x1ddb   :  { %v7035_v53 = vmul.f32 0.5, %v6972_v48  ;;  %14979 = vmatprep.mubr.f32.mxu1 %v18731_v34  ;;  %v7052_v11 = vsub.f32 %v16799_v31, %v7036_v27 }
0x1ddc   :  { %v14875_v8 = vpop.f32.mrf.mxu1  ;;  %14980 = vmatmul.mubr.f32.gmra.mxu1 %v18734_v59 }
0x1ddd   :  { %v18739_v60 = vsub.f32 %v16794_v13, %v7035_v53  ;;  %v7038_v56 = vmul.f32 0.5, %v14875_v8 }
0x1dde   :  { %v6982_v41 = vpop.f32.mrf.mxu1 }
0x1ddf   :  { %v7037_v35 = vmul.f32 0.5, %v6982_v41  ;;  %14982 = vmatprep.mubr.f32.mxu1 %v18739_v60  ;;  %v7054_v22 = vsub.f32 %v16817_v7, %v7038_v56 }
0x1de0   :  { %v14878_v50 = vpop.f32.mrf.mxu1  ;;  %14983 = vmatmul.mubr.f32.gmra.mxu1 %v7052_v11 }
0x1de1   :  { %v7053_v25 = vsub.f32 %v16812_v18, %v7037_v35  ;;  %v7040_v38 = vmul.f32 0.5, %v14878_v50 }
0x1de2   :  { %v6992_v46 = vpop.f32.mrf.mxu1 }
0x1de3   :  { %v7039_v20 = vmul.f32 0.5, %v6992_v46  ;;  %14985 = vmatprep.mubr.f32.mxu1 %v7053_v25  ;;  %v7056_v16 = vsub.f32 %v16835_v45, %v7040_v38 }
0x1de4   :  { %v14881_v55 = vpop.f32.mrf.mxu1  ;;  %14986 = vmatmul.mubr.f32.gmra.mxu1 %v7054_v22 }
0x1de5   :  { %v7055_v6 = vsub.f32 %v16830_v40, %v7039_v20  ;;  %v7042_v14 = vmul.f32 0.5, %v14881_v55 }
0x1de6   :  { %v7002_v21 = vpop.f32.mrf.mxu1 }
0x1de7   :  { %v7041_v24 = vmul.f32 0.5, %v7002_v21  ;;  %14988 = vmatprep.mubr.f32.mxu1 %v7055_v6  ;;  %v7058_v48 = vsub.f32 %v16848_v42, %v7042_v14 }
0x1de8   :  { %v14884_v17 = vpop.f32.mrf.mxu1  ;;  %14989 = vmatmul.mubr.f32.gmra.mxu1 %v7056_v16 }
0x1de9   :  { %v7057_v27 = vsub.f32 %v16845_v4, %v7041_v24  ;;  %v7044_v53 = vmul.f32 0.5, %v14884_v17 }
0x1dea   :  { %v7012_v8 = vpop.f32.mrf.mxu1 }
0x1deb   :  { %v7043_v56 = vmul.f32 0.5, %v7012_v8  ;;  %14991 = vmatprep.mubr.f32.mxu1 %v7057_v27  ;;  %v7060_v38 = vsub.f32 %v16863_v51, %v7044_v53 }
0x1dec   :  { %v14887_v41 = vpop.f32.mrf.mxu1  ;;  %14992 = vmatmul.mubr.f32.gmra.mxu1 %v7058_v48 }
0x1ded   :  { %v7059_v35 = vsub.f32 %v16860_v1, %v7043_v56  ;;  %v7046_v50 = vmul.f32 0.5, %v14887_v41 }
0x1dee   :  { %v7022_v46 = vpop.f32.mrf.mxu1 }
0x1def   :  { %v7062_v20 = vsub.f32 %v16869_v49, %v7046_v50  ;;  %v7045_v55 = vmul.f32 0.5, %v7022_v46  ;;  %14994 = vmatprep.mubr.f32.mxu1 %v7059_v35 }
0x1df0   :  { %14995 = vmatmul.mubr.f32.gmra.mxu1 %v7060_v38 }
0x1df1   :  { %v7061_v21 = vsub.f32 %v16871_v36, %v7045_v55  ;;  %14888 = vmatprep.subr.mxu0 %v7062_v20 }
0x1df2   :  { %14889 = vmatpush3.msra.mxu0 %v7062_v20 }
0x1df3   :  { %14890 = vmatprep.subr.mxu0 %v7061_v21  ;;  %14997 = vmatprep.mubr.f32.mxu1 %v7061_v21 }
0x1df4   :  { %14891 = vmatpush3.msra.mxu0 %v7061_v21  ;;  %14998 = vmatmul.mubr.f32.gmra.mxu1 %v7062_v20 }
0x1df5   :  { %14892 = vmatprep.subr.mxu0 %v7060_v38 }
0x1df6   :  { %14893 = vmatpush3.msra.mxu0 %v7060_v38 }
0x1df7   :  { %14894 = vmatprep.subr.mxu0 %v7059_v35 }
0x1df8   :  { %14895 = vmatpush3.msra.mxu0 %v7059_v35 }
0x1df9   :  { %14896 = vmatprep.subr.mxu0 %v7058_v48 }
0x1dfa   :  { %14897 = vmatpush3.msra.mxu0 %v7058_v48 }
0x1dfb   :  { %14898 = vmatprep.subr.mxu0 %v7057_v27 }
0x1dfc   :  { %14899 = vmatpush3.msra.mxu0 %v7057_v27 }
0x1dfd   :  { %14900 = vmatprep.subr.mxu0 %v7056_v16 }
0x1dfe   :  { %14901 = vmatpush3.msra.mxu0 %v7056_v16 }
0x1dff   :  { %14902 = vmatprep.subr.mxu0 %v7055_v6 }
0x1e00   :  { %14903 = vmatpush3.msra.mxu0 %v7055_v6 }
0x1e01   :  { %14904 = vmatprep.subr.mxu0 %v7054_v22 }
0x1e02   :  { %14905 = vmatpush3.msra.mxu0 %v7054_v22 }
0x1e03   :  { %14906 = vmatprep.subr.mxu0 %v7053_v25 }
0x1e04   :  { %14907 = vmatpush3.msra.mxu0 %v7053_v25 }
0x1e05   :  { %14908 = vmatprep.subr.mxu0 %v7052_v11 }
0x1e06   :  { %14909 = vmatpush3.msra.mxu0 %v7052_v11 }
0x1e07   :  { %14910 = vmatprep.subr.mxu0 %v18739_v60 }
0x1e08   :  { %14911 = vmatpush3.msra.mxu0 %v18739_v60 }
0x1e09   :  { %14912 = vmatprep.subr.mxu0 %v18734_v59 }
0x1e0a   :  { %14913 = vmatpush3.msra.mxu0 %v18734_v59 }
0x1e0b   :  { %14914 = vmatprep.subr.mxu0 %v18731_v34 }
0x1e0c   :  { %14915 = vmatpush3.msra.mxu0 %v18731_v34 }
0x1e0d   :  { %14916 = vmatprep.subr.mxu0 %v18726_v28 }
0x1e0e   :  { %14917 = vmatpush3.msra.mxu0 %v18726_v28 }
0x1e0f   :  { %14918 = vmatprep.subr.mxu0 %v18723_v62 }
0x1e10   :  { %14919 = vmatpush3.msra.mxu0 %v18723_v62 }
0x1e11   :  { %14921 = vmatmul.mubr.f32.vlgmr.msra.gmra.mxu0 %v18627_v37 }
0x1e12   :  { %14923 = vmatprep.mubr.f32.mxu0 %v18631_v9 }
0x1e15   :  { %14924 = vmatmul.mubr.f32.gmra.mxu0 %v18629_v54 }
0x1e16   :  { %14926 = vmatprep.mubr.f32.mxu0 %v18637_v29 }
0x1e19   :  { %14927 = vmatmul.mubr.f32.gmra.mxu0 %v18633_v12 }
0x1e1a   :  { %14929 = vmatprep.mubr.f32.mxu0 %v18643_v30 }
0x1e1d   :  { %14930 = vmatmul.mubr.f32.gmra.mxu0 %v18639_v2 }
0x1e1e   :  { %14932 = vmatprep.mubr.f32.mxu0 %v18649_v33 }
0x1e21   :  { %14933 = vmatmul.mubr.f32.gmra.mxu0 %v18645_v19 }
0x1e22   :  { %14935 = vmatprep.mubr.f32.mxu0 %v18655_v63 }
0x1e25   :  { %14936 = vmatmul.mubr.f32.gmra.mxu0 %v18651_v58 }
0x1e26   :  { %14938 = vmatprep.mubr.f32.mxu0 %v18661_v61 }
0x1e29   :  { %14939 = vmatmul.mubr.f32.gmra.mxu0 %v18657_v32 }
0x1e2a   :  { %14941 = vmatprep.mubr.f32.mxu0 %v18668_v43 }
0x1e2d   :  { %14942 = vmatmul.mubr.f32.gmra.mxu0 %v18663_v0 }
0x1e98   :  { %v18778_v37 = vpop.f32.mrf.mxu1 }
0x1e9a   :  { %v18780_v54 = vpop.f32.mrf.mxu1 }
0x1e9b   :  { %15032 = vmatprep.mubr.f32.mxu0 %v18780_v54 }
0x1e9c   :  { %v18791_v19 = vpop.f32.mrf.mxu1 }
0x1e9e   :  { %v18797_v63 = vpop.f32.mrf.mxu1 }
0x1ea0   :  { %v18803_v0 = vpop.f32.mrf.mxu1 }
0x1ea2   :  { %v18809_v28 = vpop.f32.mrf.mxu1 }
0x1ea4   :  { %v18815_v60 = vpop.f32.mrf.mxu1 }
0x1ea6   :  { %v18822_v22 = vpop.f32.mrf.mxu1 }
0x1ea8   :  { %v14990_v16 = vpop.f32.mrf.mxu1 }
0x1eaa   :  { %v7314_v14 = vpop.f32.mrf.mxu1 }
0x1eac   :  { %v14993_v24 = vpop.f32.mrf.mxu1 }
0x1eae   :  { %v7324_v17 = vpop.f32.mrf.mxu1 }
0x1eb0   :  { %v14996_v27 = vpop.f32.mrf.mxu1 }
0x1eb2   :  { %v7334_v48 = vpop.f32.mrf.mxu1 }
0x1eb4   :  { %v14999_v53 = vpop.f32.mrf.mxu1 }
0x1eb6   :  { %v7344_v8 = vpop.f32.mrf.mxu1 }
0x1ed1   :  { %v18783_v9 = vpop.f32.mrf.mxu0 }
0x1ed3   :  { %v7129_v12 = vpop.f32.mrf.mxu0 }
0x1ed4   :  { %15088 = vmatprep.mubr.f32.mxu1 %v7129_v12 }
0x1ed5   :  { %v18785_v29 = vpop.f32.mrf.mxu0 }
0x1ed7   :  { %v18787_v2 = vpop.f32.mrf.mxu0 }
0x1ed9   :  { %v18789_v30 = vpop.f32.mrf.mxu0 }
0x1edb   :  { %v18793_v33 = vpop.f32.mrf.mxu0 }
0x1edd   :  { %v18795_v58 = vpop.f32.mrf.mxu0 }
0x1edf   :  { %v18799_v32 = vpop.f32.mrf.mxu0 }
0x1ee1   :  { %v18801_v61 = vpop.f32.mrf.mxu0 }
0x1ee3   :  { %v18805_v43 = vpop.f32.mrf.mxu0 }
0x1ee5   :  { %v18807_v62 = vpop.f32.mrf.mxu0 }
0x1ee7   :  { %v18811_v34 = vpop.f32.mrf.mxu0 }
0x1ee9   :  { %v18813_v59 = vpop.f32.mrf.mxu0 }
0x1eeb   :  { %v18817_v11 = vpop.f32.mrf.mxu0 }
0x1eed   :  { %v18819_v25 = vpop.f32.mrf.mxu0 }
0x1eee   :  { %15000 = vmatprep.subr.mxu0 %v18819_v25 }
0x1eef   :  { %v18824_v6 = vpop.f32.mrf.mxu0  ;;  %15001 = vmatpush3.msra.mxu0 %v18819_v25 }
0x1ef0   :  { %15002 = vmatprep.subr.mxu0 %v18824_v6 }
0x1ef1   :  { %15003 = vmatpush3.msra.mxu0 %v18824_v6 }
0x1ef2   :  { %15004 = vmatprep.subr.mxu0 %v18813_v59 }
0x1ef3   :  { %15005 = vmatpush3.msra.mxu0 %v18813_v59 }
0x1ef4   :  { %15006 = vmatprep.subr.mxu0 %v18817_v11 }
0x1ef5   :  { %15007 = vmatpush3.msra.mxu0 %v18817_v11 }
0x1ef6   :  { %15008 = vmatprep.subr.mxu0 %v18807_v62 }
0x1ef7   :  { %15009 = vmatpush3.msra.mxu0 %v18807_v62 }
0x1ef8   :  { %15010 = vmatprep.subr.mxu0 %v18811_v34 }
0x1ef9   :  { %15011 = vmatpush3.msra.mxu0 %v18811_v34 }
0x1efa   :  { %15012 = vmatprep.subr.mxu0 %v18801_v61 }
0x1efb   :  { %15013 = vmatpush3.msra.mxu0 %v18801_v61 }
0x1efc   :  { %15014 = vmatprep.subr.mxu0 %v18805_v43 }
0x1efd   :  { %15015 = vmatpush3.msra.mxu0 %v18805_v43 }
0x1efe   :  { %15016 = vmatprep.subr.mxu0 %v18795_v58 }
0x1eff   :  { %15017 = vmatpush3.msra.mxu0 %v18795_v58 }
0x1f00   :  { %15018 = vmatprep.subr.mxu0 %v18799_v32 }
0x1f01   :  { %15019 = vmatpush3.msra.mxu0 %v18799_v32 }
0x1f02   :  { %15020 = vmatprep.subr.mxu0 %v18789_v30 }
0x1f03   :  { %15021 = vmatpush3.msra.mxu0 %v18789_v30 }
0x1f04   :  { %15022 = vmatprep.subr.mxu0 %v18793_v33 }
0x1f05   :  { %15023 = vmatpush3.msra.mxu0 %v18793_v33 }
0x1f06   :  { %15024 = vmatprep.subr.mxu0 %v18785_v29 }
0x1f07   :  { %15025 = vmatpush3.msra.mxu0 %v18785_v29 }
0x1f08   :  { %15026 = vmatprep.subr.mxu0 %v18787_v2 }
0x1f09   :  { %15027 = vmatpush3.msra.mxu0 %v18787_v2 }
0x1f0a   :  { %15028 = vmatprep.subr.mxu0 %v18783_v9 }
0x1f0b   :  { %15029 = vmatpush3.msra.mxu0 %v18783_v9 }
0x1f0c   :  { %15030 = vmatprep.subr.mxu0 %v7129_v12 }
0x1f0d   :  { %15031 = vmatpush3.msra.mxu0 %v7129_v12 }
0x1f0e   :  { %15033 = vmatmul.mubr.f32.vlgmr.msra.gmra.mxu0 %v18778_v37  ;;  %15112 = vmatprep.subr.mxu0 %v14999_v53 }
0x1f0f   :  { %15035 = vmatprep.mubr.f32.mxu0 %v18797_v63  ;;  %15113 = vmatpush3.msra.mxu0 %v14999_v53 }
0x1f10   :  { %15114 = vmatprep.subr.mxu0 %v7344_v8 }
0x1f11   :  { %15115 = vmatpush3.msra.mxu0 %v7344_v8 }
0x1f12   :  { %15036 = vmatmul.mubr.f32.gmra.mxu0 %v18791_v19  ;;  %15116 = vmatprep.subr.mxu0 %v14996_v27 }
0x1f13   :  { %15038 = vmatprep.mubr.f32.mxu0 %v18809_v28  ;;  %15117 = vmatpush3.msra.mxu0 %v14996_v27 }
0x1f14   :  { %15118 = vmatprep.subr.mxu0 %v7334_v48 }
0x1f15   :  { %15119 = vmatpush3.msra.mxu0 %v7334_v48 }
0x1f16   :  { %15039 = vmatmul.mubr.f32.gmra.mxu0 %v18803_v0  ;;  %15120 = vmatprep.subr.mxu0 %v14993_v24 }
0x1f17   :  { %15041 = vmatprep.mubr.f32.mxu0 %v18822_v22  ;;  %15121 = vmatpush3.msra.mxu0 %v14993_v24 }
0x1f18   :  { %15122 = vmatprep.subr.mxu0 %v7324_v17 }
0x1f19   :  { %15123 = vmatpush3.msra.mxu0 %v7324_v17 }
0x1f1a   :  { %15042 = vmatmul.mubr.f32.gmra.mxu0 %v18815_v60  ;;  %15124 = vmatprep.subr.mxu0 %v14990_v16 }
0x1f1b   :  { %15044 = vmatprep.mubr.f32.mxu0 %v7314_v14  ;;  %15125 = vmatpush3.msra.mxu0 %v14990_v16 }
0x1f1c   :  { %15126 = vmatprep.subr.mxu0 %v7314_v14 }
0x1f1d   :  { %15127 = vmatpush3.msra.mxu0 %v7314_v14 }
0x1f1e   :  { %15045 = vmatmul.mubr.f32.gmra.mxu0 %v14990_v16  ;;  %15128 = vmatprep.subr.mxu0 %v18815_v60 }
0x1f1f   :  { %15047 = vmatprep.mubr.f32.mxu0 %v7324_v17  ;;  %15129 = vmatpush3.msra.mxu0 %v18815_v60 }
0x1f20   :  { %15130 = vmatprep.subr.mxu0 %v18822_v22 }
0x1f21   :  { %15131 = vmatpush3.msra.mxu0 %v18822_v22 }
0x1f22   :  { %15048 = vmatmul.mubr.f32.gmra.mxu0 %v14993_v24  ;;  %15132 = vmatprep.subr.mxu0 %v18803_v0 }
0x1f23   :  { %15050 = vmatprep.mubr.f32.mxu0 %v7334_v48  ;;  %15133 = vmatpush3.msra.mxu0 %v18803_v0 }
0x1f24   :  { %15134 = vmatprep.subr.mxu0 %v18809_v28 }
0x1f25   :  { %15135 = vmatpush3.msra.mxu0 %v18809_v28 }
0x1f26   :  { %15051 = vmatmul.mubr.f32.gmra.mxu0 %v14996_v27  ;;  %15136 = vmatprep.subr.mxu0 %v18791_v19 }
0x1f27   :  { %15053 = vmatprep.mubr.f32.mxu0 %v7344_v8  ;;  %15137 = vmatpush3.msra.mxu0 %v18791_v19 }
0x1f28   :  { %15138 = vmatprep.subr.mxu0 %v18797_v63 }
0x1f29   :  { %15139 = vmatpush3.msra.mxu0 %v18797_v63 }
0x1f2a   :  { %15054 = vmatmul.mubr.f32.gmra.mxu0 %v14999_v53  ;;  %15140 = vmatprep.subr.mxu0 %v18778_v37 }
0x1f2b   :  { %15141 = vmatpush3.msra.mxu0 %v18778_v37 }
0x1f2c   :  { %15142 = vmatprep.subr.mxu0 %v18780_v54 }
0x1f2d   :  { %15143 = vmatpush3.msra.mxu0 %v18780_v54 }
0x1fce   :  { %v15034_v56 = vpop.f32.mrf.mxu0 }
0x1fcf   :  { %v7499_v41 = vmul.f32 0.5, %v15034_v56 }
0x1fd0   :  { %v7419_v35 = vpop.f32.mrf.mxu0 }
0x1fd1   :  { %v7498_v50 = vmul.f32 0.5, %v7419_v35  ;;  %v18882_v20 = vsub.f32 %v16768_v39, %v7499_v41 }
0x1fd2   :  { %v15037_v38 = vpop.f32.mrf.mxu0 }
0x1fd3   :  { %v18879_v46 = vsub.f32 %v16766_v10, %v7498_v50  ;;  %v7501_v55 = vmul.f32 0.5, %v15037_v38 }
0x1fd4   :  { %v7429_v21 = vpop.f32.mrf.mxu0 }
0x1fd5   :  { %v7500_v12 = vmul.f32 0.5, %v7429_v21  ;;  %15144 = vmatprep.mubr.f32.mxu0 %v18879_v46  ;;  %v18890_v19 = vsub.f32 %v16781_v26, %v7501_v55 }
0x1fd6   :  { %v15040_v37 = vpop.f32.mrf.mxu0  ;;  %15145 = vmatmul.mubr.f32.vlgmr.msra.gmra.mxu0 %v18882_v20 }
0x1fd7   :  { %v18887_v54 = vsub.f32 %v16776_v23, %v7500_v12  ;;  %v7503_v63 = vmul.f32 0.5, %v15040_v37 }
0x1fd8   :  { %v7439_v0 = vpop.f32.mrf.mxu0 }
0x1fd9   :  { %v7502_v28 = vmul.f32 0.5, %v7439_v0  ;;  %15147 = vmatprep.mubr.f32.mxu0 %v18887_v54  ;;  %v7519_v16 = vsub.f32 %v16799_v31, %v7503_v63 }
0x1fda   :  { %v15043_v60 = vpop.f32.mrf.mxu0  ;;  %15148 = vmatmul.mubr.f32.gmra.mxu0 %v18890_v19 }
0x1fdb   :  { %v18895_v22 = vsub.f32 %v16794_v13, %v7502_v28  ;;  %v7505_v14 = vmul.f32 0.5, %v15043_v60 }
0x1fdc   :  { %v7449_v24 = vpop.f32.mrf.mxu0 }
0x1fdd   :  { %v7504_v17 = vmul.f32 0.5, %v7449_v24  ;;  %15150 = vmatprep.mubr.f32.mxu0 %v18895_v22  ;;  %v7521_v53 = vsub.f32 %v16817_v7, %v7505_v14 }
0x1fde   :  { %v15046_v27 = vpop.f32.mrf.mxu0  ;;  %15151 = vmatmul.mubr.f32.gmra.mxu0 %v7519_v16 }
0x1fdf   :  { %v7520_v48 = vsub.f32 %v16812_v18, %v7504_v17  ;;  %v7507_v8 = vmul.f32 0.5, %v15046_v27 }
0x1fe0   :  { %v7459_v56 = vpop.f32.mrf.mxu0 }
0x1fe1   :  { %v7506_v41 = vmul.f32 0.5, %v7459_v56  ;;  %15153 = vmatprep.mubr.f32.mxu0 %v7520_v48  ;;  %v7523_v38 = vsub.f32 %v16835_v45, %v7507_v8 }
0x1fe2   :  { %v15049_v35 = vpop.f32.mrf.mxu0  ;;  %15154 = vmatmul.mubr.f32.gmra.mxu0 %v7521_v53 }
0x1fe3   :  { %v7522_v50 = vsub.f32 %v16830_v40, %v7506_v41  ;;  %v7509_v55 = vmul.f32 0.5, %v15049_v35 }
0x1fe4   :  { %v7469_v21 = vpop.f32.mrf.mxu0 }
0x1fe5   :  { %v7508_v12 = vmul.f32 0.5, %v7469_v21  ;;  %15156 = vmatprep.mubr.f32.mxu0 %v7522_v50  ;;  %v7525_v0 = vsub.f32 %v16848_v42, %v7509_v55 }
0x1fe6   :  { %v15052_v37 = vpop.f32.mrf.mxu0  ;;  %15157 = vmatmul.mubr.f32.gmra.mxu0 %v7523_v38 }
0x1fe7   :  { %v7524_v63 = vsub.f32 %v16845_v4, %v7508_v12  ;;  %v7511_v28 = vmul.f32 0.5, %v15052_v37 }
0x1fe8   :  { %v7479_v60 = vpop.f32.mrf.mxu0 }
0x1fe9   :  { %v7510_v14 = vmul.f32 0.5, %v7479_v60  ;;  %15159 = vmatprep.mubr.f32.mxu0 %v7524_v63  ;;  %v7527_v8 = vsub.f32 %v16863_v51, %v7511_v28 }
0x1fea   :  { %v15055_v24 = vpop.f32.mrf.mxu0  ;;  %15160 = vmatmul.mubr.f32.gmra.mxu0 %v7525_v0 }
0x1feb   :  { %v7526_v17 = vsub.f32 %v16860_v1, %v7510_v14  ;;  %v7513_v27 = vmul.f32 0.5, %v15055_v24 }
0x1fec   :  { %v7489_v56 = vpop.f32.mrf.mxu0 }
0x1fed   :  { %v7529_v41 = vsub.f32 %v16869_v49, %v7513_v27  ;;  %v7512_v35 = vmul.f32 0.5, %v7489_v56  ;;  %15162 = vmatprep.mubr.f32.mxu0 %v7526_v17 }
0x1fee   :  { %15163 = vmatmul.mubr.f32.gmra.mxu0 %v7527_v8 }
0x1fef   :  { %v7528_v21 = vsub.f32 %v16871_v36, %v7512_v35  ;;  %15056 = vmatprep.subr.mxu1 %v7529_v41 }
0x1ff0   :  { %15057 = vmatpush3.msra.mxu1 %v7529_v41 }
0x1ff1   :  { %15058 = vmatprep.subr.mxu1 %v7528_v21  ;;  %15165 = vmatprep.mubr.f32.mxu0 %v7528_v21 }
0x1ff2   :  { %15059 = vmatpush3.msra.mxu1 %v7528_v21  ;;  %15166 = vmatmul.mubr.f32.gmra.mxu0 %v7529_v41 }
0x1ff3   :  { %15060 = vmatprep.subr.mxu1 %v7527_v8 }
0x1ff4   :  { %15061 = vmatpush3.msra.mxu1 %v7527_v8 }
0x1ff5   :  { %15062 = vmatprep.subr.mxu1 %v7526_v17 }
0x1ff6   :  { %15063 = vmatpush3.msra.mxu1 %v7526_v17 }
0x1ff7   :  { %15064 = vmatprep.subr.mxu1 %v7525_v0 }
0x1ff8   :  { %15065 = vmatpush3.msra.mxu1 %v7525_v0 }
0x1ff9   :  { %15066 = vmatprep.subr.mxu1 %v7524_v63 }
0x1ffa   :  { %15067 = vmatpush3.msra.mxu1 %v7524_v63 }
0x1ffb   :  { %15068 = vmatprep.subr.mxu1 %v7523_v38 }
0x1ffc   :  { %15069 = vmatpush3.msra.mxu1 %v7523_v38 }
0x1ffd   :  { %15070 = vmatprep.subr.mxu1 %v7522_v50 }
0x1ffe   :  { %15071 = vmatpush3.msra.mxu1 %v7522_v50 }
0x1fff   :  { %15072 = vmatprep.subr.mxu1 %v7521_v53 }
0x2000   :  { %15073 = vmatpush3.msra.mxu1 %v7521_v53 }
0x2001   :  { %15074 = vmatprep.subr.mxu1 %v7520_v48 }
0x2002   :  { %15075 = vmatpush3.msra.mxu1 %v7520_v48 }
0x2003   :  { %15076 = vmatprep.subr.mxu1 %v7519_v16 }
0x2004   :  { %15077 = vmatpush3.msra.mxu1 %v7519_v16 }
0x2005   :  { %15078 = vmatprep.subr.mxu1 %v18895_v22 }
0x2006   :  { %15079 = vmatpush3.msra.mxu1 %v18895_v22 }
0x2007   :  { %15080 = vmatprep.subr.mxu1 %v18890_v19 }
0x2008   :  { %15081 = vmatpush3.msra.mxu1 %v18890_v19 }
0x2009   :  { %15082 = vmatprep.subr.mxu1 %v18887_v54 }
0x200a   :  { %15083 = vmatpush3.msra.mxu1 %v18887_v54 }
0x200b   :  { %15084 = vmatprep.subr.mxu1 %v18882_v20 }
0x200c   :  { %15085 = vmatpush3.msra.mxu1 %v18882_v20 }
0x200d   :  { %15086 = vmatprep.subr.mxu1 %v18879_v46 }
0x200e   :  { %15087 = vmatpush3.msra.mxu1 %v18879_v46 }
0x200f   :  { %15089 = vmatmul.mubr.f32.vlgmr.msra.gmra.mxu1 %v18783_v9 }
0x2010   :  { %15091 = vmatprep.mubr.f32.mxu1 %v18787_v2 }
0x2013   :  { %15092 = vmatmul.mubr.f32.gmra.mxu1 %v18785_v29 }
0x2014   :  { %15094 = vmatprep.mubr.f32.mxu1 %v18793_v33 }
0x2017   :  { %15095 = vmatmul.mubr.f32.gmra.mxu1 %v18789_v30 }
0x2018   :  { %15097 = vmatprep.mubr.f32.mxu1 %v18799_v32 }
0x201b   :  { %15098 = vmatmul.mubr.f32.gmra.mxu1 %v18795_v58 }
0x201c   :  { %15100 = vmatprep.mubr.f32.mxu1 %v18805_v43 }
0x201f   :  { %15101 = vmatmul.mubr.f32.gmra.mxu1 %v18801_v61 }
0x2020   :  { %15103 = vmatprep.mubr.f32.mxu1 %v18811_v34 }
0x2023   :  { %15104 = vmatmul.mubr.f32.gmra.mxu1 %v18807_v62 }
0x2024   :  { %15106 = vmatprep.mubr.f32.mxu1 %v18817_v11 }
0x2027   :  { %15107 = vmatmul.mubr.f32.gmra.mxu1 %v18813_v59 }
0x2028   :  { %15109 = vmatprep.mubr.f32.mxu1 %v18824_v6 }
0x202b   :  { %15110 = vmatmul.mubr.f32.gmra.mxu1 %v18819_v25 }
0x2096   :  { %v18934_v9 = vpop.f32.mrf.mxu0 }
0x2098   :  { %v18936_v29 = vpop.f32.mrf.mxu0 }
0x2099   :  { %15200 = vmatprep.mubr.f32.mxu1 %v18936_v29 }
0x209a   :  { %v18947_v61 = vpop.f32.mrf.mxu0 }
0x209c   :  { %v18953_v34 = vpop.f32.mrf.mxu0 }
0x209e   :  { %v18959_v25 = vpop.f32.mrf.mxu0 }
0x20a0   :  { %v18965_v20 = vpop.f32.mrf.mxu0 }
0x20a2   :  { %v18971_v22 = vpop.f32.mrf.mxu0 }
0x20a4   :  { %v18978_v53 = vpop.f32.mrf.mxu0 }
0x20a6   :  { %v15158_v38 = vpop.f32.mrf.mxu0 }
0x20a8   :  { %v7781_v55 = vpop.f32.mrf.mxu0 }
0x20aa   :  { %v15161_v12 = vpop.f32.mrf.mxu0 }
0x20ac   :  { %v7791_v37 = vpop.f32.mrf.mxu0 }
0x20ae   :  { %v15164_v63 = vpop.f32.mrf.mxu0 }
0x20b0   :  { %v7801_v0 = vpop.f32.mrf.mxu0 }
0x20b2   :  { %v15167_v28 = vpop.f32.mrf.mxu0 }
0x20b4   :  { %v7811_v60 = vpop.f32.mrf.mxu0 }
0x20cf   :  { %v18939_v2 = vpop.f32.mrf.mxu1 }
0x20d1   :  { %v7596_v30 = vpop.f32.mrf.mxu1 }
0x20d2   :  { %15256 = vmatprep.mubr.f32.mxu0 %v7596_v30 }
0x20d3   :  { %v18941_v33 = vpop.f32.mrf.mxu1 }
0x20d5   :  { %v18943_v58 = vpop.f32.mrf.mxu1 }
0x20d7   :  { %v18945_v32 = vpop.f32.mrf.mxu1 }
0x20d9   :  { %v18949_v43 = vpop.f32.mrf.mxu1 }
0x20db   :  { %v18951_v62 = vpop.f32.mrf.mxu1 }
0x20dd   :  { %v18955_v59 = vpop.f32.mrf.mxu1 }
0x20df   :  { %v18957_v11 = vpop.f32.mrf.mxu1 }
0x20e1   :  { %v18961_v6 = vpop.f32.mrf.mxu1 }
0x20e3   :  { %v18963_v46 = vpop.f32.mrf.mxu1 }
0x20e5   :  { %v18967_v54 = vpop.f32.mrf.mxu1 }
0x20e7   :  { %v18969_v19 = vpop.f32.mrf.mxu1 }
0x20e9   :  { %v18973_v16 = vpop.f32.mrf.mxu1 }
0x20eb   :  { %v18975_v48 = vpop.f32.mrf.mxu1 }
0x20ec   :  { %15168 = vmatprep.subr.mxu1 %v18975_v48 }
0x20ed   :  { %v18980_v50 = vpop.f32.mrf.mxu1  ;;  %15169 = vmatpush3.msra.mxu1 %v18975_v48 }
0x20ee   :  { %15170 = vmatprep.subr.mxu1 %v18980_v50 }
0x20ef   :  { %15171 = vmatpush3.msra.mxu1 %v18980_v50 }
0x20f0   :  { %15172 = vmatprep.subr.mxu1 %v18969_v19 }
0x20f1   :  { %15173 = vmatpush3.msra.mxu1 %v18969_v19 }
0x20f2   :  { %15174 = vmatprep.subr.mxu1 %v18973_v16 }
0x20f3   :  { %15175 = vmatpush3.msra.mxu1 %v18973_v16 }
0x20f4   :  { %15176 = vmatprep.subr.mxu1 %v18963_v46 }
0x20f5   :  { %15177 = vmatpush3.msra.mxu1 %v18963_v46 }
0x20f6   :  { %15178 = vmatprep.subr.mxu1 %v18967_v54 }
0x20f7   :  { %15179 = vmatpush3.msra.mxu1 %v18967_v54 }
0x20f8   :  { %15180 = vmatprep.subr.mxu1 %v18957_v11 }
0x20f9   :  { %15181 = vmatpush3.msra.mxu1 %v18957_v11 }
0x20fa   :  { %15182 = vmatprep.subr.mxu1 %v18961_v6 }
0x20fb   :  { %15183 = vmatpush3.msra.mxu1 %v18961_v6 }
0x20fc   :  { %15184 = vmatprep.subr.mxu1 %v18951_v62 }
0x20fd   :  { %15185 = vmatpush3.msra.mxu1 %v18951_v62 }
0x20fe   :  { %15186 = vmatprep.subr.mxu1 %v18955_v59 }
0x20ff   :  { %15187 = vmatpush3.msra.mxu1 %v18955_v59 }
0x2100   :  { %15188 = vmatprep.subr.mxu1 %v18945_v32 }
0x2101   :  { %15189 = vmatpush3.msra.mxu1 %v18945_v32 }
0x2102   :  { %15190 = vmatprep.subr.mxu1 %v18949_v43 }
0x2103   :  { %15191 = vmatpush3.msra.mxu1 %v18949_v43 }
0x2104   :  { %15192 = vmatprep.subr.mxu1 %v18941_v33 }
0x2105   :  { %15193 = vmatpush3.msra.mxu1 %v18941_v33 }
0x2106   :  { %15194 = vmatprep.subr.mxu1 %v18943_v58 }
0x2107   :  { %15195 = vmatpush3.msra.mxu1 %v18943_v58 }
0x2108   :  { %15196 = vmatprep.subr.mxu1 %v18939_v2 }
0x2109   :  { %15197 = vmatpush3.msra.mxu1 %v18939_v2 }
0x210a   :  { %15198 = vmatprep.subr.mxu1 %v7596_v30 }
0x210b   :  { %15199 = vmatpush3.msra.mxu1 %v7596_v30 }
0x210c   :  { %15201 = vmatmul.mubr.f32.vlgmr.msra.gmra.mxu1 %v18934_v9  ;;  %15280 = vmatprep.subr.mxu1 %v15167_v28 }
0x210d   :  { %15203 = vmatprep.mubr.f32.mxu1 %v18953_v34  ;;  %15281 = vmatpush3.msra.mxu1 %v15167_v28 }
0x210e   :  { %15282 = vmatprep.subr.mxu1 %v7811_v60 }
0x210f   :  { %15283 = vmatpush3.msra.mxu1 %v7811_v60 }
0x2110   :  { %15204 = vmatmul.mubr.f32.gmra.mxu1 %v18947_v61  ;;  %15284 = vmatprep.subr.mxu1 %v15164_v63 }
0x2111   :  { %15206 = vmatprep.mubr.f32.mxu1 %v18965_v20  ;;  %15285 = vmatpush3.msra.mxu1 %v15164_v63 }
0x2112   :  { %15286 = vmatprep.subr.mxu1 %v7801_v0 }
0x2113   :  { %15287 = vmatpush3.msra.mxu1 %v7801_v0 }
0x2114   :  { %15207 = vmatmul.mubr.f32.gmra.mxu1 %v18959_v25  ;;  %15288 = vmatprep.subr.mxu1 %v15161_v12 }
0x2115   :  { %15209 = vmatprep.mubr.f32.mxu1 %v18978_v53  ;;  %15289 = vmatpush3.msra.mxu1 %v15161_v12 }
0x2116   :  { %15290 = vmatprep.subr.mxu1 %v7791_v37 }
0x2117   :  { %15291 = vmatpush3.msra.mxu1 %v7791_v37 }
0x2118   :  { %15210 = vmatmul.mubr.f32.gmra.mxu1 %v18971_v22  ;;  %15292 = vmatprep.subr.mxu1 %v15158_v38 }
0x2119   :  { %15212 = vmatprep.mubr.f32.mxu1 %v7781_v55  ;;  %15293 = vmatpush3.msra.mxu1 %v15158_v38 }
0x211a   :  { %15294 = vmatprep.subr.mxu1 %v7781_v55 }
0x211b   :  { %15295 = vmatpush3.msra.mxu1 %v7781_v55 }
0x211c   :  { %15213 = vmatmul.mubr.f32.gmra.mxu1 %v15158_v38  ;;  %15296 = vmatprep.subr.mxu1 %v18971_v22 }
0x211d   :  { %15215 = vmatprep.mubr.f32.mxu1 %v7791_v37  ;;  %15297 = vmatpush3.msra.mxu1 %v18971_v22 }
0x211e   :  { %15298 = vmatprep.subr.mxu1 %v18978_v53 }
0x211f   :  { %15299 = vmatpush3.msra.mxu1 %v18978_v53 }
0x2120   :  { %15216 = vmatmul.mubr.f32.gmra.mxu1 %v15161_v12  ;;  %15300 = vmatprep.subr.mxu1 %v18959_v25 }
0x2121   :  { %15218 = vmatprep.mubr.f32.mxu1 %v7801_v0  ;;  %15301 = vmatpush3.msra.mxu1 %v18959_v25 }
0x2122   :  { %15302 = vmatprep.subr.mxu1 %v18965_v20 }
0x2123   :  { %15303 = vmatpush3.msra.mxu1 %v18965_v20 }
0x2124   :  { %15219 = vmatmul.mubr.f32.gmra.mxu1 %v15164_v63  ;;  %15304 = vmatprep.subr.mxu1 %v18947_v61 }
0x2125   :  { %15221 = vmatprep.mubr.f32.mxu1 %v7811_v60  ;;  %15305 = vmatpush3.msra.mxu1 %v18947_v61 }
0x2126   :  { %15306 = vmatprep.subr.mxu1 %v18953_v34 }
0x2127   :  { %15307 = vmatpush3.msra.mxu1 %v18953_v34 }
0x2128   :  { %15222 = vmatmul.mubr.f32.gmra.mxu1 %v15167_v28  ;;  %15308 = vmatprep.subr.mxu1 %v18934_v9 }
0x2129   :  { %15309 = vmatpush3.msra.mxu1 %v18934_v9 }
0x212a   :  { %15310 = vmatprep.subr.mxu1 %v18936_v29 }
0x212b   :  { %15311 = vmatpush3.msra.mxu1 %v18936_v29 }
0x21cc   :  { %v15202_v14 = vpop.f32.mrf.mxu1 }
0x21cd   :  { %v7966_v24 = vmul.f32 0.5, %v15202_v14 }
0x21ce   :  { %v7886_v17 = vpop.f32.mrf.mxu1 }
0x21cf   :  { %v7965_v27 = vmul.f32 0.5, %v7886_v17  ;;  %v19038_v41 = vsub.f32 %v16768_v39, %v7966_v24 }
0x21d0   :  { %v15205_v8 = vpop.f32.mrf.mxu1 }
0x21d1   :  { %v19035_v56 = vsub.f32 %v16766_v10, %v7965_v27  ;;  %v7968_v35 = vmul.f32 0.5, %v15205_v8 }
0x21d2   :  { %v7896_v21 = vpop.f32.mrf.mxu1 }
0x21d3   :  { %v7967_v30 = vmul.f32 0.5, %v7896_v21  ;;  %15312 = vmatprep.mubr.f32.mxu1 %v19035_v56  ;;  %v19046_v61 = vsub.f32 %v16781_v26, %v7968_v35 }
0x21d4   :  { %v15208_v9 = vpop.f32.mrf.mxu1  ;;  %15313 = vmatmul.mubr.f32.vlgmr.msra.gmra.mxu1 %v19038_v41 }
0x21d5   :  { %v19043_v29 = vsub.f32 %v16776_v23, %v7967_v30  ;;  %v7970_v34 = vmul.f32 0.5, %v15208_v9 }
0x21d6   :  { %v7906_v25 = vpop.f32.mrf.mxu1 }
0x21d7   :  { %v7969_v20 = vmul.f32 0.5, %v7906_v25  ;;  %15315 = vmatprep.mubr.f32.mxu1 %v19043_v29  ;;  %v7986_v38 = vsub.f32 %v16799_v31, %v7970_v34 }
0x21d8   :  { %v15211_v22 = vpop.f32.mrf.mxu1  ;;  %15316 = vmatmul.mubr.f32.gmra.mxu1 %v19046_v61 }
0x21d9   :  { %v19051_v53 = vsub.f32 %v16794_v13, %v7969_v20  ;;  %v7972_v55 = vmul.f32 0.5, %v15211_v22 }
0x21da   :  { %v7916_v12 = vpop.f32.mrf.mxu1 }
0x21db   :  { %v7971_v37 = vmul.f32 0.5, %v7916_v12  ;;  %15318 = vmatprep.mubr.f32.mxu1 %v19051_v53  ;;  %v7988_v28 = vsub.f32 %v16817_v7, %v7972_v55 }
0x21dc   :  { %v15214_v63 = vpop.f32.mrf.mxu1  ;;  %15319 = vmatmul.mubr.f32.gmra.mxu1 %v7986_v38 }
0x21dd   :  { %v7987_v0 = vsub.f32 %v16812_v18, %v7971_v37  ;;  %v7974_v60 = vmul.f32 0.5, %v15214_v63 }
0x21de   :  { %v7926_v14 = vpop.f32.mrf.mxu1 }
0x21df   :  { %v7973_v24 = vmul.f32 0.5, %v7926_v14  ;;  %15321 = vmatprep.mubr.f32.mxu1 %v7987_v0  ;;  %v7990_v8 = vsub.f32 %v16835_v45, %v7974_v60 }
0x21e0   :  { %v15217_v17 = vpop.f32.mrf.mxu1  ;;  %15322 = vmatmul.mubr.f32.gmra.mxu1 %v7988_v28 }
0x21e1   :  { %v7989_v27 = vsub.f32 %v16830_v40, %v7973_v24  ;;  %v7976_v35 = vmul.f32 0.5, %v15217_v17 }
0x21e2   :  { %v7936_v21 = vpop.f32.mrf.mxu1 }
0x21e3   :  { %v7975_v30 = vmul.f32 0.5, %v7936_v21  ;;  %15324 = vmatprep.mubr.f32.mxu1 %v7989_v27  ;;  %v7992_v25 = vsub.f32 %v16848_v42, %v7976_v35 }
0x21e4   :  { %v15220_v9 = vpop.f32.mrf.mxu1  ;;  %15325 = vmatmul.mubr.f32.gmra.mxu1 %v7990_v8 }
0x21e5   :  { %v7991_v34 = vsub.f32 %v16845_v4, %v7975_v30  ;;  %v7978_v20 = vmul.f32 0.5, %v15220_v9 }
0x21e6   :  { %v7946_v22 = vpop.f32.mrf.mxu1 }
0x21e7   :  { %v7977_v55 = vmul.f32 0.5, %v7946_v22  ;;  %15327 = vmatprep.mubr.f32.mxu1 %v7991_v34  ;;  %v7994_v60 = vsub.f32 %v16863_v51, %v7978_v20 }
0x21e8   :  { %v15223_v12 = vpop.f32.mrf.mxu1  ;;  %15328 = vmatmul.mubr.f32.gmra.mxu1 %v7992_v25 }
0x21e9   :  { %v7993_v37 = vsub.f32 %v16860_v1, %v7977_v55  ;;  %v7980_v63 = vmul.f32 0.5, %v15223_v12 }
0x21ea   :  { %v7956_v14 = vpop.f32.mrf.mxu1 }
0x21eb   :  { %v7996_v24 = vsub.f32 %v16869_v49, %v7980_v63  ;;  %v7979_v17 = vmul.f32 0.5, %v7956_v14  ;;  %15330 = vmatprep.mubr.f32.mxu1 %v7993_v37 }
0x21ec   :  { %15331 = vmatmul.mubr.f32.gmra.mxu1 %v7994_v60 }
0x21ed   :  { %v7995_v21 = vsub.f32 %v16871_v36, %v7979_v17  ;;  %15224 = vmatprep.subr.mxu0 %v7996_v24 }
0x21ee   :  { %15225 = vmatpush3.msra.mxu0 %v7996_v24 }
0x21ef   :  { %15226 = vmatprep.subr.mxu0 %v7995_v21  ;;  %15333 = vmatprep.mubr.f32.mxu1 %v7995_v21 }
0x21f0   :  { %15227 = vmatpush3.msra.mxu0 %v7995_v21  ;;  %15334 = vmatmul.mubr.f32.gmra.mxu1 %v7996_v24 }
0x21f1   :  { %15228 = vmatprep.subr.mxu0 %v7994_v60 }
0x21f2   :  { %15229 = vmatpush3.msra.mxu0 %v7994_v60 }
0x21f3   :  { %15230 = vmatprep.subr.mxu0 %v7993_v37 }
0x21f4   :  { %15231 = vmatpush3.msra.mxu0 %v7993_v37 }
0x21f5   :  { %15232 = vmatprep.subr.mxu0 %v7992_v25 }
0x21f6   :  { %15233 = vmatpush3.msra.mxu0 %v7992_v25 }
0x21f7   :  { %15234 = vmatprep.subr.mxu0 %v7991_v34 }
0x21f8   :  { %15235 = vmatpush3.msra.mxu0 %v7991_v34 }
0x21f9   :  { %15236 = vmatprep.subr.mxu0 %v7990_v8 }
0x21fa   :  { %15237 = vmatpush3.msra.mxu0 %v7990_v8 }
0x21fb   :  { %15238 = vmatprep.subr.mxu0 %v7989_v27 }
0x21fc   :  { %15239 = vmatpush3.msra.mxu0 %v7989_v27 }
0x21fd   :  { %15240 = vmatprep.subr.mxu0 %v7988_v28 }
0x21fe   :  { %15241 = vmatpush3.msra.mxu0 %v7988_v28 }
0x21ff   :  { %15242 = vmatprep.subr.mxu0 %v7987_v0 }
0x2200   :  { %15243 = vmatpush3.msra.mxu0 %v7987_v0 }
0x2201   :  { %15244 = vmatprep.subr.mxu0 %v7986_v38 }
0x2202   :  { %15245 = vmatpush3.msra.mxu0 %v7986_v38 }
0x2203   :  { %15246 = vmatprep.subr.mxu0 %v19051_v53 }
0x2204   :  { %15247 = vmatpush3.msra.mxu0 %v19051_v53 }
0x2205   :  { %15248 = vmatprep.subr.mxu0 %v19046_v61 }
0x2206   :  { %15249 = vmatpush3.msra.mxu0 %v19046_v61 }
0x2207   :  { %15250 = vmatprep.subr.mxu0 %v19043_v29 }
0x2208   :  { %15251 = vmatpush3.msra.mxu0 %v19043_v29 }
0x2209   :  { %15252 = vmatprep.subr.mxu0 %v19038_v41 }
0x220a   :  { %15253 = vmatpush3.msra.mxu0 %v19038_v41 }
0x220b   :  { %15254 = vmatprep.subr.mxu0 %v19035_v56 }
0x220c   :  { %15255 = vmatpush3.msra.mxu0 %v19035_v56 }
0x220d   :  { %15257 = vmatmul.mubr.f32.vlgmr.msra.gmra.mxu0 %v18939_v2 }
0x220e   :  { %15259 = vmatprep.mubr.f32.mxu0 %v18943_v58 }
0x2211   :  { %15260 = vmatmul.mubr.f32.gmra.mxu0 %v18941_v33 }
0x2212   :  { %15262 = vmatprep.mubr.f32.mxu0 %v18949_v43 }
0x2215   :  { %15263 = vmatmul.mubr.f32.gmra.mxu0 %v18945_v32 }
0x2216   :  { %15265 = vmatprep.mubr.f32.mxu0 %v18955_v59 }
0x2219   :  { %15266 = vmatmul.mubr.f32.gmra.mxu0 %v18951_v62 }
0x221a   :  { %15268 = vmatprep.mubr.f32.mxu0 %v18961_v6 }
0x221d   :  { %15269 = vmatmul.mubr.f32.gmra.mxu0 %v18957_v11 }
0x221e   :  { %15271 = vmatprep.mubr.f32.mxu0 %v18967_v54 }
0x2221   :  { %15272 = vmatmul.mubr.f32.gmra.mxu0 %v18963_v46 }
0x2222   :  { %15274 = vmatprep.mubr.f32.mxu0 %v18973_v16 }
0x2225   :  { %15275 = vmatmul.mubr.f32.gmra.mxu0 %v18969_v19 }
0x2226   :  { %15277 = vmatprep.mubr.f32.mxu0 %v18980_v50 }
0x2229   :  { %15278 = vmatmul.mubr.f32.gmra.mxu0 %v18975_v48 }
0x2294   :  { %v19090_v2 = vpop.f32.mrf.mxu1 }
0x2296   :  { %v19092_v33 = vpop.f32.mrf.mxu1 }
0x2297   :  { %15368 = vmatprep.mubr.f32.mxu0 %v19092_v33 }
0x2298   :  { %v19103_v11 = vpop.f32.mrf.mxu1 }
0x229a   :  { %v19109_v54 = vpop.f32.mrf.mxu1 }
0x229c   :  { %v19115_v48 = vpop.f32.mrf.mxu1 }
0x229e   :  { %v19121_v41 = vpop.f32.mrf.mxu1 }
0x22a0   :  { %v19127_v53 = vpop.f32.mrf.mxu1 }
0x22a2   :  { %v19134_v28 = vpop.f32.mrf.mxu1 }
0x22a4   :  { %v15326_v8 = vpop.f32.mrf.mxu1 }
0x22a6   :  { %v8248_v35 = vpop.f32.mrf.mxu1 }
0x22a8   :  { %v15329_v30 = vpop.f32.mrf.mxu1 }
0x22aa   :  { %v8258_v9 = vpop.f32.mrf.mxu1 }
0x22ac   :  { %v15332_v34 = vpop.f32.mrf.mxu1 }
0x22ae   :  { %v8268_v25 = vpop.f32.mrf.mxu1 }
0x22b0   :  { %v15335_v20 = vpop.f32.mrf.mxu1 }
0x22b2   :  { %v8278_v22 = vpop.f32.mrf.mxu1 }
0x22cd   :  { %v19095_v58 = vpop.f32.mrf.mxu0 }
0x22cf   :  { %v8063_v32 = vpop.f32.mrf.mxu0 }
0x22d0   :  { %15424 = vmatprep.mubr.f32.mxu1 %v8063_v32 }
0x22d1   :  { %v19097_v43 = vpop.f32.mrf.mxu0 }
0x22d3   :  { %v19099_v62 = vpop.f32.mrf.mxu0 }
0x22d5   :  { %v19101_v59 = vpop.f32.mrf.mxu0 }
0x22d7   :  { %v19105_v6 = vpop.f32.mrf.mxu0 }
0x22d9   :  { %v19107_v46 = vpop.f32.mrf.mxu0 }
0x22db   :  { %v19111_v19 = vpop.f32.mrf.mxu0 }
0x22dd   :  { %v19113_v16 = vpop.f32.mrf.mxu0 }
0x22df   :  { %v19117_v50 = vpop.f32.mrf.mxu0 }
0x22e1   :  { %v19119_v56 = vpop.f32.mrf.mxu0 }
0x22e3   :  { %v19123_v29 = vpop.f32.mrf.mxu0 }
0x22e5   :  { %v19125_v61 = vpop.f32.mrf.mxu0 }
0x22e7   :  { %v19129_v38 = vpop.f32.mrf.mxu0 }
0x22e9   :  { %v19131_v0 = vpop.f32.mrf.mxu0 }
0x22ea   :  { %15336 = vmatprep.subr.mxu0 %v19131_v0 }
0x22eb   :  { %v19136_v27 = vpop.f32.mrf.mxu0  ;;  %15337 = vmatpush3.msra.mxu0 %v19131_v0 }
0x22ec   :  { %15338 = vmatprep.subr.mxu0 %v19136_v27 }
0x22ed   :  { %15339 = vmatpush3.msra.mxu0 %v19136_v27 }
0x22ee   :  { %15340 = vmatprep.subr.mxu0 %v19125_v61 }
0x22ef   :  { %15341 = vmatpush3.msra.mxu0 %v19125_v61 }
0x22f0   :  { %15342 = vmatprep.subr.mxu0 %v19129_v38 }
0x22f1   :  { %15343 = vmatpush3.msra.mxu0 %v19129_v38 }
0x22f2   :  { %15344 = vmatprep.subr.mxu0 %v19119_v56 }
0x22f3   :  { %15345 = vmatpush3.msra.mxu0 %v19119_v56 }
0x22f4   :  { %15346 = vmatprep.subr.mxu0 %v19123_v29 }
0x22f5   :  { %15347 = vmatpush3.msra.mxu0 %v19123_v29 }
0x22f6   :  { %15348 = vmatprep.subr.mxu0 %v19113_v16 }
0x22f7   :  { %15349 = vmatpush3.msra.mxu0 %v19113_v16 }
0x22f8   :  { %15350 = vmatprep.subr.mxu0 %v19117_v50 }
0x22f9   :  { %15351 = vmatpush3.msra.mxu0 %v19117_v50 }
0x22fa   :  { %15352 = vmatprep.subr.mxu0 %v19107_v46 }
0x22fb   :  { %15353 = vmatpush3.msra.mxu0 %v19107_v46 }
0x22fc   :  { %15354 = vmatprep.subr.mxu0 %v19111_v19 }
0x22fd   :  { %15355 = vmatpush3.msra.mxu0 %v19111_v19 }
0x22fe   :  { %15356 = vmatprep.subr.mxu0 %v19101_v59 }
0x22ff   :  { %15357 = vmatpush3.msra.mxu0 %v19101_v59 }
0x2300   :  { %15358 = vmatprep.subr.mxu0 %v19105_v6 }
0x2301   :  { %15359 = vmatpush3.msra.mxu0 %v19105_v6 }
0x2302   :  { %15360 = vmatprep.subr.mxu0 %v19097_v43 }
0x2303   :  { %15361 = vmatpush3.msra.mxu0 %v19097_v43 }
0x2304   :  { %15362 = vmatprep.subr.mxu0 %v19099_v62 }
0x2305   :  { %15363 = vmatpush3.msra.mxu0 %v19099_v62 }
0x2306   :  { %15364 = vmatprep.subr.mxu0 %v19095_v58 }
0x2307   :  { %15365 = vmatpush3.msra.mxu0 %v19095_v58 }
0x2308   :  { %15366 = vmatprep.subr.mxu0 %v8063_v32 }
0x2309   :  { %15367 = vmatpush3.msra.mxu0 %v8063_v32 }
0x230a   :  { %15369 = vmatmul.mubr.f32.vlgmr.msra.gmra.mxu0 %v19090_v2  ;;  %15448 = vmatprep.subr.mxu0 %v15335_v20 }
0x230b   :  { %15371 = vmatprep.mubr.f32.mxu0 %v19109_v54  ;;  %15449 = vmatpush3.msra.mxu0 %v15335_v20 }
0x230c   :  { %15450 = vmatprep.subr.mxu0 %v8278_v22 }
0x230d   :  { %15451 = vmatpush3.msra.mxu0 %v8278_v22 }
0x230e   :  { %15372 = vmatmul.mubr.f32.gmra.mxu0 %v19103_v11  ;;  %15452 = vmatprep.subr.mxu0 %v15332_v34 }
0x230f   :  { %15374 = vmatprep.mubr.f32.mxu0 %v19121_v41  ;;  %15453 = vmatpush3.msra.mxu0 %v15332_v34 }
0x2310   :  { %15454 = vmatprep.subr.mxu0 %v8268_v25 }
0x2311   :  { %15455 = vmatpush3.msra.mxu0 %v8268_v25 }
0x2312   :  { %15375 = vmatmul.mubr.f32.gmra.mxu0 %v19115_v48  ;;  %15456 = vmatprep.subr.mxu0 %v15329_v30 }
0x2313   :  { %15377 = vmatprep.mubr.f32.mxu0 %v19134_v28  ;;  %15457 = vmatpush3.msra.mxu0 %v15329_v30 }
0x2314   :  { %15458 = vmatprep.subr.mxu0 %v8258_v9 }
0x2315   :  { %15459 = vmatpush3.msra.mxu0 %v8258_v9 }
0x2316   :  { %15378 = vmatmul.mubr.f32.gmra.mxu0 %v19127_v53  ;;  %15460 = vmatprep.subr.mxu0 %v15326_v8 }
0x2317   :  { %15380 = vmatprep.mubr.f32.mxu0 %v8248_v35  ;;  %15461 = vmatpush3.msra.mxu0 %v15326_v8 }
0x2318   :  { %15462 = vmatprep.subr.mxu0 %v8248_v35 }
0x2319   :  { %15463 = vmatpush3.msra.mxu0 %v8248_v35 }
0x231a   :  { %15381 = vmatmul.mubr.f32.gmra.mxu0 %v15326_v8  ;;  %15464 = vmatprep.subr.mxu0 %v19127_v53 }
0x231b   :  { %15383 = vmatprep.mubr.f32.mxu0 %v8258_v9  ;;  %15465 = vmatpush3.msra.mxu0 %v19127_v53 }
0x231c   :  { %15466 = vmatprep.subr.mxu0 %v19134_v28 }
0x231d   :  { %15467 = vmatpush3.msra.mxu0 %v19134_v28 }
0x231e   :  { %15384 = vmatmul.mubr.f32.gmra.mxu0 %v15329_v30  ;;  %15468 = vmatprep.subr.mxu0 %v19115_v48 }
0x231f   :  { %15386 = vmatprep.mubr.f32.mxu0 %v8268_v25  ;;  %15469 = vmatpush3.msra.mxu0 %v19115_v48 }
0x2320   :  { %15470 = vmatprep.subr.mxu0 %v19121_v41 }
0x2321   :  { %15471 = vmatpush3.msra.mxu0 %v19121_v41 }
0x2322   :  { %15387 = vmatmul.mubr.f32.gmra.mxu0 %v15332_v34  ;;  %15472 = vmatprep.subr.mxu0 %v19103_v11 }
0x2323   :  { %15389 = vmatprep.mubr.f32.mxu0 %v8278_v22  ;;  %15473 = vmatpush3.msra.mxu0 %v19103_v11 }
0x2324   :  { %15474 = vmatprep.subr.mxu0 %v19109_v54 }
0x2325   :  { %15475 = vmatpush3.msra.mxu0 %v19109_v54 }
0x2326   :  { %15390 = vmatmul.mubr.f32.gmra.mxu0 %v15335_v20  ;;  %15476 = vmatprep.subr.mxu0 %v19090_v2 }
0x2327   :  { %15477 = vmatpush3.msra.mxu0 %v19090_v2 }
0x2328   :  { %15478 = vmatprep.subr.mxu0 %v19092_v33 }
0x2329   :  { %15479 = vmatpush3.msra.mxu0 %v19092_v33 }
0x23ca   :  { %v15370_v55 = vpop.f32.mrf.mxu0 }
0x23cb   :  { %v8433_v12 = vmul.f32 0.5, %v15370_v55 }
0x23cc   :  { %v8353_v37 = vpop.f32.mrf.mxu0 }
0x23cd   :  { %v8432_v63 = vmul.f32 0.5, %v8353_v37  ;;  %v19194_v24 = vsub.f32 %v16768_v39, %v8433_v12 }
0x23ce   :  { %v15373_v60 = vpop.f32.mrf.mxu0 }
0x23cf   :  { %v19191_v14 = vsub.f32 %v16766_v10, %v8432_v63  ;;  %v8435_v17 = vmul.f32 0.5, %v15373_v60 }
0x23d0   :  { %v8363_v21 = vpop.f32.mrf.mxu0 }
0x23d1   :  { %v8434_v32 = vmul.f32 0.5, %v8363_v21  ;;  %15480 = vmatprep.mubr.f32.mxu0 %v19191_v14  ;;  %v19202_v11 = vsub.f32 %v16781_v26, %v8435_v17 }
0x23d2   :  { %v15376_v2 = vpop.f32.mrf.mxu0  ;;  %15481 = vmatmul.mubr.f32.vlgmr.msra.gmra.mxu0 %v19194_v24 }
0x23d3   :  { %v19199_v33 = vsub.f32 %v16776_v23, %v8434_v32  ;;  %v8437_v54 = vmul.f32 0.5, %v15376_v2 }
0x23d4   :  { %v8373_v48 = vpop.f32.mrf.mxu0 }
0x23d5   :  { %v8436_v41 = vmul.f32 0.5, %v8373_v48  ;;  %15483 = vmatprep.mubr.f32.mxu0 %v19199_v33  ;;  %v8453_v8 = vsub.f32 %v16799_v31, %v8437_v54 }
0x23d6   :  { %v15379_v53 = vpop.f32.mrf.mxu0  ;;  %15484 = vmatmul.mubr.f32.gmra.mxu0 %v19202_v11 }
0x23d7   :  { %v19207_v28 = vsub.f32 %v16794_v13, %v8436_v41  ;;  %v8439_v35 = vmul.f32 0.5, %v15379_v53 }
0x23d8   :  { %v8383_v30 = vpop.f32.mrf.mxu0 }
0x23d9   :  { %v8438_v9 = vmul.f32 0.5, %v8383_v30  ;;  %15486 = vmatprep.mubr.f32.mxu0 %v19207_v28  ;;  %v8455_v20 = vsub.f32 %v16817_v7, %v8439_v35 }
0x23da   :  { %v15382_v34 = vpop.f32.mrf.mxu0  ;;  %15487 = vmatmul.mubr.f32.gmra.mxu0 %v8453_v8 }
0x23db   :  { %v8454_v25 = vsub.f32 %v16812_v18, %v8438_v9  ;;  %v8441_v22 = vmul.f32 0.5, %v15382_v34 }
0x23dc   :  { %v8393_v55 = vpop.f32.mrf.mxu0 }
0x23dd   :  { %v8440_v12 = vmul.f32 0.5, %v8393_v55  ;;  %15489 = vmatprep.mubr.f32.mxu0 %v8454_v25  ;;  %v8457_v60 = vsub.f32 %v16835_v45, %v8441_v22 }
0x23de   :  { %v15385_v37 = vpop.f32.mrf.mxu0  ;;  %15490 = vmatmul.mubr.f32.gmra.mxu0 %v8455_v20 }
0x23df   :  { %v8456_v63 = vsub.f32 %v16830_v40, %v8440_v12  ;;  %v8443_v17 = vmul.f32 0.5, %v15385_v37 }
0x23e0   :  { %v8403_v21 = vpop.f32.mrf.mxu0 }
0x23e1   :  { %v8442_v32 = vmul.f32 0.5, %v8403_v21  ;;  %15492 = vmatprep.mubr.f32.mxu0 %v8456_v63  ;;  %v8459_v48 = vsub.f32 %v16848_v42, %v8443_v17 }
0x23e2   :  { %v15388_v2 = vpop.f32.mrf.mxu0  ;;  %15493 = vmatmul.mubr.f32.gmra.mxu0 %v8457_v60 }
0x23e3   :  { %v8458_v54 = vsub.f32 %v16845_v4, %v8442_v32  ;;  %v8445_v41 = vmul.f32 0.5, %v15388_v2 }
0x23e4   :  { %v8413_v53 = vpop.f32.mrf.mxu0 }
0x23e5   :  { %v8444_v35 = vmul.f32 0.5, %v8413_v53  ;;  %15495 = vmatprep.mubr.f32.mxu0 %v8458_v54  ;;  %v8461_v22 = vsub.f32 %v16863_v51, %v8445_v41 }
0x23e6   :  { %v15391_v30 = vpop.f32.mrf.mxu0  ;;  %15496 = vmatmul.mubr.f32.gmra.mxu0 %v8459_v48 }
0x23e7   :  { %v8460_v9 = vsub.f32 %v16860_v1, %v8444_v35  ;;  %v8447_v34 = vmul.f32 0.5, %v15391_v30 }
0x23e8   :  { %v8423_v55 = vpop.f32.mrf.mxu0 }
0x23e9   :  { %v8463_v12 = vsub.f32 %v16869_v49, %v8447_v34  ;;  %v8446_v37 = vmul.f32 0.5, %v8423_v55  ;;  %15498 = vmatprep.mubr.f32.mxu0 %v8460_v9 }
0x23ea   :  { %15499 = vmatmul.mubr.f32.gmra.mxu0 %v8461_v22 }
0x23eb   :  { %v8462_v21 = vsub.f32 %v16871_v36, %v8446_v37  ;;  %15392 = vmatprep.subr.mxu1 %v8463_v12 }
0x23ec   :  { %15393 = vmatpush3.msra.mxu1 %v8463_v12 }
0x23ed   :  { %15394 = vmatprep.subr.mxu1 %v8462_v21  ;;  %15501 = vmatprep.mubr.f32.mxu0 %v8462_v21 }
0x23ee   :  { %15395 = vmatpush3.msra.mxu1 %v8462_v21  ;;  %15502 = vmatmul.mubr.f32.gmra.mxu0 %v8463_v12 }
0x23ef   :  { %15396 = vmatprep.subr.mxu1 %v8461_v22 }
0x23f0   :  { %15397 = vmatpush3.msra.mxu1 %v8461_v22 }
0x23f1   :  { %15398 = vmatprep.subr.mxu1 %v8460_v9 }
0x23f2   :  { %15399 = vmatpush3.msra.mxu1 %v8460_v9 }
0x23f3   :  { %15400 = vmatprep.subr.mxu1 %v8459_v48 }
0x23f4   :  { %15401 = vmatpush3.msra.mxu1 %v8459_v48 }
0x23f5   :  { %15402 = vmatprep.subr.mxu1 %v8458_v54 }
0x23f6   :  { %15403 = vmatpush3.msra.mxu1 %v8458_v54 }
0x23f7   :  { %15404 = vmatprep.subr.mxu1 %v8457_v60 }
0x23f8   :  { %15405 = vmatpush3.msra.mxu1 %v8457_v60 }
0x23f9   :  { %15406 = vmatprep.subr.mxu1 %v8456_v63 }
0x23fa   :  { %15407 = vmatpush3.msra.mxu1 %v8456_v63 }
0x23fb   :  { %15408 = vmatprep.subr.mxu1 %v8455_v20 }
0x23fc   :  { %15409 = vmatpush3.msra.mxu1 %v8455_v20 }
0x23fd   :  { %15410 = vmatprep.subr.mxu1 %v8454_v25 }
0x23fe   :  { %15411 = vmatpush3.msra.mxu1 %v8454_v25 }
0x23ff   :  { %15412 = vmatprep.subr.mxu1 %v8453_v8 }
0x2400   :  { %15413 = vmatpush3.msra.mxu1 %v8453_v8 }
0x2401   :  { %15414 = vmatprep.subr.mxu1 %v19207_v28 }
0x2402   :  { %15415 = vmatpush3.msra.mxu1 %v19207_v28 }
0x2403   :  { %15416 = vmatprep.subr.mxu1 %v19202_v11 }
0x2404   :  { %15417 = vmatpush3.msra.mxu1 %v19202_v11 }
0x2405   :  { %15418 = vmatprep.subr.mxu1 %v19199_v33 }
0x2406   :  { %15419 = vmatpush3.msra.mxu1 %v19199_v33 }
0x2407   :  { %15420 = vmatprep.subr.mxu1 %v19194_v24 }
0x2408   :  { %15421 = vmatpush3.msra.mxu1 %v19194_v24 }
0x2409   :  { %15422 = vmatprep.subr.mxu1 %v19191_v14 }
0x240a   :  { %15423 = vmatpush3.msra.mxu1 %v19191_v14 }
0x240b   :  { %15425 = vmatmul.mubr.f32.vlgmr.msra.gmra.mxu1 %v19095_v58 }
0x240c   :  { %15427 = vmatprep.mubr.f32.mxu1 %v19099_v62 }
0x240f   :  { %15428 = vmatmul.mubr.f32.gmra.mxu1 %v19097_v43 }
0x2410   :  { %15430 = vmatprep.mubr.f32.mxu1 %v19105_v6 }
0x2413   :  { %15431 = vmatmul.mubr.f32.gmra.mxu1 %v19101_v59 }
0x2414   :  { %15433 = vmatprep.mubr.f32.mxu1 %v19111_v19 }
0x2417   :  { %15434 = vmatmul.mubr.f32.gmra.mxu1 %v19107_v46 }
0x2418   :  { %15436 = vmatprep.mubr.f32.mxu1 %v19117_v50 }
0x241b   :  { %15437 = vmatmul.mubr.f32.gmra.mxu1 %v19113_v16 }
0x241c   :  { %15439 = vmatprep.mubr.f32.mxu1 %v19123_v29 }
0x241f   :  { %15440 = vmatmul.mubr.f32.gmra.mxu1 %v19119_v56 }
0x2420   :  { %15442 = vmatprep.mubr.f32.mxu1 %v19129_v38 }
0x2423   :  { %15443 = vmatmul.mubr.f32.gmra.mxu1 %v19125_v61 }
0x2424   :  { %15445 = vmatprep.mubr.f32.mxu1 %v19136_v27 }
0x2427   :  { %15446 = vmatmul.mubr.f32.gmra.mxu1 %v19131_v0 }
0x2492   :  { %v19246_v58 = vpop.f32.mrf.mxu0 }
0x2494   :  { %v19248_v43 = vpop.f32.mrf.mxu0 }
0x2495   :  { %15536 = vmatprep.mubr.f32.mxu1 %v19248_v43 }
0x2496   :  { %v19259_v16 = vpop.f32.mrf.mxu0 }
0x2498   :  { %v19265_v29 = vpop.f32.mrf.mxu0 }
0x249a   :  { %v19271_v0 = vpop.f32.mrf.mxu0 }
0x249c   :  { %v19277_v24 = vpop.f32.mrf.mxu0 }
0x249e   :  { %v19283_v28 = vpop.f32.mrf.mxu0 }
0x24a0   :  { %v19290_v20 = vpop.f32.mrf.mxu0 }
0x24a2   :  { %v15494_v60 = vpop.f32.mrf.mxu0 }
0x24a4   :  { %v8715_v17 = vpop.f32.mrf.mxu0 }
0x24a6   :  { %v15497_v32 = vpop.f32.mrf.mxu0 }
0x24a8   :  { %v8725_v2 = vpop.f32.mrf.mxu0 }
0x24aa   :  { %v15500_v54 = vpop.f32.mrf.mxu0 }
0x24ac   :  { %v8735_v48 = vpop.f32.mrf.mxu0 }
0x24ae   :  { %v15503_v41 = vpop.f32.mrf.mxu0 }
0x24b0   :  { %v8745_v53 = vpop.f32.mrf.mxu0 }
0x24cb   :  { %v19251_v62 = vpop.f32.mrf.mxu1 }
0x24cd   :  { %v8530_v59 = vpop.f32.mrf.mxu1 }
0x24ce   :  { %15592 = vmatprep.mubr.f32.mxu0 %v8530_v59 }
0x24cf   :  { %v19253_v6 = vpop.f32.mrf.mxu1 }
0x24d1   :  { %v19255_v46 = vpop.f32.mrf.mxu1 }
0x24d3   :  { %v19257_v19 = vpop.f32.mrf.mxu1 }
0x24d5   :  { %v19261_v50 = vpop.f32.mrf.mxu1 }
0x24d7   :  { %v19263_v56 = vpop.f32.mrf.mxu1 }
0x24d9   :  { %v19267_v61 = vpop.f32.mrf.mxu1 }
0x24db   :  { %v19269_v38 = vpop.f32.mrf.mxu1 }
0x24dd   :  { %v19273_v27 = vpop.f32.mrf.mxu1 }
0x24df   :  { %v19275_v14 = vpop.f32.mrf.mxu1 }
0x24e1   :  { %v19279_v33 = vpop.f32.mrf.mxu1 }
0x24e3   :  { %v19281_v11 = vpop.f32.mrf.mxu1 }
0x24e5   :  { %v19285_v8 = vpop.f32.mrf.mxu1 }
0x24e7   :  { %v19287_v25 = vpop.f32.mrf.mxu1 }
0x24e8   :  { %15504 = vmatprep.subr.mxu1 %v19287_v25 }
0x24e9   :  { %v19292_v63 = vpop.f32.mrf.mxu1  ;;  %15505 = vmatpush3.msra.mxu1 %v19287_v25 }
0x24ea   :  { %15506 = vmatprep.subr.mxu1 %v19292_v63 }
0x24eb   :  { %15507 = vmatpush3.msra.mxu1 %v19292_v63 }
0x24ec   :  { %15508 = vmatprep.subr.mxu1 %v19281_v11 }
0x24ed   :  { %15509 = vmatpush3.msra.mxu1 %v19281_v11 }
0x24ee   :  { %15510 = vmatprep.subr.mxu1 %v19285_v8 }
0x24ef   :  { %15511 = vmatpush3.msra.mxu1 %v19285_v8 }
0x24f0   :  { %15512 = vmatprep.subr.mxu1 %v19275_v14 }
0x24f1   :  { %15513 = vmatpush3.msra.mxu1 %v19275_v14 }
0x24f2   :  { %15514 = vmatprep.subr.mxu1 %v19279_v33 }
0x24f3   :  { %15515 = vmatpush3.msra.mxu1 %v19279_v33 }
0x24f4   :  { %15516 = vmatprep.subr.mxu1 %v19269_v38 }
0x24f5   :  { %15517 = vmatpush3.msra.mxu1 %v19269_v38 }
0x24f6   :  { %15518 = vmatprep.subr.mxu1 %v19273_v27 }
0x24f7   :  { %15519 = vmatpush3.msra.mxu1 %v19273_v27 }
0x24f8   :  { %15520 = vmatprep.subr.mxu1 %v19263_v56 }
0x24f9   :  { %15521 = vmatpush3.msra.mxu1 %v19263_v56 }
0x24fa   :  { %15522 = vmatprep.subr.mxu1 %v19267_v61 }
0x24fb   :  { %15523 = vmatpush3.msra.mxu1 %v19267_v61 }
0x24fc   :  { %15524 = vmatprep.subr.mxu1 %v19257_v19 }
0x24fd   :  { %15525 = vmatpush3.msra.mxu1 %v19257_v19 }
0x24fe   :  { %15526 = vmatprep.subr.mxu1 %v19261_v50 }
0x24ff   :  { %15527 = vmatpush3.msra.mxu1 %v19261_v50 }
0x2500   :  { %15528 = vmatprep.subr.mxu1 %v19253_v6 }
0x2501   :  { %15529 = vmatpush3.msra.mxu1 %v19253_v6 }
0x2502   :  { %15530 = vmatprep.subr.mxu1 %v19255_v46 }
0x2503   :  { %15531 = vmatpush3.msra.mxu1 %v19255_v46 }
0x2504   :  { %15532 = vmatprep.subr.mxu1 %v19251_v62 }
0x2505   :  { %15533 = vmatpush3.msra.mxu1 %v19251_v62 }
0x2506   :  { %15534 = vmatprep.subr.mxu1 %v8530_v59 }
0x2507   :  { %15535 = vmatpush3.msra.mxu1 %v8530_v59 }
0x2508   :  { %15537 = vmatmul.mubr.f32.vlgmr.msra.gmra.mxu1 %v19246_v58  ;;  %15616 = vmatprep.subr.mxu1 %v15503_v41 }
0x2509   :  { %15539 = vmatprep.mubr.f32.mxu1 %v19265_v29  ;;  %15617 = vmatpush3.msra.mxu1 %v15503_v41 }
0x250a   :  { %15618 = vmatprep.subr.mxu1 %v8745_v53 }
0x250b   :  { %15619 = vmatpush3.msra.mxu1 %v8745_v53 }
0x250c   :  { %15540 = vmatmul.mubr.f32.gmra.mxu1 %v19259_v16  ;;  %15620 = vmatprep.subr.mxu1 %v15500_v54 }
0x250d   :  { %15542 = vmatprep.mubr.f32.mxu1 %v19277_v24  ;;  %15621 = vmatpush3.msra.mxu1 %v15500_v54 }
0x250e   :  { %15622 = vmatprep.subr.mxu1 %v8735_v48 }
0x250f   :  { %15623 = vmatpush3.msra.mxu1 %v8735_v48 }
0x2510   :  { %15543 = vmatmul.mubr.f32.gmra.mxu1 %v19271_v0  ;;  %15624 = vmatprep.subr.mxu1 %v15497_v32 }
0x2511   :  { %15545 = vmatprep.mubr.f32.mxu1 %v19290_v20  ;;  %15625 = vmatpush3.msra.mxu1 %v15497_v32 }
0x2512   :  { %15626 = vmatprep.subr.mxu1 %v8725_v2 }
0x2513   :  { %15627 = vmatpush3.msra.mxu1 %v8725_v2 }
0x2514   :  { %15546 = vmatmul.mubr.f32.gmra.mxu1 %v19283_v28  ;;  %15628 = vmatprep.subr.mxu1 %v15494_v60 }
0x2515   :  { %15548 = vmatprep.mubr.f32.mxu1 %v8715_v17  ;;  %15629 = vmatpush3.msra.mxu1 %v15494_v60 }
0x2516   :  { %15630 = vmatprep.subr.mxu1 %v8715_v17 }
0x2517   :  { %15631 = vmatpush3.msra.mxu1 %v8715_v17 }
0x2518   :  { %15549 = vmatmul.mubr.f32.gmra.mxu1 %v15494_v60  ;;  %15632 = vmatprep.subr.mxu1 %v19283_v28 }
0x2519   :  { %15551 = vmatprep.mubr.f32.mxu1 %v8725_v2  ;;  %15633 = vmatpush3.msra.mxu1 %v19283_v28 }
0x251a   :  { %15634 = vmatprep.subr.mxu1 %v19290_v20 }
0x251b   :  { %15635 = vmatpush3.msra.mxu1 %v19290_v20 }
0x251c   :  { %15552 = vmatmul.mubr.f32.gmra.mxu1 %v15497_v32  ;;  %15636 = vmatprep.subr.mxu1 %v19271_v0 }
0x251d   :  { %15554 = vmatprep.mubr.f32.mxu1 %v8735_v48  ;;  %15637 = vmatpush3.msra.mxu1 %v19271_v0 }
0x251e   :  { %15638 = vmatprep.subr.mxu1 %v19277_v24 }
0x251f   :  { %15639 = vmatpush3.msra.mxu1 %v19277_v24 }
0x2520   :  { %15555 = vmatmul.mubr.f32.gmra.mxu1 %v15500_v54  ;;  %15640 = vmatprep.subr.mxu1 %v19259_v16 }
0x2521   :  { %15557 = vmatprep.mubr.f32.mxu1 %v8745_v53  ;;  %15641 = vmatpush3.msra.mxu1 %v19259_v16 }
0x2522   :  { %15642 = vmatprep.subr.mxu1 %v19265_v29 }
0x2523   :  { %15643 = vmatpush3.msra.mxu1 %v19265_v29 }
0x2524   :  { %15558 = vmatmul.mubr.f32.gmra.mxu1 %v15503_v41  ;;  %15644 = vmatprep.subr.mxu1 %v19246_v58 }
0x2525   :  { %15645 = vmatpush3.msra.mxu1 %v19246_v58 }
0x2526   :  { %15646 = vmatprep.subr.mxu1 %v19248_v43 }
0x2527   :  { %15647 = vmatpush3.msra.mxu1 %v19248_v43 }
0x25c8   :  { %v15538_v35 = vpop.f32.mrf.mxu1 }
0x25c9   :  { %v8900_v30 = vmul.f32 0.5, %v15538_v35 }
0x25ca   :  { %v8820_v9 = vpop.f32.mrf.mxu1 }
0x25cb   :  { %v8899_v34 = vmul.f32 0.5, %v8820_v9  ;;  %v19350_v12 = vsub.f32 %v16768_v39, %v8900_v30 }
0x25cc   :  { %v15541_v22 = vpop.f32.mrf.mxu1 }
0x25cd   :  { %v19347_v55 = vsub.f32 %v16766_v10, %v8899_v34  ;;  %v8902_v37 = vmul.f32 0.5, %v15541_v22 }
0x25ce   :  { %v8830_v21 = vpop.f32.mrf.mxu1 }
0x25cf   :  { %v8901_v59 = vmul.f32 0.5, %v8830_v21  ;;  %15648 = vmatprep.mubr.f32.mxu1 %v19347_v55  ;;  %v19358_v16 = vsub.f32 %v16781_v26, %v8902_v37 }
0x25d0   :  { %v15544_v58 = vpop.f32.mrf.mxu1  ;;  %15649 = vmatmul.mubr.f32.vlgmr.msra.gmra.mxu1 %v19350_v12 }
0x25d1   :  { %v19355_v43 = vsub.f32 %v16776_v23, %v8901_v59  ;;  %v8904_v29 = vmul.f32 0.5, %v15544_v58 }
0x25d2   :  { %v8840_v0 = vpop.f32.mrf.mxu1 }
0x25d3   :  { %v8903_v24 = vmul.f32 0.5, %v8840_v0  ;;  %15651 = vmatprep.mubr.f32.mxu1 %v19355_v43  ;;  %v8920_v60 = vsub.f32 %v16799_v31, %v8904_v29 }
0x25d4   :  { %v15547_v28 = vpop.f32.mrf.mxu1  ;;  %15652 = vmatmul.mubr.f32.gmra.mxu1 %v19358_v16 }
0x25d5   :  { %v19363_v20 = vsub.f32 %v16794_v13, %v8903_v24  ;;  %v8906_v17 = vmul.f32 0.5, %v15547_v28 }
0x25d6   :  { %v8850_v32 = vpop.f32.mrf.mxu1 }
0x25d7   :  { %v8905_v2 = vmul.f32 0.5, %v8850_v32  ;;  %15654 = vmatprep.mubr.f32.mxu1 %v19363_v20  ;;  %v8922_v41 = vsub.f32 %v16817_v7, %v8906_v17 }
0x25d8   :  { %v15550_v54 = vpop.f32.mrf.mxu1  ;;  %15655 = vmatmul.mubr.f32.gmra.mxu1 %v8920_v60 }
0x25d9   :  { %v8921_v48 = vsub.f32 %v16812_v18, %v8905_v2  ;;  %v8908_v53 = vmul.f32 0.5, %v15550_v54 }
0x25da   :  { %v8860_v35 = vpop.f32.mrf.mxu1 }
0x25db   :  { %v8907_v30 = vmul.f32 0.5, %v8860_v35  ;;  %15657 = vmatprep.mubr.f32.mxu1 %v8921_v48  ;;  %v8924_v22 = vsub.f32 %v16835_v45, %v8908_v53 }
0x25dc   :  { %v15553_v9 = vpop.f32.mrf.mxu1  ;;  %15658 = vmatmul.mubr.f32.gmra.mxu1 %v8922_v41 }
0x25dd   :  { %v8923_v34 = vsub.f32 %v16830_v40, %v8907_v30  ;;  %v8910_v37 = vmul.f32 0.5, %v15553_v9 }
0x25de   :  { %v8870_v21 = vpop.f32.mrf.mxu1 }
0x25df   :  { %v8909_v59 = vmul.f32 0.5, %v8870_v21  ;;  %15660 = vmatprep.mubr.f32.mxu1 %v8923_v34  ;;  %v8926_v0 = vsub.f32 %v16848_v42, %v8910_v37 }
0x25e0   :  { %v15556_v58 = vpop.f32.mrf.mxu1  ;;  %15661 = vmatmul.mubr.f32.gmra.mxu1 %v8924_v22 }
0x25e1   :  { %v8925_v29 = vsub.f32 %v16845_v4, %v8909_v59  ;;  %v8912_v24 = vmul.f32 0.5, %v15556_v58 }
0x25e2   :  { %v8880_v28 = vpop.f32.mrf.mxu1 }
0x25e3   :  { %v8911_v17 = vmul.f32 0.5, %v8880_v28  ;;  %15663 = vmatprep.mubr.f32.mxu1 %v8925_v29  ;;  %v8928_v53 = vsub.f32 %v16863_v51, %v8912_v24 }
0x25e4   :  { %v15559_v32 = vpop.f32.mrf.mxu1  ;;  %15664 = vmatmul.mubr.f32.gmra.mxu1 %v8926_v0 }
0x25e5   :  { %v8927_v2 = vsub.f32 %v16860_v1, %v8911_v17  ;;  %v8914_v54 = vmul.f32 0.5, %v15559_v32 }
0x25e6   :  { %v8890_v35 = vpop.f32.mrf.mxu1 }
0x25e7   :  { %v8930_v30 = vsub.f32 %v16869_v49, %v8914_v54  ;;  %v8913_v9 = vmul.f32 0.5, %v8890_v35  ;;  %15666 = vmatprep.mubr.f32.mxu1 %v8927_v2 }
0x25e8   :  { %15667 = vmatmul.mubr.f32.gmra.mxu1 %v8928_v53 }
0x25e9   :  { %v8929_v21 = vsub.f32 %v16871_v36, %v8913_v9  ;;  %15560 = vmatprep.subr.mxu0 %v8930_v30 }
0x25ea   :  { %15561 = vmatpush3.msra.mxu0 %v8930_v30 }
0x25eb   :  { %15562 = vmatprep.subr.mxu0 %v8929_v21  ;;  %15669 = vmatprep.mubr.f32.mxu1 %v8929_v21 }
0x25ec   :  { %15563 = vmatpush3.msra.mxu0 %v8929_v21  ;;  %15670 = vmatmul.mubr.f32.gmra.mxu1 %v8930_v30 }
0x25ed   :  { %15564 = vmatprep.subr.mxu0 %v8928_v53 }
0x25ee   :  { %15565 = vmatpush3.msra.mxu0 %v8928_v53 }
0x25ef   :  { %15566 = vmatprep.subr.mxu0 %v8927_v2 }
0x25f0   :  { %15567 = vmatpush3.msra.mxu0 %v8927_v2 }
0x25f1   :  { %15568 = vmatprep.subr.mxu0 %v8926_v0 }
0x25f2   :  { %15569 = vmatpush3.msra.mxu0 %v8926_v0 }
0x25f3   :  { %15570 = vmatprep.subr.mxu0 %v8925_v29 }
0x25f4   :  { %15571 = vmatpush3.msra.mxu0 %v8925_v29 }
0x25f5   :  { %15572 = vmatprep.subr.mxu0 %v8924_v22 }
0x25f6   :  { %15573 = vmatpush3.msra.mxu0 %v8924_v22 }
0x25f7   :  { %15574 = vmatprep.subr.mxu0 %v8923_v34 }
0x25f8   :  { %15575 = vmatpush3.msra.mxu0 %v8923_v34 }
0x25f9   :  { %15576 = vmatprep.subr.mxu0 %v8922_v41 }
0x25fa   :  { %15577 = vmatpush3.msra.mxu0 %v8922_v41 }
0x25fb   :  { %15578 = vmatprep.subr.mxu0 %v8921_v48 }
0x25fc   :  { %15579 = vmatpush3.msra.mxu0 %v8921_v48 }
0x25fd   :  { %15580 = vmatprep.subr.mxu0 %v8920_v60 }
0x25fe   :  { %15581 = vmatpush3.msra.mxu0 %v8920_v60 }
0x25ff   :  { %15582 = vmatprep.subr.mxu0 %v19363_v20 }
0x2600   :  { %15583 = vmatpush3.msra.mxu0 %v19363_v20 }
0x2601   :  { %15584 = vmatprep.subr.mxu0 %v19358_v16 }
0x2602   :  { %15585 = vmatpush3.msra.mxu0 %v19358_v16 }
0x2603   :  { %15586 = vmatprep.subr.mxu0 %v19355_v43 }
0x2604   :  { %15587 = vmatpush3.msra.mxu0 %v19355_v43 }
0x2605   :  { %15588 = vmatprep.subr.mxu0 %v19350_v12 }
0x2606   :  { %15589 = vmatpush3.msra.mxu0 %v19350_v12 }
0x2607   :  { %15590 = vmatprep.subr.mxu0 %v19347_v55 }
0x2608   :  { %15591 = vmatpush3.msra.mxu0 %v19347_v55 }
0x2609   :  { %15593 = vmatmul.mubr.f32.vlgmr.msra.gmra.mxu0 %v19251_v62 }
0x260a   :  { %15595 = vmatprep.mubr.f32.mxu0 %v19255_v46 }
0x260d   :  { %15596 = vmatmul.mubr.f32.gmra.mxu0 %v19253_v6 }
0x260e   :  { %15598 = vmatprep.mubr.f32.mxu0 %v19261_v50 }
0x2611   :  { %15599 = vmatmul.mubr.f32.gmra.mxu0 %v19257_v19 }
0x2612   :  { %15601 = vmatprep.mubr.f32.mxu0 %v19267_v61 }
0x2615   :  { %15602 = vmatmul.mubr.f32.gmra.mxu0 %v19263_v56 }
0x2616   :  { %15604 = vmatprep.mubr.f32.mxu0 %v19273_v27 }
0x2619   :  { %15605 = vmatmul.mubr.f32.gmra.mxu0 %v19269_v38 }
0x261a   :  { %15607 = vmatprep.mubr.f32.mxu0 %v19279_v33 }
0x261d   :  { %15608 = vmatmul.mubr.f32.gmra.mxu0 %v19275_v14 }
0x261e   :  { %15610 = vmatprep.mubr.f32.mxu0 %v19285_v8 }
0x2621   :  { %15611 = vmatmul.mubr.f32.gmra.mxu0 %v19281_v11 }
0x2622   :  { %15613 = vmatprep.mubr.f32.mxu0 %v19292_v63 }
0x2625   :  { %15614 = vmatmul.mubr.f32.gmra.mxu0 %v19287_v25 }
0x2690   :  { %v19402_v62 = vpop.f32.mrf.mxu1 }
0x2692   :  { %v19404_v6 = vpop.f32.mrf.mxu1 }
0x2693   :  { %15704 = vmatprep.mubr.f32.mxu0 %v19404_v6 }
0x2694   :  { %v19415_v38 = vpop.f32.mrf.mxu1 }
0x2696   :  { %v19421_v33 = vpop.f32.mrf.mxu1 }
0x2698   :  { %v19427_v25 = vpop.f32.mrf.mxu1 }
0x269a   :  { %v19433_v12 = vpop.f32.mrf.mxu1 }
0x269c   :  { %v19439_v20 = vpop.f32.mrf.mxu1 }
0x269e   :  { %v19446_v41 = vpop.f32.mrf.mxu1 }
0x26a0   :  { %v15662_v22 = vpop.f32.mrf.mxu1 }
0x26a2   :  { %v9182_v37 = vpop.f32.mrf.mxu1 }
0x26a4   :  { %v15665_v59 = vpop.f32.mrf.mxu1 }
0x26a6   :  { %v9192_v58 = vpop.f32.mrf.mxu1 }
0x26a8   :  { %v15668_v29 = vpop.f32.mrf.mxu1 }
0x26aa   :  { %v9202_v0 = vpop.f32.mrf.mxu1 }
0x26ac   :  { %v15671_v24 = vpop.f32.mrf.mxu1 }
0x26ae   :  { %v9212_v28 = vpop.f32.mrf.mxu1 }
0x26c9   :  { %v19407_v46 = vpop.f32.mrf.mxu0 }
0x26cb   :  { %v8997_v19 = vpop.f32.mrf.mxu0 }
0x26cc   :  { %15760 = vmatprep.mubr.f32.mxu1 %v8997_v19 }
0x26cd   :  { %v19409_v50 = vpop.f32.mrf.mxu0 }
0x26cf   :  { %v19411_v56 = vpop.f32.mrf.mxu0 }
0x26d1   :  { %v19413_v61 = vpop.f32.mrf.mxu0 }
0x26d3   :  { %v19417_v27 = vpop.f32.mrf.mxu0 }
0x26d5   :  { %v19419_v14 = vpop.f32.mrf.mxu0 }
0x26d7   :  { %v19423_v11 = vpop.f32.mrf.mxu0 }
0x26d9   :  { %v19425_v8 = vpop.f32.mrf.mxu0 }
0x26db   :  { %v19429_v63 = vpop.f32.mrf.mxu0 }
0x26dd   :  { %v19431_v55 = vpop.f32.mrf.mxu0 }
0x26df   :  { %v19435_v43 = vpop.f32.mrf.mxu0 }
0x26e1   :  { %v19437_v16 = vpop.f32.mrf.mxu0 }
0x26e3   :  { %v19441_v60 = vpop.f32.mrf.mxu0 }
0x26e5   :  { %v19443_v48 = vpop.f32.mrf.mxu0 }
0x26e6   :  { %15672 = vmatprep.subr.mxu0 %v19443_v48 }
0x26e7   :  { %v19448_v34 = vpop.f32.mrf.mxu0  ;;  %15673 = vmatpush3.msra.mxu0 %v19443_v48 }
0x26e8   :  { %15674 = vmatprep.subr.mxu0 %v19448_v34 }
0x26e9   :  { %15675 = vmatpush3.msra.mxu0 %v19448_v34 }
0x26ea   :  { %15676 = vmatprep.subr.mxu0 %v19437_v16 }
0x26eb   :  { %15677 = vmatpush3.msra.mxu0 %v19437_v16 }
0x26ec   :  { %15678 = vmatprep.subr.mxu0 %v19441_v60 }
0x26ed   :  { %15679 = vmatpush3.msra.mxu0 %v19441_v60 }
0x26ee   :  { %15680 = vmatprep.subr.mxu0 %v19431_v55 }
0x26ef   :  { %15681 = vmatpush3.msra.mxu0 %v19431_v55 }
0x26f0   :  { %15682 = vmatprep.subr.mxu0 %v19435_v43 }
0x26f1   :  { %15683 = vmatpush3.msra.mxu0 %v19435_v43 }
0x26f2   :  { %15684 = vmatprep.subr.mxu0 %v19425_v8 }
0x26f3   :  { %15685 = vmatpush3.msra.mxu0 %v19425_v8 }
0x26f4   :  { %15686 = vmatprep.subr.mxu0 %v19429_v63 }
0x26f5   :  { %15687 = vmatpush3.msra.mxu0 %v19429_v63 }
0x26f6   :  { %15688 = vmatprep.subr.mxu0 %v19419_v14 }
0x26f7   :  { %15689 = vmatpush3.msra.mxu0 %v19419_v14 }
0x26f8   :  { %15690 = vmatprep.subr.mxu0 %v19423_v11 }
0x26f9   :  { %15691 = vmatpush3.msra.mxu0 %v19423_v11 }
0x26fa   :  { %15692 = vmatprep.subr.mxu0 %v19413_v61 }
0x26fb   :  { %15693 = vmatpush3.msra.mxu0 %v19413_v61 }
0x26fc   :  { %15694 = vmatprep.subr.mxu0 %v19417_v27 }
0x26fd   :  { %15695 = vmatpush3.msra.mxu0 %v19417_v27 }
0x26fe   :  { %15696 = vmatprep.subr.mxu0 %v19409_v50 }
0x26ff   :  { %15697 = vmatpush3.msra.mxu0 %v19409_v50 }
0x2700   :  { %15698 = vmatprep.subr.mxu0 %v19411_v56 }
0x2701   :  { %15699 = vmatpush3.msra.mxu0 %v19411_v56 }
0x2702   :  { %15700 = vmatprep.subr.mxu0 %v19407_v46 }
0x2703   :  { %15701 = vmatpush3.msra.mxu0 %v19407_v46 }
0x2704   :  { %15702 = vmatprep.subr.mxu0 %v8997_v19 }
0x2705   :  { %15703 = vmatpush3.msra.mxu0 %v8997_v19 }
0x2706   :  { %15705 = vmatmul.mubr.f32.vlgmr.msra.gmra.mxu0 %v19402_v62  ;;  %15784 = vmatprep.subr.mxu0 %v15671_v24 }
0x2707   :  { %15707 = vmatprep.mubr.f32.mxu0 %v19421_v33  ;;  %15785 = vmatpush3.msra.mxu0 %v15671_v24 }
0x2708   :  { %15786 = vmatprep.subr.mxu0 %v9212_v28 }
0x2709   :  { %15787 = vmatpush3.msra.mxu0 %v9212_v28 }
0x270a   :  { %15708 = vmatmul.mubr.f32.gmra.mxu0 %v19415_v38  ;;  %15788 = vmatprep.subr.mxu0 %v15668_v29 }
0x270b   :  { %15710 = vmatprep.mubr.f32.mxu0 %v19433_v12  ;;  %15789 = vmatpush3.msra.mxu0 %v15668_v29 }
0x270c   :  { %15790 = vmatprep.subr.mxu0 %v9202_v0 }
0x270d   :  { %15791 = vmatpush3.msra.mxu0 %v9202_v0 }
0x270e   :  { %15711 = vmatmul.mubr.f32.gmra.mxu0 %v19427_v25  ;;  %15792 = vmatprep.subr.mxu0 %v15665_v59 }
0x270f   :  { %15713 = vmatprep.mubr.f32.mxu0 %v19446_v41  ;;  %15793 = vmatpush3.msra.mxu0 %v15665_v59 }
0x2710   :  { %15794 = vmatprep.subr.mxu0 %v9192_v58 }
0x2711   :  { %15795 = vmatpush3.msra.mxu0 %v9192_v58 }
0x2712   :  { %15714 = vmatmul.mubr.f32.gmra.mxu0 %v19439_v20  ;;  %15796 = vmatprep.subr.mxu0 %v15662_v22 }
0x2713   :  { %15716 = vmatprep.mubr.f32.mxu0 %v9182_v37  ;;  %15797 = vmatpush3.msra.mxu0 %v15662_v22 }
0x2714   :  { %15798 = vmatprep.subr.mxu0 %v9182_v37 }
0x2715   :  { %15799 = vmatpush3.msra.mxu0 %v9182_v37 }
0x2716   :  { %15717 = vmatmul.mubr.f32.gmra.mxu0 %v15662_v22  ;;  %15800 = vmatprep.subr.mxu0 %v19439_v20 }
0x2717   :  { %15719 = vmatprep.mubr.f32.mxu0 %v9192_v58  ;;  %15801 = vmatpush3.msra.mxu0 %v19439_v20 }
0x2718   :  { %15802 = vmatprep.subr.mxu0 %v19446_v41 }
0x2719   :  { %15803 = vmatpush3.msra.mxu0 %v19446_v41 }
0x271a   :  { %15720 = vmatmul.mubr.f32.gmra.mxu0 %v15665_v59  ;;  %15804 = vmatprep.subr.mxu0 %v19427_v25 }
0x271b   :  { %15722 = vmatprep.mubr.f32.mxu0 %v9202_v0  ;;  %15805 = vmatpush3.msra.mxu0 %v19427_v25 }
0x271c   :  { %15806 = vmatprep.subr.mxu0 %v19433_v12 }
0x271d   :  { %15807 = vmatpush3.msra.mxu0 %v19433_v12 }
0x271e   :  { %15723 = vmatmul.mubr.f32.gmra.mxu0 %v15668_v29  ;;  %15808 = vmatprep.subr.mxu0 %v19415_v38 }
0x271f   :  { %15725 = vmatprep.mubr.f32.mxu0 %v9212_v28  ;;  %15809 = vmatpush3.msra.mxu0 %v19415_v38 }
0x2720   :  { %15810 = vmatprep.subr.mxu0 %v19421_v33 }
0x2721   :  { %15811 = vmatpush3.msra.mxu0 %v19421_v33 }
0x2722   :  { %15726 = vmatmul.mubr.f32.gmra.mxu0 %v15671_v24  ;;  %15812 = vmatprep.subr.mxu0 %v19402_v62 }
0x2723   :  { %15813 = vmatpush3.msra.mxu0 %v19402_v62 }
0x2724   :  { %15814 = vmatprep.subr.mxu0 %v19404_v6 }
0x2725   :  { %15815 = vmatpush3.msra.mxu0 %v19404_v6 }
0x27c6   :  { %v15706_v17 = vpop.f32.mrf.mxu0 }
0x27c7   :  { %v9367_v32 = vmul.f32 0.5, %v15706_v17 }
0x27c8   :  { %v9287_v2 = vpop.f32.mrf.mxu0 }
0x27c9   :  { %v9366_v54 = vmul.f32 0.5, %v9287_v2  ;;  %v19506_v30 = vsub.f32 %v16768_v39, %v9367_v32 }
0x27ca   :  { %v15709_v53 = vpop.f32.mrf.mxu0 }
0x27cb   :  { %v19503_v35 = vsub.f32 %v16766_v10, %v9366_v54  ;;  %v9369_v9 = vmul.f32 0.5, %v15709_v53 }
0x27cc   :  { %v9297_v21 = vpop.f32.mrf.mxu0 }
0x27cd   :  { %v9368_v19 = vmul.f32 0.5, %v9297_v21  ;;  %15816 = vmatprep.mubr.f32.mxu0 %v19503_v35  ;;  %v19514_v38 = vsub.f32 %v16781_v26, %v9369_v9 }
0x27ce   :  { %v15712_v62 = vpop.f32.mrf.mxu0  ;;  %15817 = vmatmul.mubr.f32.vlgmr.msra.gmra.mxu0 %v19506_v30 }
0x27cf   :  { %v19511_v6 = vsub.f32 %v16776_v23, %v9368_v19  ;;  %v9371_v33 = vmul.f32 0.5, %v15712_v62 }
0x27d0   :  { %v9307_v25 = vpop.f32.mrf.mxu0 }
0x27d1   :  { %v9370_v12 = vmul.f32 0.5, %v9307_v25  ;;  %15819 = vmatprep.mubr.f32.mxu0 %v19511_v6  ;;  %v9387_v22 = vsub.f32 %v16799_v31, %v9371_v33 }
0x27d2   :  { %v15715_v20 = vpop.f32.mrf.mxu0  ;;  %15820 = vmatmul.mubr.f32.gmra.mxu0 %v19514_v38 }
0x27d3   :  { %v19519_v41 = vsub.f32 %v16794_v13, %v9370_v12  ;;  %v9373_v37 = vmul.f32 0.5, %v15715_v20 }
0x27d4   :  { %v9317_v59 = vpop.f32.mrf.mxu0 }
0x27d5   :  { %v9372_v58 = vmul.f32 0.5, %v9317_v59  ;;  %15822 = vmatprep.mubr.f32.mxu0 %v19519_v41  ;;  %v9389_v24 = vsub.f32 %v16817_v7, %v9373_v37 }
0x27d6   :  { %v15718_v29 = vpop.f32.mrf.mxu0  ;;  %15823 = vmatmul.mubr.f32.gmra.mxu0 %v9387_v22 }
0x27d7   :  { %v9388_v0 = vsub.f32 %v16812_v18, %v9372_v58  ;;  %v9375_v28 = vmul.f32 0.5, %v15718_v29 }
0x27d8   :  { %v9327_v17 = vpop.f32.mrf.mxu0 }
0x27d9   :  { %v9374_v32 = vmul.f32 0.5, %v9327_v17  ;;  %15825 = vmatprep.mubr.f32.mxu0 %v9388_v0  ;;  %v9391_v53 = vsub.f32 %v16835_v45, %v9375_v28 }
0x27da   :  { %v15721_v2 = vpop.f32.mrf.mxu0  ;;  %15826 = vmatmul.mubr.f32.gmra.mxu0 %v9389_v24 }
0x27db   :  { %v9390_v54 = vsub.f32 %v16830_v40, %v9374_v32  ;;  %v9377_v9 = vmul.f32 0.5, %v15721_v2 }
0x27dc   :  { %v9337_v21 = vpop.f32.mrf.mxu0 }
0x27dd   :  { %v9376_v19 = vmul.f32 0.5, %v9337_v21  ;;  %15828 = vmatprep.mubr.f32.mxu0 %v9390_v54  ;;  %v9393_v25 = vsub.f32 %v16848_v42, %v9377_v9 }
0x27de   :  { %v15724_v62 = vpop.f32.mrf.mxu0  ;;  %15829 = vmatmul.mubr.f32.gmra.mxu0 %v9391_v53 }
0x27df   :  { %v9392_v33 = vsub.f32 %v16845_v4, %v9376_v19  ;;  %v9379_v12 = vmul.f32 0.5, %v15724_v62 }
0x27e0   :  { %v9347_v20 = vpop.f32.mrf.mxu0 }
0x27e1   :  { %v9378_v37 = vmul.f32 0.5, %v9347_v20  ;;  %15831 = vmatprep.mubr.f32.mxu0 %v9392_v33  ;;  %v9395_v28 = vsub.f32 %v16863_v51, %v9379_v12 }
0x27e2   :  { %v15727_v59 = vpop.f32.mrf.mxu0  ;;  %15832 = vmatmul.mubr.f32.gmra.mxu0 %v9393_v25 }
0x27e3   :  { %v9394_v58 = vsub.f32 %v16860_v1, %v9378_v37  ;;  %v9381_v29 = vmul.f32 0.5, %v15727_v59 }
0x27e4   :  { %v9357_v17 = vpop.f32.mrf.mxu0 }
0x27e5   :  { %v9397_v32 = vsub.f32 %v16869_v49, %v9381_v29  ;;  %v9380_v2 = vmul.f32 0.5, %v9357_v17  ;;  %15834 = vmatprep.mubr.f32.mxu0 %v9394_v58 }
0x27e6   :  { %15835 = vmatmul.mubr.f32.gmra.mxu0 %v9395_v28 }
0x27e7   :  { %v9396_v21 = vsub.f32 %v16871_v36, %v9380_v2  ;;  %15728 = vmatprep.subr.mxu1 %v9397_v32 }
0x27e8   :  { %15729 = vmatpush3.msra.mxu1 %v9397_v32 }
0x27e9   :  { %15730 = vmatprep.subr.mxu1 %v9396_v21  ;;  %15837 = vmatprep.mubr.f32.mxu0 %v9396_v21 }
0x27ea   :  { %15731 = vmatpush3.msra.mxu1 %v9396_v21  ;;  %15838 = vmatmul.mubr.f32.gmra.mxu0 %v9397_v32 }
0x27eb   :  { %15732 = vmatprep.subr.mxu1 %v9395_v28 }
0x27ec   :  { %15733 = vmatpush3.msra.mxu1 %v9395_v28 }
0x27ed   :  { %15734 = vmatprep.subr.mxu1 %v9394_v58 }
0x27ee   :  { %15735 = vmatpush3.msra.mxu1 %v9394_v58 }
0x27ef   :  { %15736 = vmatprep.subr.mxu1 %v9393_v25 }
0x27f0   :  { %15737 = vmatpush3.msra.mxu1 %v9393_v25 }
0x27f1   :  { %15738 = vmatprep.subr.mxu1 %v9392_v33 }
0x27f2   :  { %15739 = vmatpush3.msra.mxu1 %v9392_v33 }
0x27f3   :  { %15740 = vmatprep.subr.mxu1 %v9391_v53 }
0x27f4   :  { %15741 = vmatpush3.msra.mxu1 %v9391_v53 }
0x27f5   :  { %15742 = vmatprep.subr.mxu1 %v9390_v54 }
0x27f6   :  { %15743 = vmatpush3.msra.mxu1 %v9390_v54 }
0x27f7   :  { %15744 = vmatprep.subr.mxu1 %v9389_v24 }
0x27f8   :  { %15745 = vmatpush3.msra.mxu1 %v9389_v24 }
0x27f9   :  { %15746 = vmatprep.subr.mxu1 %v9388_v0 }
0x27fa   :  { %15747 = vmatpush3.msra.mxu1 %v9388_v0 }
0x27fb   :  { %15748 = vmatprep.subr.mxu1 %v9387_v22 }
0x27fc   :  { %15749 = vmatpush3.msra.mxu1 %v9387_v22 }
0x27fd   :  { %15750 = vmatprep.subr.mxu1 %v19519_v41 }
0x27fe   :  { %15751 = vmatpush3.msra.mxu1 %v19519_v41 }
0x27ff   :  { %15752 = vmatprep.subr.mxu1 %v19514_v38 }
0x2800   :  { %15753 = vmatpush3.msra.mxu1 %v19514_v38 }
0x2801   :  { %15754 = vmatprep.subr.mxu1 %v19511_v6 }
0x2802   :  { %15755 = vmatpush3.msra.mxu1 %v19511_v6 }
0x2803   :  { %15756 = vmatprep.subr.mxu1 %v19506_v30 }
0x2804   :  { %15757 = vmatpush3.msra.mxu1 %v19506_v30 }
0x2805   :  { %15758 = vmatprep.subr.mxu1 %v19503_v35 }
0x2806   :  { %15759 = vmatpush3.msra.mxu1 %v19503_v35 }
0x2807   :  { %15761 = vmatmul.mubr.f32.vlgmr.msra.gmra.mxu1 %v19407_v46 }
0x2808   :  { %15763 = vmatprep.mubr.f32.mxu1 %v19411_v56 }
0x280b   :  { %15764 = vmatmul.mubr.f32.gmra.mxu1 %v19409_v50 }
0x280c   :  { %15766 = vmatprep.mubr.f32.mxu1 %v19417_v27 }
0x280f   :  { %15767 = vmatmul.mubr.f32.gmra.mxu1 %v19413_v61 }
0x2810   :  { %15769 = vmatprep.mubr.f32.mxu1 %v19423_v11 }
0x2813   :  { %15770 = vmatmul.mubr.f32.gmra.mxu1 %v19419_v14 }
0x2814   :  { %15772 = vmatprep.mubr.f32.mxu1 %v19429_v63 }
0x2817   :  { %15773 = vmatmul.mubr.f32.gmra.mxu1 %v19425_v8 }
0x2818   :  { %15775 = vmatprep.mubr.f32.mxu1 %v19435_v43 }
0x281b   :  { %15776 = vmatmul.mubr.f32.gmra.mxu1 %v19431_v55 }
0x281c   :  { %15778 = vmatprep.mubr.f32.mxu1 %v19441_v60 }
0x281f   :  { %15779 = vmatmul.mubr.f32.gmra.mxu1 %v19437_v16 }
0x2820   :  { %15781 = vmatprep.mubr.f32.mxu1 %v19448_v34 }
0x2823   :  { %15782 = vmatmul.mubr.f32.gmra.mxu1 %v19443_v48 }
0x288e   :  { %v19558_v46 = vpop.f32.mrf.mxu0 }
0x2890   :  { %v19560_v50 = vpop.f32.mrf.mxu0 }
0x2891   :  { %15872 = vmatprep.mubr.f32.mxu1 %v19560_v50 }
0x2892   :  { %v19571_v8 = vpop.f32.mrf.mxu0 }
0x2894   :  { %v19577_v43 = vpop.f32.mrf.mxu0 }
0x2896   :  { %v19583_v48 = vpop.f32.mrf.mxu0 }
0x2898   :  { %v19589_v30 = vpop.f32.mrf.mxu0 }
0x289a   :  { %v19595_v41 = vpop.f32.mrf.mxu0 }
0x289c   :  { %v19602_v24 = vpop.f32.mrf.mxu0 }
0x289e   :  { %v15830_v53 = vpop.f32.mrf.mxu0 }
0x28a0   :  { %v9649_v9 = vpop.f32.mrf.mxu0 }
0x28a2   :  { %v15833_v19 = vpop.f32.mrf.mxu0 }
0x28a4   :  { %v9659_v62 = vpop.f32.mrf.mxu0 }
0x28a6   :  { %v15836_v33 = vpop.f32.mrf.mxu0 }
0x28a8   :  { %v9669_v25 = vpop.f32.mrf.mxu0 }
0x28aa   :  { %v15839_v12 = vpop.f32.mrf.mxu0 }
0x28ac   :  { %v9679_v20 = vpop.f32.mrf.mxu0 }
0x28c7   :  { %v19563_v56 = vpop.f32.mrf.mxu1 }
0x28c9   :  { %v9464_v61 = vpop.f32.mrf.mxu1 }
0x28ca   :  { %15928 = vmatprep.mubr.f32.mxu0 %v9464_v61 }
0x28cb   :  { %v19565_v27 = vpop.f32.mrf.mxu1 }
0x28cd   :  { %v19567_v14 = vpop.f32.mrf.mxu1 }
0x28cf   :  { %v19569_v11 = vpop.f32.mrf.mxu1 }
0x28d1   :  { %v19573_v63 = vpop.f32.mrf.mxu1 }
0x28d3   :  { %v19575_v55 = vpop.f32.mrf.mxu1 }
0x28d5   :  { %v19579_v16 = vpop.f32.mrf.mxu1 }
0x28d7   :  { %v19581_v60 = vpop.f32.mrf.mxu1 }
0x28d9   :  { %v19585_v34 = vpop.f32.mrf.mxu1 }
0x28db   :  { %v19587_v35 = vpop.f32.mrf.mxu1 }
0x28dd   :  { %v19591_v6 = vpop.f32.mrf.mxu1 }
0x28df   :  { %v19593_v38 = vpop.f32.mrf.mxu1 }
0x28e1   :  { %v19597_v22 = vpop.f32.mrf.mxu1 }
0x28e3   :  { %v19599_v0 = vpop.f32.mrf.mxu1 }
0x28e4   :  { %15840 = vmatprep.subr.mxu1 %v19599_v0 }
0x28e5   :  { %v19604_v54 = vpop.f32.mrf.mxu1  ;;  %15841 = vmatpush3.msra.mxu1 %v19599_v0 }
0x28e6   :  { %15842 = vmatprep.subr.mxu1 %v19604_v54 }
0x28e7   :  { %15843 = vmatpush3.msra.mxu1 %v19604_v54 }
0x28e8   :  { %15844 = vmatprep.subr.mxu1 %v19593_v38 }
0x28e9   :  { %15845 = vmatpush3.msra.mxu1 %v19593_v38 }
0x28ea   :  { %15846 = vmatprep.subr.mxu1 %v19597_v22 }
0x28eb   :  { %15847 = vmatpush3.msra.mxu1 %v19597_v22 }
0x28ec   :  { %15848 = vmatprep.subr.mxu1 %v19587_v35 }
0x28ed   :  { %15849 = vmatpush3.msra.mxu1 %v19587_v35 }
0x28ee   :  { %15850 = vmatprep.subr.mxu1 %v19591_v6 }
0x28ef   :  { %15851 = vmatpush3.msra.mxu1 %v19591_v6 }
0x28f0   :  { %15852 = vmatprep.subr.mxu1 %v19581_v60 }
0x28f1   :  { %15853 = vmatpush3.msra.mxu1 %v19581_v60 }
0x28f2   :  { %15854 = vmatprep.subr.mxu1 %v19585_v34 }
0x28f3   :  { %15855 = vmatpush3.msra.mxu1 %v19585_v34 }
0x28f4   :  { %15856 = vmatprep.subr.mxu1 %v19575_v55 }
0x28f5   :  { %15857 = vmatpush3.msra.mxu1 %v19575_v55 }
0x28f6   :  { %15858 = vmatprep.subr.mxu1 %v19579_v16 }
0x28f7   :  { %15859 = vmatpush3.msra.mxu1 %v19579_v16 }
0x28f8   :  { %15860 = vmatprep.subr.mxu1 %v19569_v11 }
0x28f9   :  { %15861 = vmatpush3.msra.mxu1 %v19569_v11 }
0x28fa   :  { %15862 = vmatprep.subr.mxu1 %v19573_v63 }
0x28fb   :  { %15863 = vmatpush3.msra.mxu1 %v19573_v63 }
0x28fc   :  { %15864 = vmatprep.subr.mxu1 %v19565_v27 }
0x28fd   :  { %15865 = vmatpush3.msra.mxu1 %v19565_v27 }
0x28fe   :  { %15866 = vmatprep.subr.mxu1 %v19567_v14 }
0x28ff   :  { %15867 = vmatpush3.msra.mxu1 %v19567_v14 }
0x2900   :  { %15868 = vmatprep.subr.mxu1 %v19563_v56 }
0x2901   :  { %15869 = vmatpush3.msra.mxu1 %v19563_v56 }
0x2902   :  { %15870 = vmatprep.subr.mxu1 %v9464_v61 }
0x2903   :  { %15871 = vmatpush3.msra.mxu1 %v9464_v61 }
0x2904   :  { %15873 = vmatmul.mubr.f32.vlgmr.msra.gmra.mxu1 %v19558_v46  ;;  %15952 = vmatprep.subr.mxu1 %v15839_v12 }
0x2905   :  { %15875 = vmatprep.mubr.f32.mxu1 %v19577_v43  ;;  %15953 = vmatpush3.msra.mxu1 %v15839_v12 }
0x2906   :  { %15954 = vmatprep.subr.mxu1 %v9679_v20 }
0x2907   :  { %15955 = vmatpush3.msra.mxu1 %v9679_v20 }
0x2908   :  { %15876 = vmatmul.mubr.f32.gmra.mxu1 %v19571_v8  ;;  %15956 = vmatprep.subr.mxu1 %v15836_v33 }
0x2909   :  { %15878 = vmatprep.mubr.f32.mxu1 %v19589_v30  ;;  %15957 = vmatpush3.msra.mxu1 %v15836_v33 }
0x290a   :  { %15958 = vmatprep.subr.mxu1 %v9669_v25 }
0x290b   :  { %15959 = vmatpush3.msra.mxu1 %v9669_v25 }
0x290c   :  { %15879 = vmatmul.mubr.f32.gmra.mxu1 %v19583_v48  ;;  %15960 = vmatprep.subr.mxu1 %v15833_v19 }
0x290d   :  { %15881 = vmatprep.mubr.f32.mxu1 %v19602_v24  ;;  %15961 = vmatpush3.msra.mxu1 %v15833_v19 }
0x290e   :  { %15962 = vmatprep.subr.mxu1 %v9659_v62 }
0x290f   :  { %15963 = vmatpush3.msra.mxu1 %v9659_v62 }
0x2910   :  { %15882 = vmatmul.mubr.f32.gmra.mxu1 %v19595_v41  ;;  %15964 = vmatprep.subr.mxu1 %v15830_v53 }
0x2911   :  { %15884 = vmatprep.mubr.f32.mxu1 %v9649_v9  ;;  %15965 = vmatpush3.msra.mxu1 %v15830_v53 }
0x2912   :  { %15966 = vmatprep.subr.mxu1 %v9649_v9 }
0x2913   :  { %15967 = vmatpush3.msra.mxu1 %v9649_v9 }
0x2914   :  { %15885 = vmatmul.mubr.f32.gmra.mxu1 %v15830_v53  ;;  %15968 = vmatprep.subr.mxu1 %v19595_v41 }
0x2915   :  { %15887 = vmatprep.mubr.f32.mxu1 %v9659_v62  ;;  %15969 = vmatpush3.msra.mxu1 %v19595_v41 }
0x2916   :  { %15970 = vmatprep.subr.mxu1 %v19602_v24 }
0x2917   :  { %15971 = vmatpush3.msra.mxu1 %v19602_v24 }
0x2918   :  { %15888 = vmatmul.mubr.f32.gmra.mxu1 %v15833_v19  ;;  %15972 = vmatprep.subr.mxu1 %v19583_v48 }
0x2919   :  { %15890 = vmatprep.mubr.f32.mxu1 %v9669_v25  ;;  %15973 = vmatpush3.msra.mxu1 %v19583_v48 }
0x291a   :  { %15974 = vmatprep.subr.mxu1 %v19589_v30 }
0x291b   :  { %15975 = vmatpush3.msra.mxu1 %v19589_v30 }
0x291c   :  { %15891 = vmatmul.mubr.f32.gmra.mxu1 %v15836_v33  ;;  %15976 = vmatprep.subr.mxu1 %v19571_v8 }
0x291d   :  { %15893 = vmatprep.mubr.f32.mxu1 %v9679_v20  ;;  %15977 = vmatpush3.msra.mxu1 %v19571_v8 }
0x291e   :  { %15978 = vmatprep.subr.mxu1 %v19577_v43 }
0x291f   :  { %15979 = vmatpush3.msra.mxu1 %v19577_v43 }
0x2920   :  { %15894 = vmatmul.mubr.f32.gmra.mxu1 %v15839_v12  ;;  %15980 = vmatprep.subr.mxu1 %v19558_v46 }
0x2921   :  { %15981 = vmatpush3.msra.mxu1 %v19558_v46 }
0x2922   :  { %15982 = vmatprep.subr.mxu1 %v19560_v50 }
0x2923   :  { %15983 = vmatpush3.msra.mxu1 %v19560_v50 }
0x29c4   :  { %v15874_v37 = vpop.f32.mrf.mxu1 }
0x29c5   :  { %v9834_v59 = vmul.f32 0.5, %v15874_v37 }
0x29c6   :  { %v9754_v58 = vpop.f32.mrf.mxu1 }
0x29c7   :  { %v9833_v29 = vmul.f32 0.5, %v9754_v58  ;;  %v19662_v32 = vsub.f32 %v16768_v39, %v9834_v59 }
0x29c8   :  { %v15877_v28 = vpop.f32.mrf.mxu1 }
0x29c9   :  { %v19659_v17 = vsub.f32 %v16766_v10, %v9833_v29  ;;  %v9836_v2 = vmul.f32 0.5, %v15877_v28 }
0x29ca   :  { %v9764_v21 = vpop.f32.mrf.mxu1 }
0x29cb   :  { %v9835_v61 = vmul.f32 0.5, %v9764_v21  ;;  %15984 = vmatprep.mubr.f32.mxu1 %v19659_v17  ;;  %v19670_v8 = vsub.f32 %v16781_v26, %v9836_v2 }
0x29cc   :  { %v15880_v46 = vpop.f32.mrf.mxu1  ;;  %15985 = vmatmul.mubr.f32.vlgmr.msra.gmra.mxu1 %v19662_v32 }
0x29cd   :  { %v19667_v50 = vsub.f32 %v16776_v23, %v9835_v61  ;;  %v9838_v43 = vmul.f32 0.5, %v15880_v46 }
0x29ce   :  { %v9774_v48 = vpop.f32.mrf.mxu1 }
0x29cf   :  { %v9837_v30 = vmul.f32 0.5, %v9774_v48  ;;  %15987 = vmatprep.mubr.f32.mxu1 %v19667_v50  ;;  %v9854_v53 = vsub.f32 %v16799_v31, %v9838_v43 }
0x29d0   :  { %v15883_v41 = vpop.f32.mrf.mxu1  ;;  %15988 = vmatmul.mubr.f32.gmra.mxu1 %v19670_v8 }
0x29d1   :  { %v19675_v24 = vsub.f32 %v16794_v13, %v9837_v30  ;;  %v9840_v9 = vmul.f32 0.5, %v15883_v41 }
0x29d2   :  { %v9784_v19 = vpop.f32.mrf.mxu1 }
0x29d3   :  { %v9839_v62 = vmul.f32 0.5, %v9784_v19  ;;  %15990 = vmatprep.mubr.f32.mxu1 %v19675_v24  ;;  %v9856_v12 = vsub.f32 %v16817_v7, %v9840_v9 }
0x29d4   :  { %v15886_v33 = vpop.f32.mrf.mxu1  ;;  %15991 = vmatmul.mubr.f32.gmra.mxu1 %v9854_v53 }
0x29d5   :  { %v9855_v25 = vsub.f32 %v16812_v18, %v9839_v62  ;;  %v9842_v20 = vmul.f32 0.5, %v15886_v33 }
0x29d6   :  { %v9794_v37 = vpop.f32.mrf.mxu1 }
0x29d7   :  { %v9841_v59 = vmul.f32 0.5, %v9794_v37  ;;  %15993 = vmatprep.mubr.f32.mxu1 %v9855_v25  ;;  %v9858_v28 = vsub.f32 %v16835_v45, %v9842_v20 }
0x29d8   :  { %v15889_v58 = vpop.f32.mrf.mxu1  ;;  %15994 = vmatmul.mubr.f32.gmra.mxu1 %v9856_v12 }
0x29d9   :  { %v9857_v29 = vsub.f32 %v16830_v40, %v9841_v59  ;;  %v9844_v2 = vmul.f32 0.5, %v15889_v58 }
0x29da   :  { %v9804_v21 = vpop.f32.mrf.mxu1 }
0x29db   :  { %v9843_v61 = vmul.f32 0.5, %v9804_v21  ;;  %15996 = vmatprep.mubr.f32.mxu1 %v9857_v29  ;;  %v9860_v48 = vsub.f32 %v16848_v42, %v9844_v2 }
0x29dc   :  { %v15892_v46 = vpop.f32.mrf.mxu1  ;;  %15997 = vmatmul.mubr.f32.gmra.mxu1 %v9858_v28 }
0x29dd   :  { %v9859_v43 = vsub.f32 %v16845_v4, %v9843_v61  ;;  %v9846_v30 = vmul.f32 0.5, %v15892_v46 }
0x29de   :  { %v9814_v41 = vpop.f32.mrf.mxu1 }
0x29df   :  { %v9845_v9 = vmul.f32 0.5, %v9814_v41  ;;  %15999 = vmatprep.mubr.f32.mxu1 %v9859_v43  ;;  %v9862_v20 = vsub.f32 %v16863_v51, %v9846_v30 }
0x29e0   :  { %v15895_v19 = vpop.f32.mrf.mxu1  ;;  %16000 = vmatmul.mubr.f32.gmra.mxu1 %v9860_v48 }
0x29e1   :  { %v9861_v62 = vsub.f32 %v16860_v1, %v9845_v9  ;;  %v9848_v33 = vmul.f32 0.5, %v15895_v19 }
0x29e2   :  { %v9824_v37 = vpop.f32.mrf.mxu1 }
0x29e3   :  { %v9864_v59 = vsub.f32 %v16869_v49, %v9848_v33  ;;  %v9847_v58 = vmul.f32 0.5, %v9824_v37  ;;  %16002 = vmatprep.mubr.f32.mxu1 %v9861_v62 }
0x29e4   :  { %16003 = vmatmul.mubr.f32.gmra.mxu1 %v9862_v20 }
0x29e5   :  { %v9863_v21 = vsub.f32 %v16871_v36, %v9847_v58  ;;  %15896 = vmatprep.subr.mxu0 %v9864_v59 }
0x29e6   :  { %15897 = vmatpush3.msra.mxu0 %v9864_v59 }
0x29e7   :  { %15898 = vmatprep.subr.mxu0 %v9863_v21  ;;  %16005 = vmatprep.mubr.f32.mxu1 %v9863_v21 }
0x29e8   :  { %15899 = vmatpush3.msra.mxu0 %v9863_v21  ;;  %16006 = vmatmul.mubr.f32.gmra.mxu1 %v9864_v59 }
0x29e9   :  { %15900 = vmatprep.subr.mxu0 %v9862_v20 }
0x29ea   :  { %15901 = vmatpush3.msra.mxu0 %v9862_v20 }
0x29eb   :  { %15902 = vmatprep.subr.mxu0 %v9861_v62 }
0x29ec   :  { %15903 = vmatpush3.msra.mxu0 %v9861_v62 }
0x29ed   :  { %15904 = vmatprep.subr.mxu0 %v9860_v48 }
0x29ee   :  { %15905 = vmatpush3.msra.mxu0 %v9860_v48 }
0x29ef   :  { %15906 = vmatprep.subr.mxu0 %v9859_v43 }
0x29f0   :  { %15907 = vmatpush3.msra.mxu0 %v9859_v43 }
0x29f1   :  { %15908 = vmatprep.subr.mxu0 %v9858_v28 }
0x29f2   :  { %15909 = vmatpush3.msra.mxu0 %v9858_v28 }
0x29f3   :  { %15910 = vmatprep.subr.mxu0 %v9857_v29 }
0x29f4   :  { %15911 = vmatpush3.msra.mxu0 %v9857_v29 }
0x29f5   :  { %15912 = vmatprep.subr.mxu0 %v9856_v12 }
0x29f6   :  { %15913 = vmatpush3.msra.mxu0 %v9856_v12 }
0x29f7   :  { %15914 = vmatprep.subr.mxu0 %v9855_v25 }
0x29f8   :  { %15915 = vmatpush3.msra.mxu0 %v9855_v25 }
0x29f9   :  { %15916 = vmatprep.subr.mxu0 %v9854_v53 }
0x29fa   :  { %15917 = vmatpush3.msra.mxu0 %v9854_v53 }
0x29fb   :  { %15918 = vmatprep.subr.mxu0 %v19675_v24 }
0x29fc   :  { %15919 = vmatpush3.msra.mxu0 %v19675_v24 }
0x29fd   :  { %15920 = vmatprep.subr.mxu0 %v19670_v8 }
0x29fe   :  { %15921 = vmatpush3.msra.mxu0 %v19670_v8 }
0x29ff   :  { %15922 = vmatprep.subr.mxu0 %v19667_v50 }
0x2a00   :  { %15923 = vmatpush3.msra.mxu0 %v19667_v50 }
0x2a01   :  { %15924 = vmatprep.subr.mxu0 %v19662_v32 }
0x2a02   :  { %15925 = vmatpush3.msra.mxu0 %v19662_v32 }
0x2a03   :  { %15926 = vmatprep.subr.mxu0 %v19659_v17 }
0x2a04   :  { %15927 = vmatpush3.msra.mxu0 %v19659_v17 }
0x2a05   :  { %15929 = vmatmul.mubr.f32.vlgmr.msra.gmra.mxu0 %v19563_v56 }
0x2a06   :  { %15931 = vmatprep.mubr.f32.mxu0 %v19567_v14 }
0x2a09   :  { %15932 = vmatmul.mubr.f32.gmra.mxu0 %v19565_v27 }
0x2a0a   :  { %15934 = vmatprep.mubr.f32.mxu0 %v19573_v63 }
0x2a0d   :  { %15935 = vmatmul.mubr.f32.gmra.mxu0 %v19569_v11 }
0x2a0e   :  { %15937 = vmatprep.mubr.f32.mxu0 %v19579_v16 }
0x2a11   :  { %15938 = vmatmul.mubr.f32.gmra.mxu0 %v19575_v55 }
0x2a12   :  { %15940 = vmatprep.mubr.f32.mxu0 %v19585_v34 }
0x2a15   :  { %15941 = vmatmul.mubr.f32.gmra.mxu0 %v19581_v60 }
0x2a16   :  { %15943 = vmatprep.mubr.f32.mxu0 %v19591_v6 }
0x2a19   :  { %15944 = vmatmul.mubr.f32.gmra.mxu0 %v19587_v35 }
0x2a1a   :  { %15946 = vmatprep.mubr.f32.mxu0 %v19597_v22 }
0x2a1d   :  { %15947 = vmatmul.mubr.f32.gmra.mxu0 %v19593_v38 }
0x2a1e   :  { %15949 = vmatprep.mubr.f32.mxu0 %v19604_v54 }
0x2a21   :  { %15950 = vmatmul.mubr.f32.gmra.mxu0 %v19599_v0 }
0x2a8c   :  { %v15986_v56 = vpop.f32.mrf.mxu1 }
0x2a8e   :  { %v10076_v27 = vpop.f32.mrf.mxu1 }
0x2a8f   :  { %16040 = vmatprep.mubr.f32.mxu0 %v10076_v27 }
0x2a90   :  { %v15989_v8 = vpop.f32.mrf.mxu1 }
0x2a92   :  { %v10086_v24 = vpop.f32.mrf.mxu1 }
0x2a94   :  { %v15992_v53 = vpop.f32.mrf.mxu1 }
0x2a96   :  { %v10096_v25 = vpop.f32.mrf.mxu1 }
0x2a98   :  { %v15995_v12 = vpop.f32.mrf.mxu1 }
0x2a9a   :  { %v10106_v29 = vpop.f32.mrf.mxu1 }
0x2a9c   :  { %v15998_v28 = vpop.f32.mrf.mxu1 }
0x2a9e   :  { %v10116_v2 = vpop.f32.mrf.mxu1 }
0x2aa0   :  { %v16001_v61 = vpop.f32.mrf.mxu1 }
0x2aa2   :  { %v10126_v46 = vpop.f32.mrf.mxu1 }
0x2aa4   :  { %v16004_v43 = vpop.f32.mrf.mxu1 }
0x2aa6   :  { %v10136_v48 = vpop.f32.mrf.mxu1 }
0x2aa8   :  { %v16007_v30 = vpop.f32.mrf.mxu1 }
0x2aaa   :  { %v10146_v41 = vpop.f32.mrf.mxu1 }
0x2ac5   :  { %v19714_v14 = vpop.f32.mrf.mxu0 }
0x2ac7   :  { %v9931_v11 = vpop.f32.mrf.mxu0 }
0x2ac8   :  { %16096 = vmatprep.mubr.f32.mxu1 %v9931_v11 }
0x2ac9   :  { %v19716_v63 = vpop.f32.mrf.mxu0 }
0x2acb   :  { %v19718_v55 = vpop.f32.mrf.mxu0 }
0x2acd   :  { %v19720_v16 = vpop.f32.mrf.mxu0 }
0x2acf   :  { %v19722_v60 = vpop.f32.mrf.mxu0 }
0x2ad1   :  { %v19724_v34 = vpop.f32.mrf.mxu0 }
0x2ad3   :  { %v19726_v35 = vpop.f32.mrf.mxu0 }
0x2ad5   :  { %v19728_v6 = vpop.f32.mrf.mxu0 }
0x2ad7   :  { %v19730_v38 = vpop.f32.mrf.mxu0 }
0x2ad9   :  { %v19732_v22 = vpop.f32.mrf.mxu0 }
0x2adb   :  { %v19734_v0 = vpop.f32.mrf.mxu0 }
0x2add   :  { %v19736_v54 = vpop.f32.mrf.mxu0 }
0x2adf   :  { %v19738_v17 = vpop.f32.mrf.mxu0 }
0x2ae1   :  { %v19740_v32 = vpop.f32.mrf.mxu0 }
0x2ae2   :  { %16008 = vmatprep.subr.mxu0 %v19740_v32 }
0x2ae3   :  { %v19743_v50 = vpop.f32.mrf.mxu0  ;;  %16009 = vmatpush3.msra.mxu0 %v19740_v32 }
0x2ae4   :  { %16010 = vmatprep.subr.mxu0 %v19743_v50 }
0x2ae5   :  { %16011 = vmatpush3.msra.mxu0 %v19743_v50 }
0x2ae6   :  { %16012 = vmatprep.subr.mxu0 %v19736_v54 }
0x2ae7   :  { %16013 = vmatpush3.msra.mxu0 %v19736_v54 }
0x2ae8   :  { %16014 = vmatprep.subr.mxu0 %v19738_v17 }
0x2ae9   :  { %16015 = vmatpush3.msra.mxu0 %v19738_v17 }
0x2aea   :  { %16016 = vmatprep.subr.mxu0 %v19732_v22 }
0x2aeb   :  { %16017 = vmatpush3.msra.mxu0 %v19732_v22 }
0x2aec   :  { %16018 = vmatprep.subr.mxu0 %v19734_v0 }
0x2aed   :  { %16019 = vmatpush3.msra.mxu0 %v19734_v0 }
0x2aee   :  { %16020 = vmatprep.subr.mxu0 %v19728_v6 }
0x2aef   :  { %16021 = vmatpush3.msra.mxu0 %v19728_v6 }
0x2af0   :  { %16022 = vmatprep.subr.mxu0 %v19730_v38 }
0x2af1   :  { %16023 = vmatpush3.msra.mxu0 %v19730_v38 }
0x2af2   :  { %16024 = vmatprep.subr.mxu0 %v19724_v34 }
0x2af3   :  { %16025 = vmatpush3.msra.mxu0 %v19724_v34 }
0x2af4   :  { %16026 = vmatprep.subr.mxu0 %v19726_v35 }
0x2af5   :  { %16027 = vmatpush3.msra.mxu0 %v19726_v35 }
0x2af6   :  { %16028 = vmatprep.subr.mxu0 %v19720_v16 }
0x2af7   :  { %16029 = vmatpush3.msra.mxu0 %v19720_v16 }
0x2af8   :  { %16030 = vmatprep.subr.mxu0 %v19722_v60 }
0x2af9   :  { %16031 = vmatpush3.msra.mxu0 %v19722_v60 }
0x2afa   :  { %16032 = vmatprep.subr.mxu0 %v19716_v63 }
0x2afb   :  { %16033 = vmatpush3.msra.mxu0 %v19716_v63 }
0x2afc   :  { %16034 = vmatprep.subr.mxu0 %v19718_v55 }
0x2afd   :  { %16035 = vmatpush3.msra.mxu0 %v19718_v55 }
0x2afe   :  { %16036 = vmatprep.subr.mxu0 %v19714_v14 }
0x2aff   :  { %16037 = vmatpush3.msra.mxu0 %v19714_v14 }
0x2b00   :  { %16038 = vmatprep.subr.mxu0 %v9931_v11 }
0x2b01   :  { %16039 = vmatpush3.msra.mxu0 %v9931_v11 }
0x2b02   :  { %16041 = vmatmul.mubr.f32.vlgmr.msra.gmra.mxu0 %v15986_v56 }
0x2b03   :  { %16043 = vmatprep.mubr.f32.mxu0 %v10086_v24 }
0x2b06   :  { %16044 = vmatmul.mubr.f32.gmra.mxu0 %v15989_v8 }
0x2b07   :  { %16046 = vmatprep.mubr.f32.mxu0 %v10096_v25 }
0x2b0a   :  { %16047 = vmatmul.mubr.f32.gmra.mxu0 %v15992_v53 }
0x2b0b   :  { %16049 = vmatprep.mubr.f32.mxu0 %v10106_v29 }
0x2b0e   :  { %16050 = vmatmul.mubr.f32.gmra.mxu0 %v15995_v12 }
0x2b0f   :  { %16052 = vmatprep.mubr.f32.mxu0 %v10116_v2 }
0x2b12   :  { %16053 = vmatmul.mubr.f32.gmra.mxu0 %v15998_v28 }
0x2b13   :  { %16055 = vmatprep.mubr.f32.mxu0 %v10126_v46 }
0x2b16   :  { %16056 = vmatmul.mubr.f32.gmra.mxu0 %v16001_v61 }
0x2b17   :  { %16058 = vmatprep.mubr.f32.mxu0 %v10136_v48 }
0x2b1a   :  { %16059 = vmatmul.mubr.f32.gmra.mxu0 %v16004_v43 }
0x2b1b   :  { %16061 = vmatprep.mubr.f32.mxu0 %v10146_v41 }
0x2b1e   :  { %16062 = vmatmul.mubr.f32.gmra.mxu0 %v16007_v30 }
0x2bc2   :  { %v19774_v9 = vpop.f32.mrf.mxu0 }
0x2bc4   :  { %v19776_v19 = vpop.f32.mrf.mxu0 }
0x2bc6   :  { %v16045_v62 = vpop.f32.mrf.mxu0 }
0x2bc8   :  { %v10231_v33 = vpop.f32.mrf.mxu0 }
0x2bca   :  { %v16048_v20 = vpop.f32.mrf.mxu0 }
0x2bcc   :  { %v10241_v37 = vpop.f32.mrf.mxu0 }
0x2bce   :  { %v16051_v59 = vpop.f32.mrf.mxu0 }
0x2bd0   :  { %v10251_v58 = vpop.f32.mrf.mxu0 }
0x2bd2   :  { %v16054_v21 = vpop.f32.mrf.mxu0 }
0x2bd4   :  { %v10261_v56 = vpop.f32.mrf.mxu0 }
0x2bd6   :  { %v16057_v27 = vpop.f32.mrf.mxu0 }
0x2bd7   :  { %v10311_v43 = vmul.f32 0.5, %v16057_v27  ;;  %v10307_v27 = vmul.f32 0.5, %v16051_v59  ;;  %v10303_v59 = vmul.f32 0.5, %v16045_v62 }
0x2bd8   :  { %v10271_v11 = vpop.f32.mrf.mxu0 }
0x2bd9   :  { %v10310_v30 = vmul.f32 0.5, %v10271_v11  ;;  %v10306_v11 = vmul.f32 0.5, %v10251_v58  ;;  %v10302_v58 = vmul.f32 0.5, %v10231_v33 }
0x2bda   :  { %v16060_v8 = vpop.f32.mrf.mxu0 }
0x2bdb   :  { %v10313_v29 = vmul.f32 0.5, %v16060_v8  ;;  %v10327_v8 = vsub.f32 %v16848_v42, %v10311_v43  ;;  %v10323_v42 = vsub.f32 %v16817_v7, %v10307_v27  ;;  %v10319_v7 = vsub.f32 %v16781_v26, %v10303_v59 }
0x2bdc   :  { %v10281_v24 = vpop.f32.mrf.mxu0 }
0x2bdd   :  { %v10312_v61 = vmul.f32 0.5, %v10281_v24  ;;  %v10329_v48 = vsub.f32 %v16863_v51, %v10313_v29 }
0x2bde   :  { %v16063_v53 = vpop.f32.mrf.mxu0 }
0x2bdf   :  { %v10315_v25 = vmul.f32 0.5, %v16063_v53  ;;  %v10328_v41 = vsub.f32 %v16860_v1, %v10312_v61  ;;  %v10309_v53 = vmul.f32 0.5, %v16054_v21  ;;  %v10305_v21 = vmul.f32 0.5, %v16048_v20 }
0x2be0   :  { %v10291_v12 = vpop.f32.mrf.mxu0  ;;  %v10301_v20 = vmul.f32 0.5, %v19774_v9 }
0x2be1   :  { %v10331_v28 = vsub.f32 %v16869_v49, %v10315_v25  ;;  %v10314_v2 = vmul.f32 0.5, %v10291_v12  ;;  %v10308_v49 = vmul.f32 0.5, %v10261_v56  ;;  %v10325_v51 = vsub.f32 %v16835_v45, %v10309_v53 }
0x2be2   :  { %v10304_v56 = vmul.f32 0.5, %v10241_v37  ;;  %v10321_v45 = vsub.f32 %v16799_v31, %v10305_v21  ;;  %v10318_v37 = vsub.f32 %v16776_v23, %v10302_v58  ;;  %v10317_v31 = vsub.f32 %v16768_v39, %v10301_v20  ;;  %v19925_v58 = vld [vmem:[#allocation17_spill] sm:$0xff] }
0x2be3   :  { %v10330_v46 = vsub.f32 %v16871_v36, %v10314_v2  ;;  %16064 = vmatprep.subr.mxu1 %v10331_v28  ;;  %v10326_v36 = vsub.f32 %v16845_v4, %v10310_v30  ;;  %v10324_v1 = vsub.f32 %v16830_v40, %v10308_v49  ;;  %v10322_v4 = vsub.f32 %v16812_v18, %v10306_v11 }
0x2be4   :  { %16065 = vmatpush3.msra.mxu1 %v10331_v28  ;;  %v10320_v40 = vsub.f32 %v16794_v13, %v10304_v56  ;;  %v10300_v18 = vmul.f32 0.5, %v19776_v19  ;;  %16148 = vrsqrt.f32 %v19925_v58 }
0x2be5   :  { %16066 = vmatprep.subr.mxu1 %v10330_v46 }
0x2be6   :  { %16067 = vmatpush3.msra.mxu1 %v10330_v46  ;;  %v10316_v13 = vsub.f32 %v16766_v10, %v10300_v18 }
0x2be7   :  { %16068 = vmatprep.subr.mxu1 %v10329_v48 }
0x2be8   :  { %16069 = vmatpush3.msra.mxu1 %v10329_v48 }
0x2be9   :  { %16070 = vmatprep.subr.mxu1 %v10328_v41 }
0x2bea   :  { %16071 = vmatpush3.msra.mxu1 %v10328_v41 }
0x2beb   :  { %16072 = vmatprep.subr.mxu1 %v10327_v8 }
0x2bec   :  { %16073 = vmatpush3.msra.mxu1 %v10327_v8 }
0x2bed   :  { %16074 = vmatprep.subr.mxu1 %v10326_v36 }
0x2bee   :  { %16075 = vmatpush3.msra.mxu1 %v10326_v36 }
0x2bef   :  { %16076 = vmatprep.subr.mxu1 %v10325_v51 }
0x2bf0   :  { %16077 = vmatpush3.msra.mxu1 %v10325_v51 }
0x2bf1   :  { %16078 = vmatprep.subr.mxu1 %v10324_v1 }
0x2bf2   :  { %16079 = vmatpush3.msra.mxu1 %v10324_v1 }
0x2bf3   :  { %16080 = vmatprep.subr.mxu1 %v10323_v42 }
0x2bf4   :  { %16081 = vmatpush3.msra.mxu1 %v10323_v42 }
0x2bf5   :  { %16082 = vmatprep.subr.mxu1 %v10322_v4 }
0x2bf6   :  { %16083 = vmatpush3.msra.mxu1 %v10322_v4 }
0x2bf7   :  { %16084 = vmatprep.subr.mxu1 %v10321_v45 }
0x2bf8   :  { %16085 = vmatpush3.msra.mxu1 %v10321_v45 }
0x2bf9   :  { %16086 = vmatprep.subr.mxu1 %v10320_v40 }
0x2bfa   :  { %16087 = vmatpush3.msra.mxu1 %v10320_v40 }
0x2bfb   :  { %16088 = vmatprep.subr.mxu1 %v10319_v7 }
0x2bfc   :  { %16089 = vmatpush3.msra.mxu1 %v10319_v7  ;;  %v16149_v7 = vpop.eup %16148 }
0x2bfd   :  { %16090 = vmatprep.subr.mxu1 %v10318_v37 }
0x2bfe   :  { %16091 = vmatpush3.msra.mxu1 %v10318_v37 }
0x2bff   :  { %16092 = vmatprep.subr.mxu1 %v10317_v31 }
0x2c00   :  { %16093 = vmatpush3.msra.mxu1 %v10317_v31  ;;  %v10520_v31 = vmul.f32 %v16149_v7, %v19925_v58 }
0x2c01   :  { %16094 = vmatprep.subr.mxu1 %v10316_v13 }
0x2c02   :  { %16095 = vmatpush3.msra.mxu1 %v10316_v13 }
0x2c03   :  { %16097 = vmatmul.mubr.f32.vlgmr.msra.gmra.mxu1 %v19714_v14 }
0x2c04   :  { %16099 = vmatprep.mubr.f32.mxu1 %v19718_v55 }
0x2c07   :  { %16100 = vmatmul.mubr.f32.gmra.mxu1 %v19716_v63 }
0x2c08   :  { %16102 = vmatprep.mubr.f32.mxu1 %v19722_v60 }
0x2c0b   :  { %16103 = vmatmul.mubr.f32.gmra.mxu1 %v19720_v16 }
0x2c0c   :  { %16105 = vmatprep.mubr.f32.mxu1 %v19726_v35 }
0x2c0f   :  { %16106 = vmatmul.mubr.f32.gmra.mxu1 %v19724_v34 }
0x2c10   :  { %16108 = vmatprep.mubr.f32.mxu1 %v19730_v38 }
0x2c13   :  { %16109 = vmatmul.mubr.f32.gmra.mxu1 %v19728_v6 }
0x2c14   :  { %16111 = vmatprep.mubr.f32.mxu1 %v19734_v0 }
0x2c17   :  { %16112 = vmatmul.mubr.f32.gmra.mxu1 %v19732_v22 }
0x2c18   :  { %16114 = vmatprep.mubr.f32.mxu1 %v19738_v17 }
0x2c1b   :  { %16115 = vmatmul.mubr.f32.gmra.mxu1 %v19736_v54 }
0x2c1c   :  { %16117 = vmatprep.mubr.f32.mxu1 %v19743_v50 }
0x2c1f   :  { %16118 = vmatmul.mubr.f32.gmra.mxu1 %v19740_v32 }
0x2cc3   :  { %v16098_v10 = vpop.f32.mrf.mxu1 }
0x2cc4   :  { %v10478_v14 = vsel %vm16333_vm4, %v16098_v10, 0.0  ;;  %vm10523_vm4 = vcmp.eq.f32.partialorder %v19925_v58, 0.0 }
0x2cc5   :  { %v10398_v39 = vpop.f32.mrf.mxu1 }
0x2cc6   :  { %v10477_v23 = vsel %vm16323_vm3, %v10398_v39, 0.0  ;;  %vm10521_vm3 = vcmp.eq.f32.partialorder %v19925_v58, inf }
0x2cc7   :  { %v16101_v26 = vpop.f32.mrf.mxu1  ;;  %v10493_v63 = vadd.f32 %v10478_v14, %v10477_v23  ;;  %v10522_v39 = vsel %vm10521_vm3, %v19925_v58, %v10520_v31 }
0x2cc8   :  { %v10480_v35 = vsel %vm16354_vm6, %v16101_v26, 0.0  ;;  %v10524_v26 = vand.u32 2147483648, %v19925_v58 }
0x2cc9   :  { %v10408_v55 = vpop.f32.mrf.mxu1 }
0x2cca   :  { %v10479_v16 = vsel %vm16343_vm5, %v10408_v55, 0.0  ;;  %v10525_v14 = vsel %vm10523_vm4, %v10524_v26, %v10522_v39  ;;  %vm10531_vm5 = vcmask 0  }
0x2ccb   :  { %v10494_v60 = vadd.f32 %v10493_v63, %v10479_v16  ;;  %v16104_v34 = vpop.f32.mrf.mxu1 }
0x2ccc   :  { %v10482_v47 = vsel %vm16380_vm8, %v16104_v34, 0.0 }
0x2ccd   :  { %v10418_v6 = vpop.f32.mrf.mxu1  ;;  %v10495_v38 = vadd.f32 %v10494_v60, %v10480_v35 }
0x2cce   :  { %v10481_v44 = vsel %vm16372_vm7, %v10418_v6, 0.0 }
0x2ccf   :  { %v10496_v22 = vadd.f32 %v10495_v38, %v10481_v44  ;;  %v16107_v0 = vpop.f32.mrf.mxu1 }
0x2cd0   :  { %v10484_v57 = vsel %vm16404_vm10, %v16107_v0, 0.0 }
0x2cd1   :  { %v10428_v54 = vpop.f32.mrf.mxu1  ;;  %v10497_v17 = vadd.f32 %v10496_v22, %v10482_v47 }
0x2cd2   :  { %v10483_v52 = vsel %vm16398_vm9, %v10428_v54, 0.0 }
0x2cd3   :  { %v10498_v32 = vadd.f32 %v10497_v17, %v10483_v52  ;;  %v16110_v50 = vpop.f32.mrf.mxu1 }
0x2cd4   :  { %v10486_v5 = vsel %vm19914_vm11, %v16110_v50, 0.0 }
0x2cd5   :  { %v10438_v19 = vpop.f32.mrf.mxu1  ;;  %v10499_v62 = vadd.f32 %v10498_v32, %v10484_v57 }
0x2cd6   :  { %v10485_v3 = vsel %vm19915_vm12, %v10438_v19, 0.0 }
0x2cd7   :  { %v10500_v24 = vadd.f32 %v10499_v62, %v10485_v3  ;;  %v16113_v25 = vpop.f32.mrf.mxu1 }
0x2cd8   :  { %v10488_v48 = vsel %vm16440_vm14, %v16113_v25, 0.0 }
0x2cd9   :  { %v10448_v29 = vpop.f32.mrf.mxu1  ;;  %v10501_v28 = vadd.f32 %v10500_v24, %v10486_v5 }
0x2cda   :  { %v10487_v15 = vsel %vm16434_vm13, %v10448_v29, 0.0 }
0x2cdb   :  { %v10502_v61 = vadd.f32 %v10501_v28, %v10487_v15  ;;  %v16116_v46 = vpop.f32.mrf.mxu1 }
0x2cdc   :  { %v10490_v51 = vsel %vm16458_vm0, %v16116_v46, 0.0 }
0x2cdd   :  { %v10458_v30 = vpop.f32.mrf.mxu1  ;;  %v10503_v41 = vadd.f32 %v10502_v61, %v10488_v48 }
0x2cde   :  { %v10489_v8 = vsel %vm16452_vm15, %v10458_v30, 0.0 }
0x2cdf   :  { %v10504_v49 = vadd.f32 %v10503_v41, %v10489_v8  ;;  %v16119_v36 = vpop.f32.mrf.mxu1 }
0x2ce0   :  { %v10492_v59 = vsel %vm16476_vm2, %v16119_v36, 0.0 }
0x2ce1   :  { %v10468_v11 = vpop.f32.mrf.mxu1  ;;  %v10505_v1 = vadd.f32 %v10504_v49, %v10490_v51 }
0x2ce2   :  { %v10491_v42 = vsel %vm16470_vm1, %v10468_v11, 0.0 }
0x2ce3   :  { %v10506_v56 = vadd.f32 %v10505_v1, %v10491_v42 }
0x2ce5   :  { %v10507_v45 = vadd.f32 %v10506_v56, %v10492_v59 }
0x2ce7   :  { %10508 = vadd.xlane.f32.xlu1 %v10507_v45 }
0x2d70   :  { %v10509_v40 = vpop.xlane.xlu1 %10508 }
0x2d71   :  { %v10510_v20 = vrot.slane %v10509_v40, 4 }
0x2d73   :  { %v10511_v18 = vadd.f32 %v10510_v20, %v10509_v40 }
0x2d75   :  { %v10512_v37 = vrot.slane %v10511_v18, 2 }
0x2d77   :  { %v10513_v13 = vadd.f32 %v10512_v37, %v10511_v18 }
0x2d79   :  { %v10514_v10 = vrot.slane %v10513_v13, 1 }
0x2d7b   :  { %v10515_v23 = vadd.f32 %v10514_v10, %v10513_v13 }
0x2d7d   :  { %16130 = vpush %v10515_v23 }
0x2d7e   :  { %16132 = vpush %v10525_v14 }
0x2dae   :  { %s16131_s27 = spop %16130 }
0x2daf   :  { %s16133_s28 = spop %16132 }
0x2db0   :  { %s10527_s29 = smul.f32 2.0, %s16133_s28 }
0x2db2   :  { %s10528_s3 = smul.f32 %s16131_s27, %s10527_s29 }
0x2db4   :  { %s10529_s6 = ssub.f32 %s10517_s30, %s10528_s3 }
0x2db6   :  { %v10530_v63 = vstv %s10529_s6 }
0x2db7   :  { %10532 = vst.msk [vmem:[#allocation5] sm:$0x1] %vm10531_vm5, %v10530_v63 }
0x2db8   :  { %16181 = shalt.err (!%p16178_p9)
}
0x2db9   :  { %10542 = dma.vmem_to_hbm [thread:$0]  %s10540_s5, 16, %s19856_s2, [#allocation4]  }
0x2dba   :  { %16192 = dma.done.wait [#allocation4], 16  }
0x2dbb   :  { %16193 = vsyncadd [#allocation4], 4294967280 }
0x2dbc   :  { %10546 = vsyncpa [#allocation3], 1 }
0x2dbd   :  { %10547 = vsyncpa [#allocation4], 1 }

</bundles_post_ra>
